<compile_context>
chip_gen: v5e
topology: v5e:2x2
jax: 0.10.0
libtpu: 0.0.40
codegen_flags: <defaults>
</compile_context>

<pallas_src>
import numpy as np
import jax
import jax.numpy as jnp
from jax import lax
from jax.experimental import pallas as pl
from jax.experimental.pallas import tpu as pltpu


# ---------------------------------------------------------------------------
# In-kernel helpers
# ---------------------------------------------------------------------------

def _mm(a, w_ref, b_ref):
    """Un-batched 2-D matmul: bf16 operands, f32 accumulation, f32 bias add."""
    y = lax.dot_general(a.astype(jnp.bfloat16), w_ref[...],
                        (((1,), (0,)), ((), ())),
                        preferred_element_type=jnp.float32)
    return y + b_ref[...]


def _pool_w(y, c):
    """Exact stride-2 max over the W lane-groups of a (H, TN, W*c) tile."""
    w = y.shape[-1] // c
    pieces = [jnp.maximum(y[..., (2 * j) * c:(2 * j + 1) * c],
                          y[..., (2 * j + 1) * c:(2 * j + 2) * c])
              for j in range(w // 2)]
    return jnp.concatenate(pieces, axis=-1)


# ---------------------------------------------------------------------------
# Fused forward kernel: one grid step = tile_n images end-to-end
# ---------------------------------------------------------------------------

def _lenet_kernel(x_ref, w1_ref, b1_ref, w2_ref, b2_ref,
                  fw1_ref, fb1_ref, fw2_ref, fb2_ref, fw3_ref, fb3_ref,
                  out_ref):
    x = x_ref[...]                       # (3, 32, TN, 32) = (C, H, N, W), f32
    tn = x.shape[2]                      # multiple of 8 (sublane dim)

    # conv1 (5x5, 3->6) + ReLU as ONE matmul: M = 28*TN, K = 480, N = 168.
    parts = [x[c, kh:kh + 28] for c in range(3) for kh in range(5)]
    a = jnp.concatenate(parts, axis=-1).reshape(28 * tn, 3 * 5 * 32)
    y = jnp.maximum(_mm(a, w1_ref, b1_ref), 0.0)          # (28*TN, 168)

    # maxpool1 2x2/2: H via leading-dim reshape + max, W via lane-group max.
    y = jnp.max(y.reshape(14, 2, tn, 168), axis=1)        # (14, TN, 168)
    y = _pool_w(y, 6)                                     # (14, TN, 84)

    # conv2 (5x5, 6->16) + ReLU as ONE matmul: M = 10*TN, K = 420, N = 160.
    parts = [y[kh:kh + 10] for kh in range(5)]
    a = jnp.concatenate(parts, axis=-1).reshape(10 * tn, 5 * 84)
    y = jnp.maximum(_mm(a, w2_ref, b2_ref), 0.0)          # (10*TN, 160)

    # maxpool2 2x2/2.
    y = jnp.max(y.reshape(5, 2, tn, 160), axis=1)         # (5, TN, 160)
    y = _pool_w(y, 16)                                    # (5, TN, 80)

    # Flatten (h, w, c) onto 400 lanes (fc1 columns are host-permuted to match
    # torch's NCHW .view(-1, 16*5*5) exactly).
    flat = jnp.concatenate([y[h] for h in range(5)], axis=-1)   # (TN, 400)

    # FC stack: plain 2-D matmuls, every output width padded to 128 lanes.
    f = jnp.maximum(_mm(flat, fw1_ref, fb1_ref), 0.0)     # (TN, 128)
    f = jnp.maximum(_mm(f, fw2_ref, fb2_ref), 0.0)        # (TN, 128)
    f = _mm(f, fw3_ref, fb3_ref)                          # (TN, 128), cols 10+ = 0
    out_ref[...] = f.astype(out_ref.dtype)


# ---------------------------------------------------------------------------
# Host-side wrapper
# ---------------------------------------------------------------------------

def lenet_forward(x_nchw, params, *, tile_n=32):
    """x_nchw: (N, 3, 32, 32) float32 (PyTorch layout). Returns (N, 10) logits."""
    N = x_nchw.shape[0]
    tile_n = max(8, (min(tile_n, N) + 7) // 8 * 8)        # sublane-aligned tile
    n_pad = pl.cdiv(N, tile_n) * tile_n

    x = x_nchw.astype(jnp.float32)
    if n_pad != N:
        x = jnp.pad(x, ((0, n_pad - N), (0, 0), (0, 0), (0, 0)))
    # (N, C, H, W) -> (C, H, N, W): batch on sublanes, W on lanes.
    x = jnp.transpose(x, (1, 2, 0, 3))

    keys = ("w1", "b1", "w2", "b2",
            "fc1_w", "fc1_b", "fc2_w", "fc2_b", "fc3_w", "fc3_b")
    ws = [params[k] for k in keys]

    def full_spec(shape):
        nd = len(shape)
        return pl.BlockSpec(shape, lambda i, _nd=nd: (0,) * _nd)

    in_specs = [pl.BlockSpec((3, 32, tile_n, 32), lambda i: (0, 0, i, 0))]
    in_specs += [full_spec(w.shape) for w in ws]

    out = pl.pallas_call(
        _lenet_kernel,
        out_shape=jax.ShapeDtypeStruct((n_pad, 128), jnp.float32),
        grid=(n_pad // tile_n,),
        in_specs=in_specs,
        out_specs=pl.BlockSpec((tile_n, 128), lambda i: (i, 0)),
        compiler_params=pltpu.CompilerParams(
            dimension_semantics=("parallel",),
            vmem_limit_bytes=40 * 1024 * 1024),
    )(x, *ws)

    return out[:N, :10]


# ---------------------------------------------------------------------------
# Parameters: torch layout -> kernel layout (done ONCE, outside the hot path)
# ---------------------------------------------------------------------------

def init_params(key):
    """Parameters in the original PyTorch (state_dict) layout."""
    ks = jax.random.split(key, 10)

    def nrm(k, shape, scale=0.1):
        return scale * jax.random.normal(k, shape, dtype=jnp.float32)

    return {
        "conv1_w": nrm(ks[0], (6, 3, 5, 5)),   "conv1_b": nrm(ks[1], (6,)),
        "conv2_w": nrm(ks[2], (16, 6, 5, 5)),  "conv2_b": nrm(ks[3], (16,)),
        "fc1_w": nrm(ks[4], (120, 400)),       "fc1_b": nrm(ks[5], (120,)),
        "fc2_w": nrm(ks[6], (84, 120)),        "fc2_b": nrm(ks[7], (84,)),
        "fc3_w": nrm(ks[8], (10, 84)),         "fc3_b": nrm(ks[9], (10,)),
    }


def prepare_params(p):
    """One-time host-side re-layout of torch-format params into kernel format."""
    w1 = np.asarray(p["conv1_w"], np.float32)   # (6, 3, 5, 5)
    b1 = np.asarray(p["conv1_b"], np.float32)
    w2 = np.asarray(p["conv2_w"], np.float32)   # (16, 6, 5, 5)
    b2 = np.asarray(p["conv2_b"], np.float32)

    # conv1 block-banded weight: row r = (c*5 + kh)*32 + w', col j = ow*6 + oc,
    # value = w1[oc, c, kh, w'-ow] when 0 <= w'-ow < 5, else 0.
    W1 = np.zeros((3 * 5 * 32, 28 * 6), np.float32)
    for c in range(3):
        for kh in range(5):
            base = (c * 5 + kh) * 32
            for kw in range(5):
                for ow in range(28):
                    W1[base + ow + kw, ow * 6:(ow + 1) * 6] = w1[:, c, kh, kw]
    B1 = np.tile(b1, 28).reshape(1, 28 * 6)

    # conv2 block-banded weight: row r = kh*84 + w'*6 + c, col j = ow*16 + oc.
    W2 = np.zeros((5 * 14 * 6, 10 * 16), np.float32)
    for kh in range(5):
        for kw in range(5):
            for c in range(6):
                for ow in range(10):
                    W2[kh * 84 + (ow + kw) * 6 + c,
                       ow * 16:(ow + 1) * 16] = w2[:, c, kh, kw]
    B2 = np.tile(b2, 10).reshape(1, 10 * 16)

    # fc1: torch input index c*25 + h*5 + w  ->  kernel column h*80 + w*16 + c.
    fc1 = np.asarray(p["fc1_w"], np.float32).reshape(120, 16, 5, 5)
    fc1 = np.transpose(fc1, (2, 3, 1, 0)).reshape(400, 120)
    fc1 = np.pad(fc1, ((0, 0), (0, 8)))                              # -> (400, 128)
    fb1 = np.pad(np.asarray(p["fc1_b"], np.float32), (0, 8)).reshape(1, 128)

    fc2 = np.pad(np.asarray(p["fc2_w"], np.float32).T, ((0, 8), (0, 44)))   # (128,128)
    fb2 = np.pad(np.asarray(p["fc2_b"], np.float32), (0, 44)).reshape(1, 128)

    fc3 = np.pad(np.asarray(p["fc3_w"], np.float32).T, ((0, 44), (0, 118)))  # (128,128)
    fb3 = np.pad(np.asarray(p["fc3_b"], np.float32), (0, 118)).reshape(1, 128)

    bf = jnp.bfloat16
    return {
        "w1": jnp.asarray(W1, bf),      "b1": jnp.asarray(B1),
        "w2": jnp.asarray(W2, bf),      "b2": jnp.asarray(B2),
        "fc1_w": jnp.asarray(fc1, bf),  "fc1_b": jnp.asarray(fb1),
        "fc2_w": jnp.asarray(fc2, bf),  "fc2_b": jnp.asarray(fb2),
        "fc3_w": jnp.asarray(fc3, bf),  "fc3_b": jnp.asarray(fb3),
    }


# ---------------------------------------------------------------------------
# Pure-JAX reference (torch semantics) + self-test
# ---------------------------------------------------------------------------

def reference_forward(x, p):
    def conv(x, w, b):
        y = lax.conv_general_dilated(
            x, w, window_strides=(1, 1), padding="VALID",
            dimension_numbers=("NCHW", "OIHW", "NCHW"))
        return y + b.reshape(1, -1, 1, 1)

    def pool(x):
        return lax.reduce_window(x, -jnp.inf, lax.max,
                                 (1, 1, 2, 2), (1, 1, 2, 2), "VALID")

    h = pool(jax.nn.relu(conv(x, p["conv1_w"], p["conv1_b"])))
    h = pool(jax.nn.relu(conv(h, p["conv2_w"], p["conv2_b"])))
    h = h.reshape(h.shape[0], -1)                    # NCHW flatten == torch .view
    h = jax.nn.relu(h @ p["fc1_w"].T + p["fc1_b"])
    h = jax.nn.relu(h @ p["fc2_w"].T + p["fc2_b"])
    return h @ p["fc3_w"].T + p["fc3_b"]


if __name__ == "__main__":
    key = jax.random.PRNGKey(0)
    kx, kp = jax.random.split(key)
    x = jax.random.normal(kx, (10, 3, 32, 32), dtype=jnp.float32)   # NCHW like torch

    torch_params = init_params(kp)
    kernel_params = prepare_params(torch_params)

    # tile_n=8 here so the tiny demo batch exercises batch padding and grid > 1.
    fwd = jax.jit(lambda xx, pp: lenet_forward(xx, pp, tile_n=8))
    out = jax.block_until_ready(fwd(x, kernel_params))

    assert out.shape == (10, 10) and out.dtype == jnp.float32
    ref = reference_forward(x, torch_params)
    assert bool(jnp.all(jnp.isfinite(out)))
    err = float(jnp.max(jnp.abs(out - ref)))
    # bf16 matmul operands with f32 accumulation -> tolerance a bit looser than f32.
    assert bool(jnp.allclose(out, ref, atol=5e-2, rtol=5e-2)), f"max abs err {err}"
    print("KERNEL_OK")
</pallas_src>

<mosaic_0001>
module attributes {stable_mosaic.version = 11 : i64} {
  func.func @_lenet_kernel(%arg0: i32, %arg1: memref<3x32x8x32xf32, #tpu.memory_space<vmem>>, %arg2: memref<480x168xbf16, #tpu.memory_space<vmem>>, %arg3: memref<1x168xf32, #tpu.memory_space<vmem>>, %arg4: memref<420x160xbf16, #tpu.memory_space<vmem>>, %arg5: memref<1x160xf32, #tpu.memory_space<vmem>>, %arg6: memref<400x128xbf16, #tpu.memory_space<vmem>>, %arg7: memref<1x128xf32, #tpu.memory_space<vmem>>, %arg8: memref<128x128xbf16, #tpu.memory_space<vmem>>, %arg9: memref<1x128xf32, #tpu.memory_space<vmem>>, %arg10: memref<128x128xbf16, #tpu.memory_space<vmem>>, %arg11: memref<1x128xf32, #tpu.memory_space<vmem>>, %arg12: memref<8x128xf32, #tpu.memory_space<vmem>>) attributes {dimension_semantics = [#tpu.dimension_semantics<parallel>], iteration_bounds = array<i64: 2>, scalar_prefetch = 0 : i64, scratch_operands = 0 : i64, tpu.core_type = #tpu.core_type<tc>, window_params = [{transform_indices = @transform_0, window_bounds = array<i64: 3, 32, 8, 32>}, {pipeline_mode = #tpu.pipeline_mode<synchronous>, transform_indices = @transform_1, window_bounds = array<i64: 480, 168>}, {pipeline_mode = #tpu.pipeline_mode<synchronous>, transform_indices = @transform_2, window_bounds = array<i64: 1, 168>}, {pipeline_mode = #tpu.pipeline_mode<synchronous>, transform_indices = @transform_3, window_bounds = array<i64: 420, 160>}, {pipeline_mode = #tpu.pipeline_mode<synchronous>, transform_indices = @transform_4, window_bounds = array<i64: 1, 160>}, {pipeline_mode = #tpu.pipeline_mode<synchronous>, transform_indices = @transform_5, window_bounds = array<i64: 400, 128>}, {pipeline_mode = #tpu.pipeline_mode<synchronous>, transform_indices = @transform_6, window_bounds = array<i64: 1, 128>}, {pipeline_mode = #tpu.pipeline_mode<synchronous>, transform_indices = @transform_7, window_bounds = array<i64: 128, 128>}, {pipeline_mode = #tpu.pipeline_mode<synchronous>, transform_indices = @transform_8, window_bounds = array<i64: 1, 128>}, {pipeline_mode = #tpu.pipeline_mode<synchronous>, transform_indices = @transform_9, window_bounds = array<i64: 128, 128>}, {pipeline_mode = #tpu.pipeline_mode<synchronous>, transform_indices = @transform_10, window_bounds = array<i64: 1, 128>}, {transform_indices = @transform_11, window_bounds = array<i64: 8, 128>}]} {
    %c0 = arith.constant 0 : index
    %c0_0 = arith.constant 0 : index
    %c0_1 = arith.constant 0 : index
    %c0_2 = arith.constant 0 : index
    %0 = vector.load %arg1[%c0, %c0_0, %c0_1, %c0_2] : memref<3x32x8x32xf32, #tpu.memory_space<vmem>>, vector<3x32x8x32xf32>
    %1 = vector.extract_strided_slice %0 {offsets = [0, 0, 0, 0], sizes = [1, 28, 8, 32], strides = [1, 1, 1, 1]} : vector<3x32x8x32xf32> to vector<1x28x8x32xf32>
    %2 = vector.shape_cast %1 : vector<1x28x8x32xf32> to vector<28x8x32xf32>
    %3 = vector.extract_strided_slice %0 {offsets = [0, 1, 0, 0], sizes = [1, 28, 8, 32], strides = [1, 1, 1, 1]} : vector<3x32x8x32xf32> to vector<1x28x8x32xf32>
    %4 = vector.shape_cast %3 : vector<1x28x8x32xf32> to vector<28x8x32xf32>
    %5 = vector.extract_strided_slice %0 {offsets = [0, 2, 0, 0], sizes = [1, 28, 8, 32], strides = [1, 1, 1, 1]} : vector<3x32x8x32xf32> to vector<1x28x8x32xf32>
    %6 = vector.shape_cast %5 : vector<1x28x8x32xf32> to vector<28x8x32xf32>
    %7 = vector.extract_strided_slice %0 {offsets = [0, 3, 0, 0], sizes = [1, 28, 8, 32], strides = [1, 1, 1, 1]} : vector<3x32x8x32xf32> to vector<1x28x8x32xf32>
    %8 = vector.shape_cast %7 : vector<1x28x8x32xf32> to vector<28x8x32xf32>
    %9 = vector.extract_strided_slice %0 {offsets = [0, 4, 0, 0], sizes = [1, 28, 8, 32], strides = [1, 1, 1, 1]} : vector<3x32x8x32xf32> to vector<1x28x8x32xf32>
    %10 = vector.shape_cast %9 : vector<1x28x8x32xf32> to vector<28x8x32xf32>
    %11 = vector.extract_strided_slice %0 {offsets = [1, 0, 0, 0], sizes = [1, 28, 8, 32], strides = [1, 1, 1, 1]} : vector<3x32x8x32xf32> to vector<1x28x8x32xf32>
    %12 = vector.shape_cast %11 : vector<1x28x8x32xf32> to vector<28x8x32xf32>
    %13 = vector.extract_strided_slice %0 {offsets = [1, 1, 0, 0], sizes = [1, 28, 8, 32], strides = [1, 1, 1, 1]} : vector<3x32x8x32xf32> to vector<1x28x8x32xf32>
    %14 = vector.shape_cast %13 : vector<1x28x8x32xf32> to vector<28x8x32xf32>
    %15 = vector.extract_strided_slice %0 {offsets = [1, 2, 0, 0], sizes = [1, 28, 8, 32], strides = [1, 1, 1, 1]} : vector<3x32x8x32xf32> to vector<1x28x8x32xf32>
    %16 = vector.shape_cast %15 : vector<1x28x8x32xf32> to vector<28x8x32xf32>
    %17 = vector.extract_strided_slice %0 {offsets = [1, 3, 0, 0], sizes = [1, 28, 8, 32], strides = [1, 1, 1, 1]} : vector<3x32x8x32xf32> to vector<1x28x8x32xf32>
    %18 = vector.shape_cast %17 : vector<1x28x8x32xf32> to vector<28x8x32xf32>
    %19 = vector.extract_strided_slice %0 {offsets = [1, 4, 0, 0], sizes = [1, 28, 8, 32], strides = [1, 1, 1, 1]} : vector<3x32x8x32xf32> to vector<1x28x8x32xf32>
    %20 = vector.shape_cast %19 : vector<1x28x8x32xf32> to vector<28x8x32xf32>
    %21 = vector.extract_strided_slice %0 {offsets = [2, 0, 0, 0], sizes = [1, 28, 8, 32], strides = [1, 1, 1, 1]} : vector<3x32x8x32xf32> to vector<1x28x8x32xf32>
    %22 = vector.shape_cast %21 : vector<1x28x8x32xf32> to vector<28x8x32xf32>
    %23 = vector.extract_strided_slice %0 {offsets = [2, 1, 0, 0], sizes = [1, 28, 8, 32], strides = [1, 1, 1, 1]} : vector<3x32x8x32xf32> to vector<1x28x8x32xf32>
    %24 = vector.shape_cast %23 : vector<1x28x8x32xf32> to vector<28x8x32xf32>
    %25 = vector.extract_strided_slice %0 {offsets = [2, 2, 0, 0], sizes = [1, 28, 8, 32], strides = [1, 1, 1, 1]} : vector<3x32x8x32xf32> to vector<1x28x8x32xf32>
    %26 = vector.shape_cast %25 : vector<1x28x8x32xf32> to vector<28x8x32xf32>
    %27 = vector.extract_strided_slice %0 {offsets = [2, 3, 0, 0], sizes = [1, 28, 8, 32], strides = [1, 1, 1, 1]} : vector<3x32x8x32xf32> to vector<1x28x8x32xf32>
    %28 = vector.shape_cast %27 : vector<1x28x8x32xf32> to vector<28x8x32xf32>
    %29 = vector.extract_strided_slice %0 {offsets = [2, 4, 0, 0], sizes = [1, 28, 8, 32], strides = [1, 1, 1, 1]} : vector<3x32x8x32xf32> to vector<1x28x8x32xf32>
    %30 = vector.shape_cast %29 : vector<1x28x8x32xf32> to vector<28x8x32xf32>
    %31 = tpu.concatenate %2, %4, %6, %8, %10, %12, %14, %16, %18, %20, %22, %24, %26, %28, %30 in 2 : vector<28x8x32xf32>, vector<28x8x32xf32>, vector<28x8x32xf32>, vector<28x8x32xf32>, vector<28x8x32xf32>, vector<28x8x32xf32>, vector<28x8x32xf32>, vector<28x8x32xf32>, vector<28x8x32xf32>, vector<28x8x32xf32>, vector<28x8x32xf32>, vector<28x8x32xf32>, vector<28x8x32xf32>, vector<28x8x32xf32>, vector<28x8x32xf32> -> vector<28x8x480xf32>
    %32 = vector.shape_cast %31 : vector<28x8x480xf32> to vector<224x480xf32>
    %33 = arith.truncf %32 : vector<224x480xf32> to vector<224x480xbf16>
    %c0_3 = arith.constant 0 : index
    %c0_4 = arith.constant 0 : index
    %34 = vector.load %arg2[%c0_3, %c0_4] : memref<480x168xbf16, #tpu.memory_space<vmem>>, vector<480x168xbf16>
    %cst = arith.constant dense<0.000000e+00> : vector<224x168xf32>
    %35 = tpu.matmul %33, %34, %cst {dimension_numbers = #tpu.dot_dimension_numbers<[1], [0], [0], [1], [0, 0, 1, 1], [], []>} : vector<224x480xbf16>, vector<480x168xbf16>, vector<224x168xf32> -> vector<224x168xf32>
    %c0_5 = arith.constant 0 : index
    %c0_6 = arith.constant 0 : index
    %36 = vector.load %arg3[%c0_5, %c0_6] : memref<1x168xf32, #tpu.memory_space<vmem>>, vector<1x168xf32>
    %37 = vector.broadcast %36 : vector<1x168xf32> to vector<224x168xf32>
    %38 = arith.addf %35, %37 : vector<224x168xf32>
    %cst_7 = arith.constant 0.000000e+00 : f32
    %39 = vector.broadcast %cst_7 : f32 to vector<224x168xf32>
    %40 = arith.maximumf %38, %39 : vector<224x168xf32>
    %41 = vector.shape_cast %40 : vector<224x168xf32> to vector<14x2x8x168xf32>
    %cst_8 = arith.constant dense<0xFF800000> : vector<14x8x168xf32>
    %42 = vector.multi_reduction <maximumf>, %41, %cst_8 [1] : vector<14x2x8x168xf32> to vector<14x8x168xf32>
    %43 = vector.extract_strided_slice %42 {offsets = [0, 0, 0], sizes = [14, 8, 6], strides = [1, 1, 1]} : vector<14x8x168xf32> to vector<14x8x6xf32>
    %44 = vector.extract_strided_slice %42 {offsets = [0, 0, 6], sizes = [14, 8, 6], strides = [1, 1, 1]} : vector<14x8x168xf32> to vector<14x8x6xf32>
    %45 = arith.maximumf %43, %44 : vector<14x8x6xf32>
    %46 = vector.extract_strided_slice %42 {offsets = [0, 0, 12], sizes = [14, 8, 6], strides = [1, 1, 1]} : vector<14x8x168xf32> to vector<14x8x6xf32>
    %47 = vector.extract_strided_slice %42 {offsets = [0, 0, 18], sizes = [14, 8, 6], strides = [1, 1, 1]} : vector<14x8x168xf32> to vector<14x8x6xf32>
    %48 = arith.maximumf %46, %47 : vector<14x8x6xf32>
    %49 = vector.extract_strided_slice %42 {offsets = [0, 0, 24], sizes = [14, 8, 6], strides = [1, 1, 1]} : vector<14x8x168xf32> to vector<14x8x6xf32>
    %50 = vector.extract_strided_slice %42 {offsets = [0, 0, 30], sizes = [14, 8, 6], strides = [1, 1, 1]} : vector<14x8x168xf32> to vector<14x8x6xf32>
    %51 = arith.maximumf %49, %50 : vector<14x8x6xf32>
    %52 = vector.extract_strided_slice %42 {offsets = [0, 0, 36], sizes = [14, 8, 6], strides = [1, 1, 1]} : vector<14x8x168xf32> to vector<14x8x6xf32>
    %53 = vector.extract_strided_slice %42 {offsets = [0, 0, 42], sizes = [14, 8, 6], strides = [1, 1, 1]} : vector<14x8x168xf32> to vector<14x8x6xf32>
    %54 = arith.maximumf %52, %53 : vector<14x8x6xf32>
    %55 = vector.extract_strided_slice %42 {offsets = [0, 0, 48], sizes = [14, 8, 6], strides = [1, 1, 1]} : vector<14x8x168xf32> to vector<14x8x6xf32>
    %56 = vector.extract_strided_slice %42 {offsets = [0, 0, 54], sizes = [14, 8, 6], strides = [1, 1, 1]} : vector<14x8x168xf32> to vector<14x8x6xf32>
    %57 = arith.maximumf %55, %56 : vector<14x8x6xf32>
    %58 = vector.extract_strided_slice %42 {offsets = [0, 0, 60], sizes = [14, 8, 6], strides = [1, 1, 1]} : vector<14x8x168xf32> to vector<14x8x6xf32>
    %59 = vector.extract_strided_slice %42 {offsets = [0, 0, 66], sizes = [14, 8, 6], strides = [1, 1, 1]} : vector<14x8x168xf32> to vector<14x8x6xf32>
    %60 = arith.maximumf %58, %59 : vector<14x8x6xf32>
    %61 = vector.extract_strided_slice %42 {offsets = [0, 0, 72], sizes = [14, 8, 6], strides = [1, 1, 1]} : vector<14x8x168xf32> to vector<14x8x6xf32>
    %62 = vector.extract_strided_slice %42 {offsets = [0, 0, 78], sizes = [14, 8, 6], strides = [1, 1, 1]} : vector<14x8x168xf32> to vector<14x8x6xf32>
    %63 = arith.maximumf %61, %62 : vector<14x8x6xf32>
    %64 = vector.extract_strided_slice %42 {offsets = [0, 0, 84], sizes = [14, 8, 6], strides = [1, 1, 1]} : vector<14x8x168xf32> to vector<14x8x6xf32>
    %65 = vector.extract_strided_slice %42 {offsets = [0, 0, 90], sizes = [14, 8, 6], strides = [1, 1, 1]} : vector<14x8x168xf32> to vector<14x8x6xf32>
    %66 = arith.maximumf %64, %65 : vector<14x8x6xf32>
    %67 = vector.extract_strided_slice %42 {offsets = [0, 0, 96], sizes = [14, 8, 6], strides = [1, 1, 1]} : vector<14x8x168xf32> to vector<14x8x6xf32>
    %68 = vector.extract_strided_slice %42 {offsets = [0, 0, 102], sizes = [14, 8, 6], strides = [1, 1, 1]} : vector<14x8x168xf32> to vector<14x8x6xf32>
    %69 = arith.maximumf %67, %68 : vector<14x8x6xf32>
    %70 = vector.extract_strided_slice %42 {offsets = [0, 0, 108], sizes = [14, 8, 6], strides = [1, 1, 1]} : vector<14x8x168xf32> to vector<14x8x6xf32>
    %71 = vector.extract_strided_slice %42 {offsets = [0, 0, 114], sizes = [14, 8, 6], strides = [1, 1, 1]} : vector<14x8x168xf32> to vector<14x8x6xf32>
    %72 = arith.maximumf %70, %71 : vector<14x8x6xf32>
    %73 = vector.extract_strided_slice %42 {offsets = [0, 0, 120], sizes = [14, 8, 6], strides = [1, 1, 1]} : vector<14x8x168xf32> to vector<14x8x6xf32>
    %74 = vector.extract_strided_slice %42 {offsets = [0, 0, 126], sizes = [14, 8, 6], strides = [1, 1, 1]} : vector<14x8x168xf32> to vector<14x8x6xf32>
    %75 = arith.maximumf %73, %74 : vector<14x8x6xf32>
    %76 = vector.extract_strided_slice %42 {offsets = [0, 0, 132], sizes = [14, 8, 6], strides = [1, 1, 1]} : vector<14x8x168xf32> to vector<14x8x6xf32>
    %77 = vector.extract_strided_slice %42 {offsets = [0, 0, 138], sizes = [14, 8, 6], strides = [1, 1, 1]} : vector<14x8x168xf32> to vector<14x8x6xf32>
    %78 = arith.maximumf %76, %77 : vector<14x8x6xf32>
    %79 = vector.extract_strided_slice %42 {offsets = [0, 0, 144], sizes = [14, 8, 6], strides = [1, 1, 1]} : vector<14x8x168xf32> to vector<14x8x6xf32>
    %80 = vector.extract_strided_slice %42 {offsets = [0, 0, 150], sizes = [14, 8, 6], strides = [1, 1, 1]} : vector<14x8x168xf32> to vector<14x8x6xf32>
    %81 = arith.maximumf %79, %80 : vector<14x8x6xf32>
    %82 = vector.extract_strided_slice %42 {offsets = [0, 0, 156], sizes = [14, 8, 6], strides = [1, 1, 1]} : vector<14x8x168xf32> to vector<14x8x6xf32>
    %83 = vector.extract_strided_slice %42 {offsets = [0, 0, 162], sizes = [14, 8, 6], strides = [1, 1, 1]} : vector<14x8x168xf32> to vector<14x8x6xf32>
    %84 = arith.maximumf %82, %83 : vector<14x8x6xf32>
    %85 = tpu.concatenate %45, %48, %51, %54, %57, %60, %63, %66, %69, %72, %75, %78, %81, %84 in 2 : vector<14x8x6xf32>, vector<14x8x6xf32>, vector<14x8x6xf32>, vector<14x8x6xf32>, vector<14x8x6xf32>, vector<14x8x6xf32>, vector<14x8x6xf32>, vector<14x8x6xf32>, vector<14x8x6xf32>, vector<14x8x6xf32>, vector<14x8x6xf32>, vector<14x8x6xf32>, vector<14x8x6xf32>, vector<14x8x6xf32> -> vector<14x8x84xf32>
    %86 = vector.extract_strided_slice %85 {offsets = [0, 0, 0], sizes = [10, 8, 84], strides = [1, 1, 1]} : vector<14x8x84xf32> to vector<10x8x84xf32>
    %87 = vector.extract_strided_slice %85 {offsets = [1, 0, 0], sizes = [10, 8, 84], strides = [1, 1, 1]} : vector<14x8x84xf32> to vector<10x8x84xf32>
    %88 = vector.extract_strided_slice %85 {offsets = [2, 0, 0], sizes = [10, 8, 84], strides = [1, 1, 1]} : vector<14x8x84xf32> to vector<10x8x84xf32>
    %89 = vector.extract_strided_slice %85 {offsets = [3, 0, 0], sizes = [10, 8, 84], strides = [1, 1, 1]} : vector<14x8x84xf32> to vector<10x8x84xf32>
    %90 = vector.extract_strided_slice %85 {offsets = [4, 0, 0], sizes = [10, 8, 84], strides = [1, 1, 1]} : vector<14x8x84xf32> to vector<10x8x84xf32>
    %91 = tpu.concatenate %86, %87, %88, %89, %90 in 2 : vector<10x8x84xf32>, vector<10x8x84xf32>, vector<10x8x84xf32>, vector<10x8x84xf32>, vector<10x8x84xf32> -> vector<10x8x420xf32>
    %92 = vector.shape_cast %91 : vector<10x8x420xf32> to vector<80x420xf32>
    %93 = arith.truncf %92 : vector<80x420xf32> to vector<80x420xbf16>
    %c0_9 = arith.constant 0 : index
    %c0_10 = arith.constant 0 : index
    %94 = vector.load %arg4[%c0_9, %c0_10] : memref<420x160xbf16, #tpu.memory_space<vmem>>, vector<420x160xbf16>
    %cst_11 = arith.constant dense<0.000000e+00> : vector<80x160xf32>
    %95 = tpu.matmul %93, %94, %cst_11 {dimension_numbers = #tpu.dot_dimension_numbers<[1], [0], [0], [1], [0, 0, 1, 1], [], []>} : vector<80x420xbf16>, vector<420x160xbf16>, vector<80x160xf32> -> vector<80x160xf32>
    %c0_12 = arith.constant 0 : index
    %c0_13 = arith.constant 0 : index
    %96 = vector.load %arg5[%c0_12, %c0_13] : memref<1x160xf32, #tpu.memory_space<vmem>>, vector<1x160xf32>
    %97 = vector.broadcast %96 : vector<1x160xf32> to vector<80x160xf32>
    %98 = arith.addf %95, %97 : vector<80x160xf32>
    %cst_14 = arith.constant 0.000000e+00 : f32
    %99 = vector.broadcast %cst_14 : f32 to vector<80x160xf32>
    %100 = arith.maximumf %98, %99 : vector<80x160xf32>
    %101 = vector.shape_cast %100 : vector<80x160xf32> to vector<5x2x8x160xf32>
    %cst_15 = arith.constant dense<0xFF800000> : vector<5x8x160xf32>
    %102 = vector.multi_reduction <maximumf>, %101, %cst_15 [1] : vector<5x2x8x160xf32> to vector<5x8x160xf32>
    %103 = vector.extract_strided_slice %102 {offsets = [0, 0, 0], sizes = [5, 8, 16], strides = [1, 1, 1]} : vector<5x8x160xf32> to vector<5x8x16xf32>
    %104 = vector.extract_strided_slice %102 {offsets = [0, 0, 16], sizes = [5, 8, 16], strides = [1, 1, 1]} : vector<5x8x160xf32> to vector<5x8x16xf32>
    %105 = arith.maximumf %103, %104 : vector<5x8x16xf32>
    %106 = vector.extract_strided_slice %102 {offsets = [0, 0, 32], sizes = [5, 8, 16], strides = [1, 1, 1]} : vector<5x8x160xf32> to vector<5x8x16xf32>
    %107 = vector.extract_strided_slice %102 {offsets = [0, 0, 48], sizes = [5, 8, 16], strides = [1, 1, 1]} : vector<5x8x160xf32> to vector<5x8x16xf32>
    %108 = arith.maximumf %106, %107 : vector<5x8x16xf32>
    %109 = vector.extract_strided_slice %102 {offsets = [0, 0, 64], sizes = [5, 8, 16], strides = [1, 1, 1]} : vector<5x8x160xf32> to vector<5x8x16xf32>
    %110 = vector.extract_strided_slice %102 {offsets = [0, 0, 80], sizes = [5, 8, 16], strides = [1, 1, 1]} : vector<5x8x160xf32> to vector<5x8x16xf32>
    %111 = arith.maximumf %109, %110 : vector<5x8x16xf32>
    %112 = vector.extract_strided_slice %102 {offsets = [0, 0, 96], sizes = [5, 8, 16], strides = [1, 1, 1]} : vector<5x8x160xf32> to vector<5x8x16xf32>
    %113 = vector.extract_strided_slice %102 {offsets = [0, 0, 112], sizes = [5, 8, 16], strides = [1, 1, 1]} : vector<5x8x160xf32> to vector<5x8x16xf32>
    %114 = arith.maximumf %112, %113 : vector<5x8x16xf32>
    %115 = vector.extract_strided_slice %102 {offsets = [0, 0, 128], sizes = [5, 8, 16], strides = [1, 1, 1]} : vector<5x8x160xf32> to vector<5x8x16xf32>
    %116 = vector.extract_strided_slice %102 {offsets = [0, 0, 144], sizes = [5, 8, 16], strides = [1, 1, 1]} : vector<5x8x160xf32> to vector<5x8x16xf32>
    %117 = arith.maximumf %115, %116 : vector<5x8x16xf32>
    %118 = tpu.concatenate %105, %108, %111, %114, %117 in 2 : vector<5x8x16xf32>, vector<5x8x16xf32>, vector<5x8x16xf32>, vector<5x8x16xf32>, vector<5x8x16xf32> -> vector<5x8x80xf32>
    %119 = vector.extract_strided_slice %118 {offsets = [0, 0, 0], sizes = [1, 8, 80], strides = [1, 1, 1]} : vector<5x8x80xf32> to vector<1x8x80xf32>
    %120 = vector.shape_cast %119 : vector<1x8x80xf32> to vector<8x80xf32>
    %121 = vector.extract_strided_slice %118 {offsets = [1, 0, 0], sizes = [1, 8, 80], strides = [1, 1, 1]} : vector<5x8x80xf32> to vector<1x8x80xf32>
    %122 = vector.shape_cast %121 : vector<1x8x80xf32> to vector<8x80xf32>
    %123 = vector.extract_strided_slice %118 {offsets = [2, 0, 0], sizes = [1, 8, 80], strides = [1, 1, 1]} : vector<5x8x80xf32> to vector<1x8x80xf32>
    %124 = vector.shape_cast %123 : vector<1x8x80xf32> to vector<8x80xf32>
    %125 = vector.extract_strided_slice %118 {offsets = [3, 0, 0], sizes = [1, 8, 80], strides = [1, 1, 1]} : vector<5x8x80xf32> to vector<1x8x80xf32>
    %126 = vector.shape_cast %125 : vector<1x8x80xf32> to vector<8x80xf32>
    %127 = vector.extract_strided_slice %118 {offsets = [4, 0, 0], sizes = [1, 8, 80], strides = [1, 1, 1]} : vector<5x8x80xf32> to vector<1x8x80xf32>
    %128 = vector.shape_cast %127 : vector<1x8x80xf32> to vector<8x80xf32>
    %129 = tpu.concatenate %120, %122, %124, %126, %128 in 1 : vector<8x80xf32>, vector<8x80xf32>, vector<8x80xf32>, vector<8x80xf32>, vector<8x80xf32> -> vector<8x400xf32>
    %130 = arith.truncf %129 : vector<8x400xf32> to vector<8x400xbf16>
    %c0_16 = arith.constant 0 : index
    %c0_17 = arith.constant 0 : index
    %131 = vector.load %arg6[%c0_16, %c0_17] : memref<400x128xbf16, #tpu.memory_space<vmem>>, vector<400x128xbf16>
    %cst_18 = arith.constant dense<0.000000e+00> : vector<8x128xf32>
    %132 = tpu.matmul %130, %131, %cst_18 {dimension_numbers = #tpu.dot_dimension_numbers<[1], [0], [0], [1], [0, 0, 1, 1], [], []>} : vector<8x400xbf16>, vector<400x128xbf16>, vector<8x128xf32> -> vector<8x128xf32>
    %c0_19 = arith.constant 0 : index
    %c0_20 = arith.constant 0 : index
    %133 = vector.load %arg7[%c0_19, %c0_20] : memref<1x128xf32, #tpu.memory_space<vmem>>, vector<1x128xf32>
    %134 = vector.broadcast %133 : vector<1x128xf32> to vector<8x128xf32>
    %135 = arith.addf %132, %134 : vector<8x128xf32>
    %cst_21 = arith.constant 0.000000e+00 : f32
    %136 = vector.broadcast %cst_21 : f32 to vector<8x128xf32>
    %137 = arith.maximumf %135, %136 : vector<8x128xf32>
    %138 = arith.truncf %137 : vector<8x128xf32> to vector<8x128xbf16>
    %c0_22 = arith.constant 0 : index
    %c0_23 = arith.constant 0 : index
    %139 = vector.load %arg8[%c0_22, %c0_23] : memref<128x128xbf16, #tpu.memory_space<vmem>>, vector<128x128xbf16>
    %cst_24 = arith.constant dense<0.000000e+00> : vector<8x128xf32>
    %140 = tpu.matmul %138, %139, %cst_24 {dimension_numbers = #tpu.dot_dimension_numbers<[1], [0], [0], [1], [0, 0, 1, 1], [], []>} : vector<8x128xbf16>, vector<128x128xbf16>, vector<8x128xf32> -> vector<8x128xf32>
    %c0_25 = arith.constant 0 : index
    %c0_26 = arith.constant 0 : index
    %141 = vector.load %arg9[%c0_25, %c0_26] : memref<1x128xf32, #tpu.memory_space<vmem>>, vector<1x128xf32>
    %142 = vector.broadcast %141 : vector<1x128xf32> to vector<8x128xf32>
    %143 = arith.addf %140, %142 : vector<8x128xf32>
    %cst_27 = arith.constant 0.000000e+00 : f32
    %144 = vector.broadcast %cst_27 : f32 to vector<8x128xf32>
    %145 = arith.maximumf %143, %144 : vector<8x128xf32>
    %146 = arith.truncf %145 : vector<8x128xf32> to vector<8x128xbf16>
    %c0_28 = arith.constant 0 : index
    %c0_29 = arith.constant 0 : index
    %147 = vector.load %arg10[%c0_28, %c0_29] : memref<128x128xbf16, #tpu.memory_space<vmem>>, vector<128x128xbf16>
    %cst_30 = arith.constant dense<0.000000e+00> : vector<8x128xf32>
    %148 = tpu.matmul %146, %147, %cst_30 {dimension_numbers = #tpu.dot_dimension_numbers<[1], [0], [0], [1], [0, 0, 1, 1], [], []>} : vector<8x128xbf16>, vector<128x128xbf16>, vector<8x128xf32> -> vector<8x128xf32>
    %c0_31 = arith.constant 0 : index
    %c0_32 = arith.constant 0 : index
    %149 = vector.load %arg11[%c0_31, %c0_32] : memref<1x128xf32, #tpu.memory_space<vmem>>, vector<1x128xf32>
    %150 = vector.broadcast %149 : vector<1x128xf32> to vector<8x128xf32>
    %151 = arith.addf %148, %150 : vector<8x128xf32>
    %c0_33 = arith.constant 0 : index
    %c0_34 = arith.constant 0 : index
    %152 = vector.load %arg12[%c0_33, %c0_34] : memref<8x128xf32, #tpu.memory_space<vmem>>, vector<8x128xf32>
    tpu.vector_store %arg12[%c0_33, %c0_34], %151 {strides = array<i32>} : memref<8x128xf32, #tpu.memory_space<vmem>>, vector<8x128xf32>,
    return
  }
  func.func @transform_0(%arg0: i32) -> (i32, i32, i32, i32) {
    %c0_i32 = arith.constant 0 : i32
    %c0_i32_0 = arith.constant 0 : i32
    %c0_i32_1 = arith.constant 0 : i32
    %c0_i32_2 = arith.constant 0 : i32
    return %c0_i32, %c0_i32_0, %arg0, %c0_i32_1 : i32, i32, i32, i32
  }
  func.func @transform_1(%arg0: i32) -> (i32, i32) {
    %c0_i32 = arith.constant 0 : i32
    %c0_i32_0 = arith.constant 0 : i32
    %c0_i32_1 = arith.constant 0 : i32
    return %c0_i32, %c0_i32_0 : i32, i32
  }
  func.func @transform_2(%arg0: i32) -> (i32, i32) {
    %c0_i32 = arith.constant 0 : i32
    %c0_i32_0 = arith.constant 0 : i32
    %c0_i32_1 = arith.constant 0 : i32
    return %c0_i32, %c0_i32_0 : i32, i32
  }
  func.func @transform_3(%arg0: i32) -> (i32, i32) {
    %c0_i32 = arith.constant 0 : i32
    %c0_i32_0 = arith.constant 0 : i32
    %c0_i32_1 = arith.constant 0 : i32
    return %c0_i32, %c0_i32_0 : i32, i32
  }
  func.func @transform_4(%arg0: i32) -> (i32, i32) {
    %c0_i32 = arith.constant 0 : i32
    %c0_i32_0 = arith.constant 0 : i32
    %c0_i32_1 = arith.constant 0 : i32
    return %c0_i32, %c0_i32_0 : i32, i32
  }
  func.func @transform_5(%arg0: i32) -> (i32, i32) {
    %c0_i32 = arith.constant 0 : i32
    %c0_i32_0 = arith.constant 0 : i32
    %c0_i32_1 = arith.constant 0 : i32
    return %c0_i32, %c0_i32_0 : i32, i32
  }
  func.func @transform_6(%arg0: i32) -> (i32, i32) {
    %c0_i32 = arith.constant 0 : i32
    %c0_i32_0 = arith.constant 0 : i32
    %c0_i32_1 = arith.constant 0 : i32
    return %c0_i32, %c0_i32_0 : i32, i32
  }
  func.func @transform_7(%arg0: i32) -> (i32, i32) {
    %c0_i32 = arith.constant 0 : i32
    %c0_i32_0 = arith.constant 0 : i32
    %c0_i32_1 = arith.constant 0 : i32
    return %c0_i32, %c0_i32_0 : i32, i32
  }
  func.func @transform_8(%arg0: i32) -> (i32, i32) {
    %c0_i32 = arith.constant 0 : i32
    %c0_i32_0 = arith.constant 0 : i32
    %c0_i32_1 = arith.constant 0 : i32
    return %c0_i32, %c0_i32_0 : i32, i32
  }
  func.func @transform_9(%arg0: i32) -> (i32, i32) {
    %c0_i32 = arith.constant 0 : i32
    %c0_i32_0 = arith.constant 0 : i32
    %c0_i32_1 = arith.constant 0 : i32
    return %c0_i32, %c0_i32_0 : i32, i32
  }
  func.func @transform_10(%arg0: i32) -> (i32, i32) {
    %c0_i32 = arith.constant 0 : i32
    %c0_i32_0 = arith.constant 0 : i32
    %c0_i32_1 = arith.constant 0 : i32
    return %c0_i32, %c0_i32_0 : i32, i32
  }
  func.func @transform_11(%arg0: i32) -> (i32, i32) {
    %c0_i32 = arith.constant 0 : i32
    %c0_i32_0 = arith.constant 0 : i32
    return %arg0, %c0_i32 : i32, i32
  }
}

</mosaic_0001>

<bundles_post_ra>
// kernel: _lambda_.1
= control target key start
LH: loop header
LB: loop body
LE: loop exit
PB: predicated region body
PF: predicated region fallthrough
CT: control target
= control target key end

     0   :  { %s12620_s0 = inlined_call_operand.vmem [shape: f32[3,32,16,32], index: 0, kind: input, shape index: {}]   ;;  %s12621_s1 = inlined_call_operand.vmem [shape: bf16[480,168], index: 1, kind: input, shape index: {}]   ;;  %s12622_s2 = inlined_call_operand.vmem [shape: f32[1,168], index: 2, kind: input, shape index: {}]   ;;  %s12623_s3 = inlined_call_operand.vmem [shape: bf16[420,160], index: 3, kind: input, shape index: {}]   ;;  %s12624_s4 = inlined_call_operand.vmem [shape: f32[1,160], index: 4, kind: input, shape index: {}]   ;;  %s12625_s5 = inlined_call_operand.vmem [shape: bf16[400,128], index: 5, kind: input, shape index: {}]   ;;  %s12626_s6 = inlined_call_operand.vmem [shape: f32[1,128], index: 6, kind: input, shape index: {}]   ;;  %s12627_s7 = inlined_call_operand.vmem [shape: bf16[128,128], index: 7, kind: input, shape index: {}]   ;;  %s12628_s8 = inlined_call_operand.vmem [shape: f32[1,128], index: 8, kind: input, shape index: {}]   ;;  %s12629_s9 = inlined_call_operand.vmem [shape: bf16[128,128], index: 9, kind: input, shape index: {}]   ;;  %s12630_s10 = inlined_call_operand.vmem [shape: f32[1,128], index: 10, kind: input, shape index: {}]   ;;  %s12631_s11 = inlined_call_operand.hbm [shape: f32[16,128], index: 11, kind: output, shape index: {}]  }
   0x1   :  { %12785 = sst [smem:[#allocation48_spill]] %s12620_s0 }
   0x2   :  { %12786 = sst [smem:[#allocation49_spill]] %s12621_s1 }
   0x3   :  { %12787 = sst [smem:[#allocation50_spill]] %s12622_s2 }
   0x4   :  { %16 = vsyncpa [#allocation4], 0 }
   0x5   :  { %18 = vsyncpa [#allocation4 + $0x1], 0  ;;  %s8225_s17 = smov 0   ;;  %s8227_s18 = smov 0  }
   0x6   :  { %s8229_s19 = smov 0   ;;  %s8231_s20 = smov 0  }
   0x7 LB: > { %12788 = sst [smem:[#allocation6_spill]] %s8135_s18  ;;  %s12632_s21 = sadd.s32 4294967295, %s8143_s20   ;;  %s8143_s20 = sphi %s8231_s20, %s13063_s20   ;;  %s8139_s19 = sphi %s8229_s19, %s13062_s19   ;;  %s8135_s18 = sphi %s8227_s18, %s13061_s18   ;;  %s8131_s17 = sphi %s8225_s17, %s13060_s17  }
   0x8   : > { %12789 = sst [smem:[#allocation7_spill]] %s8139_s19  ;;  %s5784_s22 = sadd.s32 4294967294, %s8143_s20  }
   0x9   : > { %s8248_s23 = sadd.s32 1, %s8143_s20   ;;  %s31_s24 = sadd.s32 1, %s8139_s19 }
   0xa   : > { %s28_s25 = ssub.s32 %s8143_s20, %s8248_s23  ;;  %p38_p0 = scmp.ne.s32.totalorder %s8139_s19, %s8135_s18 }
   0xb   : > { %p29_p1 = scmp.eq.s32.totalorder %s28_s25, 0  ;;  %p39_p2 = scmp.eq.s32.totalorder %s8143_s20, 0 }
   0xc   : > { %p278_p3 = scmp.eq.s32.totalorder %s12632_s21, 1  ;;  %p283_p4 = scmp.ne.s32.totalorder %s8135_s18, %s8131_s17 }
   0xd   : > { %s8261_s26 = scalar_select %p29_p1, %s8139_s19, %s31_s24  }
   0xe   : > { %p40_p5 = por %p39_p2, %p38_p0  ;;  %p8263_p6 = por %p278_p3, %p38_p0 }
   0xf   : > { %12790 = sst [smem:[#allocation8_spill]] %s8261_s26  ;;  %p284_p7 = scmp.eq.s32.totalorder %s5784_s22, 1 }
  0x10   : > { %p5786_p9 = scmp.ge.s32.totalorder %s8143_s20, 2 }
  0x11   : > { %p8267_p8 = por %p284_p7, %p283_p4 }
  0x12   : > { %330 = sbr.rel (%p5786_p9) target bundleno = 129 (0x81), region = 56 }
  0x17   : > { %333 = sbr.rel (!%p40_p5) target bundleno = 129 (0x81), region = 60  ;;  %s335_s29 = sand.u32 (%p40_p5), 1, %s8139_s19  }
  0x18   : > { %s5787_s30 = sshll.u32 (%p40_p5), %s8143_s20, 3  ;;  %s6598_s12 = smul.u32 (%p40_p5), 768, %s335_s29 }
  0x19   : > { %s12793_s0 = sld [smem:[#allocation48_spill]] (%p40_p5) }
  0x1a   : > { %s8284_s16 = scalar_lea.vmem (%p40_p5), [#allocation2], %s6598_s12 }
  0x1f   : > { %s8279_s15 = scalar_lea.vmem %s12793_s0, %s5787_s30 }
  0x20   : > { %v558_v0 = vld [vmem:[%s8279_s15] sm:$0xff]  ;;  %v560_v1 = vld [vmem:[%s8279_s15 + $0x10] sm:$0xff] }
  0x21   : > { %v562_v2 = vld [vmem:[%s8279_s15 + $0x20] sm:$0xff]  ;;  %559 = vst [vmem:[%s8284_s16] sm:$0xff] %v558_v0  ;;  %v564_v3 = vld [vmem:[%s8279_s15 + $0x30] sm:$0xff] }
  0x22   : > { %561 = vst [vmem:[%s8284_s16 + $0x8] sm:$0xff] %v560_v1  ;;  %v566_v4 = vld [vmem:[%s8279_s15 + $0x40] sm:$0xff]  ;;  %v568_v5 = vld [vmem:[%s8279_s15 + $0x50] sm:$0xff] }
  0x23   : > { %563 = vst [vmem:[%s8284_s16 + $0x10] sm:$0xff] %v562_v2  ;;  %v570_v6 = vld [vmem:[%s8279_s15 + $0x60] sm:$0xff]  ;;  %v572_v7 = vld [vmem:[%s8279_s15 + $0x70] sm:$0xff] }
  0x24   : > { %565 = vst [vmem:[%s8284_s16 + $0x18] sm:$0xff] %v564_v3  ;;  %v574_v8 = vld [vmem:[%s8279_s15 + $0x80] sm:$0xff]  ;;  %v576_v9 = vld [vmem:[%s8279_s15 + $0x90] sm:$0xff] }
  0x25   : > { %567 = vst [vmem:[%s8284_s16 + $0x20] sm:$0xff] %v566_v4  ;;  %v578_v10 = vld [vmem:[%s8279_s15 + $0xa0] sm:$0xff]  ;;  %v580_v11 = vld [vmem:[%s8279_s15 + $0xb0] sm:$0xff] }
  0x26   : > { %569 = vst [vmem:[%s8284_s16 + $0x28] sm:$0xff] %v568_v5  ;;  %v582_v12 = vld [vmem:[%s8279_s15 + $0xc0] sm:$0xff]  ;;  %v584_v13 = vld [vmem:[%s8279_s15 + $0xd0] sm:$0xff] }
  0x27   : > { %571 = vst [vmem:[%s8284_s16 + $0x30] sm:$0xff] %v570_v6  ;;  %v586_v14 = vld [vmem:[%s8279_s15 + $0xe0] sm:$0xff]  ;;  %v588_v15 = vld [vmem:[%s8279_s15 + $0xf0] sm:$0xff] }
  0x28   : > { %573 = vst [vmem:[%s8284_s16 + $0x38] sm:$0xff] %v572_v7  ;;  %v590_v16 = vld [vmem:[%s8279_s15 + $0x100] sm:$0xff]  ;;  %v592_v17 = vld [vmem:[%s8279_s15 + $0x110] sm:$0xff] }
  0x29   : > { %575 = vst [vmem:[%s8284_s16 + $0x40] sm:$0xff] %v574_v8  ;;  %v594_v18 = vld [vmem:[%s8279_s15 + $0x120] sm:$0xff]  ;;  %v596_v19 = vld [vmem:[%s8279_s15 + $0x130] sm:$0xff] }
  0x2a   : > { %577 = vst [vmem:[%s8284_s16 + $0x48] sm:$0xff] %v576_v9  ;;  %v598_v20 = vld [vmem:[%s8279_s15 + $0x140] sm:$0xff]  ;;  %v600_v21 = vld [vmem:[%s8279_s15 + $0x150] sm:$0xff] }
  0x2b   : > { %579 = vst [vmem:[%s8284_s16 + $0x50] sm:$0xff] %v578_v10  ;;  %v602_v22 = vld [vmem:[%s8279_s15 + $0x160] sm:$0xff]  ;;  %v604_v23 = vld [vmem:[%s8279_s15 + $0x170] sm:$0xff] }
  0x2c   : > { %581 = vst [vmem:[%s8284_s16 + $0x58] sm:$0xff] %v580_v11  ;;  %v606_v24 = vld [vmem:[%s8279_s15 + $0x180] sm:$0xff]  ;;  %v608_v25 = vld [vmem:[%s8279_s15 + $0x190] sm:$0xff] }
  0x2d   : > { %583 = vst [vmem:[%s8284_s16 + $0x60] sm:$0xff] %v582_v12  ;;  %v610_v26 = vld [vmem:[%s8279_s15 + $0x1a0] sm:$0xff]  ;;  %v612_v27 = vld [vmem:[%s8279_s15 + $0x1b0] sm:$0xff] }
  0x2e   : > { %585 = vst [vmem:[%s8284_s16 + $0x68] sm:$0xff] %v584_v13  ;;  %v614_v28 = vld [vmem:[%s8279_s15 + $0x1c0] sm:$0xff]  ;;  %v616_v29 = vld [vmem:[%s8279_s15 + $0x1d0] sm:$0xff] }
  0x2f   : > { %587 = vst [vmem:[%s8284_s16 + $0x70] sm:$0xff] %v586_v14  ;;  %v618_v30 = vld [vmem:[%s8279_s15 + $0x1e0] sm:$0xff]  ;;  %v620_v31 = vld [vmem:[%s8279_s15 + $0x1f0] sm:$0xff] }
  0x30   : > { %589 = vst [vmem:[%s8284_s16 + $0x78] sm:$0xff] %v588_v15  ;;  %v622_v32 = vld [vmem:[%s8279_s15 + $0x200] sm:$0xff]  ;;  %v624_v33 = vld [vmem:[%s8279_s15 + $0x210] sm:$0xff] }
  0x31   : > { %591 = vst [vmem:[%s8284_s16 + $0x80] sm:$0xff] %v590_v16  ;;  %v626_v34 = vld [vmem:[%s8279_s15 + $0x220] sm:$0xff]  ;;  %v628_v35 = vld [vmem:[%s8279_s15 + $0x230] sm:$0xff] }
  0x32   : > { %593 = vst [vmem:[%s8284_s16 + $0x88] sm:$0xff] %v592_v17  ;;  %v630_v36 = vld [vmem:[%s8279_s15 + $0x240] sm:$0xff]  ;;  %v632_v37 = vld [vmem:[%s8279_s15 + $0x250] sm:$0xff] }
  0x33   : > { %595 = vst [vmem:[%s8284_s16 + $0x90] sm:$0xff] %v594_v18  ;;  %v634_v38 = vld [vmem:[%s8279_s15 + $0x260] sm:$0xff]  ;;  %v636_v39 = vld [vmem:[%s8279_s15 + $0x270] sm:$0xff] }
  0x34   : > { %597 = vst [vmem:[%s8284_s16 + $0x98] sm:$0xff] %v596_v19  ;;  %v638_v40 = vld [vmem:[%s8279_s15 + $0x280] sm:$0xff]  ;;  %v640_v41 = vld [vmem:[%s8279_s15 + $0x290] sm:$0xff] }
  0x35   : > { %599 = vst [vmem:[%s8284_s16 + $0xa0] sm:$0xff] %v598_v20  ;;  %v642_v42 = vld [vmem:[%s8279_s15 + $0x2a0] sm:$0xff]  ;;  %v644_v43 = vld [vmem:[%s8279_s15 + $0x2b0] sm:$0xff] }
  0x36   : > { %601 = vst [vmem:[%s8284_s16 + $0xa8] sm:$0xff] %v600_v21  ;;  %v646_v44 = vld [vmem:[%s8279_s15 + $0x2c0] sm:$0xff]  ;;  %v648_v45 = vld [vmem:[%s8279_s15 + $0x2d0] sm:$0xff] }
  0x37   : > { %603 = vst [vmem:[%s8284_s16 + $0xb0] sm:$0xff] %v602_v22  ;;  %v650_v46 = vld [vmem:[%s8279_s15 + $0x2e0] sm:$0xff]  ;;  %v652_v47 = vld [vmem:[%s8279_s15 + $0x2f0] sm:$0xff] }
  0x38   : > { %605 = vst [vmem:[%s8284_s16 + $0xb8] sm:$0xff] %v604_v23  ;;  %v654_v48 = vld [vmem:[%s8279_s15 + $0x300] sm:$0xff]  ;;  %v656_v49 = vld [vmem:[%s8279_s15 + $0x310] sm:$0xff] }
  0x39   : > { %607 = vst [vmem:[%s8284_s16 + $0xc0] sm:$0xff] %v606_v24  ;;  %v658_v50 = vld [vmem:[%s8279_s15 + $0x320] sm:$0xff]  ;;  %v660_v51 = vld [vmem:[%s8279_s15 + $0x330] sm:$0xff] }
  0x3a   : > { %609 = vst [vmem:[%s8284_s16 + $0xc8] sm:$0xff] %v608_v25  ;;  %v662_v52 = vld [vmem:[%s8279_s15 + $0x340] sm:$0xff]  ;;  %v664_v53 = vld [vmem:[%s8279_s15 + $0x350] sm:$0xff] }
  0x3b   : > { %611 = vst [vmem:[%s8284_s16 + $0xd0] sm:$0xff] %v610_v26  ;;  %v666_v54 = vld [vmem:[%s8279_s15 + $0x360] sm:$0xff]  ;;  %v668_v55 = vld [vmem:[%s8279_s15 + $0x370] sm:$0xff] }
  0x3c   : > { %613 = vst [vmem:[%s8284_s16 + $0xd8] sm:$0xff] %v612_v27  ;;  %v670_v56 = vld [vmem:[%s8279_s15 + $0x380] sm:$0xff]  ;;  %v672_v57 = vld [vmem:[%s8279_s15 + $0x390] sm:$0xff] }
  0x3d   : > { %615 = vst [vmem:[%s8284_s16 + $0xe0] sm:$0xff] %v614_v28  ;;  %v674_v58 = vld [vmem:[%s8279_s15 + $0x3a0] sm:$0xff]  ;;  %v676_v59 = vld [vmem:[%s8279_s15 + $0x3b0] sm:$0xff] }
  0x3e   : > { %617 = vst [vmem:[%s8284_s16 + $0xe8] sm:$0xff] %v616_v29  ;;  %v678_v60 = vld [vmem:[%s8279_s15 + $0x3c0] sm:$0xff]  ;;  %v680_v61 = vld [vmem:[%s8279_s15 + $0x3d0] sm:$0xff] }
  0x3f   : > { %619 = vst [vmem:[%s8284_s16 + $0xf0] sm:$0xff] %v618_v30  ;;  %v682_v62 = vld [vmem:[%s8279_s15 + $0x3e0] sm:$0xff]  ;;  %v684_v63 = vld [vmem:[%s8279_s15 + $0x3f0] sm:$0xff] }
  0x40   : > { %621 = vst [vmem:[%s8284_s16 + $0xf8] sm:$0xff] %v620_v31  ;;  %v686_v0 = vld [vmem:[%s8279_s15 + $0x400] sm:$0xff]  ;;  %v688_v1 = vld [vmem:[%s8279_s15 + $0x410] sm:$0xff] }
  0x41   : > { %623 = vst [vmem:[%s8284_s16 + $0x100] sm:$0xff] %v622_v32  ;;  %v690_v2 = vld [vmem:[%s8279_s15 + $0x420] sm:$0xff]  ;;  %v692_v3 = vld [vmem:[%s8279_s15 + $0x430] sm:$0xff] }
  0x42   : > { %625 = vst [vmem:[%s8284_s16 + $0x108] sm:$0xff] %v624_v33  ;;  %v694_v4 = vld [vmem:[%s8279_s15 + $0x440] sm:$0xff]  ;;  %v696_v5 = vld [vmem:[%s8279_s15 + $0x450] sm:$0xff] }
  0x43   : > { %627 = vst [vmem:[%s8284_s16 + $0x110] sm:$0xff] %v626_v34  ;;  %v698_v6 = vld [vmem:[%s8279_s15 + $0x460] sm:$0xff]  ;;  %v700_v7 = vld [vmem:[%s8279_s15 + $0x470] sm:$0xff] }
  0x44   : > { %629 = vst [vmem:[%s8284_s16 + $0x118] sm:$0xff] %v628_v35  ;;  %v702_v8 = vld [vmem:[%s8279_s15 + $0x480] sm:$0xff]  ;;  %v704_v9 = vld [vmem:[%s8279_s15 + $0x490] sm:$0xff] }
  0x45   : > { %631 = vst [vmem:[%s8284_s16 + $0x120] sm:$0xff] %v630_v36  ;;  %v706_v10 = vld [vmem:[%s8279_s15 + $0x4a0] sm:$0xff]  ;;  %v708_v11 = vld [vmem:[%s8279_s15 + $0x4b0] sm:$0xff] }
  0x46   : > { %633 = vst [vmem:[%s8284_s16 + $0x128] sm:$0xff] %v632_v37  ;;  %v710_v12 = vld [vmem:[%s8279_s15 + $0x4c0] sm:$0xff]  ;;  %v712_v13 = vld [vmem:[%s8279_s15 + $0x4d0] sm:$0xff] }
  0x47   : > { %635 = vst [vmem:[%s8284_s16 + $0x130] sm:$0xff] %v634_v38  ;;  %v714_v14 = vld [vmem:[%s8279_s15 + $0x4e0] sm:$0xff]  ;;  %v716_v15 = vld [vmem:[%s8279_s15 + $0x4f0] sm:$0xff] }
  0x48   : > { %637 = vst [vmem:[%s8284_s16 + $0x138] sm:$0xff] %v636_v39  ;;  %v718_v16 = vld [vmem:[%s8279_s15 + $0x500] sm:$0xff]  ;;  %v720_v17 = vld [vmem:[%s8279_s15 + $0x510] sm:$0xff] }
  0x49   : > { %639 = vst [vmem:[%s8284_s16 + $0x140] sm:$0xff] %v638_v40  ;;  %v722_v18 = vld [vmem:[%s8279_s15 + $0x520] sm:$0xff]  ;;  %v724_v19 = vld [vmem:[%s8279_s15 + $0x530] sm:$0xff] }
  0x4a   : > { %641 = vst [vmem:[%s8284_s16 + $0x148] sm:$0xff] %v640_v41  ;;  %v726_v20 = vld [vmem:[%s8279_s15 + $0x540] sm:$0xff]  ;;  %v728_v21 = vld [vmem:[%s8279_s15 + $0x550] sm:$0xff] }
  0x4b   : > { %643 = vst [vmem:[%s8284_s16 + $0x150] sm:$0xff] %v642_v42  ;;  %v730_v22 = vld [vmem:[%s8279_s15 + $0x560] sm:$0xff]  ;;  %v732_v23 = vld [vmem:[%s8279_s15 + $0x570] sm:$0xff] }
  0x4c   : > { %645 = vst [vmem:[%s8284_s16 + $0x158] sm:$0xff] %v644_v43  ;;  %v734_v24 = vld [vmem:[%s8279_s15 + $0x580] sm:$0xff]  ;;  %v736_v25 = vld [vmem:[%s8279_s15 + $0x590] sm:$0xff] }
  0x4d   : > { %647 = vst [vmem:[%s8284_s16 + $0x160] sm:$0xff] %v646_v44  ;;  %v738_v26 = vld [vmem:[%s8279_s15 + $0x5a0] sm:$0xff]  ;;  %v740_v27 = vld [vmem:[%s8279_s15 + $0x5b0] sm:$0xff] }
  0x4e   : > { %649 = vst [vmem:[%s8284_s16 + $0x168] sm:$0xff] %v648_v45  ;;  %v742_v28 = vld [vmem:[%s8279_s15 + $0x5c0] sm:$0xff]  ;;  %v744_v29 = vld [vmem:[%s8279_s15 + $0x5d0] sm:$0xff] }
  0x4f   : > { %651 = vst [vmem:[%s8284_s16 + $0x170] sm:$0xff] %v650_v46  ;;  %v746_v30 = vld [vmem:[%s8279_s15 + $0x5e0] sm:$0xff]  ;;  %v748_v31 = vld [vmem:[%s8279_s15 + $0x5f0] sm:$0xff] }
  0x50   : > { %653 = vst [vmem:[%s8284_s16 + $0x178] sm:$0xff] %v652_v47 }
  0x51   : > { %655 = vst [vmem:[%s8284_s16 + $0x180] sm:$0xff] %v654_v48 }
  0x52   : > { %657 = vst [vmem:[%s8284_s16 + $0x188] sm:$0xff] %v656_v49 }
  0x53   : > { %659 = vst [vmem:[%s8284_s16 + $0x190] sm:$0xff] %v658_v50 }
  0x54   : > { %661 = vst [vmem:[%s8284_s16 + $0x198] sm:$0xff] %v660_v51 }
  0x55   : > { %663 = vst [vmem:[%s8284_s16 + $0x1a0] sm:$0xff] %v662_v52 }
  0x56   : > { %665 = vst [vmem:[%s8284_s16 + $0x1a8] sm:$0xff] %v664_v53 }
  0x57   : > { %667 = vst [vmem:[%s8284_s16 + $0x1b0] sm:$0xff] %v666_v54 }
  0x58   : > { %669 = vst [vmem:[%s8284_s16 + $0x1b8] sm:$0xff] %v668_v55 }
  0x59   : > { %671 = vst [vmem:[%s8284_s16 + $0x1c0] sm:$0xff] %v670_v56 }
  0x5a   : > { %673 = vst [vmem:[%s8284_s16 + $0x1c8] sm:$0xff] %v672_v57 }
  0x5b   : > { %675 = vst [vmem:[%s8284_s16 + $0x1d0] sm:$0xff] %v674_v58 }
  0x5c   : > { %677 = vst [vmem:[%s8284_s16 + $0x1d8] sm:$0xff] %v676_v59 }
  0x5d   : > { %679 = vst [vmem:[%s8284_s16 + $0x1e0] sm:$0xff] %v678_v60 }
  0x5e   : > { %681 = vst [vmem:[%s8284_s16 + $0x1e8] sm:$0xff] %v680_v61 }
  0x5f   : > { %683 = vst [vmem:[%s8284_s16 + $0x1f0] sm:$0xff] %v682_v62 }
  0x60   : > { %685 = vst [vmem:[%s8284_s16 + $0x1f8] sm:$0xff] %v684_v63 }
  0x61   : > { %687 = vst [vmem:[%s8284_s16 + $0x200] sm:$0xff] %v686_v0 }
  0x62   : > { %689 = vst [vmem:[%s8284_s16 + $0x208] sm:$0xff] %v688_v1 }
  0x63   : > { %691 = vst [vmem:[%s8284_s16 + $0x210] sm:$0xff] %v690_v2 }
  0x64   : > { %693 = vst [vmem:[%s8284_s16 + $0x218] sm:$0xff] %v692_v3 }
  0x65   : > { %695 = vst [vmem:[%s8284_s16 + $0x220] sm:$0xff] %v694_v4 }
  0x66   : > { %697 = vst [vmem:[%s8284_s16 + $0x228] sm:$0xff] %v696_v5 }
  0x67   : > { %699 = vst [vmem:[%s8284_s16 + $0x230] sm:$0xff] %v698_v6 }
  0x68   : > { %701 = vst [vmem:[%s8284_s16 + $0x238] sm:$0xff] %v700_v7 }
  0x69   : > { %703 = vst [vmem:[%s8284_s16 + $0x240] sm:$0xff] %v702_v8 }
  0x6a   : > { %705 = vst [vmem:[%s8284_s16 + $0x248] sm:$0xff] %v704_v9 }
  0x6b   : > { %707 = vst [vmem:[%s8284_s16 + $0x250] sm:$0xff] %v706_v10 }
  0x6c   : > { %709 = vst [vmem:[%s8284_s16 + $0x258] sm:$0xff] %v708_v11 }
  0x6d   : > { %711 = vst [vmem:[%s8284_s16 + $0x260] sm:$0xff] %v710_v12 }
  0x6e   : > { %713 = vst [vmem:[%s8284_s16 + $0x268] sm:$0xff] %v712_v13 }
  0x6f   : > { %715 = vst [vmem:[%s8284_s16 + $0x270] sm:$0xff] %v714_v14 }
  0x70   : > { %717 = vst [vmem:[%s8284_s16 + $0x278] sm:$0xff] %v716_v15 }
  0x71   : > { %719 = vst [vmem:[%s8284_s16 + $0x280] sm:$0xff] %v718_v16 }
  0x72   : > { %721 = vst [vmem:[%s8284_s16 + $0x288] sm:$0xff] %v720_v17 }
  0x73   : > { %723 = vst [vmem:[%s8284_s16 + $0x290] sm:$0xff] %v722_v18 }
  0x74   : > { %725 = vst [vmem:[%s8284_s16 + $0x298] sm:$0xff] %v724_v19 }
  0x75   : > { %727 = vst [vmem:[%s8284_s16 + $0x2a0] sm:$0xff] %v726_v20 }
  0x76   : > { %729 = vst [vmem:[%s8284_s16 + $0x2a8] sm:$0xff] %v728_v21 }
  0x77   : > { %731 = vst [vmem:[%s8284_s16 + $0x2b0] sm:$0xff] %v730_v22 }
  0x78   : > { %733 = vst [vmem:[%s8284_s16 + $0x2b8] sm:$0xff] %v732_v23 }
  0x79   : > { %735 = vst [vmem:[%s8284_s16 + $0x2c0] sm:$0xff] %v734_v24 }
  0x7a   : > { %737 = vst [vmem:[%s8284_s16 + $0x2c8] sm:$0xff] %v736_v25 }
  0x7b   : > { %739 = vst [vmem:[%s8284_s16 + $0x2d0] sm:$0xff] %v738_v26 }
  0x7c   : > { %741 = vst [vmem:[%s8284_s16 + $0x2d8] sm:$0xff] %v740_v27 }
  0x7d   : > { %743 = vst [vmem:[%s8284_s16 + $0x2e0] sm:$0xff] %v742_v28 }
  0x7e   : > { %745 = vst [vmem:[%s8284_s16 + $0x2e8] sm:$0xff] %v744_v29 }
  0x7f   : > { %747 = vst [vmem:[%s8284_s16 + $0x2f0] sm:$0xff] %v746_v30 }
  0x80   : > { %749 = vst [vmem:[%s8284_s16 + $0x2f8] sm:$0xff] %v748_v31 }
  0x81 PF: > { %p5788_p10 = scmp.ge.s32.totalorder %s8143_s20, 1  ;;  %p754_p11 = scmp.lt.s32.totalorder %s8143_s20, 3 }
  0x83   : > { %p755_p12 = pnand %p5788_p10, %p754_p11 }
  0x85   : > { %758 = sbr.rel (%p755_p12) target bundleno = 2805 (0xaf5), region = 98 }
  0x8a   : > { %s8478_s22 = sand.u32 1, %s8135_s18   ;;  %s12637_s29 = smov 32   ;;  %vm12780_vm0 = vcmask 261120   ;;  %vm12763_vm1 = vcmask 523264   ;;  %vm1829_vm2 = vcmask 785408   ;;  %vm3235_vm3 = vcmask 326656  }
  0x8b   : > { %s6599_s24 = smul.u32 768, %s8478_s22  ;;  %s12635_s30 = smov 64   ;;  %vm4062_vm4 = vcmask 48128   ;;  %vm4077_vm5 = vcmask 97280   ;;  %vm4092_vm6 = vcmask 146432   ;;  %vm4107_vm7 = vcmask 195584  }
  0x8c   : > { %s12633_s12 = smov 96   ;;  %s12802_s1 = sld [smem:[#allocation49_spill]]  ;;  %vm4122_vm8 = vcmask 244736   ;;  %vm4137_vm9 = vcmask 293888   ;;  %vm4152_vm10 = vcmask 343040   ;;  %vm4167_vm11 = vcmask 392192  }
  0x8d   : > { %s8481_s25 = scalar_lea.vmem [#allocation2], %s6599_s24  ;;  %s12803_s15 = smov 64   ;;  %vm4182_vm12 = vcmask 441344   ;;  %vm3403_vm13 = vcmask 998400   ;;  %vm4197_vm14 = vcmask 490496   ;;  %vm4212_vm15 = vcmask 539648  }
  0x8e   : > { %v8484_v32 = vld [vmem:[%s8481_s25 + $0x48] sm:$0xff]  ;;  %v8487_v33 = vld [vmem:[%s8481_s25 + $0x50] sm:$0xff]  ;;  %v812_v41 = vld [vmem:[%s8481_s25 + $0x58] sm:$0xff]  ;;  %s12809_s13 = smov 32   ;;  %s12864_s2 = sld [smem:[#allocation50_spill]] }
  0x8f   : > { %v8490_v34 = vld [vmem:[%s8481_s25 + $0x28] sm:$0xff]  ;;  %v8494_v35 = vpack.i.bf16 %v8487_v33, %v8484_v32  ;;  %v8497_v36 = vld [vmem:[%s8481_s25 + $0x30] sm:$0xff]  ;;  %v813_v42 = vld [vmem:[%s8481_s25 + $0x60] sm:$0xff]  ;;  %v6749_v18 = vpack.i.bf16 %v812_v41, %v8487_v33  ;;  %s8148_s16 = smov 122   ;;  %s8150_s24 = smov 116  }
  0x90   : > { %v8500_v37 = vld [vmem:[%s8481_s25 + $0x8] sm:$0xff]  ;;  %v8503_v38 = vld [vmem:[%s8481_s25 + $0x10] sm:$0xff]  ;;  %v8507_v39 = vpack.i.bf16 %v8497_v36, %v8490_v34  ;;  %v8519_v43 = vld [vmem:[%s8481_s25 + $0x38] sm:$0xff]  ;;  %v8528_v47 = vpack.i.bf16 %v813_v42, %v812_v41  ;;  %s8151_s14 = smov 98   ;;  %s12778_s18 = smov 86  }
  0x91   : > { %v6659_v40 = vpack.i.bf16 %v8503_v38, %v8500_v37  ;;  %6680 = vrot.lane.b32.xlu2 %v8494_v35, %s12637_s29  ;;  %v809_v44 = vld [vmem:[%s8481_s25 + $0x40] sm:$0xff]  ;;  %v8523_v45 = vld [vmem:[%s8481_s25 + $0x18] sm:$0xff]  ;;  %v8540_v50 = vld [vmem:[%s8481_s25 + $0x88] sm:$0xff]  ;;  %v6739_v12 = vpack.i.bf16 %v8519_v43, %v8497_v36  ;;  %s8153_s0 = smov 110   ;;  %s12761_s21 = smov 80  }
  0x92   : > { %6670 = vrot.lane.b32.xlu1 %v8507_v39, %s12637_s29  ;;  %v8526_v46 = vld [vmem:[%s8481_s25 + $0x20] sm:$0xff]  ;;  %v8531_v48 = vpack.i.bf16 %v809_v44, %v8519_v43  ;;  %v8547_v51 = vld [vmem:[%s8481_s25 + $0x90] sm:$0xff]  ;;  %v8550_v52 = vld [vmem:[%s8481_s25 + $0x78] sm:$0xff]  ;;  %v6729_v8 = vpack.i.bf16 %v8523_v45, %v8503_v38  ;;  %v6744_v11 = vpack.i.bf16 %v8484_v32, %v809_v44  ;;  %s12772_s19 = smov 92   ;;  %s12771_s26 = smov 74  }
  0x93   : > { %6660 = vrot.lane.b32.xlu0 %v6659_v40, %s12637_s29  ;;  %v8535_v49 = vpack.i.bf16 %v8526_v46, %v8523_v45  ;;  %v8553_v53 = vld [vmem:[%s8481_s25 + $0x80] sm:$0xff]  ;;  %v814_v54 = vld [vmem:[%s8481_s25 + $0x68] sm:$0xff]  ;;  %v8557_v55 = vld [vmem:[%s8481_s25 + $0x70] sm:$0xff]  ;;  %v8561_v56 = vpack.i.bf16 %v8547_v51, %v8540_v50  ;;  %v6734_v13 = vpack.i.bf16 %v8490_v34, %v8526_v46 }
  0x94   : > { %v8565_v57 = vpack.i.bf16 %v8553_v53, %v8550_v52  ;;  %v8568_v58 = vpack.i.bf16 %v8557_v55, %v814_v54  ;;  %v824_v59 = vld [vmem:[%s8481_s25 + $0xb8] sm:$0xff]  ;;  %v825_v60 = vld [vmem:[%s8481_s25 + $0xc0] sm:$0xff]  ;;  %v822_v61 = vld [vmem:[%s8481_s25 + $0xa8] sm:$0xff]  ;;  %v6754_v17 = vpack.i.bf16 %v814_v54, %v813_v42 }
  0x95   : > { %v823_v62 = vld [vmem:[%s8481_s25 + $0xb0] sm:$0xff]  ;;  %v8581_v63 = vld [vmem:[%s8481_s25 + $0x98] sm:$0xff]  ;;  %v821_v0 = vld [vmem:[%s8481_s25 + $0xa0] sm:$0xff]  ;;  %v6714_v1 = vpack.i.bf16 %v825_v60, %v824_v59 }
  0x96   : > { %v6709_v2 = vpack.i.bf16 %v823_v62, %v822_v61  ;;  %v6704_v3 = vpack.i.bf16 %v821_v0, %v8581_v63  ;;  %v828_v4 = vld [vmem:[%s8481_s25 + $0xd8] sm:$0xff]  ;;  %v829_v5 = vld [vmem:[%s8481_s25 + $0xe0] sm:$0xff]  ;;  %v826_v6 = vld [vmem:[%s8481_s25 + $0xc8] sm:$0xff] }
  0x97   : > { %v827_v7 = vld [vmem:[%s8481_s25 + $0xd0] sm:$0xff]  ;;  %v6724_v9 = vpack.i.bf16 %v829_v5, %v828_v4  ;;  %v8606_v14 = vld [vmem:[%s8481_s25 + $0x218] sm:$0xff]  ;;  %v8609_v15 = vld [vmem:[%s8481_s25 + $0x220] sm:$0xff] }
  0x98   : > { %v6719_v10 = vpack.i.bf16 %v827_v7, %v826_v6  ;;  %v6759_v16 = vpack.i.bf16 %v8609_v15, %v8606_v14  ;;  %v865_v19 = vld [vmem:[%s8481_s25 + $0x200] sm:$0xff]  ;;  %v866_v20 = vld [vmem:[%s8481_s25 + $0x208] sm:$0xff]  ;;  %v8638_v29 = vld [vmem:[%s8481_s25 + $0x210] sm:$0xff] }
  0x99   : > { %6685 = vrot.lane.b32.xlu2 %v8528_v47, %s12637_s29  ;;  %v8620_v21 = vld [vmem:[%s8481_s25 + $0x120] sm:$0xff]  ;;  %v8623_v22 = vld [vmem:[%s8481_s25 + $0x128] sm:$0xff]  ;;  %v6774_v24 = vpack.i.bf16 %v866_v20, %v865_v19  ;;  %v6779_v31 = vpack.i.bf16 %v8638_v29, %v866_v20  ;;  %v8646_v32 = vld [vmem:[%s8481_s25 + $0x230] sm:$0xff]  ;;  %v6819_v60 = vpack.i.bf16 %v8606_v14, %v8638_v29 }
  0x9a   : > { %6675 = vrot.lane.b32.xlu1 %v8531_v48, %s12637_s29  ;;  %v8626_v23 = vld [vmem:[%s8481_s25 + $0x228] sm:$0xff]  ;;  %v6769_v25 = vpack.i.bf16 %v8623_v22, %v8620_v21  ;;  %v833_v27 = vld [vmem:[%s8481_s25 + $0x100] sm:$0xff]  ;;  %v835_v33 = vld [vmem:[%s8481_s25 + $0x110] sm:$0xff] }
  0x9b   : > { %6665 = vrot.lane.b32.xlu0 %v8535_v49, %s12637_s29  ;;  %v6764_v26 = vpack.i.bf16 %v8626_v23, %v8609_v15  ;;  %v834_v28 = vld [vmem:[%s8481_s25 + $0x108] sm:$0xff]  ;;  %v8650_v40 = vld [vmem:[%s8481_s25 + $0x118] sm:$0xff]  ;;  %v6804_v41 = vpack.i.bf16 %v8646_v32, %v8626_v23  ;;  %v8681_v0 = vld [vmem:[%s8481_s25 + $0x240] sm:$0xff] }
  0x9c   : > { %v6789_v30 = vpack.i.bf16 %v834_v28, %v833_v27  ;;  %v6799_v42 = vpack.i.bf16 %v8650_v40, %v835_v33  ;;  %v6794_v44 = vpack.i.bf16 %v835_v33, %v834_v28  ;;  %v8662_v54 = vld [vmem:[%s8481_s25 + $0x138] sm:$0xff]  ;;  %12794 = vst [vmem:[#allocation9_spill] sm:$0xff] %v8681_v0  ;;  %v8698_v4 = vld [vmem:[%s8481_s25 + $0x140] sm:$0xff]  ;;  %v8701_v5 = vld [vmem:[%s8481_s25 + $0x148] sm:$0xff] }
  0x9d   : > { %v8665_v59 = vld [vmem:[%s8481_s25 + $0x238] sm:$0xff]  ;;  %12797 = vst [vmem:[#allocation12_spill] sm:$0xff] %v8701_v5  ;;  %v8704_v6 = vld [vmem:[%s8481_s25 + $0x248] sm:$0xff]  ;;  %v8708_v7 = vpack.i.bf16 %v8701_v5, %v8698_v4  ;;  %v5976_v27 = vld [vmem:[%s12802_s1 + $0x170] sm:$0xf] }
  0x9e   : > { %v6809_v62 = vpack.i.bf16 %v8665_v59, %v8646_v32  ;;  %12798 = vst [vmem:[#allocation13_spill] sm:$0xff] %v8704_v6  ;;  %v6504_v33 = vld [vmem:[%s12802_s1 + $0x1d4] sm:$0xf0] }
  0xa1   : > { %6700 = vrot.lane.b32.xlu2 %v8561_v56, %s12637_s29 }
  0xa2   : > { %6695 = vrot.lane.b32.xlu1 %v8565_v57, %s12637_s29 }
  0xa3   : > { %6690 = vrot.lane.b32.xlu0 %v8568_v58, %s12637_s29 }
  0xa9   : > { %6715 = vrot.lane.b32.xlu2 %v6714_v1, %s12637_s29 }
  0xaa   : > { %6710 = vrot.lane.b32.xlu1 %v6709_v2, %s12637_s29  ;;  %v8687_v2 = vpack.i.bf16 %v8681_v0, %v8665_v59 }
  0xab   : > { %6705 = vrot.lane.b32.xlu0 %v6704_v3, %s12637_s29  ;;  %v6839_v3 = vpack.i.bf16 %v8620_v21, %v8650_v40 }
  0xb1   : > { %6730 = vrot.lane.b32.xlu2 %v6729_v8, %s12635_s30  ;;  %v6854_v8 = vpack.i.bf16 %v8704_v6, %v8681_v0 }
  0xb2   : > { %6725 = vrot.lane.b32.xlu1 %v6724_v9, %s12637_s29 }
  0xb3   : > { %6720 = vrot.lane.b32.xlu0 %v6719_v10, %s12637_s29 }
  0xb9   : > { %6745 = vrot.lane.b32.xlu2 %v6744_v11, %s12635_s30  ;;  %v8725_v11 = vld [vmem:[%s8481_s25 + $0x150] sm:$0xff] }
  0xba   : > { %6740 = vrot.lane.b32.xlu1 %v6739_v12, %s12635_s30  ;;  %12800 = vst [vmem:[#allocation15_spill] sm:$0xff] %v8725_v11  ;;  %v8728_v12 = vld [vmem:[%s8481_s25 + $0x158] sm:$0xff] }
  0xbb   : > { %6735 = vrot.lane.b32.xlu0 %v6734_v13, %s12635_s30  ;;  %v8740_v20 = vpack.i.bf16 %v8728_v12, %v8725_v11 }
  0xc1   : > { %6760 = vrot.lane.b32.xlu2 %v6759_v16, %s12637_s29 }
  0xc2   : > { %6755 = vrot.lane.b32.xlu1 %v6754_v17, %s12635_s30  ;;  %v876_v17 = vld [vmem:[%s8481_s25 + $0x258] sm:$0xff] }
  0xc3   : > { %6750 = vrot.lane.b32.xlu0 %v6749_v18, %s12635_s30 }
  0xc9   : > { %6775 = vrot.lane.b32.xlu2 %v6774_v24, %s12635_s30 }
  0xca   : > { %6770 = vrot.lane.b32.xlu1 %v6769_v25, %s12637_s29 }
  0xcb   : > { %6765 = vrot.lane.b32.xlu0 %v6764_v26, %s12635_s30  ;;  %v6460_v26 = vld [vmem:[%s12802_s1 + $0x74] sm:$0xf0] }
  0xd1   : > { %6790 = vrot.lane.b32.xlu2 %v6789_v30, %s12637_s29  ;;  %v6492_v30 = vld [vmem:[%s12802_s1 + $0x174] sm:$0xf0] }
  0xd2   : > { %6785 = vrot.lane.b32.xlu1 %v8535_v49, %s12633_s12  ;;  %v8659_v49 = vld [vmem:[%s8481_s25 + $0x130] sm:$0xff] }
  0xd3   : > { %6780 = vrot.lane.b32.xlu0 %v6779_v31, %s12633_s12  ;;  %v6814_v61 = vpack.i.bf16 %v8662_v54, %v8659_v49  ;;  %v6874_v10 = vpack.i.bf16 %v8659_v49, %v8623_v22  ;;  %v6024_v31 = vld [vmem:[%s12802_s1 + $0x1d0] sm:$0xf] }
  0xd9   : > { %6805 = vrot.lane.b32.xlu2 %v6804_v41, %s12637_s29 }
  0xda   : > { %6800 = vrot.lane.b32.xlu1 %v6799_v42, %s12633_s12 }
  0xdb   : > { %6795 = vrot.lane.b32.xlu0 %v6794_v44, %s12635_s30 }
  0xe1   : > { %6820 = vrot.lane.b32.xlu2 %v6819_v60, %s12635_s30 }
  0xe2   : > { %6815 = vrot.lane.b32.xlu1 %v6814_v61, %s12637_s29 }
  0xe3   : > { %6810 = vrot.lane.b32.xlu0 %v6809_v62, %s12635_s30  ;;  %v5840_v62 = vld [vmem:[%s12802_s1 + $0x60] sm:$0xf] }
  0xe9   : > { %6835 = vrot.lane.b32.xlu2 %v6799_v42, %s12637_s29  ;;  %v6025_v42 = vor.u32 %v6504_v33, %v6024_v31  ;;  %v8796_v31 = vld [vmem:[%s8481_s25 + $0x268] sm:$0xff]  ;;  %v5832_v33 = vld [vmem:[%s12802_s1 + $0x50] sm:$0xf] }
  0xea   : > { %6830 = vrot.lane.b32.xlu1 %v8507_v39, %s12633_s12 }
  0xeb   : > { %6825 = vrot.lane.b32.xlu0 %v6759_v16, %s12633_s12  ;;  %v8683_v1 = vpop.permute.xlu2 %6680  ;;  %v875_v16 = vld [vmem:[%s8481_s25 + $0x250] sm:$0xff]  ;;  %2785 = vmatpush.bf16.msra.mxu3 %v6025_v42 }
  0xec   : > { %12795 = vst [vmem:[#allocation10_spill] sm:$0xff] %v8683_v1  ;;  %v6889_v24 = vpack.i.bf16 %v876_v17, %v875_v16  ;;  %v5960_v42 = vld [vmem:[%s12802_s1 + $0x150] sm:$0xf] }
  0xf1   : > { %6850 = vrot.lane.b32.xlu2 %v8687_v2, %s12637_s29 }
  0xf2   : > { %6845 = vrot.lane.b32.xlu1 %v6769_v25, %s12633_s12  ;;  %v8743_v25 = vpack.i.bf16 %v875_v16, %v8704_v6  ;;  %v6490_v16 = vld [vmem:[%s12802_s1 + $0x164] sm:$0xf0] }
  0xf3   : > { %6840 = vrot.lane.b32.xlu0 %v6839_v3, %s12635_s30  ;;  %v8695_v39 = vpop.permute.xlu2 %6685  ;;  %v6458_v3 = vld [vmem:[%s12802_s1 + $0x64] sm:$0xf0] }
  0xf4   : > { %12796 = vst [vmem:[#allocation11_spill] sm:$0xff] %v8695_v39 }
  0xf9   : > { %6865 = vrot.lane.b32.xlu2 %v6804_v41, %s12633_s12  ;;  %v5977_v41 = vor.u32 %v6492_v30, %v5976_v27  ;;  %v877_v30 = vld [vmem:[%s8481_s25 + $0x260] sm:$0xff] }
  0xfa   : > { %6860 = vrot.lane.b32.xlu1 %v8708_v7, %s12637_s29 }
  0xfb   : > { %6855 = vrot.lane.b32.xlu0 %v6854_v8, %s12635_s30  ;;  %v8716_v9 = vpop.permute.xlu2 %6700  ;;  %2704 = vmatpush.bf16.msra.mxu2 %v5977_v41  ;;  %v5968_v8 = vld [vmem:[%s12802_s1 + $0x160] sm:$0xf]  ;;  %v6456_v41 = vld [vmem:[%s12802_s1 + $0x54] sm:$0xf0] }
  0xfc   : > { %12799 = vst [vmem:[#allocation14_spill] sm:$0xff] %v8716_v9  ;;  %v5969_v27 = vor.u32 %v6490_v16, %v5968_v8  ;;  %v6008_v8 = vld [vmem:[%s12802_s1 + $0x1b0] sm:$0xf]  ;;  %v6500_v16 = vld [vmem:[%s12802_s1 + $0x1b4] sm:$0xf0] }
  0xff   : > { %2705 = vmatpush.bf16.msra.mxu2 %v5969_v27 }
 0x101   : > { %6880 = vrot.lane.b32.xlu2 %v6814_v61, %s12633_s12 }
 0x102   : > { %6875 = vrot.lane.b32.xlu1 %v6874_v10, %s12635_s30  ;;  %v6909_v10 = vpack.i.bf16 %v8698_v4, %v8662_v54  ;;  %s12759_s30 = smov 62  }
 0x103   : > { %6870 = vrot.lane.b32.xlu0 %v8531_v48, %s12633_s12  ;;  %v8730_v13 = vpop.permute.xlu2 %6715  ;;  %v5848_v48 = vld [vmem:[%s12802_s1 + $0x70] sm:$0xf]  ;;  %s12805_s12 = smov 96  }
 0x104   : > { %12801 = vst [vmem:[#allocation16_spill] sm:$0xff] %v8730_v13  ;;  %v8734_v18 = vpop.permute.xlu1 %6670  ;;  %v5849_v28 = vor.u32 %v6460_v26, %v5848_v48  ;;  %v6502_v48 = vld [vmem:[%s12802_s1 + $0x1c4] sm:$0xf0]  ;;  %v5841_v26 = vor.u32 %v6458_v3, %v5840_v62  ;;  %v5833_v62 = vor.u32 %v6456_v41, %v5832_v33  ;;  %v6488_v3 = vld [vmem:[%s12802_s1 + $0x154] sm:$0xf0] }
 0x105   : > { %v8736_v19 = vpop.permute.xlu0 %6660  ;;  %v5816_v13 = vld [vmem:[%s12802_s1 + $0x30] sm:$0xf] }
 0x106   : > { %2546 = vmatpush.bf16.msra.mxu0 %v5849_v28 }
 0x109   : > { %6895 = vrot.lane.b32.xlu2 %v8740_v20, %s12637_s29 }
 0x10a   : > { %6890 = vrot.lane.b32.xlu1 %v6889_v24, %s12803_s15  ;;  %v6016_v24 = vld [vmem:[%s12802_s1 + $0x1c0] sm:$0xf]  ;;  %2547 = vmatpush.bf16.msra.mxu0 %v5841_v26  ;;  %v6476_v26 = vld [vmem:[%s12802_s1 + $0xf4] sm:$0xf0] }
 0x10b   : > { %6885 = vrot.lane.b32.xlu0 %v8743_v25, %s12637_s29  ;;  %v8768_v44 = vpop.permute.xlu2 %6730  ;;  %v6017_v28 = vor.u32 %v6502_v48, %v6016_v24  ;;  %v6009_v24 = vor.u32 %v6500_v16, %v6008_v8  ;;  %v5912_v48 = vld [vmem:[%s12802_s1 + $0xf0] sm:$0xf]  ;;  %v6924_v8 = vpack.i.bf16 %v8796_v31, %v877_v30  ;;  %v6000_v16 = vld [vmem:[%s12802_s1 + $0x1a0] sm:$0xf]  ;;  %s12779_s29 = smov 56  }
 0x10c   : > { %v8770_v60 = vpop.permute.xlu1 %6675 }
 0x10d   : > { %12804 = vst [vmem:[#allocation17_spill] sm:$0xff] %v8770_v60  ;;  %v8772_v61 = vpop.permute.xlu0 %6665  ;;  %2786 = vmatpush.bf16.msra.mxu3 %v6017_v28  ;;  %v5913_v28 = vor.u32 %v6476_v26, %v5912_v48 }
 0x10e   : > { %2548 = vmatpush.bf16.msra.mxu0 %v5833_v62  ;;  %v6486_v62 = vld [vmem:[%s12802_s1 + $0x144] sm:$0xf0] }
 0x10f   : > { %2625 = vmatpush.bf16.msra.mxu1 %v5913_v28 }
 0x111   : > { %6910 = vrot.lane.b32.xlu2 %v6909_v10, %s12803_s15  ;;  %v5961_v10 = vor.u32 %v6488_v3, %v5960_v42  ;;  %v5952_v42 = vld [vmem:[%s12802_s1 + $0x140] sm:$0xf]  ;;  %v8842_v3 = vpack.i.bf16 %v877_v30, %v876_v17  ;;  %2787 = vmatpush.bf16.msra.mxu3 %v6009_v24  ;;  %v6474_v24 = vld [vmem:[%s12802_s1 + $0xe4] sm:$0xf0] }
 0x112   : > { %6905 = vrot.lane.b32.xlu1 %v8494_v35, %s12805_s12  ;;  %v5824_v35 = vld [vmem:[%s12802_s1 + $0x40] sm:$0xf]  ;;  %v5953_v26 = vor.u32 %v6486_v62, %v5952_v42  ;;  %v6484_v62 = vld [vmem:[%s12802_s1 + $0x134] sm:$0xf0] }
 0x113   : > { %6900 = vrot.lane.b32.xlu0 %v8687_v2, %s12805_s12  ;;  %v8827_v27 = vpop.permute.xlu2 %6745  ;;  %2706 = vmatpush.bf16.msra.mxu2 %v5961_v10  ;;  %v6454_v2 = vld [vmem:[%s12802_s1 + $0x44] sm:$0xf0]  ;;  %v5904_v30 = vld [vmem:[%s12802_s1 + $0xe0] sm:$0xf] }
 0x114   : > { %12806 = vst [vmem:[#allocation18_spill] sm:$0xff] %v8827_v27  ;;  %v8829_v33 = vpop.permute.xlu1 %6695  ;;  %v6498_v10 = vld [vmem:[%s12802_s1 + $0x1a4] sm:$0xf0]  ;;  %v5825_v48 = vor.u32 %v6454_v2, %v5824_v35  ;;  %v5905_v28 = vor.u32 %v6474_v24, %v5904_v30  ;;  %v6452_v35 = vld [vmem:[%s12802_s1 + $0x34] sm:$0xf0]  ;;  %v8892_v30 = vld [vmem:[%s8481_s25 + $0x160] sm:$0xff]  ;;  %v6663_v27 = vunpack.i.h.bf16 %v8736_v19 }
 0x115   : > { %12807 = vst [vmem:[#allocation19_spill] sm:$0xff] %v8829_v33  ;;  %v8831_v41 = vpop.permute.xlu0 %6690  ;;  %v6001_v17 = vor.u32 %v6498_v10, %v6000_v16  ;;  %v5944_v2 = vld [vmem:[%s12802_s1 + $0x130] sm:$0xf]  ;;  %v5817_v42 = vor.u32 %v6452_v35, %v5816_v13  ;;  %v6496_v10 = vld [vmem:[%s12802_s1 + $0x194] sm:$0xf0]  ;;  %v8895_v24 = vld [vmem:[%s8481_s25 + $0x168] sm:$0xff] }
 0x116   : > { %12808 = vst [vmem:[#allocation20_spill] sm:$0xff] %v8831_v41  ;;  %2549 = vmatpush.bf16.msra.mxu0 %v5825_v48  ;;  %v5992_v16 = vld [vmem:[%s12802_s1 + $0x190] sm:$0xf]  ;;  %2626 = vmatpush.bf16.msra.mxu1 %v5905_v28  ;;  %v6482_v28 = vld [vmem:[%s12802_s1 + $0x124] sm:$0xf0] }
 0x117   : > { %2707 = vmatpush.bf16.msra.mxu2 %v5953_v26  ;;  %2788 = vmatpush.bf16.msra.mxu3 %v6001_v17  ;;  %v5993_v13 = vor.u32 %v6496_v10, %v5992_v16  ;;  %v5896_v48 = vld [vmem:[%s12802_s1 + $0xd0] sm:$0xf]  ;;  %v6472_v26 = vld [vmem:[%s12802_s1 + $0xd4] sm:$0xf0]  ;;  %12810 = vst [vmem:[#allocation21_spill] sm:$0xff] %v8892_v30 }
 0x118   : > { %v5897_v35 = vor.u32 %v6472_v26, %v5896_v48  ;;  %v5936_v16 = vld [vmem:[%s12802_s1 + $0x120] sm:$0xf]  ;;  %v6494_v10 = vld [vmem:[%s12802_s1 + $0x184] sm:$0xf0]  ;;  %v879_v41 = vld [vmem:[%s8481_s25 + $0x270] sm:$0xff] }
 0x119   : > { %6925 = vrot.lane.b32.xlu2 %v6924_v8, %s12803_s15  ;;  %v5945_v8 = vor.u32 %v6484_v62, %v5944_v2  ;;  %v5808_v2 = vld [vmem:[%s12802_s1 + $0x20] sm:$0xf]  ;;  %v6450_v62 = vld [vmem:[%s12802_s1 + $0x24] sm:$0xf0]  ;;  %v5937_v26 = vor.u32 %v6482_v28, %v5936_v16  ;;  %v6468_v28 = vld [vmem:[%s12802_s1 + $0xb4] sm:$0xf0] }
 0x11a   : > { %6920 = vrot.lane.b32.xlu1 %v8842_v3, %s12809_s13  ;;  %2550 = vmatpush.bf16.msra.mxu0 %v5817_v42  ;;  %v5984_v42 = vld [vmem:[%s12802_s1 + $0x180] sm:$0xf]  ;;  %v5809_v48 = vor.u32 %v6450_v62, %v5808_v2  ;;  %v5800_v2 = vld [vmem:[%s12802_s1 + $0x10] sm:$0xf]  ;;  %v6448_v62 = vld [vmem:[%s12802_s1 + $0x14] sm:$0xf0] }
 0x11b   : > { %6915 = vrot.lane.b32.xlu0 %v8708_v7, %s12805_s12  ;;  %v8889_v17 = vpop.permute.xlu2 %6760  ;;  %2708 = vmatpush.bf16.msra.mxu2 %v5945_v8  ;;  %v8921_v8 = vpack.i.bf16 %v8895_v24, %v8892_v30 }
 0x11c   : > { %v8897_v9 = vpop.permute.xlu1 %6710  ;;  %2789 = vmatpush.bf16.msra.mxu3 %v5993_v13  ;;  %v5888_v13 = vld [vmem:[%s12802_s1 + $0xc0] sm:$0xf]  ;;  %2627 = vmatpush.bf16.msra.mxu1 %v5897_v35  ;;  %v5801_v35 = vor.u32 %v6448_v62, %v5800_v2  ;;  %v6944_v62 = vpack.i.bf16 %v8725_v11, %v8701_v5 }
 0x11d   : > { %12811 = vst [vmem:[#allocation22_spill] sm:$0xff] %v8897_v9  ;;  %v8899_v7 = vpop.permute.xlu0 %6705  ;;  %v5985_v9 = vor.u32 %v6494_v10, %v5984_v42  ;;  %v5920_v2 = vld [vmem:[%s12802_s1 + $0x100] sm:$0xf] }
 0x11e   : > { %12812 = vst [vmem:[#allocation23_spill] sm:$0xff] %v8899_v7  ;;  %v6470_v7 = vld [vmem:[%s12802_s1 + $0xc4] sm:$0xf0]  ;;  %2551 = vmatpush.bf16.msra.mxu0 %v5809_v48 }
 0x11f   : > { %v5889_v33 = vor.u32 %v6470_v7, %v5888_v13  ;;  %2709 = vmatpush.bf16.msra.mxu2 %v5937_v26  ;;  %v8961_v26 = vpack.i.bf16 %v879_v41, %v8796_v31  ;;  %v6446_v13 = vld [vmem:[%s12802_s1 + $0x4] sm:$0xf0] }
 0x120   : > { %2790 = vmatpush.bf16.msra.mxu3 %v5985_v9  ;;  %v6480_v9 = vld [vmem:[%s12802_s1 + $0x114] sm:$0xf0] }
 0x121   : > { %6940 = vrot.lane.b32.xlu2 %v8528_v47, %s12805_s12  ;;  %v5928_v47 = vld [vmem:[%s12802_s1 + $0x110] sm:$0xf]  ;;  %2628 = vmatpush.bf16.msra.mxu1 %v5889_v33  ;;  %v5792_v33 = vld [vmem:[%s12802_s1] sm:$0xf] }
 0x122   : > { %6935 = vrot.lane.b32.xlu1 %v8743_v25, %s12805_s12  ;;  %v5929_v16 = vor.u32 %v6480_v9, %v5928_v47  ;;  %v5880_v25 = vld [vmem:[%s12802_s1 + $0xb0] sm:$0xf]  ;;  %2552 = vmatpush.bf16.msra.mxu0 %v5801_v35  ;;  %v5793_v31 = vor.u32 %v6446_v13, %v5792_v33  ;;  %v6478_v35 = vld [vmem:[%s12802_s1 + $0x104] sm:$0xf0]  ;;  %v5872_v47 = vld [vmem:[%s12802_s1 + $0xa0] sm:$0xf] }
 0x123   : > { %6930 = vrot.lane.b32.xlu0 %v8921_v8, %s12809_s13  ;;  %v8948_v7 = vpop.permute.xlu2 %6775  ;;  %v5881_v48 = vor.u32 %v6468_v28, %v5880_v25  ;;  %v6466_v9 = vld [vmem:[%s12802_s1 + $0xa4] sm:$0xf0]  ;;  %v5864_v28 = vld [vmem:[%s12802_s1 + $0x90] sm:$0xf]  ;;  %v6464_v33 = vld [vmem:[%s12802_s1 + $0x94] sm:$0xf0] }
 0x124   : > { %v8956_v42 = vpop.permute.xlu1 %6725  ;;  %2710 = vmatpush.bf16.msra.mxu2 %v5929_v16  ;;  %v5921_v16 = vor.u32 %v6478_v35, %v5920_v2  ;;  %v5873_v25 = vor.u32 %v6466_v9, %v5872_v47  ;;  %v8997_v13 = vld [vmem:[%s8481_s25 + $0x170] sm:$0xff]  ;;  %v9000_v2 = vld [vmem:[%s8481_s25 + $0x178] sm:$0xff]  ;;  %v5856_v47 = vld [vmem:[%s12802_s1 + $0x80] sm:$0xf] }
 0x125   : > { %12813 = vst [vmem:[#allocation24_spill] sm:$0xff] %v8956_v42  ;;  %v8958_v10 = vpop.permute.xlu0 %6720  ;;  %2629 = vmatpush.bf16.msra.mxu1 %v5881_v48  ;;  %v6462_v9 = vld [vmem:[%s12802_s1 + $0x84] sm:$0xf0]  ;;  %v9015_v42 = vpack.i.bf16 %v9000_v2, %v8997_v13 }
 0x126   : > { %12814 = vst [vmem:[#allocation25_spill] sm:$0xff] %v8958_v10  ;;  %2553 = vmatpush.bf16.msra.mxu0 %v5793_v31  ;;  %v880_v31 = vld [vmem:[%s8481_s25 + $0x278] sm:$0xff] }
 0x128   : > { %2711 = vmatpush.bf16.msra.mxu2 %v5921_v16  ;;  %v6959_v16 = vpack.i.bf16 %v880_v31, %v879_v41  ;;  %v6979_v41 = vpack.i.bf16 %v8892_v30, %v8728_v12  ;;  %v881_v12 = vld [vmem:[%s8481_s25 + $0x280] sm:$0xff] }
 0x129   : > { %6955 = vrot.lane.b32.xlu2 %v8961_v26, %s12809_s13  ;;  %2630 = vmatpush.bf16.msra.mxu1 %v5873_v25  ;;  %v5857_v25 = vor.u32 %v6462_v9, %v5856_v47  ;;  %v9035_v47 = vld [vmem:[%s8481_s25 + $0x180] sm:$0xff]  ;;  %v9038_v9 = vld [vmem:[%s8481_s25 + $0x188] sm:$0xff]  ;;  %v9063_v5 = vpack.i.bf16 %v881_v12, %v880_v31 }
 0x12a   : > { %6950 = vrot.lane.b32.xlu1 %v8740_v20, %s12805_s12  ;;  %v5865_v20 = vor.u32 %v6464_v33, %v5864_v28 }
 0x12b   : > { %6945 = vrot.lane.b32.xlu0 %v6944_v62, %s12803_s15  ;;  %v8994_v48 = vpop.permute.xlu2 %6790 }
 0x12c   : > { %v9003_v35 = vpop.permute.xlu1 %6740 }
 0x12d   : > { %v9005_v62 = vpop.permute.xlu0 %6735  ;;  %2631 = vmatpush.bf16.msra.mxu1 %v5865_v20  ;;  %v6763_v20 = vunpack.i.h.bf16 %v8889_v17 }
 0x131   : > { %6970 = vrot.lane.b32.xlu2 %v8842_v3, %s12805_s12  ;;  %2632 = vmatpush.bf16.msra.mxu1 %v5857_v25  ;;  %v6762_v3 = vunpack.i.l.bf16 %v8889_v17  ;;  %v882_v25 = vld [vmem:[%s8481_s25 + $0x288] sm:$0xff] }
 0x132   : > { %6965 = vrot.lane.b32.xlu1 %v9015_v42, %s12809_s13  ;;  %v6994_v11 = vpack.i.bf16 %v882_v25, %v881_v12  ;;  %v801_v12 = vld [vmem:[%s8481_s25] sm:$0xff] }
 0x133   : > { %6960 = vrot.lane.b32.xlu0 %v6959_v16, %s12803_s15  ;;  %v9022_v28 = vpop.permute.xlu2 %6805  ;;  %v2026_v39 = vsel %vm12780_vm0, %v8638_v29, %v6762_v3  ;;  %v6662_v29 = vunpack.i.l.bf16 %v8736_v19  ;;  %v6778_v3 = vunpack.i.h.bf16 %v8948_v7 }
 0x134   : > { %v9024_v33 = vpop.permute.xlu1 %6755 }
 0x135   : > { %12815 = vst [vmem:[#allocation26_spill] sm:$0xff] %v9024_v33  ;;  %v9026_v10 = vpop.permute.xlu0 %6750 }
 0x136   : > { %12816 = vst [vmem:[#allocation27_spill] sm:$0xff] %v9026_v10 }
 0x139   : > { %6985 = vrot.lane.b32.xlu2 %v8921_v8, %s12805_s12  ;;  %v9053_v8 = vpack.i.bf16 %v9038_v9, %v9035_v47 }
 0x13a   : > { %6980 = vrot.lane.b32.xlu1 %v6979_v41, %s12803_s15  ;;  %v2027_v41 = vsel %vm12780_vm0, %v8606_v14, %v6763_v20 }
 0x13b   : > { %6975 = vrot.lane.b32.xlu0 %v8568_v58, %s12805_s12  ;;  %v9043_v16 = vpop.permute.xlu2 %6820  ;;  %v6777_v58 = vunpack.i.l.bf16 %v8948_v7  ;;  %v6732_v7 = vunpack.i.l.bf16 %v8768_v44 }
 0x13c   : > { %v9047_v33 = vpop.permute.xlu1 %6770 }
 0x13d   : > { %v9049_v17 = vpop.permute.xlu0 %6765  ;;  %v12658_v30 = vunpack.i.l.bf16 %v9047_v33  ;;  %v12818_v19 = vunpack.i.h.bf16 %v9047_v33 }
 0x13e   : > { %v12657_v10 = vunpack.i.h.bf16 %v9049_v17  ;;  %v12659_v1 = vunpack.i.l.bf16 %v9049_v17 }
 0x140   : > { %v2054_v14 = vsel %vm12763_vm1, %v2026_v39, %v12659_v1  ;;  %v2055_v20 = vsel %vm12763_vm1, %v2027_v41, %v12657_v10  ;;  %v1942_v39 = vsel %vm12780_vm0, %v8650_v40, %v12658_v30  ;;  %v1943_v41 = vsel %vm12780_vm0, %v8620_v21, %v12818_v19 }
 0x141   : > { %v9075_v31 = vpack.c.bf16 %v2055_v20, %v2054_v14  ;;  %7000 = vrot.lane.b32.xlu2 %v9053_v8, %s12809_s13  ;;  %v6733_v10 = vunpack.i.h.bf16 %v8768_v44  ;;  %v1772_v40 = vsel %vm12780_vm0, %v801_v12, %v6662_v29  ;;  %v1773_v21 = vsel %vm12780_vm0, %v8500_v37, %v6663_v27 }
 0x142   : > { %6995 = vrot.lane.b32.xlu1 %v6994_v11, %s12803_s15  ;;  %v1970_v19 = vsel %vm12763_vm1, %v1942_v39, %v6777_v58  ;;  %v1971_v44 = vsel %vm12763_vm1, %v1943_v41, %v6778_v3  ;;  %v1801_v60 = vsel %vm12763_vm1, %v1772_v40, %v6732_v7  ;;  %v6793_v3 = vunpack.i.h.bf16 %v8994_v48 }
 0x143   : > { %12817 = vst [vmem:[#allocation28_spill] sm:$0xff] %v9075_v31  ;;  %6990 = vrot.lane.b32.xlu0 %v9063_v5, %s12809_s13  ;;  %6030 = vmatmul.msk.bf16.vlgmr.msra.gmra.mxu3 %vm1829_vm2, %v9075_v31  ;;  %v9095_v14 = vpop.permute.xlu2 %6835  ;;  %v7009_v31 = vpack.i.bf16 %v8550_v52, %v8557_v55  ;;  %v1802_v29 = vsel %vm12763_vm1, %v1773_v21, %v6733_v10  ;;  %v6792_v39 = vunpack.i.l.bf16 %v8994_v48  ;;  %v883_v52 = vld [vmem:[%s8481_s25 + $0x290] sm:$0xff] }
 0x144   : > { %v6786_v20 = vpop.permute.xlu1 %6785  ;;  %v7019_v7 = vpack.i.bf16 %v8997_v13, %v8895_v24 }
 0x145   : > { %v6781_v30 = vpop.permute.xlu0 %6780  ;;  %v6788_v11 = vunpack.i.h.bf16 %v6786_v20  ;;  %v6787_v1 = vunpack.i.l.bf16 %v6786_v20  ;;  %v6808_v20 = vunpack.i.h.bf16 %v9022_v28 }
 0x146   : > { %v6783_v6 = vunpack.i.h.bf16 %v6781_v30  ;;  %v6782_v0 = vunpack.i.l.bf16 %v6781_v30 }
 0x147   : > { %v1830_v12 = vsel %vm1829_vm2, %v1801_v60, %v6787_v1  ;;  %v1831_v37 = vsel %vm1829_vm2, %v1802_v29, %v6788_v11  ;;  %v1858_v60 = vsel %vm12780_vm0, %v8526_v46, %v6792_v39  ;;  %v6807_v46 = vunpack.i.l.bf16 %v9022_v28  ;;  %v9154_v28 = vld [vmem:[%s8481_s25 + $0x198] sm:$0xff] }
 0x148   : > { %v1998_v27 = vsel %vm1829_vm2, %v1970_v19, %v6782_v0  ;;  %v1999_v58 = vsel %vm1829_vm2, %v1971_v44, %v6783_v6  ;;  %v9112_v30 = vpack.c.bf16 %v1831_v37, %v1830_v12  ;;  %v9126_v6 = vpack.i.bf16 %v883_v52, %v882_v25  ;;  %v9151_v44 = vld [vmem:[%s8481_s25 + $0x190] sm:$0xff]  ;;  %v9157_v11 = vld [vmem:[%s8481_s25 + $0x298] sm:$0xff] }
 0x149   : > { %v9114_v41 = vpack.c.bf16 %v1999_v58, %v1998_v27  ;;  %7015 = vrot.lane.b32.xlu2 %v8565_v57, %s12805_s12  ;;  %v1859_v57 = vsel %vm12780_vm0, %v8490_v34, %v6793_v3  ;;  %v2028_v37 = vsel %vm12780_vm0, %v8609_v15, %v6807_v46 }
 0x14a   : > { %7010 = vrot.lane.b32.xlu1 %v7009_v31, %s12803_s15  ;;  %2554 = vmatmul.bf16.vlgmr.msra.gmra.mxu0 %v9112_v30 }
 0x14b   : > { %7005 = vrot.lane.b32.xlu0 %v8961_v26, %s12805_s12  ;;  %2712 = vmatmul.bf16.vlgmr.msra.gmra.mxu2 %v9114_v41  ;;  %v9124_v55 = vpop.permute.xlu2 %6850 }
 0x14c   : > { %v6801_v0 = vpop.permute.xlu1 %6800 }
 0x14d   : > { %v6796_v1 = vpop.permute.xlu0 %6795  ;;  %v6803_v10 = vunpack.i.h.bf16 %v6801_v0  ;;  %v6802_v48 = vunpack.i.l.bf16 %v6801_v0  ;;  %v9173_v0 = vpack.i.bf16 %v9154_v28, %v9151_v44 }
 0x14e   : > { %v6798_v26 = vunpack.i.h.bf16 %v6796_v1  ;;  %v6797_v31 = vunpack.i.l.bf16 %v6796_v1  ;;  %v7034_v1 = vpack.i.bf16 %v9157_v11, %v883_v52 }
 0x150   : > { %v1886_v40 = vsel %vm12763_vm1, %v1858_v60, %v6797_v31  ;;  %v1887_v25 = vsel %vm12763_vm1, %v1859_v57, %v6798_v26  ;;  %v6667_v60 = vunpack.i.l.bf16 %v8772_v61  ;;  %v6668_v57 = vunpack.i.h.bf16 %v8772_v61 }
 0x151   : > { %v1914_v34 = vsel %vm1829_vm2, %v1886_v40, %v6802_v48  ;;  %v1915_v21 = vsel %vm1829_vm2, %v1887_v25, %v6803_v10  ;;  %7030 = vrot.lane.b32.xlu2 %v9126_v6, %s12809_s13  ;;  %v6823_v10 = vunpack.i.h.bf16 %v9043_v16  ;;  %v6822_v48 = vunpack.i.l.bf16 %v9043_v16 }
 0x152   : > { %v9142_v19 = vpack.c.bf16 %v1915_v21, %v1914_v34  ;;  %7025 = vrot.lane.b32.xlu1 %v9015_v42, %s12805_s12  ;;  %v2029_v42 = vsel %vm12780_vm0, %v8626_v23, %v6808_v20  ;;  %v6738_v61 = vunpack.i.h.bf16 %v9005_v62 }
 0x153   : > { %7020 = vrot.lane.b32.xlu0 %v7019_v7, %s12803_s15  ;;  %v9148_v24 = vpop.permute.xlu2 %6865  ;;  %v6737_v7 = vunpack.i.l.bf16 %v9005_v62  ;;  %v1775_v62 = vsel %vm12780_vm0, %v8523_v45, %v6668_v57 }
 0x154   : > { %2633 = vmatmul.bf16.vlgmr.msra.gmra.mxu1 %v9142_v19  ;;  %v9159_v29 = vpop.permute.xlu1 %6815 }
 0x155   : > { %v9161_v12 = vpop.permute.xlu0 %6810  ;;  %v6818_v27 = vunpack.i.h.bf16 %v9159_v29  ;;  %v6817_v58 = vunpack.i.l.bf16 %v9159_v29 }
 0x156   : > { %v6813_v3 = vunpack.i.h.bf16 %v9161_v12  ;;  %v6812_v39 = vunpack.i.l.bf16 %v9161_v12  ;;  %v9500_v12 = vld [vmem:[%s8481_s25 + $0x2c0] sm:$0xff] }
 0x157   : > { %v1944_v52 = vsel %vm12780_vm0, %v8623_v22, %v6817_v58  ;;  %v1945_v31 = vsel %vm12780_vm0, %v8659_v49, %v6818_v27  ;;  %v1774_v22 = vsel %vm12780_vm0, %v8503_v38, %v6667_v60  ;;  %v7059_v49 = vpack.i.bf16 %v9035_v47, %v9000_v2 }
 0x158   : > { %v2056_v15 = vsel %vm12763_vm1, %v2028_v37, %v6812_v39  ;;  %v2057_v23 = vsel %vm12763_vm1, %v2029_v42, %v6813_v3  ;;  %v1972_v25 = vsel %vm12763_vm1, %v1944_v52, %v6822_v48  ;;  %v1973_v20 = vsel %vm12763_vm1, %v1945_v31, %v6823_v10 }
 0x159   : > { %v9186_v26 = vpack.c.bf16 %v2057_v23, %v2056_v15  ;;  %7045 = vrot.lane.b32.xlu2 %v9063_v5, %s12805_s12  ;;  %v7049_v38 = vpack.i.bf16 %v8540_v50, %v8553_v53  ;;  %v1803_v42 = vsel %vm12763_vm1, %v1774_v22, %v6737_v7  ;;  %v1804_v2 = vsel %vm12763_vm1, %v1775_v62, %v6738_v61  ;;  %v885_v50 = vld [vmem:[%s8481_s25 + $0x2a0] sm:$0xff]  ;;  %v9232_v53 = vld [vmem:[%s8481_s25 + $0x2a8] sm:$0xff]  ;;  %v5850_v62 = vld [vmem:[%s12802_s1 + $0x78] sm:$0xf0] }
 0x15a   : > { %7040 = vrot.lane.b32.xlu1 %v9173_v0, %s12809_s13  ;;  %v6838_v15 = vunpack.i.h.bf16 %v9095_v14  ;;  %v6837_v23 = vunpack.i.l.bf16 %v9095_v14  ;;  %v7074_v31 = vpack.i.bf16 %v9232_v53, %v885_v50 }
 0x15b   : > { %7035 = vrot.lane.b32.xlu0 %v7034_v1, %s12803_s15  ;;  %6031 = vmatmul.msk.bf16.gmra.mxu3 %vm1829_vm2, %v9186_v26  ;;  %v9205_v5 = vpop.permute.xlu2 %6880 }
 0x15c   : > { %v6831_v16 = vpop.permute.xlu1 %6830  ;;  %v1860_v61 = vsel %vm12780_vm0, %v8497_v36, %v6837_v23  ;;  %v1861_v7 = vsel %vm12780_vm0, %v8519_v43, %v6838_v15  ;;  %v6852_v36 = vunpack.i.l.bf16 %v9124_v55  ;;  %v7089_v23 = vpack.i.bf16 %v8581_v63, %v8547_v51  ;;  %v6475_v51 = vld [vmem:[%s12802_s1 + $0xf4] sm:$0xf] }
 0x15d   : > { %v6826_v40 = vpop.permute.xlu0 %6825  ;;  %v6833_v46 = vunpack.i.h.bf16 %v6831_v16  ;;  %v6832_v34 = vunpack.i.l.bf16 %v6831_v16  ;;  %v6742_v63 = vunpack.i.l.bf16 %v9003_v35 }
 0x15e   : > { %v6828_v21 = vunpack.i.h.bf16 %v6826_v40  ;;  %v6827_v37 = vunpack.i.l.bf16 %v6826_v40 }
 0x15f   : > { %v1832_v47 = vsel %vm1829_vm2, %v1803_v42, %v6832_v34  ;;  %v1833_v45 = vsel %vm1829_vm2, %v1804_v2, %v6833_v46  ;;  %v6853_v34 = vunpack.i.h.bf16 %v9124_v55  ;;  %v6672_v42 = vunpack.i.l.bf16 %v8734_v18 }
 0x160   : > { %v2000_v1 = vsel %vm1829_vm2, %v1972_v25, %v6827_v37  ;;  %v2001_v60 = vsel %vm1829_vm2, %v1973_v20, %v6828_v21  ;;  %v9225_v57 = vpack.c.bf16 %v1833_v45, %v1832_v47  ;;  %v9253_v25 = vpack.i.bf16 %v885_v50, %v9157_v11  ;;  %v9275_v47 = vld [vmem:[%s8481_s25 + $0x1a0] sm:$0xff]  ;;  %v9278_v45 = vld [vmem:[%s8481_s25 + $0x1a8] sm:$0xff] }
 0x161   : > { %v9227_v10 = vpack.c.bf16 %v2001_v60, %v2000_v1  ;;  %7060 = vrot.lane.b32.xlu2 %v7059_v49, %s12803_s15  ;;  %v6459_v49 = vld [vmem:[%s12802_s1 + $0x74] sm:$0xf]  ;;  %v6743_v55 = vunpack.i.h.bf16 %v9003_v35  ;;  %v2030_v1 = vsel %vm12780_vm0, %v8646_v32, %v6852_v36  ;;  %v6868_v60 = vunpack.i.h.bf16 %v9148_v24 }
 0x162   : > { %7055 = vrot.lane.b32.xlu1 %v8561_v56, %s12805_s12  ;;  %2559 = vmatmul.bf16.gmra.mxu0 %v9225_v57  ;;  %v5853_v20 = vor.u32 %v6459_v49, %v5850_v62  ;;  %v2031_v50 = vsel %vm12780_vm0, %v8665_v59, %v6853_v34  ;;  %v9308_v59 = vpack.i.bf16 %v9278_v45, %v9275_v47  ;;  %v12819_v36 = vunpack.i.l.bf16 %v9049_v17 }
 0x163   : > { %7050 = vrot.lane.b32.xlu0 %v7049_v38, %s12803_s15  ;;  %2717 = vmatmul.bf16.gmra.mxu2 %v9227_v10  ;;  %v9239_v48 = vpop.permute.xlu2 %6895  ;;  %v6673_v38 = vunpack.i.h.bf16 %v8734_v18 }
 0x164   : > { %v6846_v14 = vpop.permute.xlu1 %6845  ;;  %2862 = vmatpush.bf16.msrb.mxu3 %v5853_v20 }
 0x165   : > { %v6841_v52 = vpop.permute.xlu0 %6840  ;;  %v6848_v22 = vunpack.i.h.bf16 %v6846_v14  ;;  %v6847_v56 = vunpack.i.l.bf16 %v6846_v14 }
 0x166   : > { %v6843_v16 = vunpack.i.h.bf16 %v6841_v52  ;;  %v6842_v40 = vunpack.i.l.bf16 %v6841_v52 }
 0x168   : > { %v1888_v43 = vsel %vm12763_vm1, %v1860_v61, %v6842_v40  ;;  %v1889_v46 = vsel %vm12763_vm1, %v1861_v7, %v6843_v16  ;;  %v6026_v61 = vld [vmem:[%s12802_s1 + $0x1d8] sm:$0xf0] }
 0x169   : > { %v1916_v21 = vsel %vm1829_vm2, %v1888_v43, %v6847_v56  ;;  %v1917_v37 = vsel %vm1829_vm2, %v1889_v46, %v6848_v22  ;;  %7075 = vrot.lane.b32.xlu2 %v7074_v31, %s12803_s15  ;;  %v5914_v22 = vld [vmem:[%s12802_s1 + $0xf8] sm:$0xf0]  ;;  %v6491_v56 = vld [vmem:[%s12802_s1 + $0x174] sm:$0xf]  ;;  %v12820_v46 = vunpack.i.h.bf16 %v9049_v17  ;;  %v8007_v17 = vld [vmem:[%s8481_s25 + $0x20] sm:$0xff] }
 0x16a   : > { %v9262_v11 = vpack.c.bf16 %v1917_v37, %v1916_v21  ;;  %7070 = vrot.lane.b32.xlu1 %v9253_v25, %s12809_s13  ;;  %v5978_v16 = vld [vmem:[%s12802_s1 + $0x178] sm:$0xf0]  ;;  %v5917_v21 = vor.u32 %v6475_v51, %v5914_v22 }
 0x16b   : > { %7065 = vrot.lane.b32.xlu0 %v9053_v8, %s12805_s12  ;;  %v9272_v2 = vpop.permute.xlu2 %6910  ;;  %v6867_v8 = vunpack.i.l.bf16 %v9148_v24  ;;  %v6503_v24 = vld [vmem:[%s12802_s1 + $0x1d4] sm:$0xf] }
 0x16c   : > { %2638 = vmatmul.bf16.gmra.mxu1 %v9262_v11  ;;  %v9284_v15 = vpop.permute.xlu1 %6860  ;;  %v6029_v7 = vor.u32 %v6503_v24, %v6026_v61  ;;  %2941 = vmatpush.bf16.msrb.mxu0 %v5917_v21  ;;  %v6883_v24 = vunpack.i.h.bf16 %v9205_v5  ;;  %v6882_v61 = vunpack.i.l.bf16 %v9205_v5 }
 0x16d   : > { %v9286_v18 = vpop.permute.xlu0 %6855  ;;  %v12668_v14 = vunpack.i.h.bf16 %v9284_v15  ;;  %v12669_v52 = vunpack.i.l.bf16 %v9284_v15 }
 0x16e   : > { %v12670_v32 = vunpack.i.h.bf16 %v9286_v18  ;;  %v12671_v31 = vunpack.i.l.bf16 %v9286_v18  ;;  %3101 = vmatpush.bf16.msrb.mxu2 %v6029_v7 }
 0x16f   : > { %v1946_v49 = vsel %vm12780_vm0, %v8662_v54, %v12669_v52  ;;  %v1947_v62 = vsel %vm12780_vm0, %v8698_v4, %v12668_v14  ;;  %v5981_v4 = vor.u32 %v6491_v56, %v5978_v16 }
 0x170   : > { %v2058_v35 = vsel %vm12763_vm1, %v2030_v1, %v12671_v31  ;;  %v2059_v40 = vsel %vm12763_vm1, %v2031_v50, %v12670_v32  ;;  %v1974_v43 = vsel %vm12763_vm1, %v1946_v49, %v12819_v36  ;;  %v1975_v34 = vsel %vm12763_vm1, %v1947_v62, %v12820_v46  ;;  %v9374_v49 = vld [vmem:[%s8481_s25 + $0x40] sm:$0xff]  ;;  %v9381_v36 = vld [vmem:[%s8481_s25 + $0x48] sm:$0xff] }
 0x171   : > { %v9333_v20 = vpack.c.bf16 %v2059_v40, %v2058_v35  ;;  %7090 = vrot.lane.b32.xlu2 %v7089_v23, %s12803_s15  ;;  %v2002_v54 = vsel %vm1829_vm2, %v1974_v43, %v6867_v8  ;;  %v2003_v37 = vsel %vm1829_vm2, %v1975_v34, %v6868_v60  ;;  %v1776_v50 = vsel %vm12780_vm0, %v8007_v17, %v6672_v42  ;;  %v8008_v8 = vld [vmem:[%s8481_s25 + $0x28] sm:$0xff]  ;;  %v9366_v35 = vld [vmem:[%s8481_s25 + $0x98] sm:$0xff]  ;;  %v9369_v40 = vld [vmem:[%s8481_s25 + $0xa0] sm:$0xff] }
 0x172   : > { %7085 = vrot.lane.b32.xlu1 %v9126_v6, %s12805_s12  ;;  %v9348_v1 = vpack.c.bf16 %v2003_v37, %v2002_v54  ;;  %v1777_v60 = vsel %vm12780_vm0, %v8008_v8, %v6673_v38  ;;  %v1805_v6 = vsel %vm12763_vm1, %v1776_v50, %v6742_v63  ;;  %3020 = vmatpush.bf16.msrb.mxu1 %v5981_v4  ;;  %v9400_v17 = vld [vmem:[%s8481_s25 + $0x1b0] sm:$0xff]  ;;  %v9403_v50 = vld [vmem:[%s8481_s25 + $0x1b8] sm:$0xff] }
 0x173   : > { %7080 = vrot.lane.b32.xlu0 %v9308_v59, %s12809_s13  ;;  %6032 = vmatmul.msk.bf16.gmra.mxu3 %vm1829_vm2, %v9333_v20  ;;  %v9354_v23 = vpop.permute.xlu2 %6925  ;;  %v1806_v7 = vsel %vm12763_vm1, %v1777_v60, %v6743_v55  ;;  %v7099_v63 = vpack.i.bf16 %v9151_v44, %v9038_v9  ;;  %v7094_v5 = vpack.i.bf16 %v9369_v40, %v9366_v35  ;;  %v12821_v55 = vunpack.i.l.bf16 %v9047_v33  ;;  %v887_v60 = vld [vmem:[%s8481_s25 + $0x2b0] sm:$0xff] }
 0x174   : > { %v6876_v42 = vpop.permute.xlu1 %6875  ;;  %2722 = vmatmul.bf16.gmra.mxu2 %v9348_v1  ;;  %v12822_v9 = vunpack.i.h.bf16 %v9047_v33 }
 0x175   : > { %v6871_v51 = vpop.permute.xlu0 %6870  ;;  %v6878_v22 = vunpack.i.h.bf16 %v6876_v42  ;;  %v6877_v56 = vunpack.i.l.bf16 %v6876_v42  ;;  %v1862_v62 = vsel %vm12780_vm0, %v9374_v49, %v12821_v55  ;;  %v12664_v55 = vunpack.i.h.bf16 %v9239_v48 }
 0x176   : > { %v6873_v38 = vunpack.i.h.bf16 %v6871_v51  ;;  %v6872_v16 = vunpack.i.l.bf16 %v6871_v51  ;;  %v1863_v44 = vsel %vm12780_vm0, %v9381_v36, %v12822_v9  ;;  %v12824_v9 = vld [vmem:[#allocation9_spill] sm:$0xff] }
 0x177   : > { %v1890_v34 = vsel %vm12763_vm1, %v1862_v62, %v6877_v56  ;;  %v1891_v21 = vsel %vm12763_vm1, %v1863_v44, %v6878_v22  ;;  %v12665_v62 = vunpack.i.l.bf16 %v9239_v48 }
 0x178   : > { %v1834_v43 = vsel %vm1829_vm2, %v1805_v6, %v6872_v16  ;;  %v1835_v46 = vsel %vm1829_vm2, %v1806_v7, %v6873_v38  ;;  %v1918_v37 = vsel %vm1829_vm2, %v1890_v34, %v6882_v61  ;;  %v1919_v4 = vsel %vm1829_vm2, %v1891_v21, %v6883_v24  ;;  %v9413_v6 = vld [vmem:[%s8481_s25 + $0x2b8] sm:$0xff] }
 0x179   : > { %v9391_v54 = vpack.c.bf16 %v1835_v46, %v1834_v43  ;;  %7105 = vrot.lane.b32.xlu2 %v9173_v0, %s12805_s12  ;;  %v9397_v33 = vpack.c.bf16 %v1919_v4, %v1918_v37  ;;  %v12823_v0 = vld [vmem:[#allocation17_spill] sm:$0xff]  ;;  %v9421_v7 = vpack.i.bf16 %v9403_v50, %v9400_v17  ;;  %v12826_v34 = vld [vmem:[#allocation18_spill] sm:$0xff]  ;;  %v9538_v29 = vpack.i.bf16 %v9500_v12, %v9413_v6 }
 0x17a   : > { %7100 = vrot.lane.b32.xlu1 %v7099_v63, %s12803_s15  ;;  %v6678_v24 = vunpack.i.h.bf16 %v12823_v0  ;;  %v6677_v61 = vunpack.i.l.bf16 %v12823_v0  ;;  %v7114_v63 = vpack.i.bf16 %v9413_v6, %v887_v60  ;;  %v12825_v43 = vld [vmem:[#allocation13_spill] sm:$0xff]  ;;  %v6748_v21 = vunpack.i.h.bf16 %v12826_v34 }
 0x17b   : > { %7095 = vrot.lane.b32.xlu0 %v7094_v5, %s12805_s12  ;;  %2564 = vmatmul.bf16.gmra.mxu0 %v9391_v54  ;;  %v9409_v8 = vpop.permute.xlu2 %6940  ;;  %v9427_v5 = vpack.i.bf16 %v887_v60, %v9232_v53  ;;  %v6747_v37 = vunpack.i.l.bf16 %v12826_v34  ;;  %v8013_v0 = vld [vmem:[%s8481_s25 + $0x30] sm:$0xff] }
 0x17c   : > { %2643 = vmatmul.bf16.gmra.mxu1 %v9397_v33  ;;  %v9417_v42 = vpop.permute.xlu1 %6890 }
 0x17d   : > { %v6886_v51 = vpop.permute.xlu0 %6885  ;;  %v12666_v22 = vunpack.i.h.bf16 %v9417_v42  ;;  %v12667_v56 = vunpack.i.l.bf16 %v9417_v42 }
 0x17e   : > { %v6888_v38 = vunpack.i.h.bf16 %v6886_v51  ;;  %v6887_v16 = vunpack.i.l.bf16 %v6886_v51  ;;  %v1778_v51 = vsel %vm12780_vm0, %v8013_v0, %v6677_v61  ;;  %v12829_v61 = vld [vmem:[#allocation15_spill] sm:$0xff]  ;;  %v9476_v0 = vld [vmem:[%s8481_s25 + $0xb0] sm:$0xff] }
 0x180   : > { %v2032_v44 = vsel %vm12780_vm0, %v12824_v9, %v6887_v16  ;;  %v2033_v46 = vsel %vm12780_vm0, %v12825_v43, %v6888_v38  ;;  %v8014_v38 = vld [vmem:[%s8481_s25 + $0x38] sm:$0xff] }
 0x181   : > { %v2060_v4 = vsel %vm12763_vm1, %v2032_v44, %v12667_v56  ;;  %v2061_v53 = vsel %vm12763_vm1, %v2033_v46, %v12666_v22  ;;  %7120 = vrot.lane.b32.xlu2 %v9421_v7, %s12809_s13  ;;  %v1779_v16 = vsel %vm12780_vm0, %v8014_v38, %v6678_v24  ;;  %v12828_v44 = vld [vmem:[#allocation12_spill] sm:$0xff]  ;;  %v1949_v24 = vsel %vm12780_vm0, %v12829_v61, %v12664_v55 }
 0x182   : > { %v9445_v60 = vpack.c.bf16 %v2061_v53, %v2060_v4  ;;  %7115 = vrot.lane.b32.xlu1 %v7114_v63, %s12803_s15  ;;  %v1948_v43 = vsel %vm12780_vm0, %v12828_v44, %v12665_v62  ;;  %v6457_v63 = vld [vmem:[%s12802_s1 + $0x64] sm:$0xf]  ;;  %v5842_v46 = vld [vmem:[%s12802_s1 + $0x68] sm:$0xf0]  ;;  %v1807_v44 = vsel %vm12763_vm1, %v1778_v51, %v6747_v37  ;;  %v1808_v61 = vsel %vm12763_vm1, %v1779_v16, %v6748_v21 }
 0x183   : > { %7110 = vrot.lane.b32.xlu0 %v9427_v5, %s12809_s13  ;;  %v9456_v9 = vpop.permute.xlu2 %6955  ;;  %v9473_v53 = vld [vmem:[%s8481_s25 + $0xa8] sm:$0xff]  ;;  %v5845_v55 = vor.u32 %v6457_v63, %v5842_v46  ;;  %v1976_v32 = vsel %vm12763_vm1, %v1948_v43, %v6812_v39  ;;  %v1977_v31 = vsel %vm12763_vm1, %v1949_v24, %v6813_v3  ;;  %v12832_v3 = vld [vmem:[#allocation10_spill] sm:$0xff] }
 0x184   : > { %12827 = vst [vmem:[#allocation17_spill] sm:$0xff] %v9445_v60  ;;  %6033 = vmatmul.msk.bf16.gmra.mxu3 %vm1829_vm2, %v9445_v60  ;;  %v6906_v34 = vpop.permute.xlu1 %6905  ;;  %v7134_v38 = vpack.i.bf16 %v9476_v0, %v9473_v53  ;;  %v7129_v52 = vpack.i.bf16 %v9473_v53, %v9369_v40  ;;  %v6683_v39 = vunpack.i.h.bf16 %v12832_v3  ;;  %v9522_v43 = vld [vmem:[%s8481_s25 + $0x58] sm:$0xff]  ;;  %v5906_v24 = vld [vmem:[%s12802_s1 + $0xe8] sm:$0xf0] }
 0x185   : > { %v6901_v4 = vpop.permute.xlu0 %6900  ;;  %v6908_v62 = vunpack.i.h.bf16 %v6906_v34  ;;  %v6907_v22 = vunpack.i.l.bf16 %v6906_v34  ;;  %2863 = vmatpush.bf16.msrb.mxu3 %v5845_v55  ;;  %v6913_v55 = vunpack.i.h.bf16 %v9272_v2  ;;  %v8019_v34 = vld [vmem:[%s8481_s25 + $0x250] sm:$0xff] }
 0x186   : > { %v6903_v56 = vunpack.i.h.bf16 %v6901_v4  ;;  %v6902_v14 = vunpack.i.l.bf16 %v6901_v4 }
 0x187   : > { %v1836_v21 = vsel %vm1829_vm2, %v1807_v44, %v6907_v22  ;;  %v1837_v37 = vsel %vm1829_vm2, %v1808_v61, %v6908_v62  ;;  %v6682_v22 = vunpack.i.l.bf16 %v12832_v3  ;;  %v9515_v62 = vld [vmem:[%s8481_s25 + $0x50] sm:$0xff]  ;;  %v7139_v3 = vpack.i.bf16 %v9275_v47, %v9154_v28 }
 0x188   : > { %v2004_v51 = vsel %vm1829_vm2, %v1976_v32, %v6902_v14  ;;  %v2005_v16 = vsel %vm1829_vm2, %v1977_v31, %v6903_v56  ;;  %v9494_v63 = vpack.c.bf16 %v1837_v37, %v1836_v21  ;;  %v6912_v14 = vunpack.i.l.bf16 %v9272_v2  ;;  %v12833_v32 = vld [vmem:[#allocation27_spill] sm:$0xff] }
 0x189   : > { %v9496_v46 = vpack.c.bf16 %v2005_v16, %v2004_v51  ;;  %7135 = vrot.lane.b32.xlu2 %v7134_v38, %s12805_s12  ;;  %v6753_v31 = vunpack.i.h.bf16 %v12833_v32  ;;  %v1864_v2 = vsel %vm12780_vm0, %v9515_v62, %v6817_v58  ;;  %v6489_v51 = vld [vmem:[%s12802_s1 + $0x164] sm:$0xf]  ;;  %v5970_v16 = vld [vmem:[%s12802_s1 + $0x168] sm:$0xf0]  ;;  %v6752_v28 = vunpack.i.l.bf16 %v12833_v32 }
 0x18a   : > { %12830 = vst [vmem:[#allocation9_spill] sm:$0xff] %v9494_v63  ;;  %7130 = vrot.lane.b32.xlu1 %v7129_v52, %s12803_s15  ;;  %v6473_v52 = vld [vmem:[%s12802_s1 + $0xe4] sm:$0xf]  ;;  %v1892_v6 = vsel %vm12763_vm1, %v1864_v2, %v6912_v14  ;;  %v12836_v2 = vunpack.i.h.bf16 %v9354_v23  ;;  %v6942_v32 = vunpack.i.l.bf16 %v9409_v8 }
 0x18b   : > { %12831 = vst [vmem:[#allocation13_spill] sm:$0xff] %v9496_v46  ;;  %7125 = vrot.lane.b32.xlu0 %v9253_v25, %s12805_s12  ;;  %2569 = vmatmul.bf16.gmra.mxu0 %v9494_v63  ;;  %v9512_v56 = vpop.permute.xlu2 %6970  ;;  %v1865_v25 = vsel %vm12780_vm0, %v9522_v43, %v6818_v27  ;;  %v5909_v27 = vor.u32 %v6473_v52, %v5906_v24 }
 0x18c   : > { %2727 = vmatmul.bf16.gmra.mxu2 %v9496_v46  ;;  %v6921_v58 = vpop.permute.xlu1 %6920  ;;  %v1893_v52 = vsel %vm12763_vm1, %v1865_v25, %v6913_v55  ;;  %v5973_v24 = vor.u32 %v6489_v51, %v5970_v16  ;;  %v8020_v46 = vld [vmem:[%s8481_s25 + $0x258] sm:$0xff]  ;;  %v12835_v55 = vunpack.i.l.bf16 %v9354_v23 }
 0x18d   : > { %v6916_v38 = vpop.permute.xlu0 %6915  ;;  %v6923_v44 = vunpack.i.h.bf16 %v6921_v58  ;;  %v6922_v61 = vunpack.i.l.bf16 %v6921_v58  ;;  %2942 = vmatpush.bf16.msrb.mxu0 %v5909_v27  ;;  %v9578_v27 = vld [vmem:[%s8481_s25 + $0x1c8] sm:$0xff] }
 0x18e   : > { %v6918_v21 = vunpack.i.h.bf16 %v6916_v38  ;;  %v6917_v37 = vunpack.i.l.bf16 %v6916_v38  ;;  %3021 = vmatpush.bf16.msrb.mxu1 %v5973_v24 }
 0x18f   : > { %v2034_v4 = vsel %vm12780_vm0, %v8019_v34, %v6922_v61  ;;  %v2035_v60 = vsel %vm12780_vm0, %v8020_v46, %v6923_v44  ;;  %v6943_v46 = vunpack.i.h.bf16 %v9409_v8  ;;  %v9586_v44 = vld [vmem:[%s8481_s25 + $0x2c8] sm:$0xff]  ;;  %v1780_v8 = vsel %vm12780_vm0, %v9374_v49, %v6682_v22  ;;  %v6501_v61 = vld [vmem:[%s12802_s1 + $0x1c4] sm:$0xf] }
 0x190   : > { %v1920_v58 = vsel %vm1829_vm2, %v1892_v6, %v6917_v37  ;;  %v1921_v38 = vsel %vm1829_vm2, %v1893_v52, %v6918_v21  ;;  %v2062_v14 = vsel %vm12763_vm1, %v2034_v4, %v12835_v55  ;;  %v2063_v25 = vsel %vm12763_vm1, %v2035_v60, %v12836_v2  ;;  %v9575_v4 = vld [vmem:[%s8481_s25 + $0x1c0] sm:$0xff]  ;;  %v6018_v21 = vld [vmem:[%s12802_s1 + $0x1c8] sm:$0xf0]  ;;  %v12838_v55 = vld [vmem:[#allocation21_spill] sm:$0xff] }
 0x191   : > { %v9557_v47 = vpack.c.bf16 %v1921_v38, %v1920_v58  ;;  %7150 = vrot.lane.b32.xlu2 %v9538_v29, %s12809_s13  ;;  %v9567_v34 = vpack.c.bf16 %v2063_v25, %v2062_v14  ;;  %v1809_v16 = vsel %vm12763_vm1, %v1780_v8, %v6752_v28  ;;  %v6021_v49 = vor.u32 %v6501_v61, %v6018_v21 }
 0x192   : > { %7145 = vrot.lane.b32.xlu1 %v9308_v59, %s12805_s12  ;;  %v1781_v59 = vsel %vm12780_vm0, %v9381_v36, %v6683_v39  ;;  %v9606_v52 = vpack.i.bf16 %v9578_v27, %v9575_v4  ;;  %v7154_v24 = vpack.i.bf16 %v9586_v44, %v9500_v12  ;;  %v1838_v58 = vsel %vm1829_vm2, %v1809_v16, %v6942_v32  ;;  %v9644_v16 = vld [vmem:[%s8481_s25 + $0x60] sm:$0xff] }
 0x193   : > { %12834 = vst [vmem:[#allocation18_spill] sm:$0xff] %v9557_v47  ;;  %7140 = vrot.lane.b32.xlu0 %v7139_v3, %s12803_s15  ;;  %2648 = vmatmul.bf16.gmra.mxu1 %v9557_v47  ;;  %v9583_v60 = vpop.permute.xlu2 %6985  ;;  %v1810_v3 = vsel %vm12763_vm1, %v1781_v59, %v6753_v31  ;;  %v8021_v31 = vld [vmem:[%s8481_s25 + $0x158] sm:$0xff]  ;;  %v12839_v2 = vunpack.i.l.bf16 %v9286_v18  ;;  %v12840_v25 = vunpack.i.h.bf16 %v9286_v18 }
 0x194   : > { %12837 = vst [vmem:[#allocation12_spill] sm:$0xff] %v9567_v34  ;;  %6034 = vmatmul.msk.bf16.gmra.mxu3 %vm1829_vm2, %v9567_v34  ;;  %v6936_v37 = vpop.permute.xlu1 %6935  ;;  %v1839_v38 = vsel %vm1829_vm2, %v1810_v3, %v6943_v46  ;;  %3102 = vmatpush.bf16.msrb.mxu2 %v6021_v49  ;;  %v12843_v3 = vunpack.i.l.bf16 %v9284_v15 }
 0x195   : > { %v9598_v51 = vpop.permute.xlu0 %6930  ;;  %v6938_v22 = vunpack.i.h.bf16 %v6936_v37  ;;  %v6937_v6 = vunpack.i.l.bf16 %v6936_v37  ;;  %v9628_v32 = vpack.c.bf16 %v1839_v38, %v1838_v58  ;;  %v7179_v37 = vpack.i.bf16 %v9400_v17, %v9278_v45  ;;  %v6455_v38 = vld [vmem:[%s12802_s1 + $0x54] sm:$0xf]  ;;  %v9657_v45 = vld [vmem:[%s8481_s25 + $0xb8] sm:$0xff]  ;;  %v9660_v17 = vld [vmem:[%s8481_s25 + $0xc0] sm:$0xff] }
 0x196   : > { %v12674_v36 = vunpack.i.h.bf16 %v9598_v51  ;;  %v12675_v39 = vunpack.i.l.bf16 %v9598_v51  ;;  %v1866_v49 = vsel %vm12780_vm0, %v9644_v16, %v12843_v3  ;;  %v891_v3 = vld [vmem:[%s8481_s25 + $0x2d0] sm:$0xff] }
 0x197   : > { %12841 = vst [vmem:[#allocation15_spill] sm:$0xff] %v9628_v32 }
 0x198   : > { %v1950_v28 = vsel %vm12780_vm0, %v8021_v31, %v12675_v39  ;;  %v1951_v14 = vsel %vm12780_vm0, %v12838_v55, %v12674_v36  ;;  %v5834_v31 = vld [vmem:[%s12802_s1 + $0x58] sm:$0xf0]  ;;  %v7169_v55 = vpack.i.bf16 %v9657_v45, %v9476_v0 }
 0x199   : > { %v1978_v12 = vsel %vm12763_vm1, %v1950_v28, %v12839_v2  ;;  %v1979_v46 = vsel %vm12763_vm1, %v1951_v14, %v12840_v25  ;;  %7165 = vrot.lane.b32.xlu2 %v9427_v5, %s12805_s12  ;;  %v7174_v28 = vpack.i.bf16 %v9660_v17, %v9657_v45  ;;  %v9667_v14 = vld [vmem:[%s8481_s25 + $0x68] sm:$0xff]  ;;  %v12844_v2 = vunpack.i.h.bf16 %v9284_v15 }
 0x19a   : > { %v2006_v8 = vsel %vm1829_vm2, %v1978_v12, %v6937_v6  ;;  %v2007_v59 = vsel %vm1829_vm2, %v1979_v46, %v6938_v22  ;;  %7160 = vrot.lane.b32.xlu1 %v9606_v52, %s12809_s13  ;;  %v5837_v25 = vor.u32 %v6455_v38, %v5834_v31  ;;  %v6957_v46 = vunpack.i.l.bf16 %v9456_v9  ;;  %v9684_v38 = vld [vmem:[%s8481_s25 + $0x2d8] sm:$0xff] }
 0x19b   : > { %7155 = vrot.lane.b32.xlu0 %v7154_v24, %s12803_s15  ;;  %v9635_v61 = vpack.c.bf16 %v2007_v59, %v2006_v8  ;;  %2574 = vmatmul.bf16.gmra.mxu0 %v9628_v32  ;;  %v9638_v18 = vpop.permute.xlu2 %7000  ;;  %v1867_v12 = vsel %vm12780_vm0, %v9667_v14, %v12844_v2 }
 0x19c   : > { %v6951_v5 = vpop.permute.xlu1 %6950  ;;  %2864 = vmatpush.bf16.msrb.mxu3 %v5837_v25 }
 0x19d   : > { %12842 = vst [vmem:[#allocation10_spill] sm:$0xff] %v9635_v61  ;;  %v6946_v21 = vpop.permute.xlu0 %6945  ;;  %2732 = vmatmul.bf16.gmra.mxu2 %v9635_v61  ;;  %v6953_v22 = vunpack.i.h.bf16 %v6951_v5  ;;  %v6952_v6 = vunpack.i.l.bf16 %v6951_v5  ;;  %v6958_v5 = vunpack.i.h.bf16 %v9456_v9 }
 0x19e   : > { %v6948_v24 = vunpack.i.h.bf16 %v6946_v21  ;;  %v6947_v58 = vunpack.i.l.bf16 %v6946_v21 }
 0x1a0   : > { %v1894_v8 = vsel %vm12763_vm1, %v1866_v49, %v6947_v58  ;;  %v1895_v59 = vsel %vm12763_vm1, %v1867_v12, %v6948_v24  ;;  %v12846_v49 = vld [vmem:[#allocation11_spill] sm:$0xff]  ;;  %v6972_v58 = vunpack.i.l.bf16 %v9512_v56 }
 0x1a1   : > { %v1922_v21 = vsel %vm1829_vm2, %v1894_v8, %v6952_v6  ;;  %v1923_v0 = vsel %vm1829_vm2, %v1895_v59, %v6953_v22  ;;  %7180 = vrot.lane.b32.xlu2 %v7179_v37, %s12803_s15  ;;  %v6688_v24 = vunpack.i.h.bf16 %v12846_v49  ;;  %v8026_v22 = vld [vmem:[%s8481_s25 + $0x260] sm:$0xff]  ;;  %v6973_v37 = vunpack.i.h.bf16 %v9512_v56  ;;  %v12847_v56 = vld [vmem:[#allocation26_spill] sm:$0xff] }
 0x1a2   : > { %v9680_v15 = vpack.c.bf16 %v1923_v0, %v1922_v21  ;;  %7175 = vrot.lane.b32.xlu1 %v7174_v28, %s12805_s12  ;;  %v2036_v6 = vsel %vm12780_vm0, %v8026_v22, %v6957_v46  ;;  %v7194_v28 = vpack.i.bf16 %v9684_v38, %v891_v3  ;;  %v6687_v21 = vunpack.i.l.bf16 %v12846_v49 }
 0x1a3   : > { %7170 = vrot.lane.b32.xlu0 %v7169_v55, %s12803_s15  ;;  %v9690_v9 = vpop.permute.xlu2 %7015  ;;  %v8027_v55 = vld [vmem:[%s8481_s25 + $0x268] sm:$0xff]  ;;  %v6757_v0 = vunpack.i.l.bf16 %v12847_v56  ;;  %v9710_v22 = vpack.i.bf16 %v891_v3, %v9586_v44  ;;  %v6758_v44 = vunpack.i.h.bf16 %v12847_v56  ;;  %v9763_v56 = vld [vmem:[%s8481_s25 + $0x1d0] sm:$0xff] }
 0x1a4   : > { %12845 = vst [vmem:[#allocation27_spill] sm:$0xff] %v9680_v15  ;;  %2653 = vmatmul.bf16.gmra.mxu1 %v9680_v15  ;;  %v9696_v31 = vpop.permute.xlu1 %6965  ;;  %v2037_v12 = vsel %vm12780_vm0, %v8027_v55, %v6958_v5  ;;  %v8028_v55 = vld [vmem:[%s8481_s25 + $0x168] sm:$0xff]  ;;  %v9967_v15 = vld [vmem:[%s8481_s25 + $0x2f0] sm:$0xff] }
 0x1a5   : > { %v9698_v2 = vpop.permute.xlu0 %6960  ;;  %v12678_v25 = vunpack.i.h.bf16 %v9696_v31  ;;  %v12679_v8 = vunpack.i.l.bf16 %v9696_v31 }
 0x1a6   : > { %v12677_v46 = vunpack.i.h.bf16 %v9698_v2  ;;  %v12676_v59 = vunpack.i.l.bf16 %v9698_v2 }
 0x1a7   : > { %v1952_v39 = vsel %vm12780_vm0, %v8028_v55, %v12679_v8  ;;  %v1953_v49 = vsel %vm12780_vm0, %v8997_v13, %v12678_v25 }
 0x1a8   : > { %v2064_v36 = vsel %vm12763_vm1, %v2036_v6, %v12676_v59  ;;  %v2065_v5 = vsel %vm12763_vm1, %v2037_v12, %v12677_v46  ;;  %v12849_v6 = vunpack.i.l.bf16 %v9417_v42  ;;  %v12850_v12 = vunpack.i.h.bf16 %v9417_v42  ;;  %v6487_v42 = vld [vmem:[%s12802_s1 + $0x154] sm:$0xf] }
 0x1a9   : > { %v9727_v3 = vpack.c.bf16 %v2065_v5, %v2064_v36  ;;  %7195 = vrot.lane.b32.xlu2 %v7194_v28, %s12803_s15  ;;  %v6471_v36 = vld [vmem:[%s12802_s1 + $0xd4] sm:$0xf]  ;;  %v9766_v5 = vld [vmem:[%s8481_s25 + $0x1d8] sm:$0xff] }
 0x1aa   : > { %v1980_v59 = vsel %vm12763_vm1, %v1952_v39, %v12849_v6  ;;  %v1981_v46 = vsel %vm12763_vm1, %v1953_v49, %v12850_v12  ;;  %v5898_v39 = vld [vmem:[%s12802_s1 + $0xd8] sm:$0xf0]  ;;  %7190 = vrot.lane.b32.xlu1 %v9710_v22, %s12809_s13  ;;  %v6987_v6 = vunpack.i.l.bf16 %v9583_v60 }
 0x1ab   : > { %12848 = vst [vmem:[#allocation21_spill] sm:$0xff] %v9727_v3  ;;  %v2008_v55 = vsel %vm1829_vm2, %v1980_v59, %v6972_v58  ;;  %v2009_v13 = vsel %vm1829_vm2, %v1981_v46, %v6973_v37  ;;  %7185 = vrot.lane.b32.xlu0 %v9421_v7, %s12805_s12  ;;  %v1782_v37 = vsel %vm12780_vm0, %v9515_v62, %v6687_v21  ;;  %v5962_v46 = vld [vmem:[%s12802_s1 + $0x158] sm:$0xf0]  ;;  %v9760_v59 = vpop.permute.xlu2 %7030  ;;  %v6988_v21 = vunpack.i.h.bf16 %v9583_v60 }
 0x1ac   : > { %v9751_v58 = vpack.c.bf16 %v2009_v13, %v2008_v55  ;;  %v5901_v28 = vor.u32 %v6471_v36, %v5898_v39  ;;  %6035 = vmatmul.msk.bf16.gmra.mxu3 %vm1829_vm2, %v9727_v3  ;;  %v1783_v7 = vsel %vm12780_vm0, %v9522_v43, %v6688_v24  ;;  %v1811_v49 = vsel %vm12763_vm1, %v1782_v37, %v6757_v0  ;;  %v6981_v12 = vpop.permute.xlu1 %6980  ;;  %v9775_v13 = vld [vmem:[%s8481_s25 + $0xc8] sm:$0xff]  ;;  %v9785_v37 = vld [vmem:[%s8481_s25 + $0x70] sm:$0xff] }
 0x1ad   : > { %v5965_v62 = vor.u32 %v6487_v42, %v5962_v46  ;;  %v6976_v55 = vpop.permute.xlu0 %6975  ;;  %v7209_v36 = vpack.i.bf16 %v9775_v13, %v9660_v17  ;;  %v1812_v43 = vsel %vm12763_vm1, %v1783_v7, %v6758_v44  ;;  %v6983_v24 = vunpack.i.h.bf16 %v6981_v12  ;;  %v9792_v17 = vld [vmem:[%s8481_s25 + $0x78] sm:$0xff] }
 0x1ae   : > { %12851 = vst [vmem:[#allocation11_spill] sm:$0xff] %v9751_v58  ;;  %2737 = vmatmul.bf16.gmra.mxu2 %v9751_v58  ;;  %2943 = vmatpush.bf16.msrb.mxu0 %v5901_v28  ;;  %v6982_v0 = vunpack.i.l.bf16 %v6981_v12  ;;  %v6978_v39 = vunpack.i.h.bf16 %v6976_v55  ;;  %v6977_v42 = vunpack.i.l.bf16 %v6976_v55  ;;  %v9782_v60 = vpack.i.bf16 %v9766_v5, %v9763_v56 }
 0x1af   : > { %3022 = vmatpush.bf16.msrb.mxu1 %v5965_v62  ;;  %v12852_v46 = vunpack.i.l.bf16 %v9239_v48  ;;  %v12853_v44 = vunpack.i.h.bf16 %v9239_v48 }
 0x1b0   : > { %v1840_v7 = vsel %vm1829_vm2, %v1811_v49, %v6977_v42  ;;  %v1841_v62 = vsel %vm1829_vm2, %v1812_v43, %v6978_v39  ;;  %v12856_v43 = vld [vmem:[#allocation20_spill] sm:$0xff]  ;;  %v9825_v39 = vld [vmem:[%s8481_s25 + $0xd0] sm:$0xff] }
 0x1b1   : > { %v1868_v25 = vsel %vm12780_vm0, %v9785_v37, %v12852_v46  ;;  %v1869_v28 = vsel %vm12780_vm0, %v9792_v17, %v12853_v44  ;;  %v9802_v8 = vpack.c.bf16 %v1841_v62, %v1840_v7  ;;  %7210 = vrot.lane.b32.xlu2 %v7209_v36, %s12803_s15  ;;  %v7214_v42 = vpack.i.bf16 %v9825_v39, %v9775_v13  ;;  %v8033_v7 = vld [vmem:[%s8481_s25 + $0x270] sm:$0xff] }
 0x1b2   : > { %v1896_v12 = vsel %vm12763_vm1, %v1868_v25, %v6982_v0  ;;  %v1897_v55 = vsel %vm12763_vm1, %v1869_v28, %v6983_v24  ;;  %7205 = vrot.lane.b32.xlu1 %v9538_v29, %s12805_s12  ;;  %v6692_v24 = vunpack.i.l.bf16 %v12856_v43  ;;  %v7219_v0 = vpack.i.bf16 %v9575_v4, %v9403_v50 }
 0x1b3   : > { %12854 = vst [vmem:[#allocation26_spill] sm:$0xff] %v9802_v8  ;;  %v1924_v58 = vsel %vm1829_vm2, %v1896_v12, %v6987_v6  ;;  %v1925_v46 = vsel %vm1829_vm2, %v1897_v55, %v6988_v21  ;;  %7200 = vrot.lane.b32.xlu0 %v9782_v60, %s12809_s13  ;;  %2579 = vmatmul.bf16.gmra.mxu0 %v9802_v8  ;;  %v9815_v25 = vpop.permute.xlu2 %7045  ;;  %v12688_v44 = vunpack.i.h.bf16 %v9638_v18  ;;  %v12684_v28 = vunpack.i.l.bf16 %v9638_v18  ;;  %v8034_v12 = vld [vmem:[%s8481_s25 + $0x278] sm:$0xff] }
 0x1b4   : > { %v9807_v48 = vpack.c.bf16 %v1925_v46, %v1924_v58  ;;  %v9817_v49 = vpop.permute.xlu1 %6995  ;;  %v6693_v50 = vunpack.i.h.bf16 %v12856_v43  ;;  %v893_v43 = vld [vmem:[%s8481_s25 + $0x2e0] sm:$0xff] }
 0x1b5   : > { %v6991_v21 = vpop.permute.xlu0 %6990  ;;  %v12681_v58 = vunpack.i.h.bf16 %v9817_v49  ;;  %v12682_v6 = vunpack.i.l.bf16 %v9817_v49 }
 0x1b6   : > { %12855 = vst [vmem:[#allocation29_spill] sm:$0xff] %v9807_v48  ;;  %2658 = vmatmul.bf16.gmra.mxu1 %v9807_v48  ;;  %v6993_v36 = vunpack.i.h.bf16 %v6991_v21  ;;  %v6992_v29 = vunpack.i.l.bf16 %v6991_v21 }
 0x1b8   : > { %v2038_v62 = vsel %vm12780_vm0, %v8033_v7, %v6992_v29  ;;  %v2039_v55 = vsel %vm12780_vm0, %v8034_v12, %v6993_v36  ;;  %v9847_v29 = vld [vmem:[%s8481_s25 + $0x1e0] sm:$0xff]  ;;  %v862_v7 = vld [vmem:[%s8481_s25 + $0x1e8] sm:$0xff]  ;;  %v8035_v12 = vld [vmem:[%s8481_s25 + $0x178] sm:$0xff] }
 0x1b9   : > { %v2066_v4 = vsel %vm12763_vm1, %v2038_v62, %v12682_v6  ;;  %v2067_v46 = vsel %vm12763_vm1, %v2039_v55, %v12681_v58  ;;  %7225 = vrot.lane.b32.xlu2 %v9606_v52, %s12805_s12  ;;  %v9858_v62 = vld [vmem:[%s8481_s25 + $0x2e8] sm:$0xff]  ;;  %v1954_v52 = vsel %vm12780_vm0, %v8035_v12, %v12684_v28  ;;  %v8036_v55 = vld [vmem:[%s8481_s25 + $0x180] sm:$0xff]  ;;  %v1785_v12 = vsel %vm12780_vm0, %v9667_v14, %v6693_v50 }
 0x1ba   : > { %v9844_v21 = vpack.c.bf16 %v2067_v46, %v2066_v4  ;;  %7220 = vrot.lane.b32.xlu1 %v7219_v0, %s12803_s15  ;;  %v1955_v0 = vsel %vm12780_vm0, %v8036_v55, %v12688_v44  ;;  %v7018_v4 = vunpack.i.h.bf16 %v9690_v9  ;;  %v7017_v46 = vunpack.i.l.bf16 %v9690_v9 }
 0x1bb   : > { %7215 = vrot.lane.b32.xlu0 %v7214_v42, %s12805_s12  ;;  %v9854_v36 = vpop.permute.xlu2 %7060  ;;  %v1784_v42 = vsel %vm12780_vm0, %v9644_v16, %v6692_v24  ;;  %v7234_v55 = vpack.i.bf16 %v9858_v62, %v893_v43  ;;  %v9879_v16 = vpack.i.bf16 %v893_v43, %v9684_v38  ;;  %v12858_v24 = vunpack.i.l.bf16 %v9354_v23 }
 0x1bc   : > { %12857 = vst [vmem:[#allocation20_spill] sm:$0xff] %v9844_v21  ;;  %6036 = vmatmul.msk.bf16.gmra.mxu3 %vm1829_vm2, %v9844_v21  ;;  %v7011_v58 = vpop.permute.xlu1 %7010  ;;  %v9873_v21 = vpack.i.bf16 %v862_v7, %v9847_v29  ;;  %v12859_v44 = vunpack.i.h.bf16 %v9354_v23 }
 0x1bd   : > { %v7006_v6 = vpop.permute.xlu0 %7005  ;;  %v7013_v28 = vunpack.i.h.bf16 %v7011_v58  ;;  %v7012_v48 = vunpack.i.l.bf16 %v7011_v58  ;;  %v1982_v9 = vsel %vm12763_vm1, %v1954_v52, %v12858_v24 }
 0x1be   : > { %v7008_v3 = vunpack.i.h.bf16 %v7006_v6  ;;  %v7007_v8 = vunpack.i.l.bf16 %v7006_v6  ;;  %v1983_v7 = vsel %vm12763_vm1, %v1955_v0, %v12859_v44  ;;  %v5826_v44 = vld [vmem:[%s12802_s1 + $0x48] sm:$0xf0]  ;;  %v6469_v0 = vld [vmem:[%s12802_s1 + $0xc4] sm:$0xf] }
 0x1bf   : > { %v1813_v58 = vsel %vm12763_vm1, %v1784_v42, %v7012_v48  ;;  %v1814_v6 = vsel %vm12763_vm1, %v1785_v12, %v7013_v28  ;;  %v5890_v42 = vld [vmem:[%s12802_s1 + $0xc8] sm:$0xf0]  ;;  %v9925_v12 = vld [vmem:[%s8481_s25 + $0xd8] sm:$0xff] }
 0x1c0   : > { %v2010_v61 = vsel %vm1829_vm2, %v1982_v9, %v7007_v8  ;;  %v2011_v14 = vsel %vm1829_vm2, %v1983_v7, %v7008_v3  ;;  %v1842_v38 = vsel %vm1829_vm2, %v1813_v58, %v7017_v46  ;;  %v1843_v43 = vsel %vm1829_vm2, %v1814_v6, %v7018_v4  ;;  %v6499_v8 = vld [vmem:[%s12802_s1 + $0x1b4] sm:$0xf]  ;;  %v6453_v3 = vld [vmem:[%s12802_s1 + $0x44] sm:$0xf] }
 0x1c1   : > { %v9891_v50 = vpack.c.bf16 %v2011_v14, %v2010_v61  ;;  %7240 = vrot.lane.b32.xlu2 %v9873_v21, %s12809_s13  ;;  %v9897_v23 = vpack.c.bf16 %v1843_v43, %v1842_v38  ;;  %v6010_v61 = vld [vmem:[%s12802_s1 + $0x1b8] sm:$0xf0]  ;;  %v5829_v52 = vor.u32 %v6453_v3, %v5826_v44  ;;  %v5893_v9 = vor.u32 %v6469_v0, %v5890_v42  ;;  %v9935_v43 = vld [vmem:[%s8481_s25 + $0x80] sm:$0xff]  ;;  %v9942_v3 = vld [vmem:[%s8481_s25 + $0x88] sm:$0xff] }
 0x1c2   : > { %7235 = vrot.lane.b32.xlu1 %v7234_v55, %s12803_s15  ;;  %v6013_v48 = vor.u32 %v6499_v8, %v6010_v61  ;;  %v9928_v55 = vld [vmem:[%s8481_s25 + $0xe0] sm:$0xff]  ;;  %v7249_v38 = vpack.i.bf16 %v9925_v12, %v9825_v39  ;;  %v12862_v8 = vunpack.i.l.bf16 %v9598_v51  ;;  %v5954_v0 = vld [vmem:[%s12802_s1 + $0x148] sm:$0xf0]  ;;  %v7032_v42 = vunpack.i.l.bf16 %v9760_v59 }
 0x1c3   : > { %12860 = vst [vmem:[#allocation30_spill] sm:$0xff] %v9891_v50  ;;  %7230 = vrot.lane.b32.xlu0 %v9879_v16, %s12809_s13  ;;  %2742 = vmatmul.bf16.gmra.mxu2 %v9891_v50  ;;  %v9916_v28 = vpop.permute.xlu2 %7075  ;;  %v7254_v24 = vpack.i.bf16 %v9928_v55, %v9925_v12 }
 0x1c4   : > { %12861 = vst [vmem:[#allocation31_spill] sm:$0xff] %v9897_v23  ;;  %2584 = vmatmul.bf16.gmra.mxu0 %v9897_v23  ;;  %v7026_v4 = vpop.permute.xlu1 %7025  ;;  %3103 = vmatpush.bf16.msrb.mxu2 %v6013_v48  ;;  %v1870_v61 = vsel %vm12780_vm0, %v9935_v43, %v12862_v8  ;;  %v12863_v48 = vunpack.i.h.bf16 %v9598_v51  ;;  %v7033_v8 = vunpack.i.h.bf16 %v9760_v59 }
 0x1c5   : > { %v7021_v46 = vpop.permute.xlu0 %7020  ;;  %v7028_v7 = vunpack.i.h.bf16 %v7026_v4  ;;  %v7027_v14 = vunpack.i.l.bf16 %v7026_v4  ;;  %2865 = vmatpush.bf16.msrb.mxu3 %v5829_v52  ;;  %2944 = vmatpush.bf16.msrb.mxu0 %v5893_v9  ;;  %v6485_v52 = vld [vmem:[%s12802_s1 + $0x144] sm:$0xf]  ;;  %v2198_v4 = vld [vmem:[%s12864_s2] sm:$0x3] }
 0x1c6   : > { %v7023_v58 = vunpack.i.h.bf16 %v7021_v46  ;;  %v7022_v6 = vunpack.i.l.bf16 %v7021_v46  ;;  %v1871_v44 = vsel %vm12780_vm0, %v9942_v3, %v12863_v48  ;;  %v5957_v9 = vor.u32 %v6485_v52, %v5954_v0 }
 0x1c7   : > { %v9969_v34 = vperm.slane %v2198_v4, 0  ;;  %v2555_v59 = vpop.f32.mrf.mxu0 }
 0x1c8   : > { %v1898_v51 = vsel %vm12763_vm1, %v1870_v61, %v7022_v6  ;;  %v1899_v46 = vsel %vm12763_vm1, %v1871_v44, %v7023_v58  ;;  %3023 = vmatpush.bf16.msrb.mxu1 %v5957_v9  ;;  %v7047_v58 = vunpack.i.l.bf16 %v9815_v25  ;;  %v8042_v61 = vld [vmem:[%s8481_s25 + $0x288] sm:$0xff] }
 0x1c9   : > { %v1926_v48 = vsel %vm1829_vm2, %v1898_v51, %v7027_v14  ;;  %v1927_v50 = vsel %vm1829_vm2, %v1899_v46, %v7028_v7  ;;  %7255 = vrot.lane.b32.xlu2 %v7254_v24, %s12805_s12  ;;  %v8041_v7 = vld [vmem:[%s8481_s25 + $0x280] sm:$0xff]  ;;  %v7048_v24 = vunpack.i.h.bf16 %v9815_v25  ;;  %v2041_v44 = vsel %vm12780_vm0, %v8042_v61, %v7033_v8  ;;  %v8043_v9 = vld [vmem:[%s8481_s25 + $0x188] sm:$0xff] }
 0x1ca   : > { %v9964_v23 = vpack.c.bf16 %v1927_v50, %v1926_v48  ;;  %7250 = vrot.lane.b32.xlu1 %v7249_v38, %s12803_s15  ;;  %v2040_v50 = vsel %vm12780_vm0, %v8041_v7, %v7032_v42  ;;  %v2556_v25 = vadd.f32 %v2555_v59, %v9969_v34  ;;  %v7259_v51 = vpack.i.bf16 %v9763_v56, %v9578_v27  ;;  %v8044_v48 = vld [vmem:[%s8481_s25 + $0x190] sm:$0xff] }
 0x1cb   : > { %7245 = vrot.lane.b32.xlu0 %v9710_v22, %s12805_s12  ;;  %v9975_v14 = vpop.permute.xlu2 %7090  ;;  %v7269_v22 = vpack.i.bf16 %v9967_v15, %v9858_v62  ;;  %v12867_v56 = vunpack.i.l.bf16 %v9698_v2  ;;  %v12868_v61 = vunpack.i.h.bf16 %v9698_v2 }
 0x1cc   : > { %12865 = vst [vmem:[#allocation32_spill] sm:$0xff] %v9964_v23  ;;  %2663 = vmatmul.bf16.gmra.mxu1 %v9964_v23  ;;  %v9981_v6 = vpop.permute.xlu1 %7040 }
 0x1cd   : > { %v9983_v38 = vpop.permute.xlu0 %7035  ;;  %v12695_v52 = vunpack.i.h.bf16 %v9981_v6  ;;  %v12696_v0 = vunpack.i.l.bf16 %v9981_v6 }
 0x1ce   : > { %v12694_v42 = vunpack.i.h.bf16 %v9983_v38  ;;  %v12697_v4 = vunpack.i.l.bf16 %v9983_v38 }
 0x1cf   : > { %v1956_v8 = vsel %vm12780_vm0, %v8043_v9, %v12696_v0  ;;  %v1957_v59 = vsel %vm12780_vm0, %v8044_v48, %v12695_v52  ;;  %v2713_v52 = vpop.f32.mrf.mxu2 }
 0x1d0   : > { %v2068_v62 = vsel %vm12763_vm1, %v2040_v50, %v12697_v4  ;;  %v2069_v46 = vsel %vm12763_vm1, %v2041_v44, %v12694_v42  ;;  %v1984_v50 = vsel %vm12763_vm1, %v1956_v8, %v12867_v56  ;;  %v1985_v44 = vsel %vm12763_vm1, %v1957_v59, %v12868_v61 }
 0x1d1   : > { %v2634_v7 = vpop.f32.mrf.mxu1  ;;  %v10010_v27 = vpack.c.bf16 %v2069_v46, %v2068_v62  ;;  %7270 = vrot.lane.b32.xlu2 %v7269_v22, %s12809_s13  ;;  %v2012_v9 = vsel %vm1829_vm2, %v1984_v50, %v7047_v58  ;;  %v2013_v48 = vsel %vm1829_vm2, %v1985_v44, %v7048_v24  ;;  %v12869_v62 = vld [vmem:[#allocation19_spill] sm:$0xff]  ;;  %v10033_v24 = vld [vmem:[%s8481_s25 + $0x1f0] sm:$0xff]  ;;  %v864_v22 = vld [vmem:[%s8481_s25 + $0x1f8] sm:$0xff] }
 0x1d2   : > { %v2635_v42 = vadd.f32 %v2634_v7, %v2556_v25  ;;  %v6698_v46 = vunpack.i.h.bf16 %v12869_v62  ;;  %7265 = vrot.lane.b32.xlu1 %v9782_v60, %s12805_s12  ;;  %v10025_v2 = vpack.c.bf16 %v2013_v48, %v2012_v9  ;;  %v6697_v8 = vunpack.i.l.bf16 %v12869_v62  ;;  %v2792_v25 = vpop.f32.mrf.mxu3  ;;  %v896_v7 = vld [vmem:[%s8481_s25 + $0x2f8] sm:$0xff] }
 0x1d3   : > { %12866 = vst [vmem:[#allocation33_spill] sm:$0xff] %v10010_v27  ;;  %7260 = vrot.lane.b32.xlu0 %v7259_v51, %s12803_s15  ;;  %6037 = vmatmul.msk.bf16.gmra.mxu3 %vm1829_vm2, %v10010_v27  ;;  %v10030_v58 = vpop.permute.xlu2 %7105  ;;  %v7274_v9 = vpack.i.bf16 %v896_v7, %v9967_v15  ;;  %v7063_v15 = vunpack.i.h.bf16 %v9854_v36 }
 0x1d4   : > { %12870 = vst [vmem:[#allocation19_spill] sm:$0xff] %v10025_v2  ;;  %v2714_v59 = vadd.f32 %v2713_v52, %v2635_v42  ;;  %v7056_v56 = vpop.permute.xlu1 %7055  ;;  %2747 = vmatmul.bf16.gmra.mxu2 %v10025_v2  ;;  %v7279_v42 = vpack.i.bf16 %v864_v22, %v10033_v24  ;;  %v1787_v48 = vsel %vm12780_vm0, %v9792_v17, %v6698_v46  ;;  %v10059_v46 = vld [vmem:[%s8481_s25 + $0xe8] sm:$0xff]  ;;  %v12880_v2 = vunpack.i.h.bf16 %v9817_v49 }
 0x1d5   : > { %v7051_v50 = vpop.permute.xlu0 %7050  ;;  %v7058_v51 = vunpack.i.h.bf16 %v7056_v56  ;;  %v7057_v61 = vunpack.i.l.bf16 %v7056_v56  ;;  %v1786_v62 = vsel %vm12780_vm0, %v9785_v37, %v6697_v8  ;;  %v7062_v37 = vunpack.i.l.bf16 %v9854_v36  ;;  %v831_v8 = vld [vmem:[%s8481_s25 + $0xf0] sm:$0xff] }
 0x1d6   : > { %v10038_v60 = vadd.f32 %v2792_v25, %v2714_v59  ;;  %v7053_v44 = vunpack.i.h.bf16 %v7051_v50  ;;  %v7052_v52 = vunpack.i.l.bf16 %v7051_v50  ;;  %v10066_v50 = vld [vmem:[%s8481_s25 + $0x90] sm:$0xff]  ;;  %v12873_v36 = vunpack.i.h.bf16 %v9696_v31 }
 0x1d8   : > { %v1816_v0 = vsel %vm12763_vm1, %v1787_v48, %v7053_v44  ;;  %v1815_v25 = vsel %vm12763_vm1, %v1786_v62, %v7052_v52  ;;  %v1873_v44 = vsel %vm12780_vm0, %v9366_v35, %v12873_v36  ;;  %v7294_v35 = vpack.i.bf16 %v831_v8, %v10059_v46  ;;  %v10088_v36 = vpop.f32.mrf.mxu2 }
 0x1d9   : > { %v1845_v59 = vsel %vm1829_vm2, %v1816_v0, %v7058_v51  ;;  %7285 = vrot.lane.b32.xlu2 %v9879_v16, %s12805_s12  ;;  %v1844_v22 = vsel %vm1829_vm2, %v1815_v25, %v7057_v61  ;;  %v12872_v51 = vunpack.i.l.bf16 %v9696_v31  ;;  %v7299_v25 = vpack.i.bf16 %v9847_v29, %v9766_v5  ;;  %v8046_v0 = vld [vmem:[%s8481_s25 + $0x290] sm:$0xff]  ;;  %v8047_v5 = vld [vmem:[%s8481_s25 + $0x298] sm:$0xff] }
 0x1da   : > { %7280 = vrot.lane.b32.xlu1 %v7279_v42, %s12809_s13  ;;  %v10055_v17 = vpack.c.bf16 %v1845_v59, %v1844_v22  ;;  %v10076_v52 = vpop.f32.mrf.mxu3  ;;  %v10082_v59 = vpop.f32.mrf.mxu0  ;;  %v7289_v31 = vpack.i.bf16 %v10059_v46, %v9928_v55 }
 0x1db   : > { %7275 = vrot.lane.b32.xlu0 %v7274_v9, %s12803_s15  ;;  %v1872_v61 = vsel %vm12780_vm0, %v10066_v50, %v12872_v51  ;;  %v10078_v48 = vpop.permute.xlu2 %7120  ;;  %v1901_v51 = vsel %vm12763_vm1, %v1873_v44, %v7063_v15  ;;  %v12874_v15 = vunpack.i.l.bf16 %v9916_v28  ;;  %v12875_v44 = vunpack.i.h.bf16 %v9916_v28 }
 0x1dc   : > { %12871 = vst [vmem:[#allocation34_spill] sm:$0xff] %v10055_v17  ;;  %2589 = vmatmul.bf16.gmra.mxu0 %v10055_v17  ;;  %v7071_v16 = vpop.permute.xlu1 %7070 }
 0x1dd   : > { %v7066_v56 = vpop.permute.xlu0 %7065  ;;  %v7073_v42 = vunpack.i.h.bf16 %v7071_v16  ;;  %v7072_v9 = vunpack.i.l.bf16 %v7071_v16  ;;  %v1900_v16 = vsel %vm12763_vm1, %v1872_v61, %v7062_v37 }
 0x1de   : > { %v7068_v62 = vunpack.i.h.bf16 %v7066_v56  ;;  %v7067_v22 = vunpack.i.l.bf16 %v7066_v56  ;;  %v10096_v56 = vpop.f32.mrf.mxu1 }
 0x1df   : > { %v2042_v7 = vsel %vm12780_vm0, %v8046_v0, %v7072_v9  ;;  %v2043_v29 = vsel %vm12780_vm0, %v8047_v5, %v7073_v42  ;;  %v6451_v42 = vld [vmem:[%s12802_s1 + $0x34] sm:$0xf]  ;;  %v5818_v9 = vld [vmem:[%s12802_s1 + $0x38] sm:$0xf0] }
 0x1e0   : > { %v1929_v4 = vsel %vm1829_vm2, %v1901_v51, %v7068_v62  ;;  %v1928_v55 = vsel %vm1829_vm2, %v1900_v16, %v7067_v22  ;;  %v2070_v8 = vsel %vm12763_vm1, %v2042_v7, %v12874_v15  ;;  %v2071_v37 = vsel %vm12763_vm1, %v2043_v29, %v12875_v44  ;;  %v6497_v7 = vld [vmem:[%s12802_s1 + $0x1a4] sm:$0xf]  ;;  %v6002_v62 = vld [vmem:[%s12802_s1 + $0x1a8] sm:$0xf0]  ;;  %v12878_v15 = vld [vmem:[#allocation14_spill] sm:$0xff] }
 0x1e1   : > { %7300 = vrot.lane.b32.xlu2 %v7299_v25, %s12803_s15  ;;  %v10106_v61 = vpack.c.bf16 %v1929_v4, %v1928_v55  ;;  %v10108_v0 = vpack.c.bf16 %v2071_v37, %v2070_v8  ;;  %v5821_v4 = vor.u32 %v6451_v42, %v5818_v9  ;;  %v6005_v25 = vor.u32 %v6497_v7, %v6002_v62  ;;  %v8048_v42 = vld [vmem:[%s8481_s25 + $0x198] sm:$0xff]  ;;  %v8049_v7 = vld [vmem:[%s8481_s25 + $0x1a0] sm:$0xff] }
 0x1e2   : > { %7295 = vrot.lane.b32.xlu1 %v7294_v35, %s12805_s12  ;;  %v10133_v55 = vpop.f32.mrf.mxu0  ;;  %v6702_v8 = vunpack.i.l.bf16 %v12878_v15  ;;  %v6703_v62 = vunpack.i.h.bf16 %v12878_v15 }
 0x1e3   : > { %12876 = vst [vmem:[#allocation35_spill] sm:$0xff] %v10106_v61  ;;  %7290 = vrot.lane.b32.xlu0 %v7289_v31, %s12803_s15  ;;  %2668 = vmatmul.bf16.gmra.mxu1 %v10106_v61  ;;  %v10129_v31 = vpop.f32.mrf.mxu3  ;;  %v10136_v44 = vpop.permute.xlu2 %7135 }
 0x1e4   : > { %12877 = vst [vmem:[#allocation36_spill] sm:$0xff] %v10108_v0  ;;  %6038 = vmatmul.msk.bf16.gmra.mxu3 %vm1829_vm2, %v10108_v0  ;;  %v7086_v22 = vpop.permute.xlu1 %7085  ;;  %3104 = vmatpush.bf16.msrb.mxu2 %v6005_v25 }
 0x1e5   : > { %v10127_v51 = vpop.permute.xlu0 %7080  ;;  %2866 = vmatpush.bf16.msrb.mxu3 %v5821_v4  ;;  %v7088_v35 = vunpack.i.h.bf16 %v7086_v22  ;;  %v7087_v16 = vunpack.i.l.bf16 %v7086_v22  ;;  %v12879_v22 = vunpack.i.l.bf16 %v9817_v49  ;;  %v6467_v49 = vld [vmem:[%s12802_s1 + $0xb4] sm:$0xf] }
 0x1e6   : > { %v12703_v5 = vunpack.i.h.bf16 %v10127_v51  ;;  %v12702_v29 = vunpack.i.l.bf16 %v10127_v51  ;;  %v10138_v37 = vpop.f32.mrf.mxu2 }
 0x1e8   : > { %v1958_v9 = vsel %vm12780_vm0, %v8048_v42, %v12702_v29  ;;  %v1959_v4 = vsel %vm12780_vm0, %v8049_v7, %v12703_v5  ;;  %v7093_v29 = vunpack.i.h.bf16 %v9975_v14  ;;  %v7092_v7 = vunpack.i.l.bf16 %v9975_v14 }
 0x1e9   : > { %v10149_v25 = vpop.f32.mrf.mxu1  ;;  %v1986_v0 = vsel %vm12763_vm1, %v1958_v9, %v12879_v22  ;;  %v1987_v61 = vsel %vm12763_vm1, %v1959_v4, %v12880_v2  ;;  %v1788_v9 = vsel %vm12780_vm0, %v9935_v43, %v6702_v8  ;;  %v5882_v2 = vld [vmem:[%s12802_s1 + $0xb8] sm:$0xf0]  ;;  %v1789_v43 = vsel %vm12780_vm0, %v9942_v3, %v6703_v62 }
 0x1ea   : > { %v2014_v27 = vsel %vm1829_vm2, %v1986_v0, %v7087_v16  ;;  %v2015_v42 = vsel %vm1829_vm2, %v1987_v61, %v7088_v35  ;;  %v6483_v61 = vld [vmem:[%s12802_s1 + $0x134] sm:$0xf]  ;;  %v5885_v35 = vor.u32 %v6467_v49, %v5882_v2  ;;  %v5946_v16 = vld [vmem:[%s12802_s1 + $0x138] sm:$0xf0]  ;;  %v1818_v17 = vsel %vm12763_vm1, %v1789_v43, %v7093_v29 }
 0x1eb   : > { %7305 = vrot.lane.b32.xlu0 %v9873_v21, %s12805_s12  ;;  %v10162_v15 = vpack.c.bf16 %v2015_v42, %v2014_v27  ;;  %v7108_v21 = vunpack.i.h.bf16 %v10030_v58  ;;  %v7107_v27 = vunpack.i.l.bf16 %v10030_v58  ;;  %v12882_v42 = vunpack.i.l.bf16 %v9638_v18  ;;  %v10193_v49 = vpop.f32.mrf.mxu3 }
 0x1ec   : > { %v7101_v14 = vpop.permute.xlu1 %7100  ;;  %2945 = vmatpush.bf16.msrb.mxu0 %v5885_v35  ;;  %v5949_v62 = vor.u32 %v6483_v61, %v5946_v16  ;;  %v1817_v2 = vsel %vm12763_vm1, %v1788_v9, %v7092_v7  ;;  %v12886_v35 = vld [vmem:[#allocation23_spill] sm:$0xff] }
 0x1ed   : > { %12881 = vst [vmem:[#allocation14_spill] sm:$0xff] %v10162_v15  ;;  %v7096_v0 = vpop.permute.xlu0 %7095  ;;  %2752 = vmatmul.bf16.gmra.mxu2 %v10162_v15  ;;  %v7103_v8 = vunpack.i.h.bf16 %v7101_v14  ;;  %v7102_v4 = vunpack.i.l.bf16 %v7101_v14  ;;  %v1874_v58 = vsel %vm12780_vm0, %v9369_v40, %v12882_v42  ;;  %v12883_v15 = vunpack.i.h.bf16 %v9638_v18 }
 0x1ee   : > { %v7098_v22 = vunpack.i.h.bf16 %v7096_v0  ;;  %v7097_v5 = vunpack.i.l.bf16 %v7096_v0  ;;  %v2562_v0 = vpop.f32.mrf.mxu0  ;;  %3024 = vmatpush.bf16.msrb.mxu1 %v5949_v62  ;;  %v2720_v61 = vpop.f32.mrf.mxu2  ;;  %v6707_v16 = vunpack.i.l.bf16 %v12886_v35  ;;  %v5810_v62 = vld [vmem:[%s12802_s1 + $0x28] sm:$0xf0] }
 0x1ef   : > { %v1875_v3 = vsel %vm12780_vm0, %v9473_v53, %v12883_v15  ;;  %v1902_v23 = vsel %vm12763_vm1, %v1874_v58, %v7102_v4  ;;  %v10202_v15 = vpop.permute.xlu2 %7150 }
 0x1f0   : > { %v1847_v14 = vsel %vm1829_vm2, %v1818_v17, %v7098_v22  ;;  %v1903_v40 = vsel %vm12763_vm1, %v1875_v3, %v7103_v8  ;;  %v1846_v29 = vsel %vm1829_vm2, %v1817_v2, %v7097_v5  ;;  %v1930_v18 = vsel %vm1829_vm2, %v1902_v23, %v7107_v27  ;;  %v8050_v22 = vld [vmem:[%s8481_s25 + $0x2a8] sm:$0xff]  ;;  %v6449_v3 = vld [vmem:[%s12802_s1 + $0x24] sm:$0xf] }
 0x1f1   : > { %v2641_v42 = vpop.f32.mrf.mxu1  ;;  %v1931_v53 = vsel %vm1829_vm2, %v1903_v40, %v7108_v21  ;;  %v10204_v7 = vpack.c.bf16 %v1847_v14, %v1846_v29  ;;  %v8051_v40 = vld [vmem:[%s8481_s25 + $0x2a0] sm:$0xff] }
 0x1f2   : > { %v10206_v17 = vpack.c.bf16 %v1931_v53, %v1930_v18  ;;  %v5813_v53 = vor.u32 %v6449_v3, %v5810_v62  ;;  %v8053_v3 = vld [vmem:[%s8481_s25 + $0x1b0] sm:$0xff]  ;;  %v12889_v62 = vunpack.i.h.bf16 %v10078_v48 }
 0x1f3   : > { %12884 = vst [vmem:[#allocation37_spill] sm:$0xff] %v10204_v7  ;;  %2594 = vmatmul.bf16.gmra.mxu0 %v10204_v7 }
 0x1f4   : > { %12885 = vst [vmem:[#allocation38_spill] sm:$0xff] %v10206_v17  ;;  %2673 = vmatmul.bf16.gmra.mxu1 %v10206_v17  ;;  %v10210_v9 = vpop.permute.xlu1 %7115  ;;  %2867 = vmatpush.bf16.msrb.mxu3 %v5813_v53 }
 0x1f5   : > { %v7111_v5 = vpop.permute.xlu0 %7110  ;;  %v12710_v23 = vunpack.i.h.bf16 %v10210_v9  ;;  %v12709_v21 = vunpack.i.l.bf16 %v10210_v9 }
 0x1f6   : > { %v7113_v27 = vunpack.i.h.bf16 %v7111_v5  ;;  %v7112_v43 = vunpack.i.l.bf16 %v7111_v5  ;;  %v6708_v5 = vunpack.i.h.bf16 %v12886_v35  ;;  %v12888_v35 = vunpack.i.l.bf16 %v10078_v48 }
 0x1f7   : > { %v2723_v4 = vpop.f32.mrf.mxu2 }
 0x1f8   : > { %v2045_v58 = vsel %vm12780_vm0, %v8050_v22, %v7113_v27  ;;  %v2565_v2 = vpop.f32.mrf.mxu0  ;;  %v2044_v29 = vsel %vm12780_vm0, %v8051_v40, %v7112_v43  ;;  %v2563_v27 = vadd.f32 %v2562_v0, %v9969_v34  ;;  %v2802_v22 = vpop.f32.mrf.mxu3 }
 0x1f9   : > { %v2644_v14 = vpop.f32.mrf.mxu1  ;;  %v2073_v18 = vsel %vm12763_vm1, %v2045_v58, %v12710_v23  ;;  %v2566_v8 = vadd.f32 %v2565_v2, %v9969_v34  ;;  %v2072_v17 = vsel %vm12763_vm1, %v2044_v29, %v12709_v21  ;;  %v10238_v40 = vpop.permute.xlu2 %7165  ;;  %v8052_v58 = vld [vmem:[%s8481_s25 + $0x1a8] sm:$0xff]  ;;  %v1961_v2 = vsel %vm12780_vm0, %v8053_v3, %v12889_v62  ;;  %v8054_v3 = vld [vmem:[%s8481_s25 + $0x98] sm:$0xff] }
 0x1fa   : > { %v10236_v7 = vpack.c.bf16 %v2073_v18, %v2072_v17  ;;  %v2642_v43 = vadd.f32 %v2641_v42, %v2563_v27  ;;  %v1960_v0 = vsel %vm12780_vm0, %v8052_v58, %v12888_v35  ;;  %v1790_v29 = vsel %vm12780_vm0, %v10066_v50, %v6707_v16 }
 0x1fb   : > { %v2561_v17 = vadd.f32 %v10133_v55, %v9969_v34  ;;  %v7138_v42 = vunpack.i.h.bf16 %v10136_v44  ;;  %v7137_v18 = vunpack.i.l.bf16 %v10136_v44  ;;  %v2645_v53 = vadd.f32 %v2644_v14, %v2566_v8 }
 0x1fc   : > { %12887 = vst [vmem:[#allocation23_spill] sm:$0xff] %v10236_v7  ;;  %6039 = vmatmul.msk.bf16.gmra.mxu3 %vm1829_vm2, %v10236_v7  ;;  %v7131_v27 = vpop.permute.xlu1 %7130  ;;  %v1791_v62 = vsel %vm12780_vm0, %v8054_v3, %v6708_v5  ;;  %v12890_v55 = vunpack.i.l.bf16 %v9983_v38  ;;  %v12891_v44 = vunpack.i.h.bf16 %v9983_v38  ;;  %v2721_v14 = vadd.f32 %v2720_v61, %v2642_v43 }
 0x1fd   : > { %v7126_v58 = vpop.permute.xlu0 %7125  ;;  %v7133_v35 = vunpack.i.h.bf16 %v7131_v27  ;;  %v7132_v21 = vunpack.i.l.bf16 %v7131_v27  ;;  %v2640_v50 = vadd.f32 %v10149_v25, %v2561_v17  ;;  %v2724_v63 = vadd.f32 %v2723_v4, %v2645_v53 }
 0x1fe   : > { %v7128_v23 = vunpack.i.h.bf16 %v7126_v58  ;;  %v7127_v16 = vunpack.i.l.bf16 %v7126_v58  ;;  %v1988_v32 = vsel %vm12763_vm1, %v1960_v0, %v12890_v55  ;;  %v1989_v8 = vsel %vm12763_vm1, %v1961_v2, %v12891_v44 }
 0x1ff   : > { %v1819_v27 = vsel %vm12763_vm1, %v1790_v29, %v7132_v21  ;;  %v1820_v47 = vsel %vm12763_vm1, %v1791_v62, %v7133_v35  ;;  %v5874_v21 = vld [vmem:[%s12802_s1 + $0xa8] sm:$0xf0]  ;;  %v2725_v2 = vpop.f32.mrf.mxu2 }
 0x200   : > { %v2017_v7 = vsel %vm1829_vm2, %v1989_v8, %v7128_v23  ;;  %v2567_v5 = vpop.f32.mrf.mxu0  ;;  %v2016_v25 = vsel %vm1829_vm2, %v1988_v32, %v7127_v16  ;;  %v1848_v17 = vsel %vm1829_vm2, %v1819_v27, %v7137_v18  ;;  %v1849_v0 = vsel %vm1829_vm2, %v1820_v47, %v7138_v42  ;;  %v6465_v23 = vld [vmem:[%s12802_s1 + $0xa4] sm:$0xf]  ;;  %v2804_v43 = vpop.f32.mrf.mxu3 }
 0x201   : > { %v2646_v3 = vpop.f32.mrf.mxu1  ;;  %v2568_v38 = vadd.f32 %v2567_v5, %v9969_v34  ;;  %v10272_v58 = vpack.c.bf16 %v2017_v7, %v2016_v25  ;;  %v10274_v61 = vpack.c.bf16 %v1849_v0, %v1848_v17  ;;  %v2719_v32 = vadd.f32 %v10138_v37, %v2640_v50  ;;  %v6481_v47 = vld [vmem:[%s12802_s1 + $0x124] sm:$0xf]  ;;  %v5938_v7 = vld [vmem:[%s12802_s1 + $0x128] sm:$0xf0]  ;;  %v10292_v62 = vpop.permute.xlu2 %7180  ;;  %v10296_v5 = vld [vmem:[%s8481_s25 + $0xb0] sm:$0xff] }
 0x202   : > { %v5877_v4 = vor.u32 %v6465_v23, %v5874_v21  ;;  %v5941_v42 = vor.u32 %v6481_v47, %v5938_v7  ;;  %v2800_v37 = vadd.f32 %v10193_v49, %v2721_v14  ;;  %v2803_v18 = vadd.f32 %v2802_v22, %v2724_v63  ;;  %v6495_v0 = vld [vmem:[%s12802_s1 + $0x194] sm:$0xf] }
 0x203   : > { %12892 = vst [vmem:[#allocation39_spill] sm:$0xff] %v10272_v58  ;;  %v2647_v29 = vadd.f32 %v2646_v3, %v2568_v38  ;;  %2757 = vmatmul.bf16.gmra.mxu2 %v10272_v58  ;;  %2599 = vmatmul.bf16.gmra.mxu0 %v10274_v61  ;;  %v2798_v8 = vadd.f32 %v10129_v31, %v2719_v32  ;;  %v12893_v3 = vunpack.i.l.bf16 %v9981_v6  ;;  %v12894_v49 = vunpack.i.h.bf16 %v9981_v6  ;;  %v5994_v38 = vld [vmem:[%s12802_s1 + $0x198] sm:$0xf0]  ;;  %v8064_v58 = vld [vmem:[%s8481_s25 + $0x2c8] sm:$0xff] }
 0x204   : > { %v7146_v53 = vpop.permute.xlu1 %7145  ;;  %2946 = vmatpush.bf16.msrb.mxu0 %v5877_v4  ;;  %3025 = vmatpush.bf16.msrb.mxu1 %v5941_v42  ;;  %v7153_v14 = vunpack.i.h.bf16 %v10202_v15  ;;  %v7152_v25 = vunpack.i.l.bf16 %v10202_v15  ;;  %v3184_v23 = vmax.f32 %v2800_v37, 0.0  ;;  %v5997_v21 = vor.u32 %v6495_v0, %v5994_v38  ;;  %v8058_v38 = vld [vmem:[%s8481_s25 + $0x1b8] sm:$0xff] }
 0x205   : > { %v7141_v35 = vpop.permute.xlu0 %7140  ;;  %v2726_v50 = vadd.f32 %v2725_v2, %v2647_v29  ;;  %v7148_v16 = vunpack.i.h.bf16 %v7146_v53  ;;  %v7147_v55 = vunpack.i.l.bf16 %v7146_v53  ;;  %v1876_v63 = vsel %vm12780_vm0, %v10296_v5, %v12893_v3  ;;  %v8056_v53 = vld [vmem:[%s8481_s25 + $0x2b0] sm:$0xff] }
 0x206   : > { %v7143_v44 = vunpack.i.h.bf16 %v7141_v35  ;;  %v7142_v27 = vunpack.i.l.bf16 %v7141_v35  ;;  %v1877_v22 = vsel %vm12780_vm0, %v9657_v45, %v12894_v49  ;;  %v3186_v32 = vmax.f32 %v2803_v18, 0.0  ;;  %3105 = vmatpush.bf16.msrb.mxu2 %v5997_v21  ;;  %v8057_v35 = vld [vmem:[%s8481_s25 + $0x2b8] sm:$0xff] }
 0x207   : > { %v2805_v17 = vadd.f32 %v2804_v43, %v2726_v50  ;;  %v3182_v7 = vmax.f32 %v2798_v8, 0.0  ;;  %v2046_v18 = vsel %vm12780_vm0, %v8056_v53, %v7152_v25  ;;  %v2047_v50 = vsel %vm12780_vm0, %v8057_v35, %v7153_v14 }
 0x208   : > { %v1905_v31 = vsel %vm12763_vm1, %v1877_v22, %v7143_v44  ;;  %v10315_v6 = vpop.f32.mrf.mxu0  ;;  %v1904_v45 = vsel %vm12763_vm1, %v1876_v63, %v7142_v27  ;;  %v7168_v3 = vunpack.i.h.bf16 %v10238_v40  ;;  %v7167_v63 = vunpack.i.l.bf16 %v10238_v40 }
 0x209   : > { %v1933_v15 = vsel %vm1829_vm2, %v1905_v31, %v7148_v16  ;;  %v3188_v4 = vmax.f32 %v2805_v17, 0.0  ;;  %v1932_v47 = vsel %vm1829_vm2, %v1904_v45, %v7147_v55  ;;  %v10324_v29 = vmax.f32 %v3182_v7, %v3184_v23  ;;  %v10335_v16 = vpop.f32.mrf.mxu3  ;;  %v10347_v14 = vpop.permute.xlu2 %7195  ;;  %v8059_v45 = vld [vmem:[%s8481_s25 + $0x1c0] sm:$0xff]  ;;  %v12898_v7 = vld [vmem:[#allocation22_spill] sm:$0xff] }
 0x20a   : > { %v10320_v43 = vpack.c.bf16 %v1933_v15, %v1932_v47  ;;  %v12896_v21 = vunpack.i.l.bf16 %v9916_v28  ;;  %v6713_v53 = vunpack.i.h.bf16 %v12898_v7 }
 0x20b   : > { %v10322_v2 = vmax.f32 %v3186_v32, %v3188_v4  ;;  %v12897_v4 = vunpack.i.h.bf16 %v9916_v28 }
 0x20c   : > { %2678 = vmatmul.bf16.gmra.mxu1 %v10320_v43  ;;  %v10327_v42 = vpop.permute.xlu1 %7160 }
 0x20d   : > { %v10329_v37 = vpop.permute.xlu0 %7155  ;;  %v12716_v55 = vunpack.i.h.bf16 %v10327_v42  ;;  %v12715_v44 = vunpack.i.l.bf16 %v10327_v42  ;;  %v7309_v22 = vpack.i.bf16 %v10322_v2, %v10324_v29 }
 0x20e   : > { %v12718_v8 = vunpack.i.h.bf16 %v10329_v37  ;;  %v12717_v27 = vunpack.i.l.bf16 %v10329_v37 }
 0x20f   : > { %v10343_v49 = vpop.f32.mrf.mxu2  ;;  %7310 = vrot.lane.b32.xlu1 %v7309_v22, %s8148_s16  ;;  %v1962_v23 = vsel %vm12780_vm0, %v8058_v38, %v12715_v44  ;;  %v1963_v15 = vsel %vm12780_vm0, %v8059_v45, %v12716_v55  ;;  %v2571_v55 = vadd.f32 %v10315_v6, %v9969_v34 }
 0x210   : > { %v2074_v25 = vsel %vm12763_vm1, %v2046_v18, %v12717_v27  ;;  %v2075_v17 = vsel %vm12763_vm1, %v2047_v50, %v12718_v8  ;;  %v2572_v31 = vpop.f32.mrf.mxu0  ;;  %v2649_v40 = vpop.f32.mrf.mxu1  ;;  %v1990_v32 = vsel %vm12763_vm1, %v1962_v23, %v12896_v21  ;;  %v1991_v47 = vsel %vm12763_vm1, %v1963_v15, %v12897_v4  ;;  %v8060_v15 = vld [vmem:[%s8481_s25 + $0xa8] sm:$0xff] }
 0x211   : > { %v10356_v0 = vpack.c.bf16 %v2075_v17, %v2074_v25  ;;  %v2018_v18 = vsel %vm1829_vm2, %v1990_v32, %v7167_v63  ;;  %v2019_v35 = vsel %vm1829_vm2, %v1991_v47, %v7168_v3  ;;  %v6712_v50 = vunpack.i.l.bf16 %v12898_v7  ;;  %v10383_v4 = vpop.f32.mrf.mxu3  ;;  %v8061_v32 = vld [vmem:[%s8481_s25 + $0xa0] sm:$0xff] }
 0x212   : > { %v10378_v22 = vpack.c.bf16 %v2019_v35, %v2018_v18  ;;  %v1793_v21 = vsel %vm12780_vm0, %v8060_v15, %v6713_v53  ;;  %v6447_v53 = vld [vmem:[%s12802_s1 + $0x14] sm:$0xf]  ;;  %v7182_v15 = vunpack.i.l.bf16 %v10292_v62 }
 0x213   : > { %12895 = vst [vmem:[#allocation40_spill] sm:$0xff] %v10356_v0  ;;  %6040 = vmatmul.msk.bf16.gmra.mxu3 %vm1829_vm2, %v10356_v0  ;;  %v1792_v3 = vsel %vm12780_vm0, %v8061_v32, %v6712_v50  ;;  %v5802_v50 = vld [vmem:[%s12802_s1 + $0x18] sm:$0xf0]  ;;  %v10405_v32 = vld [vmem:[%s8481_s25 + $0xc0] sm:$0xff] }
 0x214   : > { %12899 = vst [vmem:[#allocation22_spill] sm:$0xff] %v10378_v22  ;;  %v7176_v25 = vpop.permute.xlu1 %7175  ;;  %2762 = vmatmul.bf16.gmra.mxu2 %v10378_v22 }
 0x215   : > { %v7171_v17 = vpop.permute.xlu0 %7170  ;;  %v7178_v38 = vunpack.i.h.bf16 %v7176_v25  ;;  %v7177_v28 = vunpack.i.l.bf16 %v7176_v25  ;;  %v10390_v25 = vpop.permute.xlu2 %7210 }
 0x216   : > { %v7173_v23 = vunpack.i.h.bf16 %v7171_v17  ;;  %v7172_v45 = vunpack.i.l.bf16 %v7171_v17 }
 0x217   : > { %v2730_v63 = vpop.f32.mrf.mxu2 }
 0x218   : > { %v1822_v47 = vsel %vm12763_vm1, %v1793_v21, %v7173_v23  ;;  %v2651_v7 = vpop.f32.mrf.mxu1  ;;  %v1821_v18 = vsel %vm12763_vm1, %v1792_v3, %v7172_v45  ;;  %v2575_v17 = vpop.f32.mrf.mxu0  ;;  %v7183_v23 = vunpack.i.h.bf16 %v10292_v62  ;;  %v2573_v21 = vadd.f32 %v2572_v31, %v9969_v34 }
 0x219   : > { %v1851_v35 = vsel %vm1829_vm2, %v1822_v47, %v7178_v38  ;;  %v1850_v44 = vsel %vm1829_vm2, %v1821_v18, %v7177_v28  ;;  %v5805_v38 = vor.u32 %v6447_v53, %v5802_v50  ;;  %v12901_v28 = vunpack.i.l.bf16 %v10127_v51 }
 0x21a   : > { %v10401_v45 = vpack.c.bf16 %v1851_v35, %v1850_v44  ;;  %v12902_v31 = vunpack.i.h.bf16 %v10127_v51  ;;  %v2652_v53 = vadd.f32 %v2651_v7, %v2573_v21  ;;  %v2650_v18 = vadd.f32 %v2649_v40, %v2571_v55 }
 0x21b   : > { %v1878_v3 = vsel %vm12780_vm0, %v10405_v32, %v12901_v28  ;;  %2868 = vmatpush.bf16.msrb.mxu3 %v5805_v38  ;;  %v2576_v7 = vadd.f32 %v2575_v17, %v9969_v34  ;;  %v12904_v55 = vunpack.i.h.bf16 %v10347_v14 }
 0x21c   : > { %12900 = vst [vmem:[#allocation41_spill] sm:$0xff] %v10401_v45  ;;  %2604 = vmatmul.bf16.gmra.mxu0 %v10401_v45  ;;  %v7191_v62 = vpop.permute.xlu1 %7190  ;;  %v1879_v35 = vsel %vm12780_vm0, %v9775_v13, %v12902_v31  ;;  %v1906_v47 = vsel %vm12763_vm1, %v1878_v3, %v7182_v15  ;;  %v8063_v45 = vld [vmem:[%s8481_s25 + $0x2c0] sm:$0xff] }
 0x21d   : > { %v7186_v44 = vpop.permute.xlu0 %7185  ;;  %v7193_v50 = vunpack.i.h.bf16 %v7191_v62  ;;  %v7192_v28 = vunpack.i.l.bf16 %v7191_v62  ;;  %v1907_v6 = vsel %vm12763_vm1, %v1879_v35, %v7183_v23  ;;  %v12903_v62 = vunpack.i.l.bf16 %v10347_v14  ;;  %v10440_v31 = vpop.permute.xlu2 %7225 }
 0x21e   : > { %v7188_v27 = vunpack.i.h.bf16 %v7186_v44  ;;  %v7187_v8 = vunpack.i.l.bf16 %v7186_v44  ;;  %v2731_v23 = vadd.f32 %v2730_v63, %v2652_v53  ;;  %v5866_v63 = vld [vmem:[%s12802_s1 + $0x98] sm:$0xf0]  ;;  %v2729_v35 = vadd.f32 %v10343_v49, %v2650_v18 }
 0x21f   : > { %v2048_v51 = vsel %vm12780_vm0, %v8063_v45, %v7192_v28  ;;  %v2049_v13 = vsel %vm12780_vm0, %v8064_v58, %v7193_v50  ;;  %v12905_v58 = vld [vmem:[#allocation16_spill] sm:$0xff] }
 0x220   : > { %v2733_v22 = vpop.f32.mrf.mxu2  ;;  %v1935_v0 = vsel %vm1829_vm2, %v1907_v6, %v7188_v27  ;;  %v1934_v21 = vsel %vm1829_vm2, %v1906_v47, %v7187_v8  ;;  %v2076_v15 = vsel %vm12763_vm1, %v2048_v51, %v12903_v62  ;;  %v2077_v40 = vsel %vm12763_vm1, %v2049_v13, %v12904_v55  ;;  %v2812_v27 = vpop.f32.mrf.mxu3  ;;  %v6463_v47 = vld [vmem:[%s12802_s1 + $0x94] sm:$0xf]  ;;  %v5930_v6 = vld [vmem:[%s12802_s1 + $0x118] sm:$0xf0] }
 0x221   : > { %v2654_v38 = vpop.f32.mrf.mxu1  ;;  %v10435_v3 = vpack.c.bf16 %v1935_v0, %v1934_v21  ;;  %v10437_v44 = vpack.c.bf16 %v2077_v40, %v2076_v15  ;;  %v6717_v17 = vunpack.i.l.bf16 %v12905_v58  ;;  %v2577_v8 = vpop.f32.mrf.mxu0  ;;  %v6479_v0 = vld [vmem:[%s12802_s1 + $0x114] sm:$0xf]  ;;  %v5869_v28 = vor.u32 %v6463_v47, %v5866_v63 }
 0x222   : > { %v2655_v45 = vadd.f32 %v2654_v38, %v2576_v7  ;;  %v6718_v51 = vunpack.i.h.bf16 %v12905_v58  ;;  %v2810_v13 = vadd.f32 %v10383_v4, %v2731_v23  ;;  %v5933_v62 = vor.u32 %v6479_v0, %v5930_v6  ;;  %v8065_v55 = vld [vmem:[%s8481_s25 + $0x1d0] sm:$0xff]  ;;  %v8066_v58 = vld [vmem:[%s8481_s25 + $0x1c8] sm:$0xff] }
 0x223   : > { %2683 = vmatmul.bf16.gmra.mxu1 %v10435_v3  ;;  %6041 = vmatmul.msk.bf16.gmra.mxu3 %vm1829_vm2, %v10437_v44  ;;  %v2578_v15 = vadd.f32 %v2577_v8, %v9969_v34  ;;  %v1794_v4 = vsel %vm12780_vm0, %v10296_v5, %v6717_v17  ;;  %v7212_v23 = vunpack.i.l.bf16 %v10390_v25  ;;  %v12906_v8 = vunpack.i.h.bf16 %v10210_v9 }
 0x224   : > { %v7206_v53 = vpop.permute.xlu1 %7205  ;;  %v2734_v18 = vadd.f32 %v2733_v22, %v2655_v45  ;;  %2947 = vmatpush.bf16.msrb.mxu0 %v5869_v28  ;;  %v2808_v22 = vadd.f32 %v10335_v16, %v2729_v35  ;;  %3026 = vmatpush.bf16.msrb.mxu1 %v5933_v62  ;;  %v12907_v28 = vunpack.i.l.bf16 %v10210_v9  ;;  %v8067_v16 = vld [vmem:[%s8481_s25 + $0xb8] sm:$0xff]  ;;  %v7213_v6 = vunpack.i.h.bf16 %v10390_v25 }
 0x225   : > { %v10455_v50 = vpop.permute.xlu0 %7200  ;;  %v7208_v7 = vunpack.i.h.bf16 %v7206_v53  ;;  %v7207_v38 = vunpack.i.l.bf16 %v7206_v53  ;;  %v1795_v35 = vsel %vm12780_vm0, %v8067_v16, %v6718_v51  ;;  %v7228_v25 = vunpack.i.h.bf16 %v10440_v31 }
 0x226   : > { %v12724_v49 = vunpack.i.h.bf16 %v10455_v50  ;;  %v12723_v21 = vunpack.i.l.bf16 %v10455_v50 }
 0x228   : > { %v1965_v40 = vsel %vm12780_vm0, %v8065_v55, %v12724_v49  ;;  %v1964_v47 = vsel %vm12780_vm0, %v8066_v58, %v12723_v21  ;;  %v2735_v0 = vpop.f32.mrf.mxu2  ;;  %v3192_v55 = vmax.f32 %v2810_v13, 0.0  ;;  %v2813_v58 = vadd.f32 %v2812_v27, %v2734_v18  ;;  %v2814_v49 = vpop.f32.mrf.mxu3 }
 0x229   : > { %v2656_v45 = vpop.f32.mrf.mxu1  ;;  %v1993_v63 = vsel %vm12763_vm1, %v1965_v40, %v12906_v8  ;;  %v1992_v5 = vsel %vm12763_vm1, %v1964_v47, %v12907_v28  ;;  %v7227_v27 = vunpack.i.l.bf16 %v10440_v31 }
 0x22a   : > { %v2657_v53 = vadd.f32 %v2656_v45, %v2578_v15  ;;  %v2021_v17 = vsel %vm1829_vm2, %v1993_v63, %v7208_v7  ;;  %v2020_v21 = vsel %vm1829_vm2, %v1992_v5, %v7207_v38  ;;  %v12908_v15 = vunpack.i.l.bf16 %v10078_v48 }
 0x22b   : > { %v10488_v62 = vpack.c.bf16 %v2021_v17, %v2020_v21  ;;  %v12909_v7 = vunpack.i.h.bf16 %v10078_v48  ;;  %v3190_v45 = vmax.f32 %v2808_v22, 0.0  ;;  %v1823_v38 = vsel %vm12763_vm1, %v1794_v4, %v7212_v23  ;;  %v10501_v21 = vpop.permute.xlu2 %7240  ;;  %v5986_v23 = vld [vmem:[%s12802_s1 + $0x188] sm:$0xf0] }
 0x22c   : > { %v2736_v40 = vadd.f32 %v2735_v0, %v2657_v53  ;;  %v1880_v9 = vsel %vm12780_vm0, %v9825_v39, %v12908_v15  ;;  %v7221_v13 = vpop.permute.xlu1 %7220  ;;  %v1824_v0 = vsel %vm12763_vm1, %v1795_v35, %v7213_v6 }
 0x22d   : > { %v1881_v51 = vsel %vm12780_vm0, %v9925_v12, %v12909_v7  ;;  %v7216_v18 = vpop.permute.xlu0 %7215  ;;  %v7223_v8 = vunpack.i.h.bf16 %v7221_v13  ;;  %v7222_v63 = vunpack.i.l.bf16 %v7221_v13  ;;  %2767 = vmatmul.bf16.gmra.mxu2 %v10488_v62  ;;  %v10504_v48 = vmax.f32 %v3190_v45, %v3192_v55 }
 0x22e   : > { %v2815_v47 = vadd.f32 %v2814_v49, %v2736_v40  ;;  %v7218_v39 = vunpack.i.h.bf16 %v7216_v18  ;;  %v3194_v12 = vmax.f32 %v2813_v58, 0.0  ;;  %v7217_v22 = vunpack.i.l.bf16 %v7216_v18  ;;  %v6493_v49 = vld [vmem:[%s12802_s1 + $0x184] sm:$0xf]  ;;  %v5794_v40 = vld [vmem:[%s12802_s1 + $0x8] sm:$0xf0] }
 0x22f   : > { %12910 = vst [vmem:[#allocation16_spill] sm:$0xff] %v10504_v48  ;;  %v1908_v28 = vsel %vm12763_vm1, %v1880_v9, %v7222_v63  ;;  %v1909_v4 = vsel %vm12763_vm1, %v1881_v51, %v7223_v8  ;;  %v5989_v55 = vor.u32 %v6493_v49, %v5986_v23  ;;  %v6445_v58 = vld [vmem:[%s12802_s1 + $0x4] sm:$0xf]  ;;  %v7242_v49 = vunpack.i.l.bf16 %v10501_v21  ;;  %v8069_v23 = vld [vmem:[%s8481_s25 + $0x2d0] sm:$0xff] }
 0x230   : > { %v3196_v53 = vmax.f32 %v2815_v47, 0.0  ;;  %v1853_v31 = vsel %vm1829_vm2, %v1824_v0, %v7218_v39  ;;  %v2580_v5 = vpop.f32.mrf.mxu0  ;;  %v1852_v16 = vsel %vm1829_vm2, %v1823_v38, %v7217_v22  ;;  %v1936_v35 = vsel %vm1829_vm2, %v1908_v28, %v7227_v27  ;;  %v8068_v28 = vld [vmem:[%s8481_s25 + $0x2d8] sm:$0xff] }
 0x231   : > { %v1937_v6 = vsel %vm1829_vm2, %v1909_v4, %v7228_v25  ;;  %v2581_v9 = vadd.f32 %v2580_v5, %v9969_v34  ;;  %v10528_v7 = vpack.c.bf16 %v1853_v31, %v1852_v16  ;;  %3106 = vmatpush.bf16.msrb.mxu2 %v5989_v55  ;;  %v5797_v45 = vor.u32 %v6445_v58, %v5794_v40  ;;  %v2738_v25 = vpop.f32.mrf.mxu2  ;;  %v12912_v55 = vld [vmem:[#allocation25_spill] sm:$0xff] }
 0x232   : > { %v10525_v15 = vmax.f32 %v3194_v12, %v3196_v53  ;;  %v10530_v51 = vpack.c.bf16 %v1937_v6, %v1936_v35  ;;  %v2817_v12 = vpop.f32.mrf.mxu3  ;;  %v7243_v0 = vunpack.i.h.bf16 %v10501_v21  ;;  %v6461_v35 = vld [vmem:[%s12802_s1 + $0x84] sm:$0xf]  ;;  %v5858_v6 = vld [vmem:[%s12802_s1 + $0x88] sm:$0xf0]  ;;  %v6723_v58 = vunpack.i.h.bf16 %v12912_v55 }
 0x233   : > { %v2659_v17 = vpop.f32.mrf.mxu1  ;;  %2609 = vmatmul.bf16.gmra.mxu0 %v10528_v7  ;;  %2869 = vmatpush.bf16.msrb.mxu3 %v5797_v45  ;;  %v7256_v53 = vpop.permute.xlu2 %7255  ;;  %v6722_v21 = vunpack.i.l.bf16 %v12912_v55  ;;  %v6477_v45 = vld [vmem:[%s12802_s1 + $0x104] sm:$0xf] }
 0x234   : > { %12911 = vst [vmem:[#allocation42_spill] sm:$0xff] %v10525_v15  ;;  %v2660_v27 = vadd.f32 %v2659_v17, %v2581_v9  ;;  %2688 = vmatmul.bf16.gmra.mxu1 %v10530_v51  ;;  %v7314_v13 = vpack.i.bf16 %v10525_v15, %v10504_v48  ;;  %v7236_v18 = vpop.permute.xlu1 %7235  ;;  %v5861_v9 = vor.u32 %v6461_v35, %v5858_v6  ;;  %v12914_v35 = vunpack.i.l.bf16 %v10329_v37 }
 0x235   : > { %v7231_v38 = vpop.permute.xlu0 %7230  ;;  %v7238_v8 = vunpack.i.h.bf16 %v7236_v18  ;;  %v7237_v63 = vunpack.i.l.bf16 %v7236_v18 }
 0x236   : > { %v2739_v47 = vadd.f32 %v2738_v25, %v2660_v27  ;;  %v7233_v39 = vunpack.i.h.bf16 %v7231_v38  ;;  %7315 = vrot.lane.b32.xlu2 %v7314_v13, %s8148_s16  ;;  %v7232_v22 = vunpack.i.l.bf16 %v7231_v38  ;;  %v5922_v25 = vld [vmem:[%s12802_s1 + $0x108] sm:$0xf0]  ;;  %v8070_v27 = vld [vmem:[%s8481_s25 + $0x1e0] sm:$0xff]  ;;  %v8071_v38 = vld [vmem:[%s8481_s25 + $0x1d8] sm:$0xff]  ;;  %2948 = vmatpush.bf16.msrb.mxu0 %v5861_v9  ;;  %s13036_s1 = smov 50  }
 0x237   : > { %v1967_v13 = vsel %vm12780_vm0, %v8070_v27, %v7243_v0  ;;  %v5925_v18 = vor.u32 %v6477_v45, %v5922_v25  ;;  %v1796_v0 = vsel %vm12780_vm0, %v10405_v32, %v6722_v21 }
 0x238   : > { %v10538_v31 = vadd.f32 %v2817_v12, %v2739_v47  ;;  %v2051_v4 = vsel %vm12780_vm0, %v8068_v28, %v7233_v39  ;;  %v2050_v5 = vsel %vm12780_vm0, %v8069_v23, %v7232_v22  ;;  %v1966_v47 = vsel %vm12780_vm0, %v8071_v38, %v7242_v49  ;;  %v8072_v23 = vld [vmem:[%s8481_s25 + $0xc8] sm:$0xff] }
 0x239   : > { %v2079_v17 = vsel %vm12763_vm1, %v2051_v4, %v7238_v8  ;;  %v2078_v16 = vsel %vm12763_vm1, %v2050_v5, %v7237_v63  ;;  %v7258_v8 = vunpack.i.h.bf16 %v7256_v53  ;;  %v7257_v63 = vunpack.i.l.bf16 %v7256_v53  ;;  %3027 = vmatpush.bf16.msrb.mxu1 %v5925_v18 }
 0x23a   : > { %v10555_v40 = vpack.c.bf16 %v2079_v17, %v2078_v16  ;;  %v1797_v5 = vsel %vm12780_vm0, %v8072_v23, %v6723_v58  ;;  %v10573_v17 = vpop.f32.mrf.mxu0  ;;  %v12913_v53 = vunpack.i.h.bf16 %v10329_v37  ;;  %v1994_v6 = vsel %vm12763_vm1, %v1966_v47, %v12914_v35  ;;  %v10591_v37 = vpop.f32.mrf.mxu3 }
 0x23b   : > { %v7271_v25 = vpop.permute.xlu2 %7270 }
 0x23c   : > { %6042 = vmatmul.msk.bf16.gmra.mxu3 %vm1829_vm2, %v10555_v40  ;;  %v7251_v39 = vpop.permute.xlu1 %7250  ;;  %v1995_v16 = vsel %vm12763_vm1, %v1967_v13, %v12913_v53  ;;  %v7272_v35 = vunpack.i.l.bf16 %v7271_v25 }
 0x23d   : > { %v7246_v12 = vpop.permute.xlu0 %7245  ;;  %v7253_v22 = vunpack.i.h.bf16 %v7251_v39  ;;  %v7252_v28 = vunpack.i.l.bf16 %v7251_v39 }
 0x23e   : > { %v7248_v4 = vunpack.i.h.bf16 %v7246_v12  ;;  %v7247_v49 = vunpack.i.l.bf16 %v7246_v12 }
 0x23f   : > { %v1825_v9 = vsel %vm12763_vm1, %v1796_v0, %v7252_v28  ;;  %v1826_v58 = vsel %vm12763_vm1, %v1797_v5, %v7253_v22  ;;  %v8073_v28 = vld [vmem:[%s8481_s25 + $0xe0] sm:$0xff]  ;;  %v10603_v5 = vpop.f32.mrf.mxu2  ;;  %v10605_v0 = vpop.f32.mrf.mxu1 }
 0x240   : > { %v2023_v55 = vsel %vm1829_vm2, %v1995_v16, %v7248_v4  ;;  %v2022_v45 = vsel %vm1829_vm2, %v1994_v6, %v7247_v49  ;;  %v1854_v32 = vsel %vm1829_vm2, %v1825_v9, %v7257_v63  ;;  %v1855_v21 = vsel %vm1829_vm2, %v1826_v58, %v7258_v8  ;;  %v8074_v58 = vld [vmem:[%s8481_s25 + $0x2e8] sm:$0xff] }
 0x241   : > { %v10587_v27 = vpack.c.bf16 %v2023_v55, %v2022_v45  ;;  %v10589_v13 = vpack.c.bf16 %v1855_v21, %v1854_v32  ;;  %v12916_v63 = vunpack.i.h.bf16 %v10327_v42  ;;  %v12917_v4 = vunpack.i.l.bf16 %v10327_v42  ;;  %v8075_v32 = vld [vmem:[%s8481_s25 + $0x2e0] sm:$0xff] }
 0x242   : > { %v7273_v16 = vunpack.i.h.bf16 %v7271_v25  ;;  %v10609_v6 = vpop.f32.mrf.mxu0  ;;  %v2052_v21 = vsel %vm12780_vm0, %v8075_v32, %v7272_v35 }
 0x243   : > { %12915 = vst [vmem:[#allocation25_spill] sm:$0xff] %v10587_v27  ;;  %2772 = vmatmul.bf16.gmra.mxu2 %v10587_v27  ;;  %2614 = vmatmul.bf16.gmra.mxu0 %v10589_v13  ;;  %v1883_v8 = vsel %vm12780_vm0, %v10059_v46, %v12916_v63  ;;  %v1882_v23 = vsel %vm12780_vm0, %v8073_v28, %v12917_v4  ;;  %v7286_v9 = vpop.permute.xlu2 %7285 }
 0x244   : > { %v7266_v18 = vpop.permute.xlu1 %7265  ;;  %v2053_v45 = vsel %vm12780_vm0, %v8074_v58, %v7273_v16 }
 0x245   : > { %v7261_v38 = vpop.permute.xlu0 %7260  ;;  %v7268_v47 = vunpack.i.h.bf16 %v7266_v18  ;;  %v7267_v39 = vunpack.i.l.bf16 %v7266_v18  ;;  %v7288_v18 = vunpack.i.h.bf16 %v7286_v9 }
 0x246   : > { %v7263_v12 = vunpack.i.h.bf16 %v7261_v38  ;;  %v7262_v22 = vunpack.i.l.bf16 %v7261_v38 }
 0x248   : > { %v1910_v49 = vsel %vm12763_vm1, %v1882_v23, %v7262_v22  ;;  %v1911_v53 = vsel %vm12763_vm1, %v1883_v8, %v7263_v12  ;;  %v7287_v12 = vunpack.i.l.bf16 %v7286_v9  ;;  %v10620_v22 = vpop.f32.mrf.mxu3  ;;  %v10622_v8 = vpop.f32.mrf.mxu2  ;;  %v12919_v9 = vunpack.i.h.bf16 %v10347_v14 }
 0x249   : > { %v1938_v46 = vsel %vm1829_vm2, %v1910_v49, %v7267_v39  ;;  %v1939_v55 = vsel %vm1829_vm2, %v1911_v53, %v7268_v47  ;;  %v2664_v28 = vpop.f32.mrf.mxu1  ;;  %v8076_v49 = vld [vmem:[%s8481_s25 + $0x1e8] sm:$0xff] }
 0x24a   : > { %v10613_v42 = vpack.c.bf16 %v1939_v55, %v1938_v46  ;;  %v12918_v46 = vunpack.i.l.bf16 %v10347_v14 }
 0x24c   : > { %2693 = vmatmul.bf16.gmra.mxu1 %v10613_v42  ;;  %v7281_v25 = vpop.permute.xlu1 %7280 }
 0x24d   : > { %v7276_v38 = vpop.permute.xlu0 %7275  ;;  %v7283_v39 = vunpack.i.h.bf16 %v7281_v25  ;;  %v7282_v47 = vunpack.i.l.bf16 %v7281_v25 }
 0x24e   : > { %v7278_v63 = vunpack.i.h.bf16 %v7276_v38  ;;  %v7277_v4 = vunpack.i.l.bf16 %v7276_v38  ;;  %v12921_v38 = vld [vmem:[#allocation24_spill] sm:$0xff] }
 0x24f   : > { %v1969_v23 = vsel %vm12780_vm0, %v10033_v24, %v7283_v39  ;;  %v1968_v53 = vsel %vm12780_vm0, %v8076_v49, %v7282_v47  ;;  %v2587_v39 = vpop.f32.mrf.mxu0  ;;  %v8077_v49 = vld [vmem:[%s8481_s25 + $0xd8] sm:$0xff] }
 0x250   : > { %v2081_v16 = vsel %vm12763_vm1, %v2053_v45, %v7278_v63  ;;  %v2080_v35 = vsel %vm12763_vm1, %v2052_v21, %v7277_v4  ;;  %v1996_v55 = vsel %vm12763_vm1, %v1968_v53, %v12918_v46  ;;  %v1997_v58 = vsel %vm12763_vm1, %v1969_v23, %v12919_v9  ;;  %v8078_v53 = vld [vmem:[%s8481_s25 + $0xd0] sm:$0xff]  ;;  %v7301_v46 = vpop.permute.xlu2 %7300 }
 0x251   : > { %v10636_v32 = vpack.c.bf16 %v2081_v16, %v2080_v35  ;;  %v2024_v24 = vsel %vm1829_vm2, %v1996_v55, %v7287_v12  ;;  %v2025_v25 = vsel %vm1829_vm2, %v1997_v58, %v7288_v18  ;;  %v6728_v45 = vunpack.i.h.bf16 %v12921_v38  ;;  %v2824_v55 = vpop.f32.mrf.mxu3 }
 0x252   : > { %v6727_v21 = vunpack.i.l.bf16 %v12921_v38  ;;  %v10642_v47 = vpack.c.bf16 %v2025_v25, %v2024_v24  ;;  %v2745_v24 = vpop.f32.mrf.mxu2  ;;  %v2666_v25 = vpop.f32.mrf.mxu1 }
 0x253   : > { %12920 = vst [vmem:[#allocation43_spill] sm:$0xff] %v10636_v32  ;;  %6043 = vmatmul.msk.bf16.gmra.mxu3 %vm1829_vm2, %v10636_v32  ;;  %v1799_v18 = vsel %vm12780_vm0, %v8077_v49, %v6728_v45  ;;  %v832_v45 = vld [vmem:[%s8481_s25 + $0xf8] sm:$0xff]  ;;  %v7303_v49 = vunpack.i.h.bf16 %v7301_v46  ;;  %v7302_v32 = vunpack.i.l.bf16 %v7301_v46  ;;  %v2588_v46 = vadd.f32 %v2587_v39, %v9969_v34 }
 0x254   : > { %12922 = vst [vmem:[#allocation24_spill] sm:$0xff] %v10642_v47  ;;  %2777 = vmatmul.bf16.gmra.mxu2 %v10642_v47  ;;  %v7296_v63 = vpop.permute.xlu1 %7295  ;;  %v1798_v16 = vsel %vm12780_vm0, %v8078_v53, %v6727_v21  ;;  %v12924_v53 = vunpack.i.h.bf16 %v10455_v50 }
 0x255   : > { %v7291_v14 = vpop.permute.xlu0 %7290  ;;  %v7298_v12 = vunpack.i.h.bf16 %v7296_v63  ;;  %v7297_v35 = vunpack.i.l.bf16 %v7296_v63 }
 0x256   : > { %v7293_v4 = vunpack.i.h.bf16 %v7291_v14  ;;  %v7292_v23 = vunpack.i.l.bf16 %v7291_v14 }
 0x258   : > { %v1827_v9 = vsel %vm12763_vm1, %v1798_v16, %v7292_v23  ;;  %v1828_v58 = vsel %vm12763_vm1, %v1799_v18, %v7293_v4  ;;  %v1885_v23 = vsel %vm12780_vm0, %v832_v45, %v12924_v53  ;;  %v8079_v4 = vld [vmem:[%s8481_s25 + $0xf0] sm:$0xff]  ;;  %v12925_v18 = vunpack.i.l.bf16 %v10455_v50  ;;  %s8149_s25 = smov 104  }
 0x259   : > { %v1856_v38 = vsel %vm1829_vm2, %v1827_v9, %v7297_v35  ;;  %v1857_v14 = vsel %vm1829_vm2, %v1828_v58, %v7298_v12  ;;  %v2590_v21 = vpop.f32.mrf.mxu0  ;;  %v1913_v58 = vsel %vm12763_vm1, %v1885_v23, %v7303_v49  ;;  %v2586_v50 = vadd.f32 %v10609_v6, %v9969_v34  ;;  %v12926_v23 = vld [vmem:[#allocation28_spill] sm:$0xff] }
 0x25a   : > { %v10655_v47 = vpack.c.bf16 %v1857_v14, %v1856_v38  ;;  %v1884_v16 = vsel %vm12780_vm0, %v8079_v4, %v12925_v18  ;;  %v2827_v38 = vpop.f32.mrf.mxu3  ;;  %v2748_v27 = vpop.f32.mrf.mxu2  ;;  %v2667_v4 = vadd.f32 %v2666_v25, %v2588_v46  ;;  %vm4792_vm0 = vcmask 1041408  }
 0x25b   : > { %v1912_v9 = vsel %vm12763_vm1, %v1884_v16, %v7302_v32  ;;  %v2665_v32 = vadd.f32 %v2664_v28, %v2586_v50  ;;  %vm4242_vm1 = vcmask 637952  }
 0x25c   : > { %12923 = vst [vmem:[#allocation44_spill] sm:$0xff] %v10655_v47  ;;  %2619 = vmatmul.bf16.gmra.mxu0 %v10655_v47  ;;  %v2746_v18 = vadd.f32 %v2745_v24, %v2667_v4  ;;  %v2558_v4 = vadd.f32 %v10082_v59, %v9969_v34 }
 0x25d   : > { %v7306_v63 = vpop.permute.xlu0 %7305 }
 0x25e   : > { %v7308_v35 = vunpack.i.h.bf16 %v7306_v63  ;;  %v7307_v12 = vunpack.i.l.bf16 %v7306_v63  ;;  %v2591_v63 = vadd.f32 %v2590_v21, %v9969_v34  ;;  %v2825_v25 = vadd.f32 %v2824_v55, %v2746_v18 }
 0x260   : > { %v1940_v14 = vsel %vm1829_vm2, %v1912_v9, %v7307_v12  ;;  %v1941_v47 = vsel %vm1829_vm2, %v1913_v58, %v7308_v35  ;;  %v2669_v45 = vpop.f32.mrf.mxu1 }
 0x261   : > { %v10671_v53 = vpack.c.bf16 %v1941_v47, %v1940_v14  ;;  %v2670_v49 = vadd.f32 %v2669_v45, %v2591_v63  ;;  %v2592_v39 = vpop.f32.mrf.mxu0  ;;  %v2744_v47 = vadd.f32 %v10622_v8, %v2665_v32 }
 0x262   : > { %v2593_v35 = vadd.f32 %v2592_v39, %v9969_v34  ;;  %v2829_v21 = vpop.f32.mrf.mxu3  ;;  %v2750_v9 = vpop.f32.mrf.mxu2 }
 0x263   : > { %2698 = vmatmul.bf16.gmra.mxu1 %v10671_v53  ;;  %2870 = vmatmul.bf16.vlgmr.msrb.gmra.mxu3 %v9112_v30  ;;  %v2749_v16 = vadd.f32 %v2748_v27, %v2670_v49  ;;  %v2823_v28 = vadd.f32 %v10620_v22, %v2744_v47  ;;  %v3204_v30 = vmax.f32 %v2825_v25, 0.0 }
 0x264   : > { %6044 = vmatmul.msk.bf16.vlgmr.msrb.gmra.mxu2 %vm1829_vm2, %v12926_v23 }
 0x265   : > { %v2828_v58 = vadd.f32 %v2827_v38, %v2749_v16  ;;  %v3202_v45 = vmax.f32 %v2823_v28, 0.0 }
 0x267   : > { %v3206_v24 = vmax.f32 %v2828_v58, 0.0  ;;  %v10686_v55 = vmax.f32 %v3202_v45, %v3204_v30 }
 0x268   : > { %v2671_v6 = vpop.f32.mrf.mxu1 }
 0x269   : > { %v2672_v12 = vadd.f32 %v2671_v6, %v2593_v35  ;;  %12927 = vst [vmem:[#allocation28_spill] sm:$0xff] %v10686_v55 }
 0x26a   : > { %v2832_v49 = vpop.f32.mrf.mxu3 }
 0x26b   : > { %v2751_v46 = vadd.f32 %v2750_v9, %v2672_v12 }
 0x26c   : > { %2949 = vmatmul.bf16.vlgmr.msrb.gmra.mxu0 %v9142_v19  ;;  %v2637_v19 = vadd.f32 %v10096_v56, %v2558_v4 }
 0x26d   : > { %v2830_v14 = vadd.f32 %v2829_v21, %v2751_v46  ;;  %v3178_v21 = vmax.f32 %v10038_v60, 0.0 }
 0x26e   : > { %v2716_v39 = vadd.f32 %v10088_v36, %v2637_v19 }
 0x26f   : > { %v3208_v50 = vmax.f32 %v2830_v14, 0.0 }
 0x270   : > { %v2595_v8 = vpop.f32.mrf.mxu0  ;;  %v2753_v38 = vpop.f32.mrf.mxu2  ;;  %v2795_v56 = vadd.f32 %v10076_v52, %v2716_v39 }
 0x271   : > { %v2674_v27 = vpop.f32.mrf.mxu1  ;;  %v10688_v63 = vmax.f32 %v3206_v24, %v3208_v50  ;;  %v2596_v22 = vadd.f32 %v2595_v8, %v9969_v34 }
 0x272   : > { %v2834_v25 = vpop.f32.mrf.mxu3 }
 0x273   : > { %12928 = vst [vmem:[#allocation45_spill] sm:$0xff] %v10688_v63  ;;  %3028 = vmatmul.bf16.vlgmr.msrb.gmra.mxu1 %v9114_v41  ;;  %2875 = vmatmul.bf16.gmra.mxu3 %v9225_v57  ;;  %v7319_v32 = vpack.i.bf16 %v10688_v63, %v10686_v55  ;;  %v2675_v59 = vadd.f32 %v2674_v27, %v2596_v22 }
 0x274   : > { %6045 = vmatmul.msk.bf16.gmra.mxu2 %vm1829_vm2, %v9186_v26  ;;  %v3180_v26 = vmax.f32 %v2795_v56, 0.0 }
 0x275   : > { %7320 = vrot.lane.b32.xlu0 %v7319_v32, %s8148_s16  ;;  %v2754_v47 = vadd.f32 %v2753_v38, %v2675_v59 }
 0x276   : > { %v10707_v58 = vmax.f32 %v3178_v21, %v3180_v26  ;;  %v12935_v21 = vld [vmem:[#allocation13_spill] sm:$0xff] }
 0x277   : > { %v2833_v35 = vadd.f32 %v2832_v49, %v2754_v47  ;;  %v12931_v49 = vld [vmem:[#allocation9_spill] sm:$0xff] }
 0x278   : > { %v2597_v23 = vpop.f32.mrf.mxu0  ;;  %v2755_v16 = vpop.f32.mrf.mxu2  ;;  %12929 = vst [vmem:[#allocation46_spill] sm:$0xff] %v10707_v58 }
 0x279   : > { %v2676_v18 = vpop.f32.mrf.mxu1  ;;  %v2598_v41 = vadd.f32 %v2597_v23, %v9969_v34  ;;  %v3210_v9 = vmax.f32 %v2833_v35, 0.0  ;;  %v12932_v23 = vld [vmem:[#allocation17_spill] sm:$0xff] }
 0x27b   : > { %v2677_v57 = vadd.f32 %v2676_v18, %v2598_v41 }
 0x27c   : > { %2954 = vmatmul.bf16.gmra.mxu0 %v9262_v11 }
 0x27d   : > { %v2756_v6 = vadd.f32 %v2755_v16, %v2677_v57 }
 0x27f   : > { %v2835_v12 = vadd.f32 %v2834_v25, %v2756_v6  ;;  %v2837_v50 = vpop.f32.mrf.mxu3 }
 0x280   : > { %v2600_v46 = vpop.f32.mrf.mxu0 }
 0x281   : > { %v3212_v36 = vmax.f32 %v2835_v12, 0.0  ;;  %v10704_v28 = vpop.permute.xlu1 %7310  ;;  %v2601_v24 = vadd.f32 %v2600_v46, %v9969_v34 }
 0x282   : > { %v12736_v11 = vunpack.i.h.bf16 %v10704_v28  ;;  %v12735_v30 = vunpack.i.l.bf16 %v10704_v28 }
 0x283   : > { %3033 = vmatmul.bf16.gmra.mxu1 %v9227_v10  ;;  %v10709_v52 = vmax.f32 %v3210_v9, %v3212_v36  ;;  %2880 = vmatmul.bf16.gmra.mxu3 %v9391_v54  ;;  %v12936_v36 = vld [vmem:[#allocation15_spill] sm:$0xff] }
 0x284   : > { %6046 = vmatmul.msk.bf16.gmra.mxu2 %vm1829_vm2, %v9333_v20  ;;  %v10719_v60 = vmax.f32 %v10322_v2, %v12736_v11  ;;  %v10724_v10 = vmax.f32 %v10324_v29, %v12735_v30 }
 0x285   : > { %12930 = vst [vmem:[#allocation47_spill] sm:$0xff] %v10709_v52  ;;  %v7324_v14 = vpack.i.bf16 %v10709_v52, %v10707_v58 }
 0x286   : > { %v10731_v54 = vpack.i.bf16 %v10719_v60, %v10724_v10  ;;  %v2758_v20 = vpop.f32.mrf.mxu2 }
 0x287   : > { %7325 = vrot.lane.b32.xlu2 %v7324_v14, %s8148_s16  ;;  %v12937_v14 = vld [vmem:[#allocation12_spill] sm:$0xff] }
 0x288   : > { %7345 = vrot.lane.b32.xlu1 %v10731_v54, %s8149_s25  ;;  %v2602_v27 = vpop.f32.mrf.mxu0 }
 0x289   : > { %v2679_v45 = vpop.f32.mrf.mxu1  ;;  %v2603_v4 = vadd.f32 %v2602_v27, %v9969_v34 }
 0x28a   : > { %v2680_v8 = vadd.f32 %v2679_v45, %v2601_v24 }
 0x28c   : > { %2959 = vmatmul.bf16.gmra.mxu0 %v9397_v33  ;;  %v2759_v22 = vadd.f32 %v2758_v20, %v2680_v8  ;;  %v2839_v33 = vpop.f32.mrf.mxu3 }
 0x28e   : > { %v2760_v32 = vpop.f32.mrf.mxu2  ;;  %v2838_v59 = vadd.f32 %v2837_v50, %v2759_v22 }
 0x28f   : > { %7335 = vrot.lane.b32.xlu2 %v10731_v54, %s8150_s24 }
 0x290   : > { %v3214_v47 = vmax.f32 %v2838_v59, 0.0  ;;  %v10764_v8 = vpop.permute.xlu2 %7315 }
 0x291   : > { %v2681_v38 = vpop.f32.mrf.mxu1  ;;  %12938 = vst [vmem:[#allocation17_spill] sm:$0xff] %v10764_v8 }
 0x292   : > { %v2682_v19 = vadd.f32 %v2681_v38, %v2603_v4  ;;  %v12939_v38 = vld [vmem:[#allocation27_spill] sm:$0xff] }
 0x293   : > { %3038 = vmatmul.bf16.gmra.mxu1 %v9348_v1  ;;  %2885 = vmatmul.bf16.gmra.mxu3 %v12931_v49  ;;  %v12934_v1 = vld [vmem:[#allocation18_spill] sm:$0xff] }
 0x294   : > { %v2761_v39 = vadd.f32 %v2760_v32, %v2682_v19  ;;  %6047 = vmatmul.msk.bf16.gmra.mxu2 %vm1829_vm2, %v12932_v23  ;;  %v12731_v19 = vunpack.i.h.bf16 %v10764_v8  ;;  %v12734_v32 = vunpack.i.l.bf16 %v10764_v8  ;;  %v12974_v8 = vld [vmem:[#allocation24_spill] sm:$0xff] }
 0x296   : > { %v2840_v18 = vadd.f32 %v2839_v33, %v2761_v39  ;;  %v2842_v35 = vpop.f32.mrf.mxu3  ;;  %v10776_v23 = vmax.f32 %v10525_v15, %v12731_v19  ;;  %v10781_v33 = vmax.f32 %v10504_v48, %v12734_v32 }
 0x297   : > { %7350 = vrot.lane.b32.xlu2 %v10731_v54, %s8151_s14  ;;  %v2763_v25 = vpop.f32.mrf.mxu2 }
 0x298   : > { %v3216_v41 = vmax.f32 %v2840_v18, 0.0 }
 0x299   : > { %v2605_v57 = vpop.f32.mrf.mxu0 }
 0x29a   : > { %v10746_v56 = vmax.f32 %v3214_v47, %v3216_v41  ;;  %v2606_v6 = vadd.f32 %v2605_v57, %v9969_v34 }
 0x29c   : > { %12933 = vst [vmem:[#allocation9_spill] sm:$0xff] %v10746_v56  ;;  %2964 = vmatmul.bf16.gmra.mxu0 %v12934_v1  ;;  %v7329_v16 = vpack.i.bf16 %v10724_v10, %v10746_v56 }
 0x29e   : > { %7330 = vrot.lane.b32.xlu0 %v7329_v16, %s8148_s16  ;;  %v2844_v24 = vpop.f32.mrf.mxu3 }
 0x29f   : > { %7360 = vrot.lane.b32.xlu2 %v10731_v54, %s12778_s18  ;;  %v2765_v4 = vpop.f32.mrf.mxu2 }
 0x2a0   : > { %v2684_v26 = vpop.f32.mrf.mxu1 }
 0x2a1   : > { %v2685_v12 = vadd.f32 %v2684_v26, %v2606_v6  ;;  %v2607_v46 = vpop.f32.mrf.mxu0  ;;  %v12941_v6 = vld [vmem:[#allocation26_spill] sm:$0xff]  ;;  %v10792_v26 = vpack.i.bf16 %v10776_v23, %v10781_v33 }
 0x2a2   : > { %v2608_v45 = vadd.f32 %v2607_v46, %v9969_v34 }
 0x2a3   : > { %3043 = vmatmul.bf16.gmra.mxu1 %v12935_v21  ;;  %v2764_v9 = vadd.f32 %v2763_v25, %v2685_v12  ;;  %2890 = vmatmul.bf16.gmra.mxu3 %v12936_v36  ;;  %v12942_v25 = vld [vmem:[#allocation21_spill] sm:$0xff] }
 0x2a4   : > { %6048 = vmatmul.msk.bf16.gmra.mxu2 %vm1829_vm2, %v12937_v14 }
 0x2a5   : > { %v2843_v20 = vadd.f32 %v2842_v35, %v2764_v9  ;;  %v12940_v35 = vld [vmem:[#allocation10_spill] sm:$0xff] }
 0x2a6   : > { %7340 = vrot.lane.b32.xlu0 %v10731_v54, %s8153_s0  ;;  %v2847_v1 = vpop.f32.mrf.mxu3 }
 0x2a7   : > { %7385 = vrot.lane.b32.xlu2 %v10731_v54, %s12761_s21  ;;  %v3218_v59 = vmax.f32 %v2843_v20, 0.0  ;;  %v12943_v20 = vld [vmem:[#allocation29_spill] sm:$0xff] }
 0x2a8   : > { %v2686_v50 = vpop.f32.mrf.mxu1 }
 0x2a9   : > { %v2687_v27 = vadd.f32 %v2686_v50, %v2608_v45 }
 0x2ab   : > { %v2766_v22 = vadd.f32 %v2765_v4, %v2687_v27 }
 0x2ac   : > { %2969 = vmatmul.bf16.gmra.mxu0 %v12939_v38 }
 0x2ad   : > { %v2845_v49 = vadd.f32 %v2844_v24, %v2766_v22 }
 0x2ae   : > { %7355 = vrot.lane.b32.xlu0 %v10731_v54, %s12772_s19  ;;  %v2849_v45 = vpop.f32.mrf.mxu3 }
 0x2af   : > { %v3220_v39 = vmax.f32 %v2845_v49, 0.0  ;;  %7400 = vrot.lane.b32.xlu2 %v10731_v54, %s12771_s26  ;;  %v12944_v49 = vld [vmem:[#allocation11_spill] sm:$0xff] }
 0x2b0   : > { %v2610_v18 = vpop.f32.mrf.mxu0  ;;  %v2768_v16 = vpop.f32.mrf.mxu2 }
 0x2b1   : > { %v10783_v47 = vmax.f32 %v3218_v59, %v3220_v39  ;;  %v2611_v41 = vadd.f32 %v2610_v18, %v9969_v34  ;;  %v2689_v57 = vpop.f32.mrf.mxu1  ;;  %v12946_v39 = vld [vmem:[#allocation31_spill] sm:$0xff] }
 0x2b3   : > { %3048 = vmatmul.bf16.gmra.mxu1 %v12940_v35  ;;  %v2690_v54 = vadd.f32 %v2689_v57, %v2611_v41  ;;  %2895 = vmatmul.bf16.gmra.mxu3 %v12941_v6  ;;  %v12947_v41 = vld [vmem:[#allocation20_spill] sm:$0xff] }
 0x2b4   : > { %6049 = vmatmul.msk.bf16.gmra.mxu2 %vm1829_vm2, %v12942_v25  ;;  %v12948_v6 = vld [vmem:[#allocation32_spill] sm:$0xff] }
 0x2b5   : > { %v2769_v12 = vadd.f32 %v2768_v16, %v2690_v54 }
 0x2b6   : > { %7365 = vrot.lane.b32.xlu0 %v10792_v26, %s8148_s16 }
 0x2b7   : > { %v2848_v21 = vadd.f32 %v2847_v1, %v2769_v12  ;;  %7465 = vrot.lane.b32.xlu2 %v10792_v26, %s12771_s26 }
 0x2b8   : > { %v2612_v9 = vpop.f32.mrf.mxu0  ;;  %v2770_v24 = vpop.f32.mrf.mxu2 }
 0x2b9   : > { %v2613_v36 = vadd.f32 %v2612_v9, %v9969_v34  ;;  %v2691_v46 = vpop.f32.mrf.mxu1  ;;  %v3222_v4 = vmax.f32 %v2848_v21, 0.0 }
 0x2bb   : > { %v2692_v14 = vadd.f32 %v2691_v46, %v2613_v36 }
 0x2bc   : > { %2974 = vmatmul.bf16.gmra.mxu0 %v12943_v20  ;;  %v12949_v20 = vld [vmem:[#allocation30_spill] sm:$0xff] }
 0x2bd   : > { %v2771_v50 = vadd.f32 %v2770_v24, %v2692_v14  ;;  %v12950_v24 = vld [vmem:[#allocation34_spill] sm:$0xff] }
 0x2bf   : > { %v2850_v27 = vadd.f32 %v2849_v45, %v2771_v50  ;;  %v2852_v18 = vpop.f32.mrf.mxu3  ;;  %v12951_v50 = vld [vmem:[#allocation33_spill] sm:$0xff] }
 0x2c0   : > { %v2615_v38 = vpop.f32.mrf.mxu0 }
 0x2c1   : > { %v3224_v22 = vmax.f32 %v2850_v27, 0.0  ;;  %v2616_v1 = vadd.f32 %v2615_v38, %v9969_v34 }
 0x2c3   : > { %3053 = vmatmul.bf16.gmra.mxu1 %v12944_v49  ;;  %v10801_v59 = vmax.f32 %v3222_v4, %v3224_v22  ;;  %2900 = vmatmul.bf16.gmra.mxu3 %v12946_v39 }
 0x2c4   : > { %6050 = vmatmul.msk.bf16.gmra.mxu2 %vm1829_vm2, %v12947_v41  ;;  %v12952_v41 = vld [vmem:[#allocation35_spill] sm:$0xff] }
 0x2c5   : > { %12945 = vst [vmem:[#allocation18_spill] sm:$0xff] %v10801_v59 }
 0x2c6   : > { %v2773_v57 = vpop.f32.mrf.mxu2 }
 0x2c7   : > { %v2854_v21 = vpop.f32.mrf.mxu3 }
 0x2c8   : > { %v2617_v25 = vpop.f32.mrf.mxu0 }
 0x2c9   : > { %v2694_v16 = vpop.f32.mrf.mxu1  ;;  %v2618_v9 = vadd.f32 %v2617_v25, %v9969_v34 }
 0x2ca   : > { %v2695_v35 = vadd.f32 %v2694_v16, %v2616_v1 }
 0x2cc   : > { %v2774_v54 = vadd.f32 %v2773_v57, %v2695_v35  ;;  %2979 = vmatmul.bf16.gmra.mxu0 %v12948_v6 }
 0x2ce   : > { %v2853_v12 = vadd.f32 %v2852_v18, %v2774_v54  ;;  %v2775_v36 = vpop.f32.mrf.mxu2 }
 0x2d0   : > { %v3226_v22 = vmax.f32 %v2853_v12, 0.0  ;;  %v12955_v12 = vld [vmem:[#allocation37_spill] sm:$0xff] }
 0x2d1   : > { %v2696_v46 = vpop.f32.mrf.mxu1 }
 0x2d2   : > { %v2697_v14 = vadd.f32 %v2696_v46, %v2618_v9  ;;  %v12953_v9 = vld [vmem:[#allocation19_spill] sm:$0xff]  ;;  %v12956_v46 = vld [vmem:[#allocation36_spill] sm:$0xff] }
 0x2d3   : > { %3058 = vmatmul.bf16.gmra.mxu1 %v12949_v20  ;;  %2905 = vmatmul.bf16.gmra.mxu3 %v12950_v24 }
 0x2d4   : > { %v2776_v45 = vadd.f32 %v2775_v36, %v2697_v14  ;;  %6051 = vmatmul.msk.bf16.gmra.mxu2 %vm1829_vm2, %v12951_v50 }
 0x2d6   : > { %v2855_v27 = vadd.f32 %v2854_v21, %v2776_v45  ;;  %v2857_v4 = vpop.f32.mrf.mxu3 }
 0x2d7   : > { %v2778_v49 = vpop.f32.mrf.mxu2 }
 0x2d8   : > { %v3228_v38 = vmax.f32 %v2855_v27, 0.0  ;;  %v8080_v27 = vld [vmem:[%s12864_s2] sm:$0x3] }
 0x2d9   : > { %v2620_v39 = vpop.f32.mrf.mxu0 }
 0x2da   : > { %v10813_v18 = vmax.f32 %v3226_v22, %v3228_v38  ;;  %v2621_v57 = vadd.f32 %v2620_v39, %v9969_v34  ;;  %v10830_v22 = vperm.slane %v8080_v27, 1 }
 0x2dc   : > { %2984 = vmatmul.bf16.gmra.mxu0 %v12952_v41 }
 0x2de   : > { %v2859_v1 = vpop.f32.mrf.mxu3 }
 0x2df   : > { %v2780_v35 = vpop.f32.mrf.mxu2 }
 0x2e0   : > { %v2699_v16 = vpop.f32.mrf.mxu1 }
 0x2e1   : > { %v2700_v54 = vadd.f32 %v2699_v16, %v2621_v57  ;;  %v2622_v6 = vpop.f32.mrf.mxu0  ;;  %v10818_v21 = vpop.permute.xlu2 %7325 }
 0x2e2   : > { %12954 = vst [vmem:[#allocation13_spill] sm:$0xff] %v10818_v21  ;;  %v2623_v14 = vadd.f32 %v2622_v6, %v9969_v34  ;;  %v12729_v20 = vunpack.i.l.bf16 %v10818_v21 }
 0x2e3   : > { %v2779_v25 = vadd.f32 %v2778_v49, %v2700_v54  ;;  %3063 = vmatmul.bf16.gmra.mxu1 %v12953_v9  ;;  %2910 = vmatmul.bf16.gmra.mxu3 %v12955_v12  ;;  %v12959_v54 = vld [vmem:[#allocation38_spill] sm:$0xff] }
 0x2e4   : > { %6052 = vmatmul.msk.bf16.gmra.mxu2 %vm1829_vm2, %v12956_v46  ;;  %v10836_v41 = vmax.f32 %v10707_v58, %v12729_v20 }
 0x2e5   : > { %v2858_v36 = vadd.f32 %v2857_v4, %v2779_v25 }
 0x2e6   : > { %v2871_v45 = vpop.f32.mrf.mxu3  ;;  %12958 = vst [vmem:[#allocation12_spill] sm:$0xff] %v10836_v41 }
 0x2e7   : > { %v10825_v24 = vpop.permute.xlu0 %7320  ;;  %v3108_v49 = vpop.f32.mrf.mxu2  ;;  %v2872_v6 = vadd.f32 %v2871_v45, %v10830_v22  ;;  %v3230_v12 = vmax.f32 %v2858_v36, 0.0 }
 0x2e8   : > { %12957 = vst [vmem:[#allocation15_spill] sm:$0xff] %v10825_v24  ;;  %v2701_v50 = vpop.f32.mrf.mxu1  ;;  %v12730_v38 = vunpack.i.h.bf16 %v10825_v24 }
 0x2e9   : > { %v2702_v4 = vadd.f32 %v2701_v50, %v2623_v14  ;;  %v2950_v39 = vpop.f32.mrf.mxu0  ;;  %v10860_v19 = vpop.permute.xlu2 %7335 }
 0x2ea   : > { %v10841_v57 = vmax.f32 %v10688_v63, %v12730_v38  ;;  %v2951_v20 = vadd.f32 %v2950_v39, %v2872_v6 }
 0x2eb   : > { %v2781_v16 = vadd.f32 %v2780_v35, %v2702_v4 }
 0x2ec   : > { %2989 = vmatmul.bf16.gmra.mxu0 %v12959_v54  ;;  %v10847_v9 = vpack.i.bf16 %v10836_v41, %v10841_v57 }
 0x2ed   : > { %v2860_v25 = vadd.f32 %v2859_v1, %v2781_v16  ;;  %v12961_v1 = vld [vmem:[#allocation14_spill] sm:$0xff]  ;;  %v12962_v16 = vld [vmem:[#allocation23_spill] sm:$0xff] }
 0x2ee   : > { %v2873_v14 = vpop.f32.mrf.mxu3  ;;  %7480 = vrot.lane.b32.xlu2 %v10847_v9, %s8150_s24 }
 0x2ef   : > { %v3232_v46 = vmax.f32 %v2860_v25, 0.0  ;;  %v3110_v35 = vpop.f32.mrf.mxu2  ;;  %v2874_v54 = vadd.f32 %v2873_v14, %v10830_v22 }
 0x2f0   : > { %v3029_v50 = vpop.f32.mrf.mxu1 }
 0x2f1   : > { %v10851_v27 = vmax.f32 %v3230_v12, %v3232_v46  ;;  %v2952_v4 = vpop.f32.mrf.mxu0  ;;  %v3030_v45 = vadd.f32 %v3029_v50, %v2951_v20 }
 0x2f2   : > { %v2953_v25 = vadd.f32 %v2952_v4, %v2874_v54 }
 0x2f3   : > { %12960 = vst [vmem:[#allocation27_spill] sm:$0xff] %v10851_v27  ;;  %3068 = vmatmul.bf16.gmra.mxu1 %v12961_v1  ;;  %2915 = vmatmul.bf16.gmra.mxu3 %v10274_v61  ;;  %v3109_v36 = vadd.f32 %v3108_v49, %v3030_v45  ;;  %v2583_v61 = vadd.f32 %v10573_v17, %v9969_v34 }
 0x2f4   : > { %6053 = vmatmul.msk.bf16.gmra.mxu2 %vm1829_vm2, %v12962_v16 }
 0x2f5   : > { %v3179_v20 = vmax.f32 %v3109_v36, 0.0  ;;  %v2662_v1 = vadd.f32 %v10605_v0, %v2583_v61  ;;  %v12966_v0 = vld [vmem:[#allocation40_spill] sm:$0xff] }
 0x2f6   : > { %v2876_v38 = vpop.f32.mrf.mxu3  ;;  %7495 = vrot.lane.b32.xlu2 %v10847_v9, %s8151_s14 }
 0x2f7   : > { %v3113_v6 = vpop.f32.mrf.mxu2  ;;  %v2877_v49 = vadd.f32 %v2876_v38, %v10830_v22  ;;  %v3236_v4 = vsel %vm3235_vm3, %v3179_v20, -inf  ;;  %v12964_v38 = vld [vmem:[#allocation39_spill] sm:$0xff]  ;;  %v10876_v20 = vpop.permute.xlu2 %7350 }
 0x2f8   : > { %v3031_v12 = vpop.f32.mrf.mxu1 }
 0x2f9   : > { %v3032_v39 = vadd.f32 %v3031_v12, %v2953_v25  ;;  %v2955_v46 = vpop.f32.mrf.mxu0 }
 0x2fb   : > { %v3111_v14 = vadd.f32 %v3110_v35, %v3032_v39  ;;  %v2956_v35 = vadd.f32 %v2955_v46, %v2877_v49  ;;  %v2741_v39 = vadd.f32 %v10603_v5, %v2662_v1 }
 0x2fc   : > { %2994 = vmatmul.bf16.gmra.mxu0 %v10320_v43 }
 0x2fd   : > { %v3181_v50 = vmax.f32 %v3111_v14, 0.0  ;;  %v12965_v14 = vld [vmem:[#allocation41_spill] sm:$0xff] }
 0x2fe   : > { %v2878_v45 = vpop.f32.mrf.mxu3 }
 0x2ff   : > { %v3237_v54 = vsel %vm3235_vm3, %v3181_v50, -inf  ;;  %v3115_v36 = vpop.f32.mrf.mxu2  ;;  %v2879_v43 = vadd.f32 %v2878_v45, %v10830_v22  ;;  %v2820_v50 = vadd.f32 %v10591_v37, %v2741_v39  ;;  %v12732_v39 = vunpack.i.h.bf16 %v10818_v21 }
 0x300   : > { %v3034_v16 = vpop.f32.mrf.mxu1  ;;  %v10869_v25 = vmax.f32 %v3236_v4, %v3237_v54 }
 0x301   : > { %v2957_v12 = vpop.f32.mrf.mxu0  ;;  %v3035_v17 = vadd.f32 %v3034_v16, %v2956_v35 }
 0x302   : > { %12963 = vst [vmem:[#allocation10_spill] sm:$0xff] %v10869_v25  ;;  %v7369_v34 = vpack.i.bf16 %v10869_v25, %v10719_v60  ;;  %v2958_v61 = vadd.f32 %v2957_v12, %v2879_v43 }
 0x303   : > { %3073 = vmatmul.bf16.gmra.mxu1 %v12964_v38  ;;  %2920 = vmatmul.bf16.gmra.mxu3 %v12965_v14  ;;  %v3114_v46 = vadd.f32 %v3113_v6, %v3035_v17  ;;  %v3200_v14 = vmax.f32 %v2820_v50, 0.0  ;;  %v10886_v6 = vpop.permute.xlu2 %7360 }
 0x304   : > { %7370 = vrot.lane.b32.xlu1 %v7369_v34, %s8148_s16  ;;  %6054 = vmatmul.msk.bf16.gmra.mxu2 %vm1829_vm2, %v12966_v0  ;;  %v3198_v0 = vmax.f32 %v10538_v31, 0.0 }
 0x305   : > { %v3183_v35 = vmax.f32 %v3114_v46, 0.0 }
 0x306   : > { %v2881_v49 = vpop.f32.mrf.mxu3  ;;  %v10892_v17 = vmax.f32 %v3198_v0, %v3200_v14  ;;  %v10932_v0 = vpop.permute.xlu1 %7345 }
 0x307   : > { %v2882_v4 = vadd.f32 %v2881_v49, %v10830_v22  ;;  %v3118_v16 = vpop.f32.mrf.mxu2  ;;  %v3240_v12 = vsel %vm3235_vm3, %v3183_v35, -inf  ;;  %v10914_v35 = vmax.f32 %v10709_v52, %v12732_v39 }
 0x308   : > { %v3036_v54 = vpop.f32.mrf.mxu1  ;;  %12967 = vst [vmem:[#allocation26_spill] sm:$0xff] %v10892_v17 }
 0x309   : > { %v3037_v45 = vadd.f32 %v3036_v54, %v2958_v61  ;;  %v2960_v5 = vpop.f32.mrf.mxu0 }
 0x30a   : > { %v2961_v1 = vadd.f32 %v2960_v5, %v2882_v4 }
 0x30b   : > { %v3116_v38 = vadd.f32 %v3115_v36, %v3037_v45  ;;  %v7337_v45 = vunpack.i.l.bf16 %v10860_v19 }
 0x30c   : > { %2999 = vmatmul.bf16.gmra.mxu0 %v10435_v3 }
 0x30d   : > { %v3185_v34 = vmax.f32 %v3116_v38, 0.0 }
 0x30e   : > { %v10890_v43 = vpop.f32.mrf.mxu3 }
 0x30f   : > { %v3241_v37 = vsel %vm3235_vm3, %v3185_v34, -inf  ;;  %v10897_v3 = vpop.f32.mrf.mxu2 }
 0x310   : > { %v10895_v46 = vmax.f32 %v3240_v12, %v3241_v37  ;;  %v3039_v36 = vpop.f32.mrf.mxu1  ;;  %v10899_v31 = vpop.permute.xlu0 %7330 }
 0x311   : > { %v3040_v61 = vadd.f32 %v3039_v36, %v2961_v1  ;;  %12968 = vst [vmem:[#allocation21_spill] sm:$0xff] %v10899_v31  ;;  %v7333_v49 = vunpack.i.h.bf16 %v10899_v31  ;;  %v12733_v50 = vunpack.i.l.bf16 %v10899_v31  ;;  %v10903_v4 = vpop.f32.mrf.mxu0  ;;  %v12969_v1 = vld [vmem:[#allocation22_spill] sm:$0xff]  ;;  %v10934_v12 = vpop.permute.xlu2 %7385 }
 0x312   : > { %v7374_v54 = vpack.i.bf16 %v10895_v46, %v10892_v17 }
 0x313   : > { %v10908_v5 = vadd.f32 %v3118_v16, %v3040_v61  ;;  %3078 = vmatmul.bf16.gmra.mxu1 %v12969_v1  ;;  %v4064_v38 = vsel %vm4062_vm4, %v10724_v10, %v7333_v49  ;;  %v10921_v14 = vmax.f32 %v10746_v56, %v12733_v50  ;;  %2925 = vmatmul.bf16.gmra.mxu3 %v10528_v7  ;;  %v7352_v1 = vunpack.i.l.bf16 %v10876_v20 }
 0x314   : > { %7375 = vrot.lane.b32.xlu0 %v7374_v54, %s8148_s16  ;;  %6055 = vmatmul.msk.bf16.gmra.mxu2 %vm1829_vm2, %v10437_v44  ;;  %v4079_v16 = vsel %vm4077_vm5, %v4064_v38, %v7337_v45  ;;  %v7347_v54 = vunpack.i.l.bf16 %v10932_v0 }
 0x315   : > { %v10930_v34 = vpack.i.bf16 %v10921_v14, %v10914_v35 }
 0x316   : > { %v2886_v10 = vpop.f32.mrf.mxu3 }
 0x317   : > { %v2887_v37 = vadd.f32 %v2886_v10, %v10830_v22  ;;  %7525 = vrot.lane.b32.xlu2 %v10930_v34, %s8150_s24  ;;  %v3123_v36 = vpop.f32.mrf.mxu2 }
 0x318   : > { %v10939_v7 = vpop.f32.mrf.mxu1  ;;  %v10941_v44 = vpop.permute.xlu0 %7340 }
 0x319   : > { %v7342_v61 = vunpack.i.l.bf16 %v10941_v44  ;;  %v2965_v49 = vpop.f32.mrf.mxu0 }
 0x31a   : > { %v2966_v45 = vadd.f32 %v2965_v49, %v2887_v37 }
 0x31b   : > { %v4094_v38 = vsel %vm4092_vm6, %v4079_v16, %v7342_v61 }
 0x31c   : > { %3004 = vmatmul.bf16.gmra.mxu0 %v10530_v51  ;;  %7390 = vrot.lane.b32.xlu0 %v10792_v26, %s8150_s24  ;;  %v4109_v10 = vsel %vm4107_vm7, %v4094_v38, %v7347_v54  ;;  %v10960_v51 = vpop.permute.xlu2 %7400 }
 0x31d   : > { %v4124_v39 = vsel %vm4122_vm8, %v4109_v10, %v7352_v1  ;;  %v7362_v1 = vunpack.i.l.bf16 %v10886_v6 }
 0x31e   : > { %v10952_v50 = vpop.f32.mrf.mxu3 }
 0x31f   : > { %7540 = vrot.lane.b32.xlu2 %v10930_v34, %s8151_s14  ;;  %v10956_v32 = vpop.f32.mrf.mxu2 }
 0x320   : > { %v3044_v37 = vpop.f32.mrf.mxu1  ;;  %v10958_v16 = vpop.permute.xlu0 %7355 }
 0x321   : > { %v3045_v49 = vadd.f32 %v3044_v37, %v2966_v45  ;;  %v7357_v61 = vunpack.i.l.bf16 %v10958_v16  ;;  %v10963_v54 = vpop.f32.mrf.mxu0  ;;  %v7387_v45 = vunpack.i.l.bf16 %v10934_v12  ;;  %v7402_v37 = vunpack.i.l.bf16 %v10960_v51 }
 0x323   : > { %v10966_v38 = vadd.f32 %v3123_v36, %v3045_v49  ;;  %3083 = vmatmul.bf16.gmra.mxu1 %v10488_v62  ;;  %v4139_v10 = vsel %vm4137_vm9, %v4124_v39, %v7357_v61  ;;  %2930 = vmatmul.bf16.gmra.mxu3 %v10589_v13 }
 0x324   : > { %7405 = vrot.lane.b32.xlu0 %v10792_v26, %s8153_s0  ;;  %v4154_v30 = vsel %vm4152_vm10, %v4139_v10, %v7362_v1  ;;  %6056 = vmatmul.msk.bf16.gmra.mxu2 %vm1829_vm2, %v10555_v40 }
 0x325   : > { %v4169_v62 = vsel %vm4167_vm11, %v4154_v30, %v7387_v45  ;;  %v12971_v30 = vld [vmem:[#allocation25_spill] sm:$0xff]  ;;  %v12972_v45 = vld [vmem:[#allocation44_spill] sm:$0xff] }
 0x326   : > { %v2891_v36 = vpop.f32.mrf.mxu3  ;;  %v10980_v49 = vsel %vm4182_vm12, %v4169_v62, %v7402_v37  ;;  %v12973_v62 = vld [vmem:[#allocation43_spill] sm:$0xff] }
 0x327   : > { %12970 = vst [vmem:[#allocation29_spill] sm:$0xff] %v10980_v49  ;;  %7555 = vrot.lane.b32.xlu2 %v10930_v34, %s12761_s21  ;;  %v3128_v61 = vpop.f32.mrf.mxu2 }
 0x328   : > { %v10984_v13 = vpop.f32.mrf.mxu1 }
 0x329   : > { %v2970_v39 = vpop.f32.mrf.mxu0 }
 0x32c   : > { %3009 = vmatmul.bf16.gmra.mxu0 %v10613_v42  ;;  %7415 = vrot.lane.b32.xlu0 %v10792_v26, %s8149_s25 }
 0x32e   : > { %v2893_v1 = vpop.f32.mrf.mxu3 }
 0x32f   : > { %v3130_v37 = vpop.f32.mrf.mxu2  ;;  %v2894_v63 = vadd.f32 %v2893_v1, %v10830_v22 }
 0x330   : > { %v3049_v40 = vpop.f32.mrf.mxu1 }
 0x331   : > { %v2972_v10 = vpop.f32.mrf.mxu0 }
 0x332   : > { %v2973_v52 = vadd.f32 %v2972_v10, %v2894_v63 }
 0x333   : > { %3088 = vmatmul.bf16.gmra.mxu1 %v12971_v30  ;;  %2935 = vmatmul.bf16.gmra.mxu3 %v12972_v45  ;;  %v2892_v30 = vadd.f32 %v2891_v36, %v10830_v22 }
 0x334   : > { %7425 = vrot.lane.b32.xlu0 %v10792_v26, %s8151_s14  ;;  %6057 = vmatmul.msk.bf16.gmra.mxu2 %vm1829_vm2, %v12973_v62  ;;  %vm4227_vm2 = vcmask 588800  }
 0x335   : > { %v2971_v41 = vadd.f32 %v2970_v39, %v2892_v30  ;;  %v7353_v30 = vunpack.i.h.bf16 %v10876_v20 }
 0x336   : > { %v2896_v11 = vpop.f32.mrf.mxu3 }
 0x337   : > { %v2897_v45 = vadd.f32 %v2896_v11, %v10830_v22  ;;  %v3133_v56 = vpop.f32.mrf.mxu2  ;;  %v3050_v15 = vadd.f32 %v3049_v40, %v2971_v41 }
 0x338   : > { %v3051_v58 = vpop.f32.mrf.mxu1 }
 0x339   : > { %v2975_v42 = vpop.f32.mrf.mxu0  ;;  %v3052_v62 = vadd.f32 %v3051_v58, %v2973_v52  ;;  %v3129_v27 = vadd.f32 %v3128_v61, %v3050_v15  ;;  %v7343_v61 = vunpack.i.h.bf16 %v10941_v44  ;;  %v7388_v44 = vunpack.i.h.bf16 %v10934_v12 }
 0x33a   : > { %v2976_v25 = vadd.f32 %v2975_v42, %v2897_v45 }
 0x33b   : > { %v3131_v36 = vadd.f32 %v3130_v37, %v3052_v62  ;;  %v3195_v58 = vmax.f32 %v3129_v27, 0.0  ;;  %v7348_v37 = vunpack.i.h.bf16 %v10932_v0  ;;  %v7358_v62 = vunpack.i.h.bf16 %v10958_v16 }
 0x33c   : > { %3014 = vmatmul.bf16.gmra.mxu0 %v10671_v53  ;;  %7435 = vrot.lane.b32.xlu0 %v10792_v26, %s12772_s19  ;;  %v7403_v0 = vunpack.i.h.bf16 %v10960_v51  ;;  %v12753_v16 = vunpack.i.l.bf16 %v10825_v24 }
 0x33d   : > { %v3197_v49 = vmax.f32 %v3131_v36, 0.0  ;;  %v7366_v36 = vpop.permute.xlu0 %7365 }
 0x33e   : > { %v2898_v21 = vpop.f32.mrf.mxu3  ;;  %v11048_v12 = vmax.f32 %v10686_v55, %v12753_v16 }
 0x33f   : > { %v2899_v48 = vadd.f32 %v2898_v21, %v10830_v22  ;;  %v3135_v39 = vpop.f32.mrf.mxu2 }
 0x340   : > { %v3054_v31 = vpop.f32.mrf.mxu1 }
 0x341   : > { %v3055_v1 = vadd.f32 %v3054_v31, %v2976_v25  ;;  %v2977_v53 = vpop.f32.mrf.mxu0  ;;  %v3252_v25 = vsel %vm3235_vm3, %v3195_v58, -inf }
 0x342   : > { %v2978_v63 = vadd.f32 %v2977_v53, %v2899_v48  ;;  %v7363_v53 = vunpack.i.h.bf16 %v10886_v6 }
 0x343   : > { %3093 = vmatmul.bf16.gmra.mxu1 %v12974_v8  ;;  %v3134_v11 = vadd.f32 %v3133_v56, %v3055_v1  ;;  %v3253_v8 = vsel %vm3235_vm3, %v3197_v49, -inf  ;;  %v7338_v49 = vunpack.i.h.bf16 %v10860_v19 }
 0x344   : > { %7445 = vrot.lane.b32.xlu0 %v10792_v26, %s12778_s18  ;;  %v11011_v48 = vmax.f32 %v3252_v25, %v3253_v8  ;;  %v7367_v8 = vunpack.i.l.bf16 %v7366_v36 }
 0x345   : > { %v3199_v52 = vmax.f32 %v3134_v11, 0.0 }
 0x347   : > { %v3256_v31 = vsel %vm3235_vm3, %v3199_v52, -inf }
 0x348   : > { %v3056_v10 = vpop.f32.mrf.mxu1 }
 0x349   : > { %v3057_v59 = vadd.f32 %v3056_v10, %v2978_v63 }
 0x34b   : > { %v3136_v41 = vadd.f32 %v3135_v39, %v3057_v59 }
 0x34c   : > { %7455 = vrot.lane.b32.xlu0 %v10792_v26, %s12761_s21 }
 0x34d   : > { %v3201_v21 = vmax.f32 %v3136_v41, 0.0  ;;  %v7368_v41 = vunpack.i.h.bf16 %v7366_v36 }
 0x34f   : > { %v3257_v15 = vsel %vm3235_vm3, %v3201_v21, -inf }
 0x350   : > { %v11013_v56 = vmax.f32 %v3256_v31, %v3257_v15  ;;  %v4067_v15 = vsel %vm4062_vm4, %v10776_v23, %v7368_v41  ;;  %v11096_v41 = vpop.f32.mrf.mxu0 }
 0x352   : > { %v7569_v27 = vpack.i.bf16 %v11013_v56, %v11011_v48 }
 0x354   : > { %7570 = vrot.lane.b32.xlu2 %v7569_v27, %s8148_s16  ;;  %v4066_v27 = vsel %vm4062_vm4, %v10781_v33, %v7367_v8 }
 0x376   : > { %v11018_v59 = vpop.permute.xlu1 %7370 }
 0x377   : > { %v7372_v26 = vunpack.i.l.bf16 %v11018_v59 }
 0x379   : > { %v4065_v40 = vsel %vm4062_vm4, %v10719_v60, %v7372_v26 }
 0x37a   : > { %v4080_v42 = vsel %vm4077_vm5, %v4065_v40, %v7338_v49 }
 0x37b   : > { %v4095_v45 = vsel %vm4092_vm6, %v4080_v42, %v7343_v61 }
 0x37c   : > { %v4110_v1 = vsel %vm4107_vm7, %v4095_v45, %v7348_v37 }
 0x37d   : > { %v4125_v19 = vsel %vm4122_vm8, %v4110_v1, %v7353_v30 }
 0x37e   : > { %v4140_v60 = vsel %vm4137_vm9, %v4125_v19, %v7358_v62 }
 0x37f   : > { %v4155_v11 = vsel %vm4152_vm10, %v4140_v60, %v7363_v53 }
 0x380   : > { %v4170_v20 = vsel %vm4167_vm11, %v4155_v11, %v7388_v44 }
 0x381   : > { %v11039_v63 = vsel %vm4182_vm12, %v4170_v20, %v7403_v0  ;;  %v11092_v20 = vpop.f32.mrf.mxu3 }
 0x386   : > { %v11042_v10 = vpop.permute.xlu0 %7375 }
 0x387   : > { %v12754_v6 = vunpack.i.l.bf16 %v11042_v10 }
 0x389   : > { %v11053_v51 = vmax.f32 %v10892_v17, %v12754_v6 }
 0x38b   : > { %v11057_v39 = vpack.i.bf16 %v11048_v12, %v11053_v51  ;;  %v7379_v58 = vpack.i.bf16 %v10783_v47, %v11053_v51 }
 0x38d   : > { %7470 = vrot.lane.b32.xlu0 %v11057_v39, %s12771_s26  ;;  %7380 = vrot.lane.b32.xlu1 %v7379_v58, %s8148_s16 }
 0x38e   : > { %v7391_v52 = vpop.permute.xlu0 %7390 }
 0x38f   : > { %v7393_v21 = vunpack.i.h.bf16 %v7391_v52  ;;  %v7392_v25 = vunpack.i.l.bf16 %v7391_v52 }
 0x391   : > { %v4081_v61 = vsel %vm4077_vm5, %v4066_v27, %v7392_v25  ;;  %v4082_v40 = vsel %vm4077_vm5, %v4067_v15, %v7393_v21  ;;  %v11102_v21 = vpop.f32.mrf.mxu1 }
 0x395   : > { %7395 = vrot.lane.b32.xlu1 %v11057_v39, %s8150_s24  ;;  %7485 = vrot.lane.b32.xlu0 %v10847_v9, %s8153_s0 }
 0x396   : > { %v7406_v31 = vpop.permute.xlu0 %7405 }
 0x397   : > { %v7408_v26 = vunpack.i.h.bf16 %v7406_v31  ;;  %v7407_v49 = vunpack.i.l.bf16 %v7406_v31 }
 0x399   : > { %v4096_v37 = vsel %vm4092_vm6, %v4081_v61, %v7407_v49  ;;  %v4097_v42 = vsel %vm4092_vm6, %v4082_v40, %v7408_v26  ;;  %v2903_v26 = vpop.f32.mrf.mxu3  ;;  %v7466_v49 = vpop.permute.xlu2 %7465 }
 0x39a   : > { %v11106_v61 = vpop.f32.mrf.mxu2 }
 0x39d   : > { %7410 = vrot.lane.b32.xlu1 %v11057_v39, %s8153_s0  ;;  %7500 = vrot.lane.b32.xlu0 %v10847_v9, %s12772_s19 }
 0x39e   : > { %v7416_v23 = vpop.permute.xlu0 %7415 }
 0x39f   : > { %v7418_v30 = vunpack.i.h.bf16 %v7416_v23  ;;  %v7417_v45 = vunpack.i.l.bf16 %v7416_v23 }
 0x3a1   : > { %v4111_v33 = vsel %vm4107_vm7, %v4096_v37, %v7417_v45  ;;  %v4112_v62 = vsel %vm4107_vm7, %v4097_v42, %v7418_v30  ;;  %v2982_v37 = vpop.f32.mrf.mxu0  ;;  %v7468_v30 = vunpack.i.h.bf16 %v7466_v49  ;;  %v7467_v45 = vunpack.i.l.bf16 %v7466_v49 }
 0x3a5   : > { %7420 = vrot.lane.b32.xlu1 %v11057_v39, %s8149_s25  ;;  %7510 = vrot.lane.b32.xlu0 %v10847_v9, %s12761_s21 }
 0x3a6   : > { %v7426_v1 = vpop.permute.xlu0 %7425 }
 0x3a7   : > { %v7428_v53 = vunpack.i.h.bf16 %v7426_v1  ;;  %v7427_v19 = vunpack.i.l.bf16 %v7426_v1 }
 0x3a9   : > { %v4126_v44 = vsel %vm4122_vm8, %v4111_v33, %v7427_v19  ;;  %v4127_v36 = vsel %vm4122_vm8, %v4112_v62, %v7428_v53  ;;  %v3061_v33 = vpop.f32.mrf.mxu1 }
 0x3ad   : > { %7430 = vrot.lane.b32.xlu1 %v11057_v39, %s8151_s14  ;;  %7530 = vrot.lane.b32.xlu0 %v10930_v34, %s8153_s0 }
 0x3ae   : > { %v7436_v60 = vpop.permute.xlu0 %7435 }
 0x3af   : > { %v7438_v0 = vunpack.i.h.bf16 %v7436_v60  ;;  %v7437_v11 = vunpack.i.l.bf16 %v7436_v60  ;;  %v2985_v60 = vpop.f32.mrf.mxu0 }
 0x3b1   : > { %v4141_v58 = vsel %vm4137_vm9, %v4126_v44, %v7437_v11  ;;  %v4142_v52 = vsel %vm4137_vm9, %v4127_v36, %v7438_v0  ;;  %v2906_v44 = vpop.f32.mrf.mxu3  ;;  %v3140_v36 = vpop.f32.mrf.mxu2  ;;  %v7474_v11 = vpack.i.bf16 %v10813_v18, %v10841_v57 }
 0x3b2   : > { %v3064_v0 = vpop.f32.mrf.mxu1  ;;  %v2907_v17 = vadd.f32 %v2906_v44, %v10830_v22  ;;  %v3191_v44 = vmax.f32 %v10966_v38, 0.0 }
 0x3b4   : > { %v3248_v38 = vsel %vm3235_vm3, %v3191_v44, -inf }
 0x3b5   : > { %7440 = vrot.lane.b32.xlu1 %v11057_v39, %s12772_s19  ;;  %7545 = vrot.lane.b32.xlu0 %v10930_v34, %s12772_s19 }
 0x3b6   : > { %v7446_v8 = vpop.permute.xlu0 %7445 }
 0x3b7   : > { %v7448_v25 = vunpack.i.h.bf16 %v7446_v8  ;;  %v7447_v31 = vunpack.i.l.bf16 %v7446_v8  ;;  %v2987_v8 = vpop.f32.mrf.mxu0 }
 0x3b9   : > { %v4156_v15 = vsel %vm4152_vm10, %v4141_v58, %v7447_v31  ;;  %v4157_v27 = vsel %vm4152_vm10, %v4142_v52, %v7448_v25  ;;  %v2908_v58 = vpop.f32.mrf.mxu3  ;;  %v3143_v52 = vpop.f32.mrf.mxu2 }
 0x3ba   : > { %v3066_v25 = vpop.f32.mrf.mxu1 }
 0x3bd   : > { %7450 = vrot.lane.b32.xlu1 %v11057_v39, %s12778_s18  ;;  %7560 = vrot.lane.b32.xlu0 %v10930_v34, %s12771_s26 }
 0x3be   : > { %v7456_v40 = vpop.permute.xlu0 %7455 }
 0x3bf   : > { %v7458_v42 = vunpack.i.h.bf16 %v7456_v40  ;;  %v7457_v23 = vunpack.i.l.bf16 %v7456_v40 }
 0x3c1   : > { %v4171_v62 = vsel %vm4167_vm11, %v4156_v15, %v7457_v23  ;;  %v4172_v1 = vsel %vm4167_vm11, %v4157_v27, %v7458_v42  ;;  %v2911_v31 = vpop.f32.mrf.mxu3  ;;  %v3145_v15 = vpop.f32.mrf.mxu2 }
 0x3c2   : > { %v11115_v53 = vsel %vm4182_vm12, %v4171_v62, %v7467_v45  ;;  %v11118_v19 = vsel %vm4182_vm12, %v4172_v1, %v7468_v30  ;;  %v11127_v27 = vpop.f32.mrf.mxu0  ;;  %v2889_v30 = vadd.f32 %v10952_v50, %v10830_v22  ;;  %v2884_v45 = vadd.f32 %v10890_v43, %v10830_v22 }
 0x3c3   : > { %12975 = vst [vmem:[#allocation11_spill] sm:$0xff] %v11115_v53  ;;  %v2909_v50 = vadd.f32 %v2908_v58, %v10830_v22  ;;  %v2986_v58 = vadd.f32 %v2985_v60, %v2907_v17 }
 0x3c4   : > { %12976 = vst [vmem:[#allocation31_spill] sm:$0xff] %v11118_v19  ;;  %v2968_v1 = vadd.f32 %v10963_v54, %v2889_v30  ;;  %v2904_v19 = vadd.f32 %v2903_v26, %v10830_v22 }
 0x3c5   : > { %7460 = vrot.lane.b32.xlu1 %v11057_v39, %s12761_s21  ;;  %v11131_v39 = vpop.f32.mrf.mxu1  ;;  %s12775_s21 = smov 68  }
 0x3c9   : > { %v2913_v49 = vpop.f32.mrf.mxu3  ;;  %v11133_v40 = vpop.f32.mrf.mxu2 }
 0x3ca   : > { %v2992_v42 = vpop.f32.mrf.mxu0  ;;  %v2914_v17 = vadd.f32 %v2913_v49, %v10830_v22 }
 0x3cd   : > { %7475 = vrot.lane.b32.xlu1 %v7474_v11, %s8148_s16  ;;  %v3071_v23 = vpop.f32.mrf.mxu1  ;;  %v2963_v11 = vadd.f32 %v10903_v4, %v2884_v45  ;;  %v2902_v4 = vadd.f32 %v11092_v20, %v10830_v22  ;;  %v3187_v20 = vmax.f32 %v10908_v5, 0.0 }
 0x3cf   : > { %v3042_v6 = vadd.f32 %v10939_v7, %v2963_v11  ;;  %v2983_v7 = vadd.f32 %v2982_v37, %v2904_v19  ;;  %v2981_v11 = vadd.f32 %v11096_v41, %v2902_v4 }
 0x3d1   : > { %v2916_v62 = vpop.f32.mrf.mxu3  ;;  %v11145_v16 = vpop.f32.mrf.mxu2  ;;  %v3121_v54 = vadd.f32 %v10897_v3, %v3042_v6  ;;  %v3065_v3 = vadd.f32 %v3064_v0, %v2986_v58  ;;  %v3060_v24 = vadd.f32 %v11102_v21, %v2981_v11  ;;  %v2912_v21 = vadd.f32 %v2911_v31, %v10830_v22 }
 0x3d2   : > { %v2995_v53 = vpop.f32.mrf.mxu0  ;;  %v2917_v19 = vadd.f32 %v2916_v62, %v10830_v22 }
 0x3d3   : > { %v3189_v26 = vmax.f32 %v3121_v54, 0.0  ;;  %v3144_v5 = vadd.f32 %v3143_v52, %v3065_v3  ;;  %v3139_v49 = vadd.f32 %v11106_v61, %v3060_v24  ;;  %v2991_v52 = vadd.f32 %v11127_v27, %v2912_v21 }
 0x3d4   : > { %v2996_v54 = vadd.f32 %v2995_v53, %v2917_v19 }
 0x3d5   : > { %7490 = vrot.lane.b32.xlu1 %v10847_v9, %s8149_s25  ;;  %v3074_v43 = vpop.f32.mrf.mxu1  ;;  %v3245_v41 = vsel %vm3235_vm3, %v3189_v26, -inf  ;;  %v3070_v61 = vadd.f32 %v11131_v39, %v2991_v52 }
 0x3d7   : > { %v3149_v39 = vadd.f32 %v11133_v40, %v3070_v61 }
 0x3d9   : > { %v2918_v30 = vpop.f32.mrf.mxu3 }
 0x3da   : > { %v2919_v6 = vadd.f32 %v2918_v30, %v10830_v22  ;;  %v3075_v30 = vadd.f32 %v3074_v43, %v2996_v54 }
 0x3dd   : > { %7505 = vrot.lane.b32.xlu1 %v10847_v9, %s12778_s18  ;;  %v3076_v60 = vpop.f32.mrf.mxu1 }
 0x3e5   : > { %7515 = vrot.lane.b32.xlu1 %v10847_v9, %s12771_s26  ;;  %v3047_v9 = vadd.f32 %v10984_v13, %v2968_v1  ;;  %v2988_v13 = vadd.f32 %v2987_v8, %v2909_v50  ;;  %v2997_v8 = vpop.f32.mrf.mxu0 }
 0x3e6   : > { %v2998_v0 = vadd.f32 %v2997_v8, %v2919_v6 }
 0x3e7   : > { %v3126_v55 = vadd.f32 %v10956_v32, %v3047_v9  ;;  %v3067_v1 = vadd.f32 %v3066_v25, %v2988_v13  ;;  %v3062_v32 = vadd.f32 %v3061_v33, %v2983_v7  ;;  %v3153_v9 = vpop.f32.mrf.mxu2  ;;  %v3244_v25 = vsel %vm3235_vm3, %v3187_v20, -inf }
 0x3e8   : > { %v3077_v4 = vadd.f32 %v3076_v60, %v2998_v0  ;;  %v11177_v13 = vmax.f32 %v3244_v25, %v3245_v41  ;;  %v3207_v7 = vmax.f32 %v3144_v5, 0.0  ;;  %v3154_v43 = vadd.f32 %v3153_v9, %v3075_v30 }
 0x3e9   : > { %v3193_v45 = vmax.f32 %v3126_v55, 0.0  ;;  %v3146_v55 = vadd.f32 %v3145_v15, %v3067_v1  ;;  %v3141_v33 = vadd.f32 %v3140_v36, %v3062_v32  ;;  %v2993_v36 = vadd.f32 %v2992_v42, %v2914_v17 }
 0x3ea   : > { %v3203_v1 = vmax.f32 %v3139_v49, 0.0  ;;  %v3264_v27 = vsel %vm3235_vm3, %v3207_v7, -inf  ;;  %v3211_v17 = vmax.f32 %v3149_v39, 0.0 }
 0x3eb   : > { %v3249_v37 = vsel %vm3235_vm3, %v3193_v45, -inf  ;;  %v3209_v50 = vmax.f32 %v3146_v55, 0.0  ;;  %v3072_v31 = vadd.f32 %v3071_v23, %v2993_v36  ;;  %v3215_v55 = vmax.f32 %v3154_v43, 0.0 }
 0x3ec   : > { %v11172_v15 = vmax.f32 %v3248_v38, %v3249_v37  ;;  %v3260_v44 = vsel %vm3235_vm3, %v3203_v1, -inf }
 0x3ed   : > { %7520 = vrot.lane.b32.xlu1 %v10930_v34, %s8148_s16  ;;  %v3265_v24 = vsel %vm3235_vm3, %v3209_v50, -inf  ;;  %v3151_v23 = vadd.f32 %v11145_v16, %v3072_v31  ;;  %v3272_v41 = vsel %vm3235_vm3, %v3215_v55, -inf }
 0x3ee   : > { %v7564_v58 = vpack.i.bf16 %v11172_v15, %v11177_v13  ;;  %v11189_v11 = vmax.f32 %v3264_v27, %v3265_v24  ;;  %v11247_v27 = vpop.permute.xlu2 %7480 }
 0x3ef   : > { %v3155_v45 = vpop.f32.mrf.mxu2  ;;  %v3213_v37 = vmax.f32 %v3151_v23, 0.0 }
 0x3f0   : > { %v3156_v42 = vadd.f32 %v3155_v45, %v3077_v4 }
 0x3f1   : > { %v3269_v40 = vsel %vm3235_vm3, %v3213_v37, -inf }
 0x3f2   : > { %v3217_v3 = vmax.f32 %v3156_v42, 0.0 }
 0x3f4   : > { %v3273_v19 = vsel %vm3235_vm3, %v3217_v3, -inf }
 0x3f5   : > { %7535 = vrot.lane.b32.xlu1 %v10930_v34, %s8149_s25 }
 0x3f6   : > { %v11260_v55 = vpop.permute.xlu2 %7495 }
 0x3f7   : > { %12979 = vst [vmem:[#allocation30_spill] sm:$0xff] %v11260_v55 }
 0x3fd   : > { %7550 = vrot.lane.b32.xlu1 %v10930_v34, %s12778_s18  ;;  %v3205_v34 = vmax.f32 %v3141_v33, 0.0  ;;  %v11207_v33 = vmax.f32 %v3272_v41, %v3273_v19 }
 0x3ff   : > { %v11175_v62 = vpop.permute.xlu1 %7380  ;;  %v3261_v26 = vsel %vm3235_vm3, %v3205_v34, -inf  ;;  %v11233_v30 = vpop.permute.xlu0 %7470 }
 0x400   : > { %v7382_v53 = vunpack.i.l.bf16 %v11175_v62  ;;  %v11196_v20 = vmax.f32 %v3260_v44, %v3261_v26  ;;  %v7472_v61 = vunpack.i.l.bf16 %v11233_v30  ;;  %v7482_v44 = vunpack.i.l.bf16 %v11247_v27 }
 0x402   : > { %v4068_v8 = vsel %vm4062_vm4, %v11053_v51, %v7382_v53  ;;  %v7574_v9 = vpack.i.bf16 %v11189_v11, %v11196_v20  ;;  %v3268_v51 = vsel %vm3235_vm3, %v3211_v17, -inf  ;;  %v7497_v17 = vunpack.i.l.bf16 %v11260_v55 }
 0x403   : > { %v11213_v5 = vmax.f32 %v3268_v51, %v3269_v40 }
 0x405   : > { %7565 = vrot.lane.b32.xlu1 %v7564_v58, %s8148_s16  ;;  %v7579_v0 = vpack.i.bf16 %v11207_v33, %v11213_v5 }
 0x407   : > { %v11191_v32 = vpop.permute.xlu1 %7395  ;;  %v11241_v42 = vpop.permute.xlu0 %7485 }
 0x408   : > { %v7397_v6 = vunpack.i.l.bf16 %v11191_v32  ;;  %v7487_v39 = vunpack.i.l.bf16 %v11241_v42 }
 0x40a   : > { %v4083_v16 = vsel %vm4077_vm5, %v4068_v8, %v7397_v6 }
 0x40d   : > { %7575 = vrot.lane.b32.xlu1 %v7574_v9, %s8148_s16 }
 0x40f   : > { %v11209_v60 = vpop.permute.xlu1 %7410  ;;  %v11257_v8 = vpop.permute.xlu0 %7500 }
 0x410   : > { %v7412_v38 = vunpack.i.l.bf16 %v11209_v60  ;;  %12978 = vst [vmem:[#allocation32_spill] sm:$0xff] %v11257_v8  ;;  %v7502_v19 = vunpack.i.l.bf16 %v11257_v8 }
 0x412   : > { %v4098_v21 = vsel %vm4092_vm6, %v4083_v16, %v7412_v38 }
 0x415   : > { %7580 = vrot.lane.b32.xlu1 %v7579_v0, %s8148_s16 }
 0x417   : > { %v11219_v25 = vpop.permute.xlu1 %7420  ;;  %v11270_v51 = vpop.permute.xlu0 %7510 }
 0x418   : > { %v7422_v49 = vunpack.i.l.bf16 %v11219_v25  ;;  %12980 = vst [vmem:[#allocation34_spill] sm:$0xff] %v11270_v51  ;;  %v7512_v0 = vunpack.i.l.bf16 %v11270_v51 }
 0x41a   : > { %v4113_v50 = vsel %vm4107_vm7, %v4098_v21, %v7422_v49 }
 0x41f   : > { %v11223_v36 = vpop.permute.xlu1 %7430 }
 0x420   : > { %v7432_v54 = vunpack.i.l.bf16 %v11223_v36 }
 0x422   : > { %v4128_v4 = vsel %vm4122_vm8, %v4113_v50, %v7432_v54 }
 0x427   : > { %v11227_v34 = vpop.permute.xlu1 %7440 }
 0x428   : > { %v7442_v7 = vunpack.i.l.bf16 %v11227_v34 }
 0x42a   : > { %v4143_v52 = vsel %vm4137_vm9, %v4128_v4, %v7442_v7  ;;  %v7526_v7 = vpop.permute.xlu2 %7525 }
 0x42f   : > { %v11231_v31 = vpop.permute.xlu1 %7450 }
 0x430   : > { %v7452_v45 = vunpack.i.l.bf16 %v11231_v31 }
 0x432   : > { %v4158_v58 = vsel %vm4152_vm10, %v4143_v52, %v7452_v45  ;;  %v7531_v45 = vpop.permute.xlu0 %7530 }
 0x437   : > { %v11237_v1 = vpop.permute.xlu1 %7460 }
 0x438   : > { %v7462_v24 = vunpack.i.l.bf16 %v11237_v1 }
 0x43a   : > { %v4173_v53 = vsel %vm4167_vm11, %v4158_v58, %v7462_v24 }
 0x43b   : > { %v11245_v26 = vsel %vm4182_vm12, %v4173_v53, %v7472_v61  ;;  %v7528_v53 = vunpack.i.h.bf16 %v7526_v7 }
 0x43c   : > { %12977 = vst [vmem:[#allocation20_spill] sm:$0xff] %v11245_v26 }
 0x43f   : > { %v11249_v23 = vpop.permute.xlu1 %7475 }
 0x440   : > { %v7477_v43 = vunpack.i.l.bf16 %v11249_v23 }
 0x442   : > { %v4070_v3 = vsel %vm4062_vm4, %v10841_v57, %v7477_v43  ;;  %v7527_v43 = vunpack.i.l.bf16 %v7526_v7 }
 0x443   : > { %v4085_v6 = vsel %vm4077_vm5, %v4070_v3, %v7482_v44  ;;  %v7533_v44 = vunpack.i.h.bf16 %v7531_v45 }
 0x444   : > { %v4100_v37 = vsel %vm4092_vm6, %v4085_v6, %v7487_v39  ;;  %v7532_v39 = vunpack.i.l.bf16 %v7531_v45 }
 0x447   : > { %v11262_v16 = vpop.permute.xlu1 %7490 }
 0x448   : > { %v7492_v9 = vunpack.i.l.bf16 %v11262_v16 }
 0x44a   : > { %v4115_v40 = vsel %vm4107_vm7, %v4100_v37, %v7492_v9 }
 0x44b   : > { %v4130_v57 = vsel %vm4122_vm8, %v4115_v40, %v7497_v17  ;;  %v7541_v17 = vpop.permute.xlu2 %7540 }
 0x44c   : > { %v4145_v41 = vsel %vm4137_vm9, %v4130_v57, %v7502_v19  ;;  %v7546_v57 = vpop.permute.xlu0 %7545 }
 0x44f   : > { %v11272_v38 = vpop.permute.xlu1 %7505 }
 0x450   : > { %12981 = vst [vmem:[#allocation33_spill] sm:$0xff] %v11272_v38  ;;  %v7507_v21 = vunpack.i.l.bf16 %v11272_v38 }
 0x452   : > { %v4160_v49 = vsel %vm4152_vm10, %v4145_v41, %v7507_v21 }
 0x453   : > { %v4175_v50 = vsel %vm4167_vm11, %v4160_v49, %v7512_v0  ;;  %v7543_v49 = vunpack.i.h.bf16 %v7541_v17 }
 0x457   : > { %v11278_v54 = vpop.permute.xlu1 %7515 }
 0x458   : > { %12982 = vst [vmem:[#allocation35_spill] sm:$0xff] %v11278_v54  ;;  %v7517_v4 = vunpack.i.l.bf16 %v11278_v54 }
 0x45a   : > { %v11282_v52 = vsel %vm4182_vm12, %v4175_v50, %v7517_v4  ;;  %v7542_v50 = vunpack.i.l.bf16 %v7541_v17  ;;  %v7548_v4 = vunpack.i.h.bf16 %v7546_v57 }
 0x45b   : > { %12983 = vst [vmem:[#allocation19_spill] sm:$0xff] %v11282_v52 }
 0x45f   : > { %v7521_v58 = vpop.permute.xlu1 %7520 }
 0x460   : > { %v7523_v24 = vunpack.i.h.bf16 %v7521_v58  ;;  %v7522_v61 = vunpack.i.l.bf16 %v7521_v58 }
 0x462   : > { %v4072_v3 = vsel %vm4062_vm4, %v10921_v14, %v7523_v24  ;;  %v4071_v6 = vsel %vm4062_vm4, %v10914_v35, %v7522_v61  ;;  %v7547_v14 = vunpack.i.l.bf16 %v7546_v57  ;;  %v7378_v57 = vunpack.i.h.bf16 %v11042_v10 }
 0x463   : > { %v4086_v37 = vsel %vm4077_vm5, %v4071_v6, %v7527_v43  ;;  %v4087_v9 = vsel %vm4077_vm5, %v4072_v3, %v7528_v53  ;;  %v7556_v53 = vpop.permute.xlu2 %7555 }
 0x464   : > { %v4101_v19 = vsel %vm4092_vm6, %v4086_v37, %v7532_v39  ;;  %v4102_v40 = vsel %vm4092_vm6, %v4087_v9, %v7533_v44  ;;  %v7558_v3 = vunpack.i.h.bf16 %v7556_v53  ;;  %v7557_v6 = vunpack.i.l.bf16 %v7556_v53 }
 0x467   : > { %v7536_v41 = vpop.permute.xlu1 %7535 }
 0x468   : > { %v7538_v21 = vunpack.i.h.bf16 %v7536_v41  ;;  %v7537_v0 = vunpack.i.l.bf16 %v7536_v41 }
 0x46a   : > { %v4116_v7 = vsel %vm4107_vm7, %v4101_v19, %v7537_v0  ;;  %v4117_v35 = vsel %vm4107_vm7, %v4102_v40, %v7538_v21  ;;  %v2921_v40 = vpop.f32.mrf.mxu3  ;;  %v3461_v0 = vmax.f32 %v10895_v46, %v7378_v57 }
 0x46b   : > { %v4131_v45 = vsel %vm4122_vm8, %v4116_v7, %v7542_v50  ;;  %v4132_v58 = vsel %vm4122_vm8, %v4117_v35, %v7543_v49  ;;  %v3000_v49 = vpop.f32.mrf.mxu0  ;;  %v3158_v35 = vpop.f32.mrf.mxu2 }
 0x46c   : > { %v4146_v24 = vsel %vm4137_vm9, %v4131_v45, %v7547_v14  ;;  %v4147_v61 = vsel %vm4137_vm9, %v4132_v58, %v7548_v4  ;;  %v3079_v4 = vpop.f32.mrf.mxu1 }
 0x46f   : > { %v7551_v43 = vpop.permute.xlu1 %7550 }
 0x470   : > { %v7553_v44 = vunpack.i.h.bf16 %v7551_v43  ;;  %v7552_v39 = vunpack.i.l.bf16 %v7551_v43 }
 0x472   : > { %v4161_v37 = vsel %vm4152_vm10, %v4146_v24, %v7552_v39  ;;  %v4162_v9 = vsel %vm4152_vm10, %v4147_v61, %v7553_v44  ;;  %v2923_v7 = vpop.f32.mrf.mxu3  ;;  %v2922_v24 = vadd.f32 %v2921_v40, %v10830_v22 }
 0x473   : > { %v11301_v17 = vsel %vm4167_vm11, %v4161_v37, %v7557_v6  ;;  %v11304_v19 = vsel %vm4167_vm11, %v4162_v9, %v7558_v3  ;;  %v2924_v45 = vadd.f32 %v2923_v7, %v10830_v22  ;;  %v3002_v58 = vpop.f32.mrf.mxu0  ;;  %v3160_v44 = vpop.f32.mrf.mxu2  ;;  %v12986_v3 = vunpack.i.h.bf16 %v10704_v28 }
 0x474   : > { %12984 = vst [vmem:[#allocation37_spill] sm:$0xff] %v11301_v17  ;;  %v3081_v61 = vpop.f32.mrf.mxu1  ;;  %v3001_v53 = vadd.f32 %v3000_v49, %v2922_v24  ;;  %v12987_v37 = vunpack.i.l.bf16 %v10704_v28  ;;  %v12988_v28 = vld [vmem:[#allocation18_spill] sm:$0xff] }
 0x475   : > { %12985 = vst [vmem:[#allocation36_spill] sm:$0xff] %v11304_v19  ;;  %v3003_v46 = vadd.f32 %v3002_v58, %v2924_v45 }
 0x476   : > { %v3405_v9 = vsel %vm3403_vm13, %v12987_v37, %v7378_v57 }
 0x477   : > { %v11307_v41 = vpop.permute.xlu1 %7565  ;;  %v3082_v43 = vadd.f32 %v3081_v61, %v3003_v46 }
 0x478   : > { %v7567_v21 = vunpack.i.l.bf16 %v11307_v41 }
 0x479   : > { %v3161_v39 = vadd.f32 %v3160_v44, %v3082_v43 }
 0x47a   : > { %v3462_v50 = vmax.f32 %v11177_v13, %v7567_v21  ;;  %v3080_v13 = vadd.f32 %v3079_v4, %v3001_v53  ;;  %v3406_v6 = vsel %vm3403_vm13, %v12986_v3, %v7567_v21 }
 0x47b   : > { %v3221_v49 = vmax.f32 %v3161_v39, 0.0  ;;  %v3005_v58 = vpop.f32.mrf.mxu0  ;;  %v11335_v53 = vpop.f32.mrf.mxu2 }
 0x47c   : > { %v7584_v14 = vpack.i.bf16 %v3462_v50, %v3461_v0  ;;  %v3159_v40 = vadd.f32 %v3158_v35, %v3080_v13  ;;  %v3434_v0 = vmax.f32 %v10322_v2, %v3406_v6  ;;  %v3433_v50 = vmax.f32 %v10324_v29, %v3405_v9  ;;  %v11333_v2 = vpop.permute.xlu2 %7570  ;;  %v2926_v29 = vpop.f32.mrf.mxu3 }
 0x47d   : > { %v3277_v45 = vsel %vm3235_vm3, %v3221_v49, -inf  ;;  %v3084_v61 = vpop.f32.mrf.mxu1  ;;  %v7572_v55 = vunpack.i.l.bf16 %v11333_v2 }
 0x47e   : > { %7585 = vrot.lane.b32.xlu2 %v7584_v14, %s12759_s30  ;;  %s12774_s30 = smov 50   ;;  %v3219_v4 = vmax.f32 %v3159_v40, 0.0  ;;  %v7599_v7 = vpack.i.bf16 %v3434_v0, %v3433_v50 }
 0x480   : > { %v3276_v21 = vsel %vm3235_vm3, %v3219_v4, -inf }
 0x483   : > { %v3007_v13 = vpop.f32.mrf.mxu0  ;;  %v3165_v6 = vpop.f32.mrf.mxu2 }
 0x484   : > { %v2928_v46 = vpop.f32.mrf.mxu3 }
 0x485   : > { %v3086_v44 = vpop.f32.mrf.mxu1 }
 0x486   : > { %7590 = vrot.lane.b32.xlu2 %v7584_v14, %s12779_s29 }
 0x48b   : > { %v3010_v49 = vpop.f32.mrf.mxu0 }
 0x48c   : > { %v2931_v39 = vpop.f32.mrf.mxu3 }
 0x48e   : > { %7595 = vrot.lane.b32.xlu2 %v7584_v14, %s12774_s30  ;;  %v11328_v14 = vmax.f32 %v3276_v21, %v3277_v45  ;;  %v12989_v45 = vld [vmem:[#allocation29_spill] sm:$0xff] }
 0x490   : > { %v7604_v57 = vpack.i.bf16 %v11328_v14, %v12988_v28 }
 0x496   : > { %7600 = vrot.lane.b32.xlu2 %v7599_v7, %s12775_s21 }
 0x49e   : > { %7605 = vrot.lane.b32.xlu2 %v7604_v57, %s8148_s16 }
 0x4d8   : > { %v7586_v35 = vpop.permute.xlu2 %7585 }
 0x4d9   : > { %v7588_v40 = vunpack.i.h.bf16 %v7586_v35  ;;  %v7587_v0 = vunpack.i.l.bf16 %v7586_v35 }
 0x4e0   : > { %v7591_v24 = vpop.permute.xlu2 %7590 }
 0x4e1   : > { %v7593_v50 = vunpack.i.h.bf16 %v7591_v24  ;;  %v7592_v4 = vunpack.i.l.bf16 %v7591_v24 }
 0x4e8   : > { %v7596_v43 = vpop.permute.xlu2 %7595 }
 0x4e9   : > { %v7598_v57 = vunpack.i.h.bf16 %v7596_v43  ;;  %v7597_v19 = vunpack.i.l.bf16 %v7596_v43  ;;  %v2933_v43 = vpop.f32.mrf.mxu3 }
 0x4f0   : > { %v7601_v3 = vpop.permute.xlu2 %7600 }
 0x4f1   : > { %v7603_v37 = vunpack.i.h.bf16 %v7601_v3  ;;  %v7602_v9 = vunpack.i.l.bf16 %v7601_v3  ;;  %v3089_v3 = vpop.f32.mrf.mxu1 }
 0x4f3   : > { %v4200_v7 = vsel %vm4197_vm14, %v11039_v63, %v7603_v37  ;;  %v4199_v21 = vsel %vm4197_vm14, %v12989_v45, %v7602_v9  ;;  %v12765_v63 = vunpack.i.h.bf16 %v11175_v62 }
 0x4f4   : > { %v4214_v17 = vsel %vm4212_vm15, %v4199_v21, %v7587_v0  ;;  %v4215_v52 = vsel %vm4212_vm15, %v4200_v7, %v7588_v40  ;;  %v3168_v0 = vpop.f32.mrf.mxu2  ;;  %v3012_v40 = vpop.f32.mrf.mxu0  ;;  %v2927_v7 = vadd.f32 %v2926_v29, %v10830_v22 }
 0x4f5   : > { %v4230_v35 = vsel %vm4227_vm2, %v4215_v52, %v7593_v50  ;;  %v4229_v26 = vsel %vm4227_vm2, %v4214_v17, %v7592_v4  ;;  %v11358_v52 = vmax.f32 %v10783_v47, %v12765_v63  ;;  %v2934_v17 = vadd.f32 %v2933_v43, %v10830_v22 }
 0x4f6   : > { %v11346_v54 = vsel %vm4242_vm1, %v4229_v26, %v7597_v19  ;;  %v11349_v24 = vsel %vm4242_vm1, %v4230_v35, %v7598_v57  ;;  %v2929_v19 = vadd.f32 %v2928_v46, %v10830_v22  ;;  %v2932_v4 = vadd.f32 %v2931_v39, %v10830_v22 }
 0x4f7   : > { %v3013_v21 = vadd.f32 %v3012_v40, %v2934_v17  ;;  %v3006_v46 = vadd.f32 %v3005_v58, %v2927_v7  ;;  %v7568_v39 = vunpack.i.h.bf16 %v11307_v41 }
 0x4f8   : > { %v11352_v37 = vpop.permute.xlu2 %7605  ;;  %v3008_v57 = vadd.f32 %v3007_v13, %v2929_v19  ;;  %v3011_v35 = vadd.f32 %v3010_v49, %v2932_v4  ;;  %v3464_v49 = vmax.f32 %v11011_v48, %v7572_v55  ;;  %v12992_v19 = vld [vmem:[#allocation17_spill] sm:$0xff] }
 0x4f9   : > { %v12766_v9 = vunpack.i.l.bf16 %v11352_v37  ;;  %v3091_v45 = vpop.f32.mrf.mxu1  ;;  %v3085_v51 = vadd.f32 %v3084_v61, %v3006_v46  ;;  %v3463_v58 = vmax.f32 %v11172_v15, %v7568_v39  ;;  %v12993_v40 = vunpack.i.l.bf16 %v12992_v19 }
 0x4fa   : > { %v3092_v43 = vadd.f32 %v3091_v45, %v3013_v21  ;;  %v3087_v63 = vadd.f32 %v3086_v44, %v3008_v57  ;;  %v12994_v7 = vunpack.i.h.bf16 %v12992_v19  ;;  %v12996_v21 = vld [vmem:[#allocation16_spill] sm:$0xff] }
 0x4fb   : > { %v11363_v26 = vmax.f32 %v12988_v28, %v12766_v9  ;;  %v3090_v9 = vadd.f32 %v3089_v3, %v3011_v35  ;;  %v3164_v13 = vadd.f32 %v11335_v53, %v3085_v51  ;;  %v12990_v51 = vld [vmem:[#allocation27_spill] sm:$0xff]  ;;  %v3407_v4 = vsel %vm3403_vm13, %v12993_v40, %v7568_v39  ;;  %v12997_v35 = vld [vmem:[#allocation42_spill] sm:$0xff] }
 0x4fc   : > { %v3170_v38 = vpop.f32.mrf.mxu2  ;;  %v3166_v29 = vadd.f32 %v3165_v6, %v3087_v63  ;;  %v7664_v6 = vpack.i.bf16 %v3464_v49, %v3463_v58  ;;  %v3408_v45 = vsel %vm3403_vm13, %v12994_v7, %v7572_v55  ;;  %v3435_v57 = vmax.f32 %v12996_v21, %v3407_v4  ;;  %v3015_v39 = vpop.f32.mrf.mxu0 }
 0x4fd   : > { %v7619_v50 = vpack.i.bf16 %v11363_v26, %v11358_v52  ;;  %v3171_v8 = vadd.f32 %v3170_v38, %v3092_v43  ;;  %v3169_v17 = vadd.f32 %v3168_v0, %v3090_v9  ;;  %v3223_v38 = vmax.f32 %v3164_v13, 0.0 }
 0x4fe   : > { %v3225_v61 = vmax.f32 %v3166_v29, 0.0  ;;  %v2936_v29 = vpop.f32.mrf.mxu3 }
 0x4ff   : > { %7620 = vrot.lane.b32.xlu2 %v7619_v50, %s8153_s0  ;;  %7615 = vrot.lane.b32.xlu1 %v7619_v50, %s8150_s24  ;;  %v3229_v44 = vmax.f32 %v3171_v8, 0.0  ;;  %v3227_v41 = vmax.f32 %v3169_v17, 0.0  ;;  %v3280_v15 = vsel %vm3235_vm3, %v3223_v38, -inf  ;;  %v11411_v17 = vpop.permute.xlu1 %7575  ;;  %v11420_v38 = vpop.permute.xlu0 %7560 }
 0x500   : > { %7610 = vrot.lane.b32.xlu0 %v7619_v50, %s8148_s16  ;;  %v3281_v63 = vsel %vm3235_vm3, %v3225_v61, -inf }
 0x501   : > { %v3285_v3 = vsel %vm3235_vm3, %v3229_v44, -inf  ;;  %v3284_v9 = vsel %vm3235_vm3, %v3227_v41, -inf  ;;  %v11391_v48 = vmax.f32 %v3280_v15, %v3281_v63  ;;  %v3094_v58 = vpop.f32.mrf.mxu1  ;;  %v2937_v63 = vadd.f32 %v2936_v29, %v10830_v22 }
 0x502   : > { %v11389_v8 = vmax.f32 %v3284_v9, %v3285_v3 }
 0x503   : > { %v7654_v0 = vpack.i.bf16 %v11048_v12, %v11391_v48  ;;  %v3016_v40 = vadd.f32 %v3015_v39, %v2937_v63 }
 0x504   : > { %v7679_v53 = vpack.i.bf16 %v11389_v8, %v12990_v51  ;;  %v3173_v61 = vpop.f32.mrf.mxu2 }
 0x506   : > { %v2938_v44 = vpop.f32.mrf.mxu3 }
 0x507   : > { %7650 = vrot.lane.b32.xlu2 %v7619_v50, %s12771_s26  ;;  %7630 = vrot.lane.b32.xlu1 %v7619_v50, %s8151_s14  ;;  %s12991_s26 = smov 80   ;;  %v11415_v55 = vpop.permute.xlu1 %7580  ;;  %v2939_v41 = vadd.f32 %v2938_v44, %v10830_v22 }
 0x508   : > { %7625 = vrot.lane.b32.xlu0 %v7619_v50, %s8149_s25 }
 0x509   : > { %v3096_v3 = vpop.f32.mrf.mxu1 }
 0x50f   : > { %7635 = vrot.lane.b32.xlu1 %v7619_v50, %s12772_s19  ;;  %7665 = vrot.lane.b32.xlu2 %v7664_v6, %s12779_s29  ;;  %s12995_s19 = smov 62  }
 0x510   : > { %7640 = vrot.lane.b32.xlu0 %v7619_v50, %s12778_s18 }
 0x517   : > { %7645 = vrot.lane.b32.xlu1 %v7619_v50, %s12991_s26  ;;  %7680 = vrot.lane.b32.xlu2 %v7679_v53, %s8148_s16  ;;  %v3436_v50 = vmax.f32 %v12997_v35, %v3408_v45  ;;  %v7478_v53 = vunpack.i.h.bf16 %v11249_v23  ;;  %v7488_v23 = vunpack.i.h.bf16 %v11241_v42 }
 0x518   : > { %7655 = vrot.lane.b32.xlu0 %v7654_v0, %s8148_s16 }
 0x519   : > { %v7674_v43 = vpack.i.bf16 %v3436_v50, %v3435_v57  ;;  %v3175_v57 = vpop.f32.mrf.mxu2  ;;  %v11430_v22 = vmax.f32 %v10813_v18, %v7478_v53 }
 0x51f   : > { %7670 = vrot.lane.b32.xlu1 %v7664_v6, %s12774_s30 }
 0x520   : > { %7660 = vrot.lane.b32.xlu0 %v7664_v6, %s12995_s19  ;;  %v3017_v6 = vpop.f32.mrf.mxu0 }
 0x521   : > { %v3018_v9 = vadd.f32 %v3017_v6, %v2939_v41 }
 0x523   : > { %v3097_v15 = vadd.f32 %v3096_v3, %v3018_v9 }
 0x525   : > { %v3176_v44 = vadd.f32 %v3175_v57, %v3097_v15  ;;  %v7577_v15 = vunpack.i.l.bf16 %v11411_v17 }
 0x527   : > { %7675 = vrot.lane.b32.xlu1 %v7674_v43, %s12775_s21  ;;  %v3095_v43 = vadd.f32 %v3094_v58, %v3016_v40  ;;  %v3233_v57 = vmax.f32 %v3176_v44, 0.0 }
 0x559   : > { %v7621_v46 = vpop.permute.xlu2 %7620 }
 0x55a   : > { %v7623_v39 = vunpack.i.h.bf16 %v7621_v46  ;;  %v7622_v41 = vunpack.i.l.bf16 %v7621_v46 }
 0x561   : > { %v11413_v13 = vpop.permute.xlu2 %7650 }
 0x569   : > { %v11417_v49 = vpop.permute.xlu2 %7665 }
 0x571   : > { %v7616_v0 = vpop.permute.xlu1 %7615  ;;  %v11424_v19 = vpop.permute.xlu2 %7680 }
 0x572   : > { %v7618_v4 = vunpack.i.h.bf16 %v7616_v0  ;;  %v7617_v7 = vunpack.i.l.bf16 %v7616_v0  ;;  %v7611_v45 = vpop.permute.xlu0 %7610  ;;  %v12773_v21 = vunpack.i.l.bf16 %v11424_v19 }
 0x573   : > { %v7613_v35 = vunpack.i.h.bf16 %v7611_v45  ;;  %v7612_v50 = vunpack.i.l.bf16 %v7611_v45 }
 0x574   : > { %v11435_v29 = vmax.f32 %v12990_v51, %v12773_v21 }
 0x575   : > { %v4074_v6 = vsel %vm4062_vm4, %v11363_v26, %v7613_v35  ;;  %v4073_v3 = vsel %vm4062_vm4, %v11358_v52, %v7612_v50  ;;  %v7573_v52 = vunpack.i.h.bf16 %v11333_v2  ;;  %v3174_v26 = vadd.f32 %v3173_v61, %v3095_v43 }
 0x576   : > { %v4089_v58 = vsel %vm4077_vm5, %v4074_v6, %v7618_v4  ;;  %v4088_v63 = vsel %vm4077_vm5, %v4073_v3, %v7617_v7  ;;  %v11445_v9 = vpack.i.bf16 %v11435_v29, %v11430_v22  ;;  %v3466_v35 = vmax.f32 %v11196_v20, %v7577_v15 }
 0x577   : > { %v4103_v0 = vsel %vm4092_vm6, %v4088_v63, %v7622_v41  ;;  %v4104_v46 = vsel %vm4092_vm6, %v4089_v58, %v7623_v39  ;;  %v3465_v41 = vmax.f32 %v11013_v56, %v7573_v52  ;;  %v3231_v6 = vmax.f32 %v3174_v26, 0.0 }
 0x578   : > { %7685 = vrot.lane.b32.xlu2 %v11445_v9, %s8148_s16  ;;  %7690 = vrot.lane.b32.xlu0 %v11445_v9, %s8150_s24  ;;  %v3289_v58 = vsel %vm3235_vm3, %v3233_v57, -inf  ;;  %v7578_v63 = vunpack.i.h.bf16 %v11411_v17  ;;  %v7373_v56 = vunpack.i.h.bf16 %v11018_v59  ;;  %s12783_s24 = smov 40  }
 0x579   : > { %7695 = vrot.lane.b32.xlu1 %v11445_v9, %s8153_s0  ;;  %v7631_v40 = vpop.permute.xlu1 %7630  ;;  %v7714_v44 = vpack.i.bf16 %v3466_v35, %v3465_v41  ;;  %v3288_v20 = vsel %vm3235_vm3, %v3231_v6, -inf  ;;  %s13031_s0 = smov 92  }
 0x57a   : > { %v7633_v4 = vunpack.i.h.bf16 %v7631_v40  ;;  %v7632_v7 = vunpack.i.l.bf16 %v7631_v40  ;;  %v7626_v45 = vpop.permute.xlu0 %7625 }
 0x57b   : > { %v7628_v50 = vunpack.i.h.bf16 %v7626_v45  ;;  %v7627_v39 = vunpack.i.l.bf16 %v7626_v45 }
 0x57d   : > { %v4118_v3 = vsel %vm4107_vm7, %v4103_v0, %v7627_v39  ;;  %v4119_v2 = vsel %vm4107_vm7, %v4104_v46, %v7628_v50  ;;  %v11472_v46 = vmax.f32 %v3288_v20, %v3289_v58  ;;  %v12998_v39 = vld [vmem:[#allocation10_spill] sm:$0xff] }
 0x57e   : > { %v4133_v61 = vsel %vm4122_vm8, %v4118_v3, %v7632_v7  ;;  %v4134_v43 = vsel %vm4122_vm8, %v4119_v2, %v7633_v4  ;;  %v3467_v7 = vmax.f32 %v11189_v11, %v7578_v63  ;;  %v3460_v41 = vmax.f32 %v12998_v39, %v7373_v56  ;;  %v13000_v11 = vld [vmem:[#allocation12_spill] sm:$0xff] }
 0x57f   : > { %v12999_v2 = vunpack.i.l.bf16 %v11042_v10  ;;  %v7709_v20 = vpack.i.bf16 %v13000_v11, %v11472_v46 }
 0x580   : > { %7700 = vrot.lane.b32.xlu2 %v11445_v9, %s8149_s25  ;;  %7705 = vrot.lane.b32.xlu0 %v11445_v9, %s8151_s14  ;;  %s13019_s25 = smov 74   ;;  %s12781_s14 = smov 124  }
 0x581   : > { %7715 = vrot.lane.b32.xlu1 %v7714_v44, %s12995_s19  ;;  %v7636_v0 = vpop.permute.xlu1 %7635  ;;  %v3409_v58 = vsel %vm3403_vm13, %v12999_v2, %v7573_v52  ;;  %v13003_v52 = vld [vmem:[#allocation26_spill] sm:$0xff] }
 0x582   : > { %v7638_v26 = vunpack.i.h.bf16 %v7636_v0  ;;  %v7637_v40 = vunpack.i.l.bf16 %v7636_v0  ;;  %v7641_v4 = vpop.permute.xlu0 %7640  ;;  %v13001_v0 = vld [vmem:[#allocation15_spill] sm:$0xff] }
 0x583   : > { %v7643_v45 = vunpack.i.h.bf16 %v7641_v4  ;;  %v7642_v57 = vunpack.i.l.bf16 %v7641_v4  ;;  %v13002_v4 = vunpack.i.l.bf16 %v13001_v0 }
 0x584   : > { %v4148_v35 = vsel %vm4137_vm9, %v4133_v61, %v7637_v40  ;;  %v4149_v50 = vsel %vm4137_vm9, %v4134_v43, %v7638_v26  ;;  %v7583_v43 = vunpack.i.h.bf16 %v11415_v55  ;;  %v7582_v26 = vunpack.i.l.bf16 %v11415_v55 }
 0x585   : > { %v4163_v6 = vsel %vm4152_vm10, %v4148_v35, %v7642_v57  ;;  %v4164_v3 = vsel %vm4152_vm10, %v4149_v50, %v7643_v45  ;;  %v3410_v61 = vsel %vm3403_vm13, %v13002_v4, %v7577_v15  ;;  %v7739_v40 = vpack.i.bf16 %v3460_v41, %v3467_v7  ;;  %v13004_v57 = vld [vmem:[#allocation28_spill] sm:$0xff] }
 0x586   : > { %v3437_v45 = vmax.f32 %v13003_v52, %v3409_v58  ;;  %v3438_v35 = vmax.f32 %v13004_v57, %v3410_v61  ;;  %v3469_v15 = vmax.f32 %v11207_v33, %v7583_v43  ;;  %v3468_v55 = vmax.f32 %v11213_v5, %v7582_v26 }
 0x587   : > { %v7652_v7 = vunpack.i.l.bf16 %v11413_v13  ;;  %v7653_v4 = vunpack.i.h.bf16 %v11413_v13  ;;  %v7423_v52 = vunpack.i.h.bf16 %v11219_v25  ;;  %v7433_v13 = vunpack.i.h.bf16 %v11223_v36  ;;  %v13005_v25 = vld [vmem:[#allocation21_spill] sm:$0xff] }
 0x588   : > { %7725 = vrot.lane.b32.xlu2 %v7714_v44, %s12774_s30  ;;  %7710 = vrot.lane.b32.xlu0 %v7709_v20, %s8148_s16  ;;  %v7398_v20 = vunpack.i.h.bf16 %v11191_v32  ;;  %v7729_v21 = vpack.i.bf16 %v3438_v35, %v3437_v45  ;;  %v7453_v36 = vunpack.i.h.bf16 %v11231_v31  ;;  %s12776_s16 = smov 84  }
 0x589   : > { %7740 = vrot.lane.b32.xlu1 %v7739_v40, %s12779_s29  ;;  %v7646_v10 = vpop.permute.xlu1 %7645 }
 0x58a   : > { %v7648_v50 = vunpack.i.h.bf16 %v7646_v10  ;;  %v7647_v39 = vunpack.i.l.bf16 %v7646_v10  ;;  %v11499_v2 = vpop.permute.xlu0 %7655  ;;  %v7413_v10 = vunpack.i.h.bf16 %v11209_v60  ;;  %v7443_v60 = vunpack.i.h.bf16 %v11227_v34 }
 0x58b   : > { %v7658_v41 = vunpack.i.h.bf16 %v11499_v2 }
 0x58c   : > { %v4178_v58 = vsel %vm4167_vm11, %v4163_v6, %v7647_v39  ;;  %v4179_v61 = vsel %vm4167_vm11, %v4164_v3, %v7648_v50  ;;  %v7764_v3 = vpack.i.bf16 %v3469_v15, %v3468_v55  ;;  %v13006_v50 = vunpack.i.l.bf16 %v13005_v25  ;;  %v13007_v39 = vld [vmem:[#allocation13_spill] sm:$0xff] }
 0x58d   : > { %v4069_v33 = vsel %vm4062_vm4, %v11048_v12, %v7658_v41  ;;  %v11514_v5 = vsel %vm4182_vm12, %v4178_v58, %v7652_v7  ;;  %v11518_v32 = vsel %vm4182_vm12, %v4179_v61, %v7653_v4  ;;  %v13008_v7 = vunpack.i.h.bf16 %v13007_v39  ;;  %v13010_v4 = vld [vmem:[#allocation47_spill] sm:$0xff] }
 0x58e   : > { %v4084_v57 = vsel %vm4077_vm5, %v4069_v33, %v7398_v20  ;;  %v3413_v12 = vsel %vm3403_vm13, %v13006_v50, %v7583_v43  ;;  %v7463_v15 = vunpack.i.h.bf16 %v11237_v1  ;;  %v7473_v55 = vunpack.i.h.bf16 %v11233_v30 }
 0x58f   : > { %v4099_v6 = vsel %vm4092_vm6, %v4084_v57, %v7413_v10  ;;  %v3412_v41 = vsel %vm3403_vm13, %v13008_v7, %v7582_v26  ;;  %v13009_v26 = vld [vmem:[#allocation9_spill] sm:$0xff]  ;;  %v13011_v61 = vunpack.i.h.bf16 %v13001_v0  ;;  %v7657_v10 = vunpack.i.l.bf16 %v11499_v2 }
 0x590   : > { %v4114_v45 = vsel %vm4107_vm7, %v4099_v6, %v7423_v52  ;;  %7730 = vrot.lane.b32.xlu2 %v7729_v21, %s12775_s21  ;;  %7720 = vrot.lane.b32.xlu0 %v7714_v44, %s12779_s29  ;;  %v3441_v20 = vmax.f32 %v13009_v26, %v3413_v12  ;;  %v3440_v58 = vmax.f32 %v13010_v4, %v3412_v41  ;;  %v13012_v52 = vunpack.i.l.bf16 %v13007_v39  ;;  %v13015_v12 = vld [vmem:[#allocation31_spill] sm:$0xff] }
 0x591   : > { %v4129_v35 = vsel %vm4122_vm8, %v4114_v45, %v7433_v13  ;;  %7765 = vrot.lane.b32.xlu1 %v7764_v3, %s12774_s30  ;;  %v7671_v34 = vpop.permute.xlu1 %7670  ;;  %v3411_v1 = vsel %vm3403_vm13, %v13011_v61, %v7578_v63  ;;  %v7608_v57 = vunpack.i.h.bf16 %v11352_v37  ;;  %v13013_v63 = vld [vmem:[#allocation45_spill] sm:$0xff]  ;;  %v3471_v25 = vmax.f32 %v11391_v48, %v7657_v10 }
 0x592   : > { %v4144_v43 = vsel %vm4137_vm9, %v4129_v35, %v7443_v60  ;;  %v7769_v30 = vpack.i.bf16 %v3441_v20, %v3440_v58  ;;  %v3404_v33 = vsel %vm3403_vm13, %v13012_v52, %v7373_v56  ;;  %v7661_v17 = vpop.permute.xlu0 %7660  ;;  %v3439_v13 = vmax.f32 %v13013_v63, %v3411_v1  ;;  %v13014_v60 = vld [vmem:[#allocation46_spill] sm:$0xff]  ;;  %v6180_v63 = vld [vmem:[%s12623_s3 + $0xf0] sm:$0xf] }
 0x593   : > { %v4159_v21 = vsel %vm4152_vm10, %v4144_v43, %v7453_v36  ;;  %v3432_v59 = vmax.f32 %v13014_v60, %v3404_v33  ;;  %v7663_v50 = vunpack.i.h.bf16 %v7661_v17  ;;  %v7662_v56 = vunpack.i.l.bf16 %v7661_v17  ;;  %v6552_v60 = vld [vmem:[%s12623_s3 + $0x174] sm:$0xf0] }
 0x594   : > { %v4174_v44 = vsel %vm4167_vm11, %v4159_v21, %v7463_v15  ;;  %v3470_v41 = vmax.f32 %v11328_v14, %v7608_v57  ;;  %v7668_v15 = vunpack.i.h.bf16 %v11417_v49  ;;  %v7667_v43 = vunpack.i.l.bf16 %v11417_v49 }
 0x595   : > { %v11543_v31 = vsel %vm4182_vm12, %v4174_v44, %v7473_v55  ;;  %v7749_v35 = vpack.i.bf16 %v3432_v59, %v3439_v13  ;;  %v7673_v14 = vunpack.i.h.bf16 %v7671_v34  ;;  %v7672_v20 = vunpack.i.l.bf16 %v7671_v34  ;;  %v6536_v13 = vld [vmem:[%s12623_s3 + $0xf4] sm:$0xf0]  ;;  %v6108_v59 = vld [vmem:[%s12623_s3 + $0x60] sm:$0xf] }
 0x596   : > { %v7784_v48 = vpack.i.bf16 %v3471_v25, %v3470_v41  ;;  %v13017_v49 = vunpack.i.l.bf16 %v11352_v37  ;;  %v13018_v61 = vunpack.i.h.bf16 %v11175_v62  ;;  %v6518_v25 = vld [vmem:[%s12623_s3 + $0x64] sm:$0xf0]  ;;  %v6092_v41 = vld [vmem:[%s12623_s3 + $0x40] sm:$0xf] }
 0x598   : > { %7745 = vrot.lane.b32.xlu2 %v7739_v40, %s12774_s30  ;;  %7735 = vrot.lane.b32.xlu0 %v7739_v40, %s12995_s19  ;;  %v13016_v40 = vld [vmem:[#allocation11_spill] sm:$0xff]  ;;  %v3415_v21 = vsel %vm3403_vm13, %v13017_v49, %v7657_v10  ;;  %v3414_v34 = vsel %vm3403_vm13, %v13018_v61, %v7608_v57  ;;  %v7774_v10 = vpack.i.bf16 %v11349_v24, %v11346_v54 }
 0x599   : > { %7770 = vrot.lane.b32.xlu1 %v7769_v30, %s12775_s21  ;;  %v7676_v0 = vpop.permute.xlu1 %7675  ;;  %v3443_v1 = vmax.f32 %v12988_v28, %v3415_v21  ;;  %v3442_v37 = vmax.f32 %v10783_v47, %v3414_v34  ;;  %v6116_v47 = vld [vmem:[%s12623_s3 + $0x70] sm:$0xf]  ;;  %v6520_v28 = vld [vmem:[%s12623_s3 + $0x74] sm:$0xf0] }
 0x59a   : > { %v7678_v2 = vunpack.i.h.bf16 %v7676_v0  ;;  %v7677_v6 = vunpack.i.l.bf16 %v7676_v0  ;;  %v6117_v52 = vor.u32 %v6520_v28, %v6116_v47  ;;  %v6068_v47 = vld [vmem:[%s12623_s3 + $0x10] sm:$0xf]  ;;  %v6508_v28 = vld [vmem:[%s12623_s3 + $0x14] sm:$0xf0] }
 0x59b   : > { %v7799_v30 = vpack.i.bf16 %v3443_v1, %v3442_v37 }
 0x59c   : > { %v4202_v39 = vsel %vm4197_vm14, %v13015_v12, %v7678_v2  ;;  %v4201_v7 = vsel %vm4197_vm14, %v13016_v40, %v7677_v6  ;;  %4799 = vmatpush.bf16.msra.mxu3 %v6117_v52  ;;  %v6244_v2 = vld [vmem:[%s12623_s3 + $0x170] sm:$0xf]  ;;  %v6181_v6 = vor.u32 %v6536_v13, %v6180_v63  ;;  %v6516_v40 = vld [vmem:[%s12623_s3 + $0x54] sm:$0xf0]  ;;  %v6069_v13 = vor.u32 %v6508_v28, %v6068_v47 }
 0x59d   : > { %v4217_v45 = vsel %vm4212_vm15, %v4202_v39, %v7663_v50  ;;  %v4216_v36 = vsel %vm4212_vm15, %v4201_v7, %v7662_v56  ;;  %v6245_v50 = vor.u32 %v6552_v60, %v6244_v2  ;;  %v6109_v56 = vor.u32 %v6518_v25, %v6108_v59  ;;  %v6100_v39 = vld [vmem:[%s12623_s3 + $0x50] sm:$0xf]  ;;  %v6060_v59 = vld [vmem:[%s12623_s3] sm:$0xf]  ;;  %v6506_v25 = vld [vmem:[%s12623_s3 + $0x4] sm:$0xf0] }
 0x59e   : > { %v4232_v55 = vsel %vm4227_vm2, %v4217_v45, %v7668_v15  ;;  %v4231_v26 = vsel %vm4227_vm2, %v4216_v36, %v7667_v43  ;;  %4833 = vmatpush.bf16.msra.mxu0 %v6181_v6  ;;  %v6101_v7 = vor.u32 %v6516_v40, %v6100_v39  ;;  %v6514_v45 = vld [vmem:[%s12623_s3 + $0x44] sm:$0xf0]  ;;  %v6084_v15 = vld [vmem:[%s12623_s3 + $0x30] sm:$0xf]  ;;  %v6512_v43 = vld [vmem:[%s12623_s3 + $0x34] sm:$0xf0] }
 0x59f   : > { %v11578_v4 = vsel %vm4242_vm1, %v4232_v55, %v7673_v14  ;;  %v11581_v58 = vsel %vm4242_vm1, %v4231_v26, %v7672_v20  ;;  %4867 = vmatpush.bf16.msra.mxu1 %v6245_v50  ;;  %v6093_v36 = vor.u32 %v6514_v45, %v6092_v41  ;;  %v6076_v55 = vld [vmem:[%s12623_s3 + $0x20] sm:$0xf]  ;;  %v6510_v26 = vld [vmem:[%s12623_s3 + $0x24] sm:$0xf0]  ;;  %v6061_v50 = vor.u32 %v6506_v25, %v6060_v59 }
 0x5a0   : > { %7760 = vrot.lane.b32.xlu0 %v7764_v3, %s12779_s29  ;;  %7750 = vrot.lane.b32.xlu2 %v7749_v35, %s12775_s21  ;;  %v7809_v44 = vpack.i.bf16 %v11578_v4, %v11581_v58  ;;  %v7779_v62 = vpack.i.bf16 %v11581_v58, %v11349_v24  ;;  %v6077_v14 = vor.u32 %v6510_v26, %v6076_v55  ;;  %v6236_v39 = vld [vmem:[%s12623_s3 + $0x160] sm:$0xf]  ;;  %v6550_v45 = vld [vmem:[%s12623_s3 + $0x164] sm:$0xf0] }
 0x5a1   : > { %7785 = vrot.lane.b32.xlu1 %v7784_v48, %s12995_s19  ;;  %4800 = vmatpush.bf16.msra.mxu3 %v6109_v56  ;;  %v6164_v56 = vld [vmem:[%s12623_s3 + $0xd0] sm:$0xf] }
 0x5a5   : > { %4801 = vmatpush.bf16.msra.mxu3 %v6101_v7 }
 0x5a8   : > { %7795 = vrot.lane.b32.xlu0 %v7784_v48, %s12774_s30  ;;  %7755 = vrot.lane.b32.xlu2 %v7764_v3, %s12995_s19  ;;  %v11616_v3 = vld [vmem:[%s12623_s3 + $0x1a0] sm:$0x33]  ;;  %s5704_s30 = scalar_lea.sflag [#allocation4], %s8478_s22 }
 0x5a9   : > { %7810 = vrot.lane.b32.xlu1 %v7809_v44, %s12776_s16  ;;  %v4669_v33 = vunpack.c.l.b16 %v11616_v3  ;;  %4802 = vmatpush.bf16.msra.mxu3 %v6093_v36 }
 0x5ab   : > { %v4723_v57 = vpack.c.b16 %v4669_v33, %v4669_v33 }
 0x5ad   : > { %v4794_v0 = vsel %vm4792_vm0, %v4723_v57, 0 }
 0x5ae   : > { %4906 = vmatpush.bf16.msra.mxu2 %v4794_v0 }
 0x5b0   : > { %7800 = vrot.lane.b32.xlu0 %v7799_v30, %s12775_s21  ;;  %7775 = vrot.lane.b32.xlu2 %v7774_v10, %s12776_s16  ;;  %s13059_s16 = sadd.s32 4294967295, %s8143_s20  }
 0x5b1   : > { %7835 = vrot.lane.b32.xlu1 %v11445_v9, %s13019_s25  ;;  %s13027_s25 = smov 68  }
 0x5b8   : > { %7780 = vrot.lane.b32.xlu2 %v7779_v62, %s12783_s24 }
 0x5c0   : > { %7790 = vrot.lane.b32.xlu2 %v7784_v48, %s12779_s29  ;;  %s13020_s29 = smov 86   ;;  %v6085_v48 = vor.u32 %v6512_v43, %v6084_v15 }
 0x5c2   : > { %4803 = vmatpush.bf16.msra.mxu3 %v6085_v48  ;;  %v6237_v48 = vor.u32 %v6550_v45, %v6236_v39  ;;  %v13024_v39 = vld [vmem:[#allocation33_spill] sm:$0xff] }
 0x5c4   : > { %4868 = vmatpush.bf16.msra.mxu1 %v6237_v48 }
 0x5c6   : > { %4804 = vmatpush.bf16.msra.mxu3 %v6077_v14  ;;  %v6156_v14 = vld [vmem:[%s12623_s3 + $0xc0] sm:$0xf] }
 0x5c8   : > { %7805 = vrot.lane.b32.xlu2 %v7809_v44, %s12781_s14  ;;  %s13029_s14 = smov 40  }
 0x5ca   : > { %4805 = vmatpush.bf16.msra.mxu3 %v6069_v13  ;;  %v13022_v13 = vld [vmem:[#allocation30_spill] sm:$0xff] }
 0x5ce   : > { %4806 = vmatpush.bf16.msra.mxu3 %v6061_v50 }
 0x5d0   : > { %7825 = vrot.lane.b32.xlu2 %v11445_v9, %s13020_s29  ;;  %s13035_s29 = smov 56  }
 0x5d2   : > { %v7686_v17 = vpop.permute.xlu2 %7685 }
 0x5d3   : > { %v7688_v20 = vunpack.i.h.bf16 %v7686_v17  ;;  %v7687_v49 = vunpack.i.l.bf16 %v7686_v17 }
 0x5d5   : > { %v4076_v37 = vsel %vm4062_vm4, %v11435_v29, %v7688_v20  ;;  %v4075_v30 = vsel %vm4062_vm4, %v11430_v22, %v7687_v49  ;;  %v6172_v22 = vld [vmem:[%s12623_s3 + $0xe0] sm:$0xf]  ;;  %v6534_v29 = vld [vmem:[%s12623_s3 + $0xe4] sm:$0xf0] }
 0x5d6   : > { %v6173_v2 = vor.u32 %v6534_v29, %v6172_v22  ;;  %v6530_v20 = vld [vmem:[%s12623_s3 + $0xc4] sm:$0xf0]  ;;  %v6132_v29 = vld [vmem:[%s12623_s3 + $0x90] sm:$0xf] }
 0x5d7   : > { %v6157_v49 = vor.u32 %v6530_v20, %v6156_v14 }
 0x5d8   : > { %4834 = vmatpush.bf16.msra.mxu0 %v6173_v2  ;;  %v7498_v2 = vunpack.i.h.bf16 %v13022_v13 }
 0x5da   : > { %v7701_v12 = vpop.permute.xlu2 %7700 }
 0x5db   : > { %v7703_v52 = vunpack.i.h.bf16 %v7701_v12  ;;  %v7702_v33 = vunpack.i.l.bf16 %v7701_v12  ;;  %v6532_v12 = vld [vmem:[%s12623_s3 + $0xd4] sm:$0xf0] }
 0x5dc   : > { %v6165_v41 = vor.u32 %v6532_v12, %v6164_v56 }
 0x5de   : > { %4835 = vmatpush.bf16.msra.mxu0 %v6165_v41  ;;  %v13025_v41 = vld [vmem:[#allocation34_spill] sm:$0xff] }
 0x5df   : > { %v7513_v45 = vunpack.i.h.bf16 %v13025_v41 }
 0x5e2   : > { %v11652_v35 = vpop.permute.xlu2 %7725  ;;  %4836 = vmatpush.bf16.msra.mxu0 %v6157_v49 }
 0x5e3   : > { %v7728_v13 = vunpack.i.h.bf16 %v11652_v35 }
 0x5ea   : > { %v11666_v21 = vpop.permute.xlu2 %7730  ;;  %v7691_v44 = vpop.permute.xlu0 %7690 }
 0x5eb   : > { %v7693_v61 = vunpack.i.h.bf16 %v7691_v44  ;;  %v7692_v34 = vunpack.i.l.bf16 %v7691_v44  ;;  %v7696_v1 = vpop.permute.xlu1 %7695  ;;  %v6148_v44 = vld [vmem:[%s12623_s3 + $0xb0] sm:$0xf]  ;;  %v7732_v59 = vunpack.i.l.bf16 %v11666_v21  ;;  %v7733_v49 = vunpack.i.h.bf16 %v11666_v21 }
 0x5ec   : > { %v7698_v10 = vunpack.i.h.bf16 %v7696_v1  ;;  %v7697_v62 = vunpack.i.l.bf16 %v7696_v1 }
 0x5ed   : > { %v4091_v57 = vsel %vm4077_vm5, %v4076_v37, %v7693_v61  ;;  %v4090_v17 = vsel %vm4077_vm5, %v4075_v30, %v7692_v34  ;;  %v6528_v61 = vld [vmem:[%s12623_s3 + $0xb4] sm:$0xf0]  ;;  %v7683_v34 = vunpack.i.h.bf16 %v11424_v19 }
 0x5ee   : > { %v4106_v0 = vsel %vm4092_vm6, %v4091_v57, %v7698_v10  ;;  %v4105_v63 = vsel %vm4092_vm6, %v4090_v17, %v7697_v62  ;;  %v6149_v1 = vor.u32 %v6528_v61, %v6148_v44  ;;  %v6526_v57 = vld [vmem:[%s12623_s3 + $0xa4] sm:$0xf0] }
 0x5ef   : > { %v4120_v6 = vsel %vm4107_vm7, %v4105_v63, %v7702_v33  ;;  %v4121_v60 = vsel %vm4107_vm7, %v4106_v0, %v7703_v52  ;;  %v3416_v10 = vsel %vm3403_vm13, %v7478_v53, %v7683_v34  ;;  %v7483_v52 = vunpack.i.h.bf16 %v11247_v27  ;;  %v6140_v33 = vld [vmem:[%s12623_s3 + $0xa0] sm:$0xf]  ;;  %v6524_v0 = vld [vmem:[%s12623_s3 + $0x94] sm:$0xf0]  ;;  %v13028_v44 = vld [vmem:[#allocation20_spill] sm:$0xff] }
 0x5f0   : > { %4837 = vmatpush.bf16.msra.mxu0 %v6149_v1  ;;  %v7493_v53 = vunpack.i.h.bf16 %v11262_v16  ;;  %v13021_v27 = vunpack.i.l.bf16 %v11424_v19  ;;  %v3444_v42 = vmax.f32 %v10813_v18, %v3416_v10  ;;  %v6141_v63 = vor.u32 %v6526_v57, %v6140_v33 }
 0x5f1   : > { %v6133_v18 = vor.u32 %v6524_v0, %v6132_v29  ;;  %v4203_v61 = vsel %vm4197_vm14, %v13028_v44, %v7732_v59  ;;  %v4204_v0 = vsel %vm4197_vm14, %v11543_v31, %v7733_v49 }
 0x5f2   : > { %v11705_v40 = vpop.permute.xlu2 %7745  ;;  %v7706_v7 = vpop.permute.xlu0 %7705 }
 0x5f3   : > { %v7708_v36 = vunpack.i.h.bf16 %v7706_v7  ;;  %v7707_v15 = vunpack.i.l.bf16 %v7706_v7  ;;  %v11710_v43 = vpop.permute.xlu1 %7715  ;;  %v7748_v41 = vunpack.i.h.bf16 %v11705_v40 }
 0x5f4   : > { %v7717_v50 = vunpack.i.l.bf16 %v11710_v43  ;;  %4838 = vmatpush.bf16.msra.mxu0 %v6141_v63  ;;  %v7718_v33 = vunpack.i.h.bf16 %v11710_v43 }
 0x5f5   : > { %v11713_v55 = vsel %vm4122_vm8, %v4120_v6, %v7707_v15  ;;  %v11716_v26 = vsel %vm4122_vm8, %v4121_v60, %v7708_v36  ;;  %v13023_v6 = vld [vmem:[#allocation32_spill] sm:$0xff]  ;;  %v13026_v36 = vld [vmem:[#allocation35_spill] sm:$0xff] }
 0x5f6   : > { %v7503_v60 = vunpack.i.h.bf16 %v13023_v6  ;;  %v7518_v15 = vunpack.i.h.bf16 %v13026_v36  ;;  %v4218_v57 = vsel %vm4212_vm15, %v4203_v61, %v7717_v50 }
 0x5f8   : > { %4839 = vmatpush.bf16.msra.mxu0 %v6133_v18 }
 0x5fa   : > { %v11731_v37 = vpop.permute.xlu0 %7710  ;;  %v11733_v30 = vpop.permute.xlu2 %7750 }
 0x5fb   : > { %v7713_v62 = vunpack.i.h.bf16 %v11731_v37  ;;  %v7712_v47 = vunpack.i.l.bf16 %v11731_v37  ;;  %v11742_v28 = vpop.permute.xlu1 %7740  ;;  %v7753_v31 = vunpack.i.h.bf16 %v11733_v30 }
 0x5fc   : > { %v7742_v59 = vunpack.i.l.bf16 %v11742_v28 }
 0x5fd   : > { %v4063_v17 = vsel %vm4062_vm4, %v13000_v11, %v7713_v62  ;;  %v3417_v22 = vsel %vm3403_vm13, %v13021_v27, %v7712_v47  ;;  %v6124_v27 = vld [vmem:[%s12623_s3 + $0x80] sm:$0xf]  ;;  %vm4390_vm4 = vcmask 687104  }
 0x5fe   : > { %v3445_v16 = vmax.f32 %v12990_v51, %v3417_v22  ;;  %v4078_v11 = vsel %vm4077_vm5, %v4063_v17, %v7483_v52  ;;  %v7508_v51 = vunpack.i.h.bf16 %v13024_v39  ;;  %v7727_v52 = vunpack.i.l.bf16 %v11652_v35  ;;  %v6522_v22 = vld [vmem:[%s12623_s3 + $0x84] sm:$0xf0]  ;;  %v6228_v35 = vld [vmem:[%s12623_s3 + $0x150] sm:$0xf] }
 0x5ff   : > { %v4093_v25 = vsel %vm4092_vm6, %v4078_v11, %v7488_v23  ;;  %v6125_v29 = vor.u32 %v6522_v22, %v6124_v27  ;;  %v4219_v11 = vsel %vm4212_vm15, %v4204_v0, %v7718_v33  ;;  %v3473_v27 = vmax.f32 %v11472_v46, %v7712_v47  ;;  %v13033_v0 = vld [vmem:[#allocation37_spill] sm:$0xff] }
 0x600   : > { %v4108_v56 = vsel %vm4107_vm7, %v4093_v25, %v7493_v53  ;;  %v7849_v12 = vpack.i.bf16 %v3445_v16, %v3444_v42  ;;  %v7752_v42 = vunpack.i.l.bf16 %v11733_v30  ;;  %v13030_v25 = vld [vmem:[#allocation19_spill] sm:$0xff]  ;;  %v6548_v30 = vld [vmem:[%s12623_s3 + $0x154] sm:$0xf0]  ;;  %vm4411_vm5 = vcmask 1014784  }
 0x601   : > { %v4123_v7 = vsel %vm4122_vm8, %v4108_v56, %v7498_v2  ;;  %4840 = vmatpush.bf16.msra.mxu0 %v6125_v29  ;;  %v7743_v2 = vunpack.i.h.bf16 %v11742_v28  ;;  %v3472_v29 = vmax.f32 %v11389_v8, %v7683_v34  ;;  %v6260_v34 = vld [vmem:[%s12623_s3 + $0x190] sm:$0xf]  ;;  %vm4422_vm6 = vcmask 654336  }
 0x602   : > { %v4138_v48 = vsel %vm4137_vm9, %v4123_v7, %v7503_v60  ;;  %v7721_v14 = vpop.permute.xlu0 %7720  ;;  %7850 = vrot.lane.b32.xlu2 %v7849_v12, %s13027_s25  ;;  %v11781_v20 = vpop.permute.xlu2 %7755  ;;  %v4205_v50 = vsel %vm4197_vm14, %v13030_v25, %v7752_v42  ;;  %v6229_v7 = vor.u32 %v6548_v30, %v6228_v35  ;;  %s13032_s25 = smov 124  }
 0x603   : > { %v4153_v1 = vsel %vm4152_vm10, %v4138_v48, %v7508_v51  ;;  %v7722_v10 = vunpack.i.l.bf16 %v7721_v14  ;;  %v11787_v62 = vpop.permute.xlu1 %7765  ;;  %v7723_v21 = vunpack.i.h.bf16 %v7721_v14  ;;  %v7758_v47 = vunpack.i.h.bf16 %v11781_v20 }
 0x604   : > { %v4168_v23 = vsel %vm4167_vm11, %v4153_v1, %v7513_v45  ;;  %v7747_v45 = vunpack.i.l.bf16 %v11705_v40  ;;  %4869 = vmatpush.bf16.msra.mxu1 %v6229_v7 }
 0x605   : > { %v4183_v53 = vsel %vm4182_vm12, %v4168_v23, %v7518_v15  ;;  %v4233_v17 = vsel %vm4227_vm2, %v4218_v57, %v7722_v10  ;;  %v4234_v63 = vsel %vm4227_vm2, %v4219_v11, %v7723_v21 }
 0x606   : > { %v11802_v43 = vsel %vm4242_vm1, %v4233_v17, %v7727_v52  ;;  %v4198_v39 = vsel %vm4197_vm14, %v4183_v53, %v7753_v31  ;;  %v11829_v51 = vsel %vm4242_vm1, %v4234_v63, %v7728_v13  ;;  %v7562_v17 = vunpack.i.l.bf16 %v11420_v38  ;;  %v6556_v31 = vld [vmem:[%s12623_s3 + $0x194] sm:$0xf0] }
 0x607   : > { %v7814_v16 = vpack.i.bf16 %v11802_v43, %v11578_v4  ;;  %v11845_v1 = vpack.i.bf16 %v11829_v51, %v11802_v43  ;;  %v7757_v13 = vunpack.i.l.bf16 %v11781_v20 }
 0x608   : > { %v4191_v42 = vsel %vm4182_vm12, %v13033_v0, %v7562_v17 }
 0x609   : > { %7815 = vrot.lane.b32.xlu0 %v7814_v16, %s12991_s26  ;;  %7840 = vrot.lane.b32.xlu1 %v7814_v16, %s13029_s14  ;;  %v13034_v16 = vld [vmem:[#allocation36_spill] sm:$0xff] }
 0x60a   : > { %v7736_v6 = vpop.permute.xlu0 %7735  ;;  %v11816_v60 = vpop.permute.xlu2 %7775 }
 0x60b   : > { %v7738_v56 = vunpack.i.h.bf16 %v7736_v6  ;;  %v7737_v12 = vunpack.i.l.bf16 %v7736_v6  ;;  %v7771_v18 = vpop.permute.xlu1 %7770  ;;  %v7778_v28 = vunpack.i.h.bf16 %v11816_v60  ;;  %v7777_v49 = vunpack.i.l.bf16 %v11816_v60 }
 0x60c   : > { %v7773_v57 = vunpack.i.h.bf16 %v7771_v18  ;;  %v7772_v23 = vunpack.i.l.bf16 %v7771_v18 }
 0x60d   : > { %v4213_v36 = vsel %vm4212_vm15, %v4198_v39, %v7738_v56  ;;  %v4220_v15 = vsel %vm4212_vm15, %v4205_v50, %v7737_v12  ;;  %v4392_v40 = vsel %vm4390_vm4, %v11346_v54, %v7778_v28  ;;  %v7563_v54 = vunpack.i.h.bf16 %v11420_v38 }
 0x60e   : > { %v4228_v48 = vsel %vm4227_vm2, %v4213_v36, %v7743_v2  ;;  %v4235_v14 = vsel %vm4227_vm2, %v4220_v15, %v7742_v59  ;;  %v4206_v38 = vsel %vm4197_vm14, %v4191_v42, %v7772_v23  ;;  %v7859_v2 = vpack.i.bf16 %v3473_v27, %v3472_v29 }
 0x60f   : > { %v11840_v44 = vsel %vm4242_vm1, %v4235_v14, %v7747_v45  ;;  %v4243_v61 = vsel %vm4242_vm1, %v4228_v48, %v7748_v41  ;;  %v4192_v11 = vsel %vm4182_vm12, %v13034_v16, %v7563_v54  ;;  %v4221_v19 = vsel %vm4212_vm15, %v4206_v38, %v7757_v13  ;;  %v6546_v48 = vld [vmem:[%s12623_s3 + $0x144] sm:$0xf0]  ;;  %v6544_v13 = vld [vmem:[%s12623_s3 + $0x134] sm:$0xf0] }
 0x610   : > { %v4391_v10 = vsel %vm4390_vm4, %v4243_v61, %v7777_v49  ;;  %v7864_v52 = vpack.i.bf16 %v11840_v44, %v11829_v51  ;;  %v4207_v37 = vsel %vm4197_vm14, %v4192_v11, %v7773_v57  ;;  %v6261_v50 = vor.u32 %v6556_v31, %v6260_v34  ;;  %v6196_v34 = vld [vmem:[%s12623_s3 + $0x110] sm:$0xf] }
 0x611   : > { %v11856_v33 = vpack.c.bf16 %v4392_v40, %v4391_v10  ;;  %7820 = vrot.lane.b32.xlu0 %v11445_v9, %s13031_s0  ;;  %7855 = vrot.lane.b32.xlu1 %v11845_v1, %s13032_s25  ;;  %v4222_v8 = vsel %vm4212_vm15, %v4207_v37, %v7758_v47  ;;  %v7767_v56 = vunpack.i.l.bf16 %v11787_v62  ;;  %v6212_v47 = vld [vmem:[%s12623_s3 + $0x130] sm:$0xf] }
 0x612   : > { %v7761_v53 = vpop.permute.xlu0 %7760  ;;  %v7781_v21 = vpop.permute.xlu2 %7780  ;;  %7865 = vrot.lane.b32.xlu2 %v7864_v52, %s12991_s26  ;;  %4907 = vmatpush.bf16.msra.mxu2 %v6261_v50 }
 0x613   : > { %v11868_v22 = vpop.permute.xlu1 %7785  ;;  %4807 = vmatmul.bf16.vlgmr.msra.gmra.mxu3 %v11856_v33  ;;  %v7763_v63 = vunpack.i.h.bf16 %v7761_v53  ;;  %v7762_v46 = vunpack.i.l.bf16 %v7761_v53  ;;  %v7783_v41 = vunpack.i.h.bf16 %v7781_v21  ;;  %v7782_v45 = vunpack.i.l.bf16 %v7781_v21 }
 0x614   : > { %v7787_v57 = vunpack.i.l.bf16 %v11868_v22  ;;  %v7788_v16 = vunpack.i.h.bf16 %v11868_v22 }
 0x615   : > { %v4236_v20 = vsel %vm4227_vm2, %v4221_v19, %v7762_v46  ;;  %v4237_v6 = vsel %vm4227_vm2, %v4222_v8, %v7763_v63  ;;  %v4401_v23 = vsel %vm3235_vm3, %v7777_v49, %v7782_v45  ;;  %v4402_v53 = vsel %vm3235_vm3, %v7778_v28, %v7783_v41  ;;  %v6204_v19 = vld [vmem:[%s12623_s3 + $0x120] sm:$0xf]  ;;  %v6542_v8 = vld [vmem:[%s12623_s3 + $0x124] sm:$0xf0] }
 0x616   : > { %v11903_v30 = vsel %vm4242_vm1, %v4236_v20, %v7767_v56  ;;  %v6205_v31 = vor.u32 %v6542_v8, %v6204_v19  ;;  %v6540_v20 = vld [vmem:[%s12623_s3 + $0x114] sm:$0xf0]  ;;  %v6538_v56 = vld [vmem:[%s12623_s3 + $0x104] sm:$0xf0] }
 0x617   : > { %v7894_v28 = vpack.i.bf16 %v11903_v30, %v11840_v44 }
 0x619   : > { %7830 = vrot.lane.b32.xlu0 %v11445_v9, %s12991_s26  ;;  %7860 = vrot.lane.b32.xlu1 %v7859_v2, %s13035_s29  ;;  %v7768_v9 = vunpack.i.h.bf16 %v11787_v62  ;;  %s8164_s29 = smov 112  }
 0x61a   : > { %v7796_v59 = vpop.permute.xlu0 %7795  ;;  %v7791_v25 = vpop.permute.xlu2 %7790  ;;  %7870 = vrot.lane.b32.xlu2 %v7859_v2, %s13036_s1  ;;  %s5789_s1 = sshll.u32 %s8478_s22, 3 }
 0x61b   : > { %v11898_v12 = vpop.permute.xlu1 %7810  ;;  %v11906_v39 = vsel %vm4242_vm1, %v4237_v6, %v7768_v9  ;;  %v7792_v49 = vunpack.i.l.bf16 %v7791_v25  ;;  %v7797_v0 = vunpack.i.l.bf16 %v7796_v59  ;;  %v7793_v37 = vunpack.i.h.bf16 %v7791_v25  ;;  %v6554_v25 = vld [vmem:[%s12623_s3 + $0x184] sm:$0xf0]  ;;  %v6188_v9 = vld [vmem:[%s12623_s3 + $0x100] sm:$0xf] }
 0x61c   : > { %v7813_v18 = vunpack.i.h.bf16 %v11898_v12  ;;  %v7812_v35 = vunpack.i.l.bf16 %v11898_v12  ;;  %v7884_v36 = vpack.i.bf16 %v11906_v39, %v11903_v30  ;;  %v6197_v6 = vor.u32 %v6540_v20, %v6196_v34 }
 0x61e   : > { %v4393_v7 = vsel %vm4390_vm4, %v11349_v24, %v7812_v35  ;;  %v4394_v62 = vsel %vm4390_vm4, %v11581_v58, %v7813_v18  ;;  %v6220_v24 = vld [vmem:[%s12623_s3 + $0x140] sm:$0xf] }
 0x61f   : > { %v11920_v15 = vpack.c.bf16 %v4394_v62, %v4393_v7  ;;  %v6221_v61 = vor.u32 %v6546_v48, %v6220_v24  ;;  %v6189_v7 = vor.u32 %v6538_v56, %v6188_v9 }
 0x621   : > { %7845 = vrot.lane.b32.xlu0 %v7859_v2, %s12995_s19  ;;  %7880 = vrot.lane.b32.xlu1 %v7864_v52, %s13029_s14  ;;  %s13037_s19 = smov 84   ;;  %v6213_v2 = vor.u32 %v6544_v13, %v6212_v47 }
 0x622   : > { %v7801_v58 = vpop.permute.xlu0 %7800  ;;  %v11928_v14 = vpop.permute.xlu2 %7805  ;;  %7885 = vrot.lane.b32.xlu2 %v7884_v36, %s12991_s26  ;;  %4870 = vmatpush.bf16.msra.mxu1 %v6221_v61 }
 0x623   : > { %v7802_v40 = vunpack.i.l.bf16 %v7801_v58  ;;  %v7808_v10 = vunpack.i.h.bf16 %v11928_v14  ;;  %v7807_v52 = vunpack.i.l.bf16 %v11928_v14  ;;  %4812 = vmatmul.bf16.gmra.mxu3 %v11920_v15  ;;  %v7803_v60 = vunpack.i.h.bf16 %v7801_v58  ;;  %v7836_v41 = vpop.permute.xlu1 %7835 }
 0x624   : > { %v7837_v20 = vunpack.i.l.bf16 %v7836_v41 }
 0x625   : > { %v4208_v21 = vsel %vm4197_vm14, %v11514_v5, %v7802_v40  ;;  %v4412_v54 = vsel %vm4411_vm5, %v4401_v23, %v7807_v52  ;;  %v4413_v17 = vsel %vm4411_vm5, %v4402_v53, %v7808_v10  ;;  %v4209_v42 = vsel %vm4197_vm14, %v11518_v32, %v7803_v60 }
 0x626   : > { %v4223_v27 = vsel %vm4212_vm15, %v4208_v21, %v7787_v57  ;;  %v11950_v29 = vpack.c.bf16 %v4413_v17, %v4412_v54  ;;  %v4224_v38 = vsel %vm4212_vm15, %v4209_v42, %v7788_v16  ;;  %4871 = vmatpush.bf16.msra.mxu1 %v6213_v2 }
 0x627   : > { %v4238_v5 = vsel %vm4227_vm2, %v4223_v27, %v7792_v49  ;;  %v4239_v46 = vsel %vm4227_vm2, %v4224_v38, %v7793_v37 }
 0x628   : > { %4841 = vmatmul.bf16.vlgmr.msra.gmra.mxu0 %v11950_v29  ;;  %v4253_v11 = vsel %vm4242_vm1, %v4238_v5, %v7797_v0 }
 0x629   : > { %7875 = vrot.lane.b32.xlu0 %v11845_v1, %s13037_s19  ;;  %7895 = vrot.lane.b32.xlu1 %v7894_v28, %s13037_s19  ;;  %v7909_v63 = vpack.i.bf16 %v4253_v11, %v11906_v39  ;;  %v7798_v1 = vunpack.i.h.bf16 %v7796_v59  ;;  %v6252_v59 = vld [vmem:[%s12623_s3 + $0x180] sm:$0xf] }
 0x62a   : > { %7900 = vrot.lane.b32.xlu2 %v7884_v36, %s13029_s14  ;;  %4872 = vmatpush.bf16.msra.mxu1 %v6205_v31  ;;  %v6253_v50 = vor.u32 %v6554_v25, %v6252_v59  ;;  %v7826_v62 = vpop.permute.xlu2 %7825  ;;  %v7838_v31 = vunpack.i.h.bf16 %v7836_v41  ;;  %v6519_v25 = vld [vmem:[%s12623_s3 + $0x74] sm:$0xf] }
 0x62b   : > { %v11971_v32 = vsel %vm4242_vm1, %v4239_v46, %v7798_v1  ;;  %v7828_v38 = vunpack.i.h.bf16 %v7826_v62  ;;  %v7827_v37 = vunpack.i.l.bf16 %v7826_v62 }
 0x62c   : > { %v7904_v22 = vpack.i.bf16 %v11971_v32, %v4253_v11  ;;  %4908 = vmatpush.bf16.msra.mxu2 %v6253_v50  ;;  %v6118_v50 = vld [vmem:[%s12623_s3 + $0x78] sm:$0xf0] }
 0x62d   : > { %v6121_v62 = vor.u32 %v6519_v25, %v6118_v50 }
 0x62e   : > { %4873 = vmatpush.bf16.msra.mxu1 %v6197_v6 }
 0x62f   : > { %4935 = vmatpush.bf16.msrb.mxu3 %v6121_v62 }
 0x631   : > { %7890 = vrot.lane.b32.xlu0 %v7894_v28, %s13032_s25  ;;  %7910 = vrot.lane.b32.xlu1 %v7909_v63, %s13032_s25 }
 0x632   : > { %7915 = vrot.lane.b32.xlu2 %v7909_v63, %s13037_s19  ;;  %4874 = vmatpush.bf16.msra.mxu1 %v6189_v7 }
 0x639   : > { %7905 = vrot.lane.b32.xlu0 %v7904_v22, %s12991_s26 }
 0x641   : > { %7920 = vrot.lane.b32.xlu0 %v7904_v22, %s13029_s14 }
 0x65c   : > { %v12006_v45 = vpop.permute.xlu2 %7850 }
 0x65d   : > { %v7853_v9 = vunpack.i.h.bf16 %v12006_v45  ;;  %v7852_v56 = vunpack.i.l.bf16 %v12006_v45  ;;  %v6517_v45 = vld [vmem:[%s12623_s3 + $0x64] sm:$0xf] }
 0x66c   : > { %v7866_v54 = vpop.permute.xlu2 %7865 }
 0x66d   : > { %v7868_v16 = vunpack.i.h.bf16 %v7866_v54  ;;  %v7867_v11 = vunpack.i.l.bf16 %v7866_v54 }
 0x66f   : > { %v12038_v13 = vpack.c.bf16 %v7868_v16, %v7867_v11 }
 0x674   : > { %v7871_v47 = vpop.permute.xlu2 %7870 }
 0x67b   : > { %v7816_v36 = vpop.permute.xlu0 %7815  ;;  %v7841_v24 = vpop.permute.xlu1 %7840 }
 0x67c   : > { %v7818_v48 = vunpack.i.h.bf16 %v7816_v36  ;;  %v7817_v58 = vunpack.i.l.bf16 %v7816_v36  ;;  %v7843_v53 = vunpack.i.h.bf16 %v7841_v24  ;;  %v7842_v21 = vunpack.i.l.bf16 %v7841_v24 }
 0x67e   : > { %v4423_v61 = vsel %vm4422_vm6, %v7807_v52, %v7817_v58  ;;  %v4424_v40 = vsel %vm4422_vm6, %v7808_v10, %v7818_v48  ;;  %v12014_v57 = vpack.c.bf16 %v7818_v48, %v7817_v58  ;;  %v4403_v14 = vsel %vm3235_vm3, %v7812_v35, %v7842_v21 }
 0x67f   : > { %v12016_v23 = vpack.c.bf16 %v4424_v40, %v4423_v61  ;;  %v4404_v10 = vsel %vm3235_vm3, %v7813_v18, %v7843_v53  ;;  %v7873_v40 = vunpack.i.h.bf16 %v7871_v47  ;;  %v7872_v53 = vunpack.i.l.bf16 %v7871_v47 }
 0x680   : > { %6266 = vmatmul.msk.bf16.vlgmr.msra.gmra.mxu2 %vm4137_vm9, %v12014_v57 }
 0x681   : > { %4875 = vmatmul.bf16.vlgmr.msra.gmra.mxu1 %v12016_v23 }
 0x683   : > { %v7821_v17 = vpop.permute.xlu0 %7820  ;;  %v7856_v27 = vpop.permute.xlu1 %7855 }
 0x684   : > { %v7858_v49 = vunpack.i.h.bf16 %v7856_v27  ;;  %v7857_v52 = vunpack.i.l.bf16 %v7856_v27  ;;  %v7823_v5 = vunpack.i.h.bf16 %v7821_v17  ;;  %v7822_v0 = vunpack.i.l.bf16 %v7821_v17  ;;  %v6110_v17 = vld [vmem:[%s12623_s3 + $0x68] sm:$0xf0]  ;;  %v7886_v27 = vpop.permute.xlu2 %7885 }
 0x686   : > { %v4414_v60 = vsel %vm4411_vm5, %v4403_v14, %v7857_v52  ;;  %v4415_v28 = vsel %vm4411_vm5, %v4404_v10, %v7858_v49  ;;  %v4151_v35 = vsel %vm4137_vm9, %v11716_v26, %v7823_v5  ;;  %v4150_v12 = vsel %vm4137_vm9, %v11713_v55, %v7822_v0 }
 0x687   : > { %v12029_v42 = vpack.c.bf16 %v4415_v28, %v4414_v60  ;;  %v4425_v1 = vsel %vm4422_vm6, %v7857_v52, %v7867_v11  ;;  %v4426_v22 = vsel %vm4422_vm6, %v7858_v49, %v7868_v16  ;;  %v4165_v2 = vsel %vm4152_vm10, %v4150_v12, %v7827_v37  ;;  %v6102_v37 = vld [vmem:[%s12623_s3 + $0x58] sm:$0xf0] }
 0x688   : > { %v4166_v19 = vsel %vm4152_vm10, %v4151_v35, %v7828_v38  ;;  %v12044_v55 = vpack.c.bf16 %v4426_v22, %v4425_v1  ;;  %v6113_v14 = vor.u32 %v6517_v45, %v6110_v17  ;;  %v7888_v16 = vunpack.i.h.bf16 %v7886_v27  ;;  %v6515_v38 = vld [vmem:[%s12623_s3 + $0x54] sm:$0xf]  ;;  %v6513_v35 = vld [vmem:[%s12623_s3 + $0x44] sm:$0xf]  ;;  %v12091_v1 = vld [vmem:[%s12624_s4] sm:$0x3] }
 0x689   : > { %4846 = vmatmul.bf16.gmra.mxu0 %v12029_v42  ;;  %v7887_v11 = vunpack.i.l.bf16 %v7886_v27 }
 0x68a   : > { %4936 = vmatpush.bf16.msrb.mxu3 %v6113_v14 }
 0x68b   : > { %v7831_v18 = vpop.permute.xlu0 %7830  ;;  %v7861_v34 = vpop.permute.xlu1 %7860  ;;  %v12093_v47 = vpack.c.bf16 %v7888_v16, %v7887_v11 }
 0x68c   : > { %v7833_v63 = vunpack.i.h.bf16 %v7831_v18  ;;  %v7832_v46 = vunpack.i.l.bf16 %v7831_v18  ;;  %v7863_v24 = vunpack.i.h.bf16 %v7861_v34  ;;  %v7862_v48 = vunpack.i.l.bf16 %v7861_v34  ;;  %v6094_v18 = vld [vmem:[%s12623_s3 + $0x48] sm:$0xf0] }
 0x68d   : > { %v6097_v22 = vor.u32 %v6513_v35, %v6094_v18 }
 0x68e   : > { %v4180_v8 = vsel %vm4167_vm11, %v4165_v2, %v7832_v46  ;;  %v4181_v26 = vsel %vm4167_vm11, %v4166_v19, %v7833_v63 }
 0x68f   : > { %v4195_v6 = vsel %vm4182_vm12, %v4180_v8, %v7837_v20  ;;  %v4196_v59 = vsel %vm4182_vm12, %v4181_v26, %v7838_v31  ;;  %v12100_v8 = vperm.slane %v12091_v1, 0  ;;  %v6511_v31 = vld [vmem:[%s12623_s3 + $0x34] sm:$0xf] }
 0x690   : > { %6267 = vmatmul.msk.bf16.gmra.mxu2 %vm4137_vm9, %v12038_v13  ;;  %v4210_v58 = vsel %vm4197_vm14, %v4195_v6, %v7852_v56  ;;  %v4211_v61 = vsel %vm4197_vm14, %v4196_v59, %v7853_v9  ;;  %v6078_v9 = vld [vmem:[%s12623_s3 + $0x28] sm:$0xf0] }
 0x691   : > { %4880 = vmatmul.bf16.gmra.mxu1 %v12044_v55 }
 0x693   : > { %v7846_v7 = vpop.permute.xlu0 %7845  ;;  %v7881_v28 = vpop.permute.xlu1 %7880 }
 0x694   : > { %v7848_v41 = vunpack.i.h.bf16 %v7846_v7  ;;  %v7847_v36 = vunpack.i.l.bf16 %v7846_v7  ;;  %v7883_v20 = vunpack.i.h.bf16 %v7881_v28  ;;  %v7882_v6 = vunpack.i.l.bf16 %v7881_v28 }
 0x696   : > { %v4225_v21 = vsel %vm4212_vm15, %v4210_v58, %v7847_v36  ;;  %v4226_v54 = vsel %vm4212_vm15, %v4211_v61, %v7848_v41  ;;  %v4808_v34 = vpop.f32.mrf.mxu3  ;;  %vm5231_vm15 = vcmask 130048  }
 0x697   : > { %v4240_v49 = vsel %vm4227_vm2, %v4225_v21, %v7862_v48  ;;  %v4241_v52 = vsel %vm4227_vm2, %v4226_v54, %v7863_v24  ;;  %v4809_v56 = vadd.f32 %v4808_v34, %v12100_v8  ;;  %v6507_v21 = vld [vmem:[%s12623_s3 + $0x14] sm:$0xf]  ;;  %v6070_v54 = vld [vmem:[%s12623_s3 + $0x18] sm:$0xf0] }
 0x698   : > { %v4255_v10 = vsel %vm4242_vm1, %v4240_v49, %v7872_v53  ;;  %v4256_v60 = vsel %vm4242_vm1, %v4241_v52, %v7873_v40  ;;  %v6073_v14 = vor.u32 %v6507_v21, %v6070_v54 }
 0x699   : > { %v7929_v5 = vpack.i.bf16 %v4255_v10, %v11971_v32  ;;  %v7924_v0 = vpack.i.bf16 %v4256_v60, %v4255_v10  ;;  %v6105_v32 = vor.u32 %v6515_v38, %v6102_v37  ;;  %v6505_v10 = vld [vmem:[%s12623_s3 + $0x4] sm:$0xf]  ;;  %v6062_v60 = vld [vmem:[%s12623_s3 + $0x8] sm:$0xf0] }
 0x69a   : > { %v6065_v35 = vor.u32 %v6505_v10, %v6062_v60  ;;  %v6555_v60 = vld [vmem:[%s12623_s3 + $0x194] sm:$0xf] }
 0x69b   : > { %v7876_v12 = vpop.permute.xlu0 %7875  ;;  %7930 = vrot.lane.b32.xlu2 %v7929_v5, %s13032_s25  ;;  %7925 = vrot.lane.b32.xlu1 %v7924_v0, %s12991_s26  ;;  %v7896_v59 = vpop.permute.xlu1 %7895 }
 0x69c   : > { %v7878_v63 = vunpack.i.h.bf16 %v7876_v12  ;;  %v7877_v46 = vunpack.i.l.bf16 %v7876_v12  ;;  %4937 = vmatpush.bf16.msrb.mxu3 %v6105_v32  ;;  %v7898_v49 = vunpack.i.h.bf16 %v7896_v59  ;;  %v7897_v52 = vunpack.i.l.bf16 %v7896_v59  ;;  %v7901_v5 = vpop.permute.xlu2 %7900 }
 0x69e   : > { %v4395_v2 = vsel %vm4390_vm4, %v11578_v4, %v7877_v46  ;;  %v4396_v19 = vsel %vm4390_vm4, %v11802_v43, %v7878_v63  ;;  %v6086_v4 = vld [vmem:[%s12623_s3 + $0x38] sm:$0xf0]  ;;  %v6509_v43 = vld [vmem:[%s12623_s3 + $0x24] sm:$0xf]  ;;  %v4405_v41 = vsel %vm3235_vm3, %v7877_v46, %v7882_v6  ;;  %v4406_v36 = vsel %vm3235_vm3, %v7878_v63, %v7883_v20  ;;  %v6174_v20 = vld [vmem:[%s12623_s3 + $0xe8] sm:$0xf0] }
 0x69f   : > { %v12104_v26 = vpack.c.bf16 %v4396_v19, %v4395_v2  ;;  %v6089_v50 = vor.u32 %v6511_v31, %v6086_v4  ;;  %v6081_v48 = vor.u32 %v6509_v43, %v6078_v9  ;;  %v4397_v38 = vsel %vm4390_vm4, %v11829_v51, %v7897_v52  ;;  %v6182_v2 = vld [vmem:[%s12623_s3 + $0xf8] sm:$0xf0]  ;;  %v6551_v19 = vld [vmem:[%s12623_s3 + $0x174] sm:$0xf]  ;;  %v6533_v43 = vld [vmem:[%s12623_s3 + $0xe4] sm:$0xf] }
 0x6a0   : > { %6268 = vmatmul.msk.bf16.gmra.mxu2 %vm4137_vm9, %v12093_v47  ;;  %4938 = vmatpush.bf16.msrb.mxu3 %v6097_v22  ;;  %v4398_v37 = vsel %vm4390_vm4, %v11840_v44, %v7898_v49  ;;  %v7903_v46 = vunpack.i.h.bf16 %v7901_v5  ;;  %v7902_v22 = vunpack.i.l.bf16 %v7901_v5  ;;  %v4670_v51 = vunpack.c.h.b16 %v11616_v3  ;;  %v6535_v44 = vld [vmem:[%s12623_s3 + $0xf4] sm:$0xf]  ;;  %v6246_v3 = vld [vmem:[%s12623_s3 + $0x178] sm:$0xf0]  ;;  %v6549_v9 = vld [vmem:[%s12623_s3 + $0x164] sm:$0xf] }
 0x6a1   : > { %4817 = vmatmul.bf16.gmra.mxu3 %v12104_v26  ;;  %v12154_v63 = vpack.c.bf16 %v4398_v37, %v4397_v38  ;;  %v6185_v4 = vor.u32 %v6535_v44, %v6182_v2  ;;  %v6545_v38 = vld [vmem:[%s12623_s3 + $0x144] sm:$0xf] }
 0x6a2   : > { %v4407_v34 = vsel %vm3235_vm3, %v7897_v52, %v7902_v22  ;;  %v4408_v31 = vsel %vm3235_vm3, %v7898_v49, %v7903_v46  ;;  %v6531_v52 = vld [vmem:[%s12623_s3 + $0xd4] sm:$0xf]  ;;  %v6525_v44 = vld [vmem:[%s12623_s3 + $0xa4] sm:$0xf] }
 0x6a3   : > { %v7891_v25 = vpop.permute.xlu0 %7890  ;;  %4969 = vmatpush.bf16.msrb.mxu0 %v6185_v4  ;;  %v6543_v22 = vld [vmem:[%s12623_s3 + $0x134] sm:$0xf]  ;;  %v6134_v4 = vld [vmem:[%s12623_s3 + $0x98] sm:$0xf0] }
 0x6a4   : > { %v7893_v7 = vunpack.i.h.bf16 %v7891_v25  ;;  %v7892_v62 = vunpack.i.l.bf16 %v7891_v25  ;;  %4939 = vmatpush.bf16.msrb.mxu3 %v6089_v50  ;;  %v4724_v25 = vpack.c.b16 %v4670_v51, %v4670_v51  ;;  %v6249_v50 = vor.u32 %v6551_v19, %v6246_v3  ;;  %v6214_v51 = vld [vmem:[%s12623_s3 + $0x138] sm:$0xf0]  ;;  %v6142_v19 = vld [vmem:[%s12623_s3 + $0xa8] sm:$0xf0] }
 0x6a5   : > { %v4842_v24 = vpop.f32.mrf.mxu0  ;;  %v6217_v2 = vor.u32 %v6543_v22, %v6214_v51 }
 0x6a6   : > { %v12122_v58 = vadd.f32 %v4842_v24, %v4809_v56  ;;  %v4416_v61 = vsel %vm4411_vm5, %v4405_v41, %v7892_v62  ;;  %v4417_v40 = vsel %vm4411_vm5, %v4406_v36, %v7893_v7  ;;  %v4427_v53 = vsel %vm4422_vm6, %v7892_v62, %v7887_v11  ;;  %v7911_v11 = vpop.permute.xlu1 %7910  ;;  %v6238_v56 = vld [vmem:[%s12623_s3 + $0x168] sm:$0xf0]  ;;  %v12188_v41 = vpop.permute.xlu2 %7915  ;;  %5003 = vmatpush.bf16.msrb.mxu1 %v6249_v50 }
 0x6a7   : > { %v12133_v45 = vpack.c.bf16 %v4417_v40, %v4416_v61  ;;  %v4428_v17 = vsel %vm4422_vm6, %v7893_v7, %v7888_v16  ;;  %v7913_v32 = vunpack.i.h.bf16 %v7911_v11  ;;  %v7912_v18 = vunpack.i.l.bf16 %v7911_v11  ;;  %v6158_v11 = vld [vmem:[%s12623_s3 + $0xc8] sm:$0xf0] }
 0x6a8   : > { %v12136_v27 = vpack.c.bf16 %v4428_v17, %v4427_v53  ;;  %4940 = vmatpush.bf16.msrb.mxu3 %v6081_v48  ;;  %v4797_v36 = vsel %vm4792_vm0, %v4724_v25, 0  ;;  %v6177_v24 = vor.u32 %v6533_v43, %v6174_v20  ;;  %v6241_v61 = vor.u32 %v6549_v9, %v6238_v56  ;;  %v6521_v43 = vld [vmem:[%s12623_s3 + $0x84] sm:$0xf]  ;;  %v6254_v50 = vld [vmem:[%s12623_s3 + $0x188] sm:$0xf0] }
 0x6a9   : > { %4851 = vmatmul.bf16.gmra.mxu0 %v12133_v45  ;;  %v4418_v6 = vsel %vm4411_vm5, %v4407_v34, %v7912_v18  ;;  %v4419_v59 = vsel %vm4411_vm5, %v4408_v31, %v7913_v32  ;;  %5042 = vmatpush.bf16.msrb.mxu2 %v4797_v36  ;;  %v7918_v53 = vunpack.i.h.bf16 %v12188_v41  ;;  %v7917_v21 = vunpack.i.l.bf16 %v12188_v41  ;;  %v6523_v31 = vld [vmem:[%s12623_s3 + $0x94] sm:$0xf]  ;;  %v6541_v20 = vld [vmem:[%s12623_s3 + $0x124] sm:$0xf]  ;;  %v6198_v36 = vld [vmem:[%s12623_s3 + $0x118] sm:$0xf0] }
 0x6aa   : > { %4885 = vmatmul.bf16.gmra.mxu1 %v12136_v27  ;;  %v12191_v48 = vpack.c.bf16 %v4419_v59, %v4418_v6  ;;  %4970 = vmatpush.bf16.msrb.mxu0 %v6177_v24  ;;  %v6145_v34 = vor.u32 %v6525_v44, %v6142_v19  ;;  %v6137_v3 = vor.u32 %v6523_v31, %v6134_v4  ;;  %v6206_v59 = vld [vmem:[%s12623_s3 + $0x128] sm:$0xf0]  ;;  %v6553_v25 = vld [vmem:[%s12623_s3 + $0x184] sm:$0xf]  ;;  %vm13038_vm0 = vcmask 261120  }
 0x6ab   : > { %v7906_v28 = vpop.permute.xlu0 %7905  ;;  %5004 = vmatpush.bf16.msrb.mxu1 %v6241_v61  ;;  %v4399_v54 = vsel %vm4390_vm4, %v11903_v30, %v7917_v21  ;;  %v4400_v17 = vsel %vm4390_vm4, %v11906_v39, %v7918_v53  ;;  %v6547_v30 = vld [vmem:[%s12623_s3 + $0x154] sm:$0xf]  ;;  %v6230_v39 = vld [vmem:[%s12623_s3 + $0x158] sm:$0xf0]  ;;  %v6209_v9 = vor.u32 %v6541_v20, %v6206_v59  ;;  %v6257_v56 = vor.u32 %v6553_v25, %v6254_v50  ;;  %v6190_v41 = vld [vmem:[%s12623_s3 + $0x108] sm:$0xf0] }
 0x6ac   : > { %v7908_v0 = vunpack.i.h.bf16 %v7906_v28  ;;  %v7907_v16 = vunpack.i.l.bf16 %v7906_v28  ;;  %4941 = vmatpush.bf16.msrb.mxu3 %v6073_v14  ;;  %v12207_v49 = vpack.c.bf16 %v4400_v17, %v4399_v54  ;;  %v6166_v14 = vld [vmem:[%s12623_s3 + $0xd8] sm:$0xf0]  ;;  %v6233_v5 = vor.u32 %v6547_v30, %v6230_v39  ;;  %vm13039_vm1 = vmmov %vm13038_vm0 }
 0x6ad   : > { %v6169_v10 = vor.u32 %v6531_v52, %v6166_v14  ;;  %v6262_v28 = vld [vmem:[%s12623_s3 + $0x198] sm:$0xf0]  ;;  %vm13041_vm7 = vmmov %vm13038_vm0 }
 0x6ae   : > { %v12150_v12 = vpack.c.bf16 %v7908_v0, %v7907_v16  ;;  %v4429_v7 = vsel %vm4422_vm6, %v7912_v18, %v7907_v16  ;;  %v4430_v62 = vsel %vm4422_vm6, %v7913_v32, %v7908_v0  ;;  %v6265_v0 = vor.u32 %v6555_v60, %v6262_v28  ;;  %v6529_v16 = vld [vmem:[%s12623_s3 + $0xc4] sm:$0xf]  ;;  %v6150_v18 = vld [vmem:[%s12623_s3 + $0xb8] sm:$0xf0]  ;;  %vm13042_vm8 = vmmov %vm13038_vm0 }
 0x6af   : > { %v12193_v40 = vpack.c.bf16 %v4430_v62, %v4429_v7  ;;  %4971 = vmatpush.bf16.msrb.mxu0 %v6169_v10  ;;  %5005 = vmatpush.bf16.msrb.mxu1 %v6233_v5  ;;  %v6161_v37 = vor.u32 %v6529_v16, %v6158_v11  ;;  %v6539_v62 = vld [vmem:[%s12623_s3 + $0x114] sm:$0xf]  ;;  %v4810_v10 = vpop.f32.mrf.mxu3  ;;  %v4844_v5 = vpop.f32.mrf.mxu0  ;;  %vm13044_vm10 = vmmov %vm13038_vm0 }
 0x6b0   : > { %6269 = vmatmul.msk.bf16.gmra.mxu2 %vm4137_vm9, %v12150_v12  ;;  %4942 = vmatpush.bf16.msrb.mxu3 %v6065_v35  ;;  %v6222_v35 = vld [vmem:[%s12623_s3 + $0x148] sm:$0xf0]  ;;  %v6201_v54 = vor.u32 %v6539_v62, %v6198_v36  ;;  %vm13045_vm12 = vmmov %vm13038_vm0 }
 0x6b1   : > { %4822 = vmatmul.bf16.gmra.mxu3 %v12154_v63  ;;  %5043 = vmatpush.bf16.msrb.mxu2 %v6265_v0  ;;  %v6225_v32 = vor.u32 %v6545_v38, %v6222_v35  ;;  %v4811_v38 = vadd.f32 %v4810_v10, %v12100_v8  ;;  %vm13046_vm13 = vmmov %vm13038_vm0 }
 0x6b2   : > { %vm13047_vm14 = vmmov %vm13038_vm0 }
 0x6b3   : > { %4972 = vmatpush.bf16.msrb.mxu0 %v6161_v37  ;;  %5006 = vmatpush.bf16.msrb.mxu1 %v6225_v32  ;;  %v7921_v7 = vpop.permute.xlu0 %7920  ;;  %vm13048_vm2 = vmmov %vm13038_vm0 }
 0x6b4   : > { %v7923_v24 = vunpack.i.h.bf16 %v7921_v7  ;;  %v7922_v61 = vunpack.i.l.bf16 %v7921_v7  ;;  %vm13049_vm4 = vmmov %vm13038_vm0 }
 0x6b5   : > { %5044 = vmatpush.bf16.msrb.mxu2 %v6257_v56 }
 0x6b6   : > { %v4409_v30 = vsel %vm3235_vm3, %v7917_v21, %v7922_v61  ;;  %v6537_v21 = vld [vmem:[%s12623_s3 + $0x104] sm:$0xf] }
 0x6b7   : > { %5007 = vmatpush.bf16.msrb.mxu1 %v6217_v2  ;;  %v4813_v11 = vpop.f32.mrf.mxu3 }
 0x6b8   : > { %v4814_v32 = vadd.f32 %v4813_v11, %v12100_v8 }
 0x6b9   : > { %4856 = vmatmul.bf16.gmra.mxu0 %v12191_v48 }
 0x6ba   : > { %4890 = vmatmul.bf16.gmra.mxu1 %v12193_v40 }
 0x6bb   : > { %5008 = vmatpush.bf16.msrb.mxu1 %v6209_v9 }
 0x6bf   : > { %5009 = vmatpush.bf16.msrb.mxu1 %v6201_v54 }
 0x6c1   : > { %4827 = vmatmul.bf16.gmra.mxu3 %v12207_v49 }
 0x6d1   : > { %4943 = vmatmul.bf16.vlgmr.msrb.gmra.mxu3 %v11856_v33  ;;  %v6527_v33 = vld [vmem:[%s12623_s3 + $0xb4] sm:$0xf] }
 0x6d2   : > { %v6153_v46 = vor.u32 %v6527_v33, %v6150_v18 }
 0x6d4   : > { %4973 = vmatpush.bf16.msrb.mxu0 %v6153_v46 }
 0x6d8   : > { %4974 = vmatpush.bf16.msrb.mxu0 %v6145_v34 }
 0x6dc   : > { %4975 = vmatpush.bf16.msrb.mxu0 %v6137_v3 }
 0x6e1   : > { %4948 = vmatmul.bf16.gmra.mxu3 %v11920_v15  ;;  %v6126_v15 = vld [vmem:[%s12623_s3 + $0x88] sm:$0xf0] }
 0x6e2   : > { %v6129_v6 = vor.u32 %v6521_v43, %v6126_v15  ;;  %v4815_v43 = vpop.f32.mrf.mxu3 }
 0x6e4   : > { %4976 = vmatpush.bf16.msrb.mxu0 %v6129_v6 }
 0x6f1   : > { %4953 = vmatmul.bf16.gmra.mxu3 %v12104_v26  ;;  %v4410_v26 = vsel %vm3235_vm3, %v7918_v53, %v7923_v24  ;;  %v6193_v53 = vor.u32 %v6537_v21, %v6190_v41  ;;  %vm13040_vm3 = vmmov %vm13038_vm0 }
 0x6f3   : > { %5010 = vmatpush.bf16.msrb.mxu1 %v6193_v53 }
 0x6f5   : > { %v7931_v17 = vpop.permute.xlu2 %7930 }
 0x6f6   : > { %v7933_v52 = vunpack.i.h.bf16 %v7931_v17  ;;  %v7932_v14 = vunpack.i.l.bf16 %v7931_v17 }
 0x6f8   : > { %v4420_v39 = vsel %vm4411_vm5, %v4409_v30, %v7932_v14  ;;  %v4421_v60 = vsel %vm4411_vm5, %v4410_v26, %v7933_v52  ;;  %vm13050_vm5 = vcmask 523264  }
 0x6f9   : > { %v12299_v28 = vpack.c.bf16 %v4421_v60, %v4420_v39 }
 0x6fb   : > { %4861 = vmatmul.bf16.gmra.mxu0 %v12299_v28 }
 0x6fe   : > { %v4876_v0 = vpop.f32.mrf.mxu1 }
 0x6ff   : > { %v4877_v16 = vadd.f32 %v4876_v0, %v12122_v58  ;;  %v4845_v58 = vadd.f32 %v4844_v5, %v4811_v38 }
 0x701   : > { %4958 = vmatmul.bf16.gmra.mxu3 %v12154_v63 }
 0x703   : > { %v4910_v37 = vpop.f32.mrf.mxu2 }
 0x704   : > { %v4911_v35 = vadd.f32 %v4910_v37, %v4877_v16 }
 0x706   : > { %v4847_v33 = vpop.f32.mrf.mxu0  ;;  %v4878_v18 = vpop.f32.mrf.mxu1  ;;  %v5071_v19 = vmax.f32 %v4911_v35, 0.0 }
 0x707   : > { %v4848_v46 = vadd.f32 %v4847_v33, %v4814_v32  ;;  %v4879_v22 = vadd.f32 %v4878_v18, %v4845_v58 }
 0x70b   : > { %v4912_v51 = vpop.f32.mrf.mxu2  ;;  %4977 = vmatmul.bf16.vlgmr.msrb.gmra.mxu0 %v11950_v29  ;;  %v4816_v29 = vadd.f32 %v4815_v43, %v12100_v8 }
 0x70c   : > { %v4913_v44 = vadd.f32 %v4912_v51, %v4879_v22  ;;  %v12346_v51 = vperm.slane %v12091_v1, 1 }
 0x70d   : > { %v7926_v2 = vpop.permute.xlu1 %7925 }
 0x70e   : > { %v5073_v34 = vmax.f32 %v4913_v44, 0.0  ;;  %v7928_v63 = vunpack.i.h.bf16 %v7926_v2  ;;  %v7927_v31 = vunpack.i.l.bf16 %v7926_v2  ;;  %v4881_v4 = vpop.f32.mrf.mxu1  ;;  %v4849_v50 = vpop.f32.mrf.mxu0 }
 0x70f   : > { %v4882_v3 = vadd.f32 %v4881_v4, %v4848_v46  ;;  %v4850_v7 = vadd.f32 %v4849_v50, %v4816_v29 }
 0x710   : > { %v12313_v15 = vmax.f32 %v5071_v19, %v5073_v34  ;;  %v4452_v20 = vpack.c.bf16 %v7928_v63, %v7927_v31  ;;  %v4431_v6 = vsel %vm4422_vm6, %v7932_v14, %v7927_v31  ;;  %v4432_v59 = vsel %vm4422_vm6, %v7933_v52, %v7928_v63 }
 0x711   : > { %v4451_v25 = vpack.c.bf16 %v4432_v59, %v4431_v6  ;;  %4963 = vmatmul.bf16.gmra.mxu3 %v12207_v49 }
 0x712   : > { %6270 = vmatmul.msk.bf16.gmra.mxu2 %vm4137_vm9, %v4452_v20 }
 0x713   : > { %4895 = vmatmul.bf16.gmra.mxu1 %v4451_v25  ;;  %v4915_v9 = vpop.f32.mrf.mxu2 }
 0x714   : > { %v4916_v56 = vadd.f32 %v4915_v9, %v4882_v3 }
 0x716   : > { %v4883_v62 = vpop.f32.mrf.mxu1  ;;  %v5075_v54 = vmax.f32 %v4916_v56, 0.0 }
 0x717   : > { %v4884_v36 = vadd.f32 %v4883_v62, %v4850_v7 }
 0x71b   : > { %v4917_v24 = vpop.f32.mrf.mxu2  ;;  %4982 = vmatmul.bf16.gmra.mxu0 %v12029_v42 }
 0x71c   : > { %v4918_v61 = vadd.f32 %v4917_v24, %v4884_v36 }
 0x71e   : > { %v5077_v17 = vmax.f32 %v4918_v61, 0.0 }
 0x720   : > { %v12321_v52 = vmax.f32 %v5075_v54, %v5077_v17 }
 0x722   : > { %6271 = vmatmul.msk.bf16.vlgmr.msrb.gmra.mxu2 %vm4137_vm9, %v12014_v57 }
 0x723   : > { %5011 = vmatmul.bf16.vlgmr.msrb.gmra.mxu1 %v12016_v23  ;;  %v12326_v49 = vpop.f32.mrf.mxu2 }
 0x724   : > { %v4818_v14 = vpop.f32.mrf.mxu3 }
 0x725   : > { %v4819_v34 = vadd.f32 %v4818_v14, %v12100_v8 }
 0x726   : > { %v4852_v30 = vpop.f32.mrf.mxu0 }
 0x727   : > { %v4886_v26 = vpop.f32.mrf.mxu1  ;;  %v4853_v43 = vadd.f32 %v4852_v30, %v4819_v34 }
 0x729   : > { %v4887_v59 = vadd.f32 %v4886_v26, %v4853_v43 }
 0x72b   : > { %4987 = vmatmul.bf16.gmra.mxu0 %v12133_v45  ;;  %v4922_v42 = vpop.f32.mrf.mxu2  ;;  %v4921_v62 = vadd.f32 %v12326_v49, %v4887_v59 }
 0x72c   : > { %v4820_v10 = vpop.f32.mrf.mxu3 }
 0x72d   : > { %v5079_v30 = vmax.f32 %v4921_v62, 0.0 }
 0x72e   : > { %v4854_v39 = vpop.f32.mrf.mxu0 }
 0x72f   : > { %v4888_v60 = vpop.f32.mrf.mxu1 }
 0x732   : > { %6272 = vmatmul.msk.bf16.gmra.mxu2 %vm4137_vm9, %v12038_v13 }
 0x733   : > { %5016 = vmatmul.bf16.gmra.mxu1 %v12044_v55  ;;  %v4925_v21 = vpop.f32.mrf.mxu2 }
 0x734   : > { %v4823_v5 = vpop.f32.mrf.mxu3 }
 0x735   : > { %v4824_v57 = vadd.f32 %v4823_v5, %v12100_v8 }
 0x736   : > { %v4857_v23 = vpop.f32.mrf.mxu0 }
 0x737   : > { %v4891_v0 = vpop.f32.mrf.mxu1  ;;  %v4858_v16 = vadd.f32 %v4857_v23, %v4824_v57 }
 0x739   : > { %v4892_v41 = vadd.f32 %v4891_v0, %v4858_v16 }
 0x73b   : > { %4992 = vmatmul.bf16.gmra.mxu0 %v12191_v48  ;;  %v4926_v45 = vadd.f32 %v4925_v21, %v4892_v41  ;;  %v4927_v55 = vpop.f32.mrf.mxu2 }
 0x73c   : > { %v4825_v53 = vpop.f32.mrf.mxu3 }
 0x73d   : > { %v4826_v11 = vadd.f32 %v4825_v53, %v12100_v8  ;;  %v5083_v58 = vmax.f32 %v4926_v45, 0.0 }
 0x73e   : > { %v4859_v38 = vpop.f32.mrf.mxu0 }
 0x73f   : > { %v4860_v37 = vadd.f32 %v4859_v38, %v4826_v11  ;;  %v4893_v35 = vpop.f32.mrf.mxu1 }
 0x741   : > { %v4894_v13 = vadd.f32 %v4893_v35, %v4860_v37 }
 0x742   : > { %6273 = vmatmul.msk.bf16.gmra.mxu2 %vm4137_vm9, %v12093_v47 }
 0x743   : > { %5021 = vmatmul.bf16.gmra.mxu1 %v12136_v27  ;;  %v4928_v32 = vadd.f32 %v4927_v55, %v4894_v13 }
 0x744   : > { %v4828_v48 = vpop.f32.mrf.mxu3 }
 0x745   : > { %v5085_v33 = vmax.f32 %v4928_v32, 0.0  ;;  %v4829_v1 = vadd.f32 %v4828_v48, %v12100_v8 }
 0x747   : > { %v12338_v18 = vmax.f32 %v5083_v58, %v5085_v33 }
 0x74b   : > { %4997 = vmatmul.bf16.gmra.mxu0 %v12299_v28 }
 0x74c   : > { %v4830_v47 = vpop.f32.mrf.mxu3 }
 0x752   : > { %6274 = vmatmul.msk.bf16.gmra.mxu2 %vm4137_vm9, %v12150_v12  ;;  %v4821_v12 = vadd.f32 %v4820_v10, %v12100_v8 }
 0x753   : > { %5026 = vmatmul.bf16.gmra.mxu1 %v12193_v40 }
 0x754   : > { %v4944_v27 = vpop.f32.mrf.mxu3  ;;  %v4855_v3 = vadd.f32 %v4854_v39, %v4821_v12 }
 0x755   : > { %v4945_v44 = vadd.f32 %v4944_v27, %v12346_v51 }
 0x756   : > { %v4889_v6 = vadd.f32 %v4888_v60, %v4855_v3 }
 0x758   : > { %v4923_v9 = vadd.f32 %v4922_v42, %v4889_v6 }
 0x75a   : > { %v5081_v54 = vmax.f32 %v4923_v9, 0.0 }
 0x75c   : > { %v4946_v19 = vpop.f32.mrf.mxu3 }
 0x75d   : > { %v4947_v40 = vadd.f32 %v4946_v19, %v12346_v51 }
 0x762   : > { %6275 = vmatmul.msk.bf16.gmra.mxu2 %vm4137_vm9, %v4452_v20  ;;  %vm13043_vm9 = vmmov %vm13038_vm0 }
 0x763   : > { %5031 = vmatmul.bf16.gmra.mxu1 %v4451_v25  ;;  %v4831_v25 = vadd.f32 %v4830_v47, %v12100_v8  ;;  %v12355_v8 = vmax.f32 %v5079_v30, %v5081_v54 }
 0x764   : > { %v4949_v14 = vpop.f32.mrf.mxu3 }
 0x765   : > { %v4950_v58 = vadd.f32 %v4949_v14, %v12346_v51 }
 0x76c   : > { %v4951_v16 = vpop.f32.mrf.mxu3 }
 0x774   : > { %v4954_v55 = vpop.f32.mrf.mxu3 }
 0x775   : > { %v4955_v6 = vadd.f32 %v4954_v55, %v12346_v51 }
 0x778   : > { %v4862_v46 = vpop.f32.mrf.mxu0 }
 0x779   : > { %v4863_v50 = vadd.f32 %v4862_v46, %v4829_v1  ;;  %v4952_v46 = vadd.f32 %v4951_v16, %v12346_v51 }
 0x77c   : > { %v4956_v19 = vpop.f32.mrf.mxu3 }
 0x780   : > { %v4864_v22 = vpop.f32.mrf.mxu0 }
 0x781   : > { %v4865_v56 = vadd.f32 %v4864_v22, %v4831_v25 }
 0x788   : > { %v4978_v2 = vpop.f32.mrf.mxu0 }
 0x789   : > { %v4979_v28 = vadd.f32 %v4978_v2, %v4945_v44 }
 0x790   : > { %v4896_v63 = vpop.f32.mrf.mxu1  ;;  %v4980_v31 = vpop.f32.mrf.mxu0 }
 0x791   : > { %v4981_v4 = vadd.f32 %v4980_v31, %v4947_v40  ;;  %v4897_v7 = vadd.f32 %v4896_v63, %v4863_v50  ;;  %v4959_v50 = vpop.f32.mrf.mxu3 }
 0x795   : > { %v4930_v20 = vpop.f32.mrf.mxu2 }
 0x796   : > { %v4931_v36 = vadd.f32 %v4930_v20, %v4897_v7 }
 0x798   : > { %v4898_v29 = vpop.f32.mrf.mxu1  ;;  %v5087_v10 = vmax.f32 %v4931_v36, 0.0  ;;  %v4983_v26 = vpop.f32.mrf.mxu0 }
 0x799   : > { %v4899_v24 = vadd.f32 %v4898_v29, %v4865_v56  ;;  %v4984_v47 = vadd.f32 %v4983_v26, %v4950_v58  ;;  %v4957_v29 = vadd.f32 %v4956_v19, %v12346_v51 }
 0x79d   : > { %v4932_v61 = vpop.f32.mrf.mxu2 }
 0x79e   : > { %v4933_v17 = vadd.f32 %v4932_v61, %v4899_v24 }
 0x7a0   : > { %v5089_v39 = vmax.f32 %v4933_v17, 0.0  ;;  %v5012_v60 = vpop.f32.mrf.mxu1  ;;  %v4985_v41 = vpop.f32.mrf.mxu0 }
 0x7a1   : > { %v5013_v5 = vadd.f32 %v5012_v60, %v4979_v28  ;;  %v4986_v44 = vadd.f32 %v4985_v41, %v4952_v46 }
 0x7a2   : > { %v12357_v57 = vmax.f32 %v5087_v10, %v5089_v39  ;;  %v4961_v10 = vpop.f32.mrf.mxu3 }
 0x7a4   : > { %v7939_v42 = vpack.i.bf16 %v12357_v57, %v12355_v8 }
 0x7a5   : > { %v5046_v49 = vpop.f32.mrf.mxu2 }
 0x7a6   : > { %v5047_v23 = vadd.f32 %v5046_v49, %v5013_v5  ;;  %7940 = vrot.lane.b32.xlu1 %v7939_v42, %s8164_s29 }
 0x7a8   : > { %v5014_v0 = vpop.f32.mrf.mxu1  ;;  %v5072_v53 = vmax.f32 %v5047_v23, 0.0  ;;  %v4988_v33 = vpop.f32.mrf.mxu0 }
 0x7a9   : > { %v5015_v21 = vadd.f32 %v5014_v0, %v4981_v4  ;;  %v4989_v25 = vadd.f32 %v4988_v33, %v4955_v6 }
 0x7aa   : > { %v5092_v35 = vsel %vm13038_vm0, %v5072_v53, -inf  ;;  %v4964_v0 = vpop.f32.mrf.mxu3  ;;  %v4960_v53 = vadd.f32 %v4959_v50, %v12346_v51  ;;  %vm13051_vm0 = vmmov %vm13050_vm5 }
 0x7ad   : > { %v5048_v45 = vpop.f32.mrf.mxu2 }
 0x7ae   : > { %v5049_v11 = vadd.f32 %v5048_v45, %v5015_v21  ;;  %v4962_v45 = vadd.f32 %v4961_v10, %v12346_v51 }
 0x7b0   : > { %v5074_v38 = vmax.f32 %v5049_v11, 0.0  ;;  %v5017_v37 = vpop.f32.mrf.mxu1  ;;  %v4990_v63 = vpop.f32.mrf.mxu0  ;;  %v4965_v11 = vadd.f32 %v4964_v0, %v12346_v51 }
 0x7b1   : > { %v5018_v22 = vadd.f32 %v5017_v37, %v4984_v47  ;;  %v4991_v62 = vadd.f32 %v4990_v63, %v4957_v29 }
 0x7b2   : > { %v5093_v13 = vsel %vm13039_vm1, %v5074_v38, -inf  ;;  %v4966_v37 = vpop.f32.mrf.mxu3 }
 0x7b3   : > { %v12364_v32 = vmax.f32 %v5092_v35, %v5093_v13 }
 0x7b5   : > { %v5051_v48 = vpop.f32.mrf.mxu2 }
 0x7b6   : > { %v5052_v2 = vadd.f32 %v5051_v48, %v5018_v22  ;;  %v4967_v48 = vadd.f32 %v4966_v37, %v12346_v51 }
 0x7b8   : > { %v5019_v27 = vpop.f32.mrf.mxu1  ;;  %v5076_v40 = vmax.f32 %v5052_v2, 0.0  ;;  %v4993_v7 = vpop.f32.mrf.mxu0 }
 0x7b9   : > { %v5020_v28 = vadd.f32 %v5019_v27, %v4986_v44  ;;  %v4994_v13 = vadd.f32 %v4993_v7, %v4960_v53 }
 0x7ba   : > { %v5096_v3 = vsel %vm13040_vm3, %v5076_v40, -inf  ;;  %vm13052_vm3 = vmmov %vm13039_vm1 }
 0x7bd   : > { %v5053_v12 = vpop.f32.mrf.mxu2 }
 0x7be   : > { %v5054_v34 = vadd.f32 %v5053_v12, %v5020_v28 }
 0x7c0   : > { %v5078_v31 = vmax.f32 %v5054_v34, 0.0  ;;  %v5022_v4 = vpop.f32.mrf.mxu1  ;;  %v4995_v26 = vpop.f32.mrf.mxu0 }
 0x7c1   : > { %v5023_v9 = vadd.f32 %v5022_v4, %v4989_v25  ;;  %v4996_v38 = vadd.f32 %v4995_v26, %v4962_v45 }
 0x7c2   : > { %v5097_v43 = vsel %vm13041_vm7, %v5078_v31, -inf  ;;  %vm13053_vm7 = vmmov %vm13051_vm0 }
 0x7c3   : > { %v12370_v20 = vmax.f32 %v5096_v3, %v5097_v43 }
 0x7c5   : > { %v7934_v1 = vpack.i.bf16 %v12370_v20, %v12321_v52  ;;  %v5056_v59 = vpop.f32.mrf.mxu2 }
 0x7c6   : > { %v5057_v36 = vadd.f32 %v5056_v59, %v5023_v9 }
 0x7c7   : > { %7935 = vrot.lane.b32.xlu0 %v7934_v1, %s8164_s29 }
 0x7c8   : > { %v5024_v56 = vpop.f32.mrf.mxu1  ;;  %v5080_v54 = vmax.f32 %v5057_v36, 0.0  ;;  %v4998_v16 = vpop.f32.mrf.mxu0 }
 0x7c9   : > { %v5025_v24 = vadd.f32 %v5024_v56, %v4991_v62  ;;  %v4999_v55 = vadd.f32 %v4998_v16, %v4965_v11 }
 0x7ca   : > { %v5100_v39 = vsel %vm13042_vm8, %v5080_v54, -inf  ;;  %vm13054_vm8 = vmmov %vm13051_vm0 }
 0x7cd   : > { %v5058_v61 = vpop.f32.mrf.mxu2 }
 0x7ce   : > { %v5059_v17 = vadd.f32 %v5058_v61, %v5025_v24 }
 0x7d0   : > { %v5082_v14 = vmax.f32 %v5059_v17, 0.0  ;;  %v5027_v30 = vpop.f32.mrf.mxu1  ;;  %v5000_v33 = vpop.f32.mrf.mxu0 }
 0x7d1   : > { %v5028_v47 = vadd.f32 %v5027_v30, %v4994_v13  ;;  %v5001_v44 = vadd.f32 %v5000_v33, %v4967_v48 }
 0x7d2   : > { %v5101_v60 = vsel %vm13043_vm9, %v5082_v14, -inf  ;;  %vm13055_vm9 = vmmov %vm13039_vm1 }
 0x7d3   : > { %v5102_v5 = vmax.f32 %v5100_v39, %v5101_v60 }
 0x7d5   : > { %v7944_v42 = vpack.i.bf16 %v5102_v5, %v12338_v18  ;;  %v5061_v49 = vpop.f32.mrf.mxu2 }
 0x7d6   : > { %v5062_v2 = vadd.f32 %v5061_v49, %v5028_v47 }
 0x7d7   : > { %7945 = vrot.lane.b32.xlu2 %v7944_v42, %s8164_s29 }
 0x7d8   : > { %v5029_v23 = vpop.f32.mrf.mxu1  ;;  %v5084_v34 = vmax.f32 %v5062_v2, 0.0 }
 0x7d9   : > { %v5030_v58 = vadd.f32 %v5029_v23, %v4996_v38 }
 0x7da   : > { %v5104_v43 = vsel %vm13045_vm12, %v5084_v34, -inf  ;;  %v6581_v34 = vld [vmem:[%s12625_s5 + $0xc0] sm:$0xff]  ;;  %vm5270_vm12 = vcmask 916480  }
 0x7db   : > { %5530 = vmatpush.bf16.msra.mxu2 %v6581_v34 }
 0x7dd   : > { %v5063_v21 = vpop.f32.mrf.mxu2 }
 0x7de   : > { %v5064_v46 = vadd.f32 %v5063_v21, %v5030_v58 }
 0x7e0   : > { %v5032_v41 = vpop.f32.mrf.mxu1  ;;  %v5086_v19 = vmax.f32 %v5064_v46, 0.0 }
 0x7e1   : > { %v5033_v22 = vadd.f32 %v5032_v41, %v4999_v55 }
 0x7e2   : > { %v5105_v4 = vsel %vm13044_vm10, %v5086_v19, -inf  ;;  %vm13056_vm10 = vmmov %vm13051_vm0 }
 0x7e3   : > { %v5106_v1 = vmax.f32 %v5104_v43, %v5105_v4  ;;  %v6563_v4 = vld [vmem:[%s12625_s5 + $0x30] sm:$0xff] }
 0x7e5   : > { %v5066_v35 = vpop.f32.mrf.mxu2 }
 0x7e6   : > { %v5067_v28 = vadd.f32 %v5066_v35, %v5033_v22 }
 0x7e8   : > { %v5034_v27 = vpop.f32.mrf.mxu1  ;;  %v5088_v63 = vmax.f32 %v5067_v28, 0.0 }
 0x7e9   : > { %v5035_v12 = vadd.f32 %v5034_v27, %v5001_v44 }
 0x7ea   : > { %v5108_v51 = vsel %vm13046_vm13, %v5088_v63, -inf  ;;  %v6572_v63 = vld [vmem:[%s12625_s5 + $0x78] sm:$0xff]  ;;  %vm13057_vm13 = vmmov %vm13039_vm1 }
 0x7eb   : > { %5497 = vmatpush.bf16.msra.mxu0 %v6572_v63  ;;  %v6589_v63 = vld [vmem:[%s12627_s7 + $0x38] sm:$0xff] }
 0x7ed   : > { %v5068_v40 = vpop.f32.mrf.mxu2 }
 0x7ee   : > { %v5069_v31 = vadd.f32 %v5068_v40, %v5035_v12 }
 0x7f0   : > { %v5090_v3 = vmax.f32 %v5069_v31, 0.0  ;;  %v6580_v31 = vld [vmem:[%s12625_s5 + $0xb8] sm:$0xff] }
 0x7f1   : > { %5510 = vmatpush.bf16.msra.mxu1 %v6580_v31  ;;  %v6588_v31 = vld [vmem:[%s12627_s7 + $0x30] sm:$0xff] }
 0x7f2   : > { %v5109_v6 = vsel %vm13047_vm14, %v5090_v3, -inf  ;;  %vm13058_vm14 = vmmov %vm13051_vm0 }
 0x7f3   : > { %v5110_v59 = vmax.f32 %v5108_v51, %v5109_v6 }
 0x7f5   : > { %v7949_v25 = vpack.i.bf16 %v5106_v1, %v5110_v59 }
 0x7f7   : > { %7950 = vrot.lane.b32.xlu0 %v7949_v25, %s8164_s29 }
 0x818   : > { %v7941_v50 = vpop.permute.xlu1 %7940 }
 0x819   : > { %v7942_v29 = vunpack.i.l.bf16 %v7941_v50 }
 0x81b   : > { %v5133_v9 = vmax.f32 %v12355_v8, %v7942_v29  ;;  %v7943_v8 = vunpack.i.h.bf16 %v7941_v50 }
 0x81d   : > { %v7959_v56 = vpack.i.bf16 %v5133_v9, %v12364_v32 }
 0x81f   : > { %7960 = vrot.lane.b32.xlu2 %v7959_v56, %s8164_s29 }
 0x831   : > { %v7946_v7 = vpop.permute.xlu2 %7945 }
 0x832   : > { %v7948_v62 = vunpack.i.h.bf16 %v7946_v7  ;;  %v7947_v30 = vunpack.i.l.bf16 %v7946_v7 }
 0x834   : > { %v5158_v54 = vmax.f32 %v5102_v5, %v7948_v62  ;;  %v12400_v26 = vmax.f32 %v12338_v18, %v7947_v30  ;;  %v12403_v5 = vmax.f32 %v12357_v57, %v7943_v8  ;;  %v6570_v8 = vld [vmem:[%s12625_s5 + $0x68] sm:$0xff] }
 0x839   : > { %v7936_v36 = vpop.permute.xlu0 %7935 }
 0x83a   : > { %v7938_v24 = vunpack.i.h.bf16 %v7936_v36  ;;  %v7937_v61 = vunpack.i.l.bf16 %v7936_v36 }
 0x83c   : > { %v5157_v17 = vmax.f32 %v12370_v20, %v7938_v24  ;;  %v5132_v14 = vmax.f32 %v12321_v52, %v7937_v61  ;;  %v7989_v52 = vpack.i.bf16 %v12400_v26, %v12403_v5 }
 0x83e   : > { %v7984_v10 = vpack.i.bf16 %v5158_v54, %v5157_v17  ;;  %v7964_v39 = vpack.i.bf16 %v5133_v9, %v5132_v14  ;;  %v7954_v60 = vpack.i.bf16 %v5132_v14, %v12313_v15 }
 0x840   : > { %7985 = vrot.lane.b32.xlu2 %v7984_v10, %s12803_s15  ;;  %7965 = vrot.lane.b32.xlu0 %v7964_v39, %s12805_s12  ;;  %v6571_v10 = vld [vmem:[%s12625_s5 + $0x70] sm:$0xff] }
 0x841   : > { %7955 = vrot.lane.b32.xlu1 %v7954_v60, %s8164_s29  ;;  %v6579_v60 = vld [vmem:[%s12625_s5 + $0xb0] sm:$0xff]  ;;  %5498 = vmatpush.bf16.msra.mxu0 %v6571_v10 }
 0x842   : > { %5511 = vmatpush.bf16.msra.mxu1 %v6579_v60 }
 0x845   : > { %5499 = vmatpush.bf16.msra.mxu0 %v6570_v8 }
 0x848   : > { %7990 = vrot.lane.b32.xlu2 %v7989_v52, %s12991_s26  ;;  %7975 = vrot.lane.b32.xlu0 %v7989_v52, %s8164_s29 }
 0x849   : > { %7970 = vrot.lane.b32.xlu1 %v7964_v39, %s12991_s26  ;;  %v6562_v39 = vld [vmem:[%s12625_s5 + $0x28] sm:$0xff] }
 0x851   : > { %7980 = vrot.lane.b32.xlu1 %v7989_v52, %s12805_s12  ;;  %v6569_v52 = vld [vmem:[%s12625_s5 + $0x60] sm:$0xff] }
 0x852   : > { %5500 = vmatpush.bf16.msra.mxu0 %v6569_v52  ;;  %v6591_v52 = vld [vmem:[%s12629_s9 + $0x8] sm:$0xff] }
 0x869   : > { %v7951_v20 = vpop.permute.xlu0 %7950 }
 0x86a   : > { %v7953_v42 = vunpack.i.h.bf16 %v7951_v20  ;;  %v7952_v49 = vunpack.i.l.bf16 %v7951_v20  ;;  %v6560_v20 = vld [vmem:[%s12625_s5 + $0x18] sm:$0xff] }
 0x86c   : > { %v5159_v23 = vmax.f32 %v5106_v1, %v7953_v42  ;;  %v5160_v18 = vmax.f32 %v5110_v59, %v7952_v49  ;;  %v6577_v42 = vld [vmem:[%s12625_s5 + $0xa0] sm:$0xff]  ;;  %v6559_v49 = vld [vmem:[%s12625_s5 + $0x10] sm:$0xff] }
 0x86e   : > { %v7994_v0 = vpack.i.bf16 %v5159_v23, %v5160_v18  ;;  %v6558_v23 = vld [vmem:[%s12625_s5 + $0x8] sm:$0xff]  ;;  %v6557_v18 = vld [vmem:[%s12625_s5] sm:$0xff] }
 0x870   : > { %7995 = vrot.lane.b32.xlu0 %v7994_v0, %s12803_s15  ;;  %v6568_v0 = vld [vmem:[%s12625_s5 + $0x58] sm:$0xff] }
 0x871   : > { %5501 = vmatpush.bf16.msra.mxu0 %v6568_v0 }
 0x879   : > { %v7961_v57 = vpop.permute.xlu2 %7960 }
 0x87a   : > { %v7963_v11 = vunpack.i.h.bf16 %v7961_v57  ;;  %v7962_v35 = vunpack.i.l.bf16 %v7961_v57  ;;  %v6576_v57 = vld [vmem:[%s12625_s5 + $0x98] sm:$0xff] }
 0x87c   : > { %v5234_v33 = vsel %vm5231_vm15, %v5133_v9, %v7963_v11  ;;  %v5156_v44 = vmax.f32 %v12364_v32, %v7962_v35  ;;  %v6564_v32 = vld [vmem:[%s12625_s5 + $0x38] sm:$0xff]  ;;  %v6565_v11 = vld [vmem:[%s12625_s5 + $0x40] sm:$0xff] }
 0x87d   : > { %5484 = vmatpush.bf16.msra.mxu3 %v6564_v32 }
 0x881   : > { %5485 = vmatpush.bf16.msra.mxu3 %v6563_v4  ;;  %v6587_v4 = vld [vmem:[%s12627_s7 + $0x28] sm:$0xff] }
 0x885   : > { %5486 = vmatpush.bf16.msra.mxu3 %v6562_v39 }
 0x89a   : > { %v7986_v13 = vpop.permute.xlu2 %7985 }
 0x89b   : > { %v7988_v47 = vunpack.i.h.bf16 %v7986_v13  ;;  %v7987_v46 = vunpack.i.l.bf16 %v7986_v13 }
 0x8a2   : > { %v7991_v25 = vpop.permute.xlu2 %7990 }
 0x8a3   : > { %v7993_v7 = vunpack.i.h.bf16 %v7991_v25  ;;  %v7992_v62 = vunpack.i.l.bf16 %v7991_v25  ;;  %v6597_v25 = vld [vmem:[%s12629_s9 + $0x38] sm:$0xff] }
 0x8b2   : > { %v7966_v41 = vpop.permute.xlu0 %7965 }
 0x8b3   : > { %v7956_v16 = vpop.permute.xlu1 %7955  ;;  %v7968_v38 = vunpack.i.h.bf16 %v7966_v41  ;;  %v7967_v37 = vunpack.i.l.bf16 %v7966_v41  ;;  %v6566_v41 = vld [vmem:[%s12625_s5 + $0x48] sm:$0xff] }
 0x8b4   : > { %v7957_v21 = vunpack.i.l.bf16 %v7956_v16  ;;  %v7958_v45 = vunpack.i.h.bf16 %v7956_v16  ;;  %v6567_v16 = vld [vmem:[%s12625_s5 + $0x50] sm:$0xff] }
 0x8b5   : > { %v5239_v22 = vsel %vm13048_vm2, %v5234_v33, %v7968_v38  ;;  %5502 = vmatpush.bf16.msra.mxu0 %v6567_v16  ;;  %v6573_v38 = vld [vmem:[%s12625_s5 + $0x80] sm:$0xff] }
 0x8b6   : > { %v12413_v53 = vmax.f32 %v12313_v15, %v7957_v21  ;;  %v5233_v55 = vsel %vm5231_vm15, %v5132_v14, %v7958_v45  ;;  %v6575_v21 = vld [vmem:[%s12625_s5 + $0x90] sm:$0xff]  ;;  %v6574_v45 = vld [vmem:[%s12625_s5 + $0x88] sm:$0xff]  ;;  %v8006_v16 = vld [vmem:[%s12630_s10] ss:$0 sm:$0xff] }
 0x8b7   : > { %v5238_v27 = vsel %vm13049_vm4, %v5233_v55, %v7967_v37 }
 0x8b8   : > { %5181 = vrot.lane.b32.xlu2 %v12413_v53, %s12805_s12  ;;  %5166 = vrot.lane.b32.xlu1 %v12413_v53, %s8164_s29  ;;  %s799_s12 = scalar_lea.vmem [#allocation3], %s5789_s1 }
 0x8b9   : > { %5503 = vmatpush.bf16.msra.mxu0 %v6566_v41  ;;  %s5716_s19 = sshll.u32 %s799_s12, 4  ;;  %s5717_s19 = int_to_ptr.vmem [resolvable:$true] %s5716_s19 }
 0x8ba   : > { %v7976_v3 = vpop.permute.xlu0 %7975 }
 0x8bb   : > { %v7971_v58 = vpop.permute.xlu1 %7970  ;;  %v7978_v51 = vunpack.i.h.bf16 %v7976_v3  ;;  %v7977_v6 = vunpack.i.l.bf16 %v7976_v3  ;;  %v6586_v3 = vld [vmem:[%s12627_s7 + $0x20] sm:$0xff] }
 0x8bc   : > { %v7973_v48 = vunpack.i.h.bf16 %v7971_v58  ;;  %v7972_v15 = vunpack.i.l.bf16 %v7971_v58 }
 0x8bd   : > { %v5235_v50 = vsel %vm5231_vm15, %v12400_v26, %v7978_v51  ;;  %v5236_v29 = vsel %vm5231_vm15, %v12403_v5, %v7977_v6  ;;  %v6561_v26 = vld [vmem:[%s12625_s5 + $0x20] sm:$0xff]  ;;  %v6578_v5 = vld [vmem:[%s12625_s5 + $0xa8] sm:$0xff]  ;;  %5504 = vmatpush.bf16.msra.mxu0 %v6565_v11  ;;  %v6584_v51 = vld [vmem:[%s12627_s7 + $0x10] sm:$0xff] }
 0x8be   : > { %v5243_v2 = vsel %vm4167_vm11, %v5238_v27, %v7972_v15  ;;  %v5244_v28 = vsel %vm4167_vm11, %v5239_v22, %v7973_v48  ;;  %5487 = vmatpush.bf16.msra.mxu3 %v6561_v26  ;;  %5512 = vmatpush.bf16.msra.mxu1 %v6578_v5 }
 0x8bf   : > { %v5249_v19 = vsel %vm13050_vm5, %v5244_v28, %v7988_v47  ;;  %v5248_v12 = vsel %vm13051_vm0, %v5243_v2, %v7987_v46 }
 0x8c0   : > { %5257 = vrot.lane.b32.xlu2 %v5249_v19, %s12809_s13  ;;  %5216 = vrot.lane.b32.xlu1 %v5156_v44, %s12803_s15  ;;  %v7999_v40 = vpack.i.bf16 %v5248_v12, %v12413_v53  ;;  %s6442_s13 = sshll.u32 %s13059_s16, 3  ;;  %s8101_s16 = scalar_lea.hbm %s12631_s11, 16 }
 0x8c1   : > { %5689 = vmatpush.bf16.msrb.mxu0 %v6597_v25  ;;  %s5714_s24 = scalar_lea.hbm %s12631_s11, %s6442_s13 }
 0x8c2   : > { %8000 = vrot.lane.b32.xlu0 %v7999_v40, %s12991_s26  ;;  %5488 = vmatpush.bf16.msra.mxu3 %v6560_v20  ;;  %v6590_v20 = vld [vmem:[%s12629_s9] sm:$0xff]  ;;  %s5718_s21 = sshll.u32 %s5714_s24, 4  ;;  %s5719_s21 = int_to_ptr.hbm [resolvable:$true] %s5718_s21 }
 0x8c3   : > { %v7981_v43 = vpop.permute.xlu1 %7980  ;;  %5513 = vmatpush.bf16.msra.mxu1 %v6577_v42  ;;  %v8005_v42 = vld [vmem:[%s12628_s8] ss:$0 sm:$0xff] }
 0x8c4   : > { %v7983_v1 = vunpack.i.h.bf16 %v7981_v43  ;;  %v7982_v59 = vunpack.i.l.bf16 %v7981_v43  ;;  %v6585_v43 = vld [vmem:[%s12627_s7 + $0x18] sm:$0xff] }
 0x8c6   : > { %v5240_v9 = vsel %vm13039_vm1, %v5235_v50, %v7983_v1  ;;  %v5241_v56 = vsel %vm13052_vm3, %v5236_v29, %v7982_v59  ;;  %5489 = vmatpush.bf16.msra.mxu3 %v6559_v49  ;;  %v6583_v1 = vld [vmem:[%s12627_s7 + $0x8] sm:$0xff]  ;;  %v6582_v59 = vld [vmem:[%s12627_s7] sm:$0xff]  ;;  %v6596_v29 = vld [vmem:[%s12629_s9 + $0x30] sm:$0xff] }
 0x8c7   : > { %v5246_v54 = vsel %vm4167_vm11, %v5241_v56, %v7992_v62  ;;  %v5245_v17 = vsel %vm4167_vm11, %v5240_v9, %v7993_v7  ;;  %5514 = vmatpush.bf16.msra.mxu1 %v6576_v57  ;;  %5690 = vmatpush.bf16.msrb.mxu0 %v6596_v29  ;;  %v6595_v9 = vld [vmem:[%s12629_s9 + $0x28] sm:$0xff]  ;;  %v6594_v56 = vld [vmem:[%s12629_s9 + $0x20] sm:$0xff]  ;;  %v6593_v62 = vld [vmem:[%s12629_s9 + $0x18] sm:$0xff] }
 0x8c8   : > { %v8004_v7 = vld [vmem:[%s12626_s6] ss:$0 sm:$0xff] }
 0x8ca   : > { %5490 = vmatpush.bf16.msra.mxu3 %v6558_v23 }
 0x8cb   : > { %5515 = vmatpush.bf16.msra.mxu1 %v6575_v21  ;;  %5691 = vmatpush.bf16.msrb.mxu0 %v6595_v9 }
 0x8ce   : > { %5491 = vmatpush.bf16.msra.mxu3 %v6557_v18 }
 0x8cf   : > { %5516 = vmatpush.bf16.msra.mxu1 %v6574_v45  ;;  %5692 = vmatpush.bf16.msrb.mxu0 %v6594_v56 }
 0x8d2   : > { %5606 = vmatpush.bf16.msrb.mxu3 %v6589_v63 }
 0x8d3   : > { %5517 = vmatpush.bf16.msra.mxu1 %v6573_v38  ;;  %5693 = vmatpush.bf16.msrb.mxu0 %v6593_v62 }
 0x8d6   : > { %5607 = vmatpush.bf16.msrb.mxu3 %v6588_v31 }
 0x8da   : > { %5608 = vmatpush.bf16.msrb.mxu3 %v6587_v4 }
 0x8de   : > { %5609 = vmatpush.bf16.msrb.mxu3 %v6586_v3 }
 0x8e2   : > { %v7996_v36 = vpop.permute.xlu0 %7995  ;;  %5610 = vmatpush.bf16.msrb.mxu3 %v6585_v43 }
 0x8e3   : > { %v7998_v24 = vunpack.i.h.bf16 %v7996_v36  ;;  %v7997_v61 = vunpack.i.l.bf16 %v7996_v36 }
 0x8e5   : > { %v5251_v14 = vsel %vm13053_vm7, %v5246_v54, %v7997_v61  ;;  %v5250_v30 = vsel %vm13054_vm8, %v5245_v17, %v7998_v24  ;;  %v6592_v24 = vld [vmem:[%s12629_s9 + $0x10] sm:$0xff] }
 0x8e6   : > { %5265 = vrot.lane.b32.xlu0 %v5251_v14, %s12803_s15  ;;  %5261 = vrot.lane.b32.xlu1 %v5250_v30, %s8164_s29  ;;  %s8095_s15 = sshra.s32 %s5719_s21, 4  ;;  %s8096_s15 = int_to_ptr.hbm [resolvable:$true] %s8095_s15 }
 0x8e7   : > { %5611 = vmatpush.bf16.msrb.mxu3 %v6584_v51  ;;  %5694 = vmatpush.bf16.msrb.mxu0 %v6592_v24  ;;  %s8097_s29 = scalar_lea.hbm %s8096_s15, 8  ;;  %p8102_p2 = scmp.lt.s32.totalorder %s8096_s15, %s12631_s11 }
 0x8e8   : > { %p8098_p13 = scmp.ne.s32.totalorder %s8096_s15, %s8097_s29  ;;  %p8103_p3 = scmp.lt.s32.totalorder %s8101_s16, %s8097_s29 }
 0x8ea   : > { %p8099_p0 = pnand %p8098_p13, %p8263_p6  ;;  %p8104_p4 = por %p8103_p3, %p8102_p2 }
 0x8eb   : > { %5612 = vmatpush.bf16.msrb.mxu3 %v6583_v1  ;;  %5695 = vmatpush.bf16.msrb.mxu0 %v6591_v52 }
 0x8ec   : > { %p8100_p1 = pneg %p8099_p0 }
 0x8ee   : > { %p8105_p5 = pnand %p8104_p4, %p8100_p1 }
 0x8ef   : > { %5613 = vmatpush.bf16.msrb.mxu3 %v6582_v59  ;;  %5696 = vmatpush.bf16.msrb.mxu0 %v6590_v20 }
 0x912   : > { %v5182_v55 = vpop.permute.xlu2 %5181 }
 0x91a   : > { %v5258_v44 = vpop.permute.xlu2 %5257 }
 0x92a   : > { %v5167_v37 = vpop.permute.xlu1 %5166 }
 0x92b   : > { %v5232_v35 = vsel %vm5231_vm15, %v12413_v53, %v5167_v37 }
 0x92c   : > { %v5237_v33 = vsel %vm13055_vm9, %v5232_v35, %v5182_v55 }
 0x932   : > { %v5217_v48 = vpop.permute.xlu1 %5216 }
 0x934   : > { %v8001_v13 = vpop.permute.xlu0 %8000 }
 0x935   : > { %v8002_v58 = vunpack.i.l.bf16 %v8001_v13  ;;  %v8003_v15 = vunpack.i.h.bf16 %v8001_v13 }
 0x937   : > { %v5242_v47 = vsel %vm4167_vm11, %v5237_v33, %v8002_v58  ;;  %v5269_v53 = vsel %vm13057_vm13, %v8003_v15, %v5258_v44 }
 0x938   : > { %v5247_v46 = vsel %vm13056_vm10, %v5242_v47, %v5217_v48 }
 0x939   : > { %v5268_v22 = vsel %vm4422_vm6, %v5247_v46, %v8003_v15 }
 0x93a   : > { %v5273_v27 = vpack.c.bf16 %v5268_v22, %v5268_v22 }
 0x93c   : > { %5492 = vmatmul.bf16.vlgmr.msra.gmra.mxu3 %v5273_v27 }
 0x958   : > { %v5266_v2 = vpop.permute.xlu0 %5265  ;;  %v5262_v28 = vpop.permute.xlu1 %5261 }
 0x959   : > { %v5276_v19 = vpack.c.bf16 %v5266_v2, %v5266_v2  ;;  %v5271_v12 = vsel %vm5270_vm12, %v5269_v53, %v5262_v28  ;;  %v5272_v40 = vsel %vm13058_vm14, %v5262_v28, %v5266_v2 }
 0x95a   : > { %v5274_v32 = vpack.c.bf16 %v5271_v12, %v5271_v12  ;;  %v5275_v34 = vpack.c.bf16 %v5272_v40, %v5272_v40 }
 0x95b   : > { %6376 = vmatmul.msk.bf16.vlgmr.msra.gmra.mxu2 %vm5231_vm15, %v5276_v19 }
 0x95c   : > { %5505 = vmatmul.bf16.vlgmr.msra.gmra.mxu0 %v5274_v32  ;;  %5518 = vmatmul.bf16.vlgmr.msra.gmra.mxu1 %v5275_v34 }
 0x9bf   : > { %v5493_v6 = vpop.f32.mrf.mxu3 }
 0x9c0   : > { %v5494_v36 = vadd.f32 %v8004_v7, %v5493_v6 }
 0x9c7   : > { %v5495_v50 = vpop.f32.mrf.mxu3 }
 0x9d9   : > { %v5506_v61 = vpop.f32.mrf.mxu0  ;;  %v5519_v54 = vpop.f32.mrf.mxu1 }
 0x9da   : > { %v5507_v17 = vadd.f32 %v5506_v61, %v5494_v36 }
 0x9dc   : > { %v5520_v14 = vadd.f32 %v5519_v54, %v5507_v17 }
 0x9de   : > { %v5532_v30 = vpop.f32.mrf.mxu2 }
 0x9df   : > { %v5533_v10 = vadd.f32 %v5532_v30, %v5520_v14 }
 0x9e1   : > { %v5536_v39 = vmax.f32 %v5533_v10, 0.0  ;;  %v5508_v60 = vpop.f32.mrf.mxu0  ;;  %v5521_v8 = vpop.f32.mrf.mxu1 }
 0x9e3   : > { %v5537_v26 = vpack.c.bf16 %v5536_v39, %v5536_v39 }
 0x9e5   : > { %5614 = vmatmul.bf16.vlgmr.msrb.gmra.mxu3 %v5537_v26 }
 0x9e6   : > { %v5534_v5 = vpop.f32.mrf.mxu2 }
 0xa68   : > { %v5615_v49 = vpop.f32.mrf.mxu3 }
 0xa69   : > { %v5616_v23 = vadd.f32 %v8005_v42, %v5615_v49 }
 0xa6b   : > { %v5619_v18 = vmax.f32 %v5616_v23, 0.0 }
 0xa6d   : > { %v5620_v0 = vpack.c.bf16 %v5619_v18, %v5619_v18 }
 0xa6f   : > { %5697 = vmatmul.bf16.vlgmr.msrb.gmra.mxu0 %v5620_v0 }
 0xa70   : > { %v5617_v57 = vpop.f32.mrf.mxu3 }
 0xaec   : > { %v5698_v21 = vpop.f32.mrf.mxu0 }
 0xaed   : > { %v5699_v41 = vadd.f32 %v8006_v16, %v5698_v21 }
 0xaef   : > { %5702 = vst [vmem:[%s799_s12] sm:$0xff] %v5699_v41 }
 0xaf0   : > { %8108 = shalt.err (!%p8105_p5)
}
 0xaf1   : > { %6600 = dma.vmem_to_hbm [thread:$0]  (%p8263_p6), %s5717_s19, 128, %s5719_s21, %s5704_s30  }
 0xaf4   : > { %v5700_v45 = vpop.f32.mrf.mxu0 }
 0xaf5 PF: > { %s5730_s22 = sand.u32 1, %s8131_s17   ;;  %p6603_p7 = pnand %p5786_p9, %p8267_p8 }
 0xaf6   : > { %s5731_s26 = scalar_lea.sflag [#allocation4], %s5730_s22 }
 0xaf7   : > { %p6604_p10 = pneg %p6603_p7 }
 0xaf9   : > { %8126 = dma.done.wait (%p6604_p10), %s5731_s26, 128  }
 0xafa   : > { %8128 = vsyncadd (%p6604_p10), %s5731_s26, 4294967168  ;;  %s13060_s17 = sld [smem:[#allocation6_spill]]  ;;  %p21_p11 = scmp.ge.s32.totalorder %s8248_s23, 4  }
 0xafb   : > { %s13061_s18 = sld [smem:[#allocation7_spill]]  ;;  %s13063_s20 = smov %s8248_s23 }
 0xafc   : > { %s13062_s19 = sld [smem:[#allocation8_spill]]  ;;  %23 = sbr.rel (!%p21_p11) target bundleno = 7 (0x7), region = 142 }
 0xb01   :  { %5737 = vsyncpa [#allocation4], 1 }
 0xb02   :  { %5739 = vsyncpa [#allocation4 + $0x1], 1 }

</bundles_post_ra>
